<compile_context>
chip_gen: v5e
topology: v5e:2x2
jax: 0.10.0
libtpu: 0.0.40
codegen_flags: <defaults>
</compile_context>

<pallas_src>
import functools

import jax
import jax.numpy as jnp
from jax.experimental import pallas as pl
from jax.experimental.pallas import tpu as pltpu


def _inception_aux_kernel(xm_ref, convw_ref, bnshift_ref, fc1w_ref, fc1b_ref,
                          fc2w_ref, fc2b_ref, o_ref, h_sc, *, n_spatial):
    j = pl.program_id(0)

    @pl.when(j == 0)
    def _():
        # 1x1 conv (bias-free) + folded BN(eval, eps=0.01) + ReLU, one spatial
        # position at a time. Results land directly in HWC-flattened bf16 order;
        # the matching row permutation is baked into fc1_w at prepare time.
        # TODO(synk): for real C_in=512/528 collapse this unrolled loop into one
        # batched (S*B, C) @ (C, 128) matmul; at toy sizes it runs once and is noise.
        for s in range(n_spatial):
            ys = jnp.dot(xm_ref[s], convw_ref[...],
                         preferred_element_type=jnp.float32)            # (batch, 128)
            h_sc[:, s * 128:(s + 1) * 128] = jnp.maximum(
                ys + bnshift_ref[...], 0.0).astype(jnp.bfloat16)
        # Initialize the VMEM-resident output accumulator with the fc2 bias.
        o_ref[...] = jnp.zeros_like(o_ref) + fc2b_ref[...]

    # fc1 tile: (batch, 2048) @ (2048, tn) + bias, ReLU  (bf16 MXU path, f32 acc).
    z = jnp.dot(h_sc[...], fc1w_ref[...], preferred_element_type=jnp.float32)
    z = jnp.maximum(z + fc1b_ref[...], 0.0)

    # Dropout(p=0.7, training=False) -> identity.
    # TODO(synk): pltpu.prng_seed / pltpu.prng_random_bits for training-mode dropout.

    # fc2 partial contraction over this fc1 tile, accumulated straight into o_ref
    # (same output block for every j => resident in VMEM across the grid).
    o_ref[...] += jnp.dot(z.astype(jnp.bfloat16), fc2w_ref[...],
                          preferred_element_type=jnp.float32)


def inception_aux_fused(xm, conv_w, bn_shift, fc1_w, fc1_b, fc2_w, fc2_b, *, tn=1024):
    n_spatial, batch, c_in = xm.shape
    k1, n1 = fc1_w.shape                 # (2048, 1024)
    n_pad = fc2_w.shape[1]               # num_class padded to a multiple of 128
    assert conv_w.shape == (c_in, 128), conv_w.shape
    assert k1 == n_spatial * 128, (k1, n_spatial)
    assert n1 % tn == 0
    assert batch % 8 == 0, "pad batch to a multiple of 8 in the wrapper"
    kernel = functools.partial(_inception_aux_kernel, n_spatial=n_spatial)
    return pl.pallas_call(
        kernel,
        out_shape=jax.ShapeDtypeStruct((batch, n_pad), jnp.float32),
        grid=(n1 // tn,),                                                 # 1 step at tn=1024
        in_specs=[
            pl.BlockSpec((n_spatial, batch, c_in), lambda j: (0, 0, 0)),  # pooled rows
            pl.BlockSpec((c_in, 128), lambda j: (0, 0)),                  # conv_w*bn_scale
            pl.BlockSpec((1, 128), lambda j: (0, 0)),                     # bn shift
            pl.BlockSpec((k1, tn), lambda j: (0, j)),                     # fc1_w tile (bf16)
            pl.BlockSpec((1, tn), lambda j: (0, j)),                      # fc1_b tile
            pl.BlockSpec((tn, n_pad), lambda j: (j, 0)),                  # fc2_w tile (bf16)
            pl.BlockSpec((1, n_pad), lambda j: (0, 0)),                   # fc2_b (padded)
        ],
        out_specs=pl.BlockSpec((batch, n_pad), lambda j: (0, 0)),
        scratch_shapes=[
            pltpu.VMEM((batch, k1), jnp.bfloat16),     # flattened conv+BN+ReLU output
        ],
        compiler_params=pltpu.CompilerParams(
            dimension_semantics=("arbitrary",)),       # grid axis is fc2's reduction
    )(xm, conv_w, bn_shift, fc1_w, fc1_b, fc2_w, fc2_b)


def init_inception_aux_params(key, in_channels, num_class):
    """Deterministic synthetic parameters matching the PyTorch module shapes."""
    ks = jax.random.split(key, 8)
    conv_w = jax.random.normal(ks[0], (128, in_channels, 1, 1), jnp.float32) * 0.1
    return {
        "conv_w": conv_w[:, :, 0, 0].T,                                   # (C_in, 128)
        "bn_gamma": 1.0 + 0.1 * jax.random.normal(ks[1], (128,), jnp.float32),
        "bn_beta": 0.1 * jax.random.normal(ks[2], (128,), jnp.float32),
        "bn_mean": 0.05 * jax.random.normal(ks[3], (128,), jnp.float32),
        "bn_var": 1.0 + 0.1 * jax.random.uniform(ks[4], (128,), jnp.float32),
        "fc1_w": jax.random.normal(ks[5], (2048, 1024), jnp.float32) * 0.02,  # x @ W
        "fc1_b": jnp.zeros((1024,), jnp.float32),
        "fc2_w": jax.random.normal(ks[6], (1024, num_class), jnp.float32) * 0.02,
        "fc2_b": 0.01 * jax.random.normal(ks[7], (num_class,), jnp.float32),
    }


def prepare_inception_aux_params(params, num_class):
    """One-time re-layout: fold BN scale, permute fc1 rows, pad fc2, cast to bf16."""
    bn_scale = params["bn_gamma"] / jnp.sqrt(params["bn_var"] + 0.01)   # module eps=0.01
    bn_shift = params["bn_beta"] - params["bn_mean"] * bn_scale
    conv_w = params["conv_w"] * bn_scale[None, :]                        # (C_in, 128)
    # fc1 rows: PyTorch channel-major flatten (c*16+s) -> kernel HWC order (s*128+c).
    fc1_w = params["fc1_w"].reshape(128, 16, 1024).transpose(1, 0, 2).reshape(2048, 1024)
    n_pad = ((num_class + 127) // 128) * 128
    fc2_w = jnp.zeros((1024, n_pad), jnp.float32).at[:, :num_class].set(params["fc2_w"])
    fc2_b = jnp.zeros((n_pad,), jnp.float32).at[:num_class].set(params["fc2_b"])
    return {
        "conv_w": conv_w.astype(jnp.float32),
        "bn_shift": bn_shift.reshape(1, 128).astype(jnp.float32),
        "fc1_w": fc1_w.astype(jnp.bfloat16),
        "fc1_b": params["fc1_b"].reshape(1, 1024).astype(jnp.float32),
        "fc2_w": fc2_w.astype(jnp.bfloat16),
        "fc2_b": fc2_b.reshape(1, n_pad).astype(jnp.float32),
    }


@functools.partial(jax.jit, static_argnums=(2,))
def inception_aux_forward(x, prepped, num_class):
    """x: (N, C_in, H, W) float32 NCHW -> logits (N, num_class) float32."""
    n, c, h, w = x.shape
    assert h % 4 == 0 and w % 4 == 0, "adaptive pool to 4x4 assumes divisible spatial dims"
    # AdaptiveAvgPool2d((4,4)): exact mean over (H/4, W/4) windows (tiny JAX glue).
    # TODO(synk): fuse the pool + layout transpose into the kernel for real
    # GoogLeNet-sized activations (at (N,512,14,14) this is a real HBM round-trip).
    pooled = x.reshape(n, c, 4, h // 4, 4, w // 4).mean(axis=(3, 5))     # (N, C, 4, 4)
    xm = pooled.transpose(2, 3, 0, 1).reshape(16, n, c)                  # (S=16, N, C_in)
    b_pad = ((n + 7) // 8) * 8                                           # sublane-aligned batch
    if b_pad != n:
        xm = jnp.pad(xm, ((0, 0), (0, b_pad - n), (0, 0)))
    out = inception_aux_fused(xm, prepped["conv_w"], prepped["bn_shift"],
                              prepped["fc1_w"], prepped["fc1_b"],
                              prepped["fc2_w"], prepped["fc2_b"])
    return out[:n, :num_class]


def inception_aux_reference(x, params):
    """Pure-JAX f32 reference mirroring the PyTorch module (eval mode)."""
    n, c, h, w = x.shape
    p = x.reshape(n, c, 4, h // 4, 4, w // 4).mean(axis=(3, 5))          # (N, C, 4, 4)
    y = jnp.einsum("nchw,ck->nkhw", p, params["conv_w"])                 # (N, 128, 4, 4)
    scale = params["bn_gamma"] / jnp.sqrt(params["bn_var"] + 0.01)
    shift = params["bn_beta"] - params["bn_mean"] * scale
    y = jnp.maximum(y * scale[None, :, None, None] + shift[None, :, None, None], 0.0)
    f = y.reshape(n, 128 * 16)                                           # torch.flatten(x, 1)
    z = jnp.maximum(f @ params["fc1_w"] + params["fc1_b"], 0.0)
    return z @ params["fc2_w"] + params["fc2_b"]                         # dropout eval = id


if __name__ == "__main__":
    key = jax.random.PRNGKey(0)
    k_x, k_p = jax.random.split(key)

    in_channels, num_class = 4, 10
    x = jax.random.normal(k_x, (2, in_channels, 16, 16), jnp.float32)    # NCHW
    params = init_inception_aux_params(k_p, in_channels, num_class)
    prepped = prepare_inception_aux_params(params, num_class)

    out = inception_aux_forward(x, prepped, num_class)
    jax.block_until_ready(out)
    assert out.shape == (2, num_class), out.shape

    ref = inception_aux_reference(x, params)
    assert jnp.allclose(out, ref, rtol=1e-1, atol=1e-2), float(jnp.max(jnp.abs(out - ref)))
    print("KERNEL_OK")
</pallas_src>

<mosaic_0001>
module attributes {stable_mosaic.version = 11 : i64} {
  func.func @_inception_aux_kernel(%arg0: i32, %arg1: memref<16x8x4xf32, #tpu.memory_space<vmem>>, %arg2: memref<4x128xf32, #tpu.memory_space<vmem>>, %arg3: memref<1x128xf32, #tpu.memory_space<vmem>>, %arg4: memref<2048x1024xbf16, #tpu.memory_space<vmem>>, %arg5: memref<1x1024xf32, #tpu.memory_space<vmem>>, %arg6: memref<1024x128xbf16, #tpu.memory_space<vmem>>, %arg7: memref<1x128xf32, #tpu.memory_space<vmem>>, %arg8: memref<8x128xf32, #tpu.memory_space<vmem>>, %arg9: memref<8x2048xbf16, #tpu.memory_space<vmem>>) attributes {dimension_semantics = [#tpu.dimension_semantics<arbitrary>], iteration_bounds = array<i64: 1>, scalar_prefetch = 0 : i64, scratch_operands = 1 : i64, tpu.core_type = #tpu.core_type<tc>, window_params = [{pipeline_mode = #tpu.pipeline_mode<synchronous>, transform_indices = @transform_0, window_bounds = array<i64: 16, 8, 4>}, {pipeline_mode = #tpu.pipeline_mode<synchronous>, transform_indices = @transform_1, window_bounds = array<i64: 4, 128>}, {pipeline_mode = #tpu.pipeline_mode<synchronous>, transform_indices = @transform_2, window_bounds = array<i64: 1, 128>}, {transform_indices = @transform_3, window_bounds = array<i64: 2048, 1024>}, {transform_indices = @transform_4, window_bounds = array<i64: 1, 1024>}, {transform_indices = @transform_5, window_bounds = array<i64: 1024, 128>}, {pipeline_mode = #tpu.pipeline_mode<synchronous>, transform_indices = @transform_6, window_bounds = array<i64: 1, 128>}, {pipeline_mode = #tpu.pipeline_mode<synchronous>, transform_indices = @transform_7, window_bounds = array<i64: 8, 128>}]} {
    %c0_i32 = arith.constant 0 : i32
    %0 = arith.cmpi eq, %arg0, %c0_i32 : i32
    %1 = arith.extui %0 : i1 to i32
    %c0_i32_0 = arith.constant 0 : i32
    %2 = arith.cmpi ne, %1, %c0_i32_0 : i32
    scf.if %2 {
      %c0_14 = arith.constant 0 : index
      %c0_15 = arith.constant 0 : index
      %c0_16 = arith.constant 0 : index
      %17 = vector.load %arg1[%c0_14, %c0_15, %c0_16] : memref<16x8x4xf32, #tpu.memory_space<vmem>>, vector<1x8x4xf32>
      %18 = vector.shape_cast %17 : vector<1x8x4xf32> to vector<8x4xf32>
      %c0_17 = arith.constant 0 : index
      %c0_18 = arith.constant 0 : index
      %19 = vector.load %arg2[%c0_17, %c0_18] : memref<4x128xf32, #tpu.memory_space<vmem>>, vector<4x128xf32>
      %cst_19 = arith.constant dense<0.000000e+00> : vector<8x128xf32>
      %20 = tpu.matmul %18, %19, %cst_19 {dimension_numbers = #tpu.dot_dimension_numbers<[1], [0], [0], [1], [0, 0, 1, 1], [], []>} : vector<8x4xf32>, vector<4x128xf32>, vector<8x128xf32> -> vector<8x128xf32>
      %c0_20 = arith.constant 0 : index
      %c0_21 = arith.constant 0 : index
      %21 = vector.load %arg3[%c0_20, %c0_21] : memref<1x128xf32, #tpu.memory_space<vmem>>, vector<1x128xf32>
      %22 = vector.broadcast %21 : vector<1x128xf32> to vector<8x128xf32>
      %23 = arith.addf %20, %22 : vector<8x128xf32>
      %cst_22 = arith.constant 0.000000e+00 : f32
      %24 = vector.broadcast %cst_22 : f32 to vector<8x128xf32>
      %25 = arith.maximumf %23, %24 : vector<8x128xf32>
      %26 = arith.truncf %25 : vector<8x128xf32> to vector<8x128xbf16>
      %c0_23 = arith.constant 0 : index
      %c0_24 = arith.constant 0 : index
      %27 = vector.load %arg9[%c0_23, %c0_24] : memref<8x2048xbf16, #tpu.memory_space<vmem>>, vector<8x128xbf16>
      tpu.vector_store %arg9[%c0_23, %c0_24], %26 {strides = array<i32>} : memref<8x2048xbf16, #tpu.memory_space<vmem>>, vector<8x128xbf16>,
      %c1 = arith.constant 1 : index
      %c0_25 = arith.constant 0 : index
      %c0_26 = arith.constant 0 : index
      %28 = vector.load %arg1[%c1, %c0_25, %c0_26] : memref<16x8x4xf32, #tpu.memory_space<vmem>>, vector<1x8x4xf32>
      %29 = vector.shape_cast %28 : vector<1x8x4xf32> to vector<8x4xf32>
      %c0_27 = arith.constant 0 : index
      %c0_28 = arith.constant 0 : index
      %30 = vector.load %arg2[%c0_27, %c0_28] : memref<4x128xf32, #tpu.memory_space<vmem>>, vector<4x128xf32>
      %cst_29 = arith.constant dense<0.000000e+00> : vector<8x128xf32>
      %31 = tpu.matmul %29, %30, %cst_29 {dimension_numbers = #tpu.dot_dimension_numbers<[1], [0], [0], [1], [0, 0, 1, 1], [], []>} : vector<8x4xf32>, vector<4x128xf32>, vector<8x128xf32> -> vector<8x128xf32>
      %c0_30 = arith.constant 0 : index
      %c0_31 = arith.constant 0 : index
      %32 = vector.load %arg3[%c0_30, %c0_31] : memref<1x128xf32, #tpu.memory_space<vmem>>, vector<1x128xf32>
      %33 = vector.broadcast %32 : vector<1x128xf32> to vector<8x128xf32>
      %34 = arith.addf %31, %33 : vector<8x128xf32>
      %cst_32 = arith.constant 0.000000e+00 : f32
      %35 = vector.broadcast %cst_32 : f32 to vector<8x128xf32>
      %36 = arith.maximumf %34, %35 : vector<8x128xf32>
      %37 = arith.truncf %36 : vector<8x128xf32> to vector<8x128xbf16>
      %c0_33 = arith.constant 0 : index
      %c128 = arith.constant 128 : index
      %38 = vector.load %arg9[%c0_33, %c128] : memref<8x2048xbf16, #tpu.memory_space<vmem>>, vector<8x128xbf16>
      tpu.vector_store %arg9[%c0_33, %c128], %37 {strides = array<i32>} : memref<8x2048xbf16, #tpu.memory_space<vmem>>, vector<8x128xbf16>,
      %c2 = arith.constant 2 : index
      %c0_34 = arith.constant 0 : index
      %c0_35 = arith.constant 0 : index
      %39 = vector.load %arg1[%c2, %c0_34, %c0_35] : memref<16x8x4xf32, #tpu.memory_space<vmem>>, vector<1x8x4xf32>
      %40 = vector.shape_cast %39 : vector<1x8x4xf32> to vector<8x4xf32>
      %c0_36 = arith.constant 0 : index
      %c0_37 = arith.constant 0 : index
      %41 = vector.load %arg2[%c0_36, %c0_37] : memref<4x128xf32, #tpu.memory_space<vmem>>, vector<4x128xf32>
      %cst_38 = arith.constant dense<0.000000e+00> : vector<8x128xf32>
      %42 = tpu.matmul %40, %41, %cst_38 {dimension_numbers = #tpu.dot_dimension_numbers<[1], [0], [0], [1], [0, 0, 1, 1], [], []>} : vector<8x4xf32>, vector<4x128xf32>, vector<8x128xf32> -> vector<8x128xf32>
      %c0_39 = arith.constant 0 : index
      %c0_40 = arith.constant 0 : index
      %43 = vector.load %arg3[%c0_39, %c0_40] : memref<1x128xf32, #tpu.memory_space<vmem>>, vector<1x128xf32>
      %44 = vector.broadcast %43 : vector<1x128xf32> to vector<8x128xf32>
      %45 = arith.addf %42, %44 : vector<8x128xf32>
      %cst_41 = arith.constant 0.000000e+00 : f32
      %46 = vector.broadcast %cst_41 : f32 to vector<8x128xf32>
      %47 = arith.maximumf %45, %46 : vector<8x128xf32>
      %48 = arith.truncf %47 : vector<8x128xf32> to vector<8x128xbf16>
      %c0_42 = arith.constant 0 : index
      %c256 = arith.constant 256 : index
      %49 = vector.load %arg9[%c0_42, %c256] : memref<8x2048xbf16, #tpu.memory_space<vmem>>, vector<8x128xbf16>
      tpu.vector_store %arg9[%c0_42, %c256], %48 {strides = array<i32>} : memref<8x2048xbf16, #tpu.memory_space<vmem>>, vector<8x128xbf16>,
      %c3 = arith.constant 3 : index
      %c0_43 = arith.constant 0 : index
      %c0_44 = arith.constant 0 : index
      %50 = vector.load %arg1[%c3, %c0_43, %c0_44] : memref<16x8x4xf32, #tpu.memory_space<vmem>>, vector<1x8x4xf32>
      %51 = vector.shape_cast %50 : vector<1x8x4xf32> to vector<8x4xf32>
      %c0_45 = arith.constant 0 : index
      %c0_46 = arith.constant 0 : index
      %52 = vector.load %arg2[%c0_45, %c0_46] : memref<4x128xf32, #tpu.memory_space<vmem>>, vector<4x128xf32>
      %cst_47 = arith.constant dense<0.000000e+00> : vector<8x128xf32>
      %53 = tpu.matmul %51, %52, %cst_47 {dimension_numbers = #tpu.dot_dimension_numbers<[1], [0], [0], [1], [0, 0, 1, 1], [], []>} : vector<8x4xf32>, vector<4x128xf32>, vector<8x128xf32> -> vector<8x128xf32>
      %c0_48 = arith.constant 0 : index
      %c0_49 = arith.constant 0 : index
      %54 = vector.load %arg3[%c0_48, %c0_49] : memref<1x128xf32, #tpu.memory_space<vmem>>, vector<1x128xf32>
      %55 = vector.broadcast %54 : vector<1x128xf32> to vector<8x128xf32>
      %56 = arith.addf %53, %55 : vector<8x128xf32>
      %cst_50 = arith.constant 0.000000e+00 : f32
      %57 = vector.broadcast %cst_50 : f32 to vector<8x128xf32>
      %58 = arith.maximumf %56, %57 : vector<8x128xf32>
      %59 = arith.truncf %58 : vector<8x128xf32> to vector<8x128xbf16>
      %c0_51 = arith.constant 0 : index
      %c384 = arith.constant 384 : index
      %60 = vector.load %arg9[%c0_51, %c384] : memref<8x2048xbf16, #tpu.memory_space<vmem>>, vector<8x128xbf16>
      tpu.vector_store %arg9[%c0_51, %c384], %59 {strides = array<i32>} : memref<8x2048xbf16, #tpu.memory_space<vmem>>, vector<8x128xbf16>,
      %c4 = arith.constant 4 : index
      %c0_52 = arith.constant 0 : index
      %c0_53 = arith.constant 0 : index
      %61 = vector.load %arg1[%c4, %c0_52, %c0_53] : memref<16x8x4xf32, #tpu.memory_space<vmem>>, vector<1x8x4xf32>
      %62 = vector.shape_cast %61 : vector<1x8x4xf32> to vector<8x4xf32>
      %c0_54 = arith.constant 0 : index
      %c0_55 = arith.constant 0 : index
      %63 = vector.load %arg2[%c0_54, %c0_55] : memref<4x128xf32, #tpu.memory_space<vmem>>, vector<4x128xf32>
      %cst_56 = arith.constant dense<0.000000e+00> : vector<8x128xf32>
      %64 = tpu.matmul %62, %63, %cst_56 {dimension_numbers = #tpu.dot_dimension_numbers<[1], [0], [0], [1], [0, 0, 1, 1], [], []>} : vector<8x4xf32>, vector<4x128xf32>, vector<8x128xf32> -> vector<8x128xf32>
      %c0_57 = arith.constant 0 : index
      %c0_58 = arith.constant 0 : index
      %65 = vector.load %arg3[%c0_57, %c0_58] : memref<1x128xf32, #tpu.memory_space<vmem>>, vector<1x128xf32>
      %66 = vector.broadcast %65 : vector<1x128xf32> to vector<8x128xf32>
      %67 = arith.addf %64, %66 : vector<8x128xf32>
      %cst_59 = arith.constant 0.000000e+00 : f32
      %68 = vector.broadcast %cst_59 : f32 to vector<8x128xf32>
      %69 = arith.maximumf %67, %68 : vector<8x128xf32>
      %70 = arith.truncf %69 : vector<8x128xf32> to vector<8x128xbf16>
      %c0_60 = arith.constant 0 : index
      %c512 = arith.constant 512 : index
      %71 = vector.load %arg9[%c0_60, %c512] : memref<8x2048xbf16, #tpu.memory_space<vmem>>, vector<8x128xbf16>
      tpu.vector_store %arg9[%c0_60, %c512], %70 {strides = array<i32>} : memref<8x2048xbf16, #tpu.memory_space<vmem>>, vector<8x128xbf16>,
      %c5 = arith.constant 5 : index
      %c0_61 = arith.constant 0 : index
      %c0_62 = arith.constant 0 : index
      %72 = vector.load %arg1[%c5, %c0_61, %c0_62] : memref<16x8x4xf32, #tpu.memory_space<vmem>>, vector<1x8x4xf32>
      %73 = vector.shape_cast %72 : vector<1x8x4xf32> to vector<8x4xf32>
      %c0_63 = arith.constant 0 : index
      %c0_64 = arith.constant 0 : index
      %74 = vector.load %arg2[%c0_63, %c0_64] : memref<4x128xf32, #tpu.memory_space<vmem>>, vector<4x128xf32>
      %cst_65 = arith.constant dense<0.000000e+00> : vector<8x128xf32>
      %75 = tpu.matmul %73, %74, %cst_65 {dimension_numbers = #tpu.dot_dimension_numbers<[1], [0], [0], [1], [0, 0, 1, 1], [], []>} : vector<8x4xf32>, vector<4x128xf32>, vector<8x128xf32> -> vector<8x128xf32>
      %c0_66 = arith.constant 0 : index
      %c0_67 = arith.constant 0 : index
      %76 = vector.load %arg3[%c0_66, %c0_67] : memref<1x128xf32, #tpu.memory_space<vmem>>, vector<1x128xf32>
      %77 = vector.broadcast %76 : vector<1x128xf32> to vector<8x128xf32>
      %78 = arith.addf %75, %77 : vector<8x128xf32>
      %cst_68 = arith.constant 0.000000e+00 : f32
      %79 = vector.broadcast %cst_68 : f32 to vector<8x128xf32>
      %80 = arith.maximumf %78, %79 : vector<8x128xf32>
      %81 = arith.truncf %80 : vector<8x128xf32> to vector<8x128xbf16>
      %c0_69 = arith.constant 0 : index
      %c640 = arith.constant 640 : index
      %82 = vector.load %arg9[%c0_69, %c640] : memref<8x2048xbf16, #tpu.memory_space<vmem>>, vector<8x128xbf16>
      tpu.vector_store %arg9[%c0_69, %c640], %81 {strides = array<i32>} : memref<8x2048xbf16, #tpu.memory_space<vmem>>, vector<8x128xbf16>,
      %c6 = arith.constant 6 : index
      %c0_70 = arith.constant 0 : index
      %c0_71 = arith.constant 0 : index
      %83 = vector.load %arg1[%c6, %c0_70, %c0_71] : memref<16x8x4xf32, #tpu.memory_space<vmem>>, vector<1x8x4xf32>
      %84 = vector.shape_cast %83 : vector<1x8x4xf32> to vector<8x4xf32>
      %c0_72 = arith.constant 0 : index
      %c0_73 = arith.constant 0 : index
      %85 = vector.load %arg2[%c0_72, %c0_73] : memref<4x128xf32, #tpu.memory_space<vmem>>, vector<4x128xf32>
      %cst_74 = arith.constant dense<0.000000e+00> : vector<8x128xf32>
      %86 = tpu.matmul %84, %85, %cst_74 {dimension_numbers = #tpu.dot_dimension_numbers<[1], [0], [0], [1], [0, 0, 1, 1], [], []>} : vector<8x4xf32>, vector<4x128xf32>, vector<8x128xf32> -> vector<8x128xf32>
      %c0_75 = arith.constant 0 : index
      %c0_76 = arith.constant 0 : index
      %87 = vector.load %arg3[%c0_75, %c0_76] : memref<1x128xf32, #tpu.memory_space<vmem>>, vector<1x128xf32>
      %88 = vector.broadcast %87 : vector<1x128xf32> to vector<8x128xf32>
      %89 = arith.addf %86, %88 : vector<8x128xf32>
      %cst_77 = arith.constant 0.000000e+00 : f32
      %90 = vector.broadcast %cst_77 : f32 to vector<8x128xf32>
      %91 = arith.maximumf %89, %90 : vector<8x128xf32>
      %92 = arith.truncf %91 : vector<8x128xf32> to vector<8x128xbf16>
      %c0_78 = arith.constant 0 : index
      %c768 = arith.constant 768 : index
      %93 = vector.load %arg9[%c0_78, %c768] : memref<8x2048xbf16, #tpu.memory_space<vmem>>, vector<8x128xbf16>
      tpu.vector_store %arg9[%c0_78, %c768], %92 {strides = array<i32>} : memref<8x2048xbf16, #tpu.memory_space<vmem>>, vector<8x128xbf16>,
      %c7 = arith.constant 7 : index
      %c0_79 = arith.constant 0 : index
      %c0_80 = arith.constant 0 : index
      %94 = vector.load %arg1[%c7, %c0_79, %c0_80] : memref<16x8x4xf32, #tpu.memory_space<vmem>>, vector<1x8x4xf32>
      %95 = vector.shape_cast %94 : vector<1x8x4xf32> to vector<8x4xf32>
      %c0_81 = arith.constant 0 : index
      %c0_82 = arith.constant 0 : index
      %96 = vector.load %arg2[%c0_81, %c0_82] : memref<4x128xf32, #tpu.memory_space<vmem>>, vector<4x128xf32>
      %cst_83 = arith.constant dense<0.000000e+00> : vector<8x128xf32>
      %97 = tpu.matmul %95, %96, %cst_83 {dimension_numbers = #tpu.dot_dimension_numbers<[1], [0], [0], [1], [0, 0, 1, 1], [], []>} : vector<8x4xf32>, vector<4x128xf32>, vector<8x128xf32> -> vector<8x128xf32>
      %c0_84 = arith.constant 0 : index
      %c0_85 = arith.constant 0 : index
      %98 = vector.load %arg3[%c0_84, %c0_85] : memref<1x128xf32, #tpu.memory_space<vmem>>, vector<1x128xf32>
      %99 = vector.broadcast %98 : vector<1x128xf32> to vector<8x128xf32>
      %100 = arith.addf %97, %99 : vector<8x128xf32>
      %cst_86 = arith.constant 0.000000e+00 : f32
      %101 = vector.broadcast %cst_86 : f32 to vector<8x128xf32>
      %102 = arith.maximumf %100, %101 : vector<8x128xf32>
      %103 = arith.truncf %102 : vector<8x128xf32> to vector<8x128xbf16>
      %c0_87 = arith.constant 0 : index
      %c896 = arith.constant 896 : index
      %104 = vector.load %arg9[%c0_87, %c896] : memref<8x2048xbf16, #tpu.memory_space<vmem>>, vector<8x128xbf16>
      tpu.vector_store %arg9[%c0_87, %c896], %103 {strides = array<i32>} : memref<8x2048xbf16, #tpu.memory_space<vmem>>, vector<8x128xbf16>,
      %c8 = arith.constant 8 : index
      %c0_88 = arith.constant 0 : index
      %c0_89 = arith.constant 0 : index
      %105 = vector.load %arg1[%c8, %c0_88, %c0_89] : memref<16x8x4xf32, #tpu.memory_space<vmem>>, vector<1x8x4xf32>
      %106 = vector.shape_cast %105 : vector<1x8x4xf32> to vector<8x4xf32>
      %c0_90 = arith.constant 0 : index
      %c0_91 = arith.constant 0 : index
      %107 = vector.load %arg2[%c0_90, %c0_91] : memref<4x128xf32, #tpu.memory_space<vmem>>, vector<4x128xf32>
      %cst_92 = arith.constant dense<0.000000e+00> : vector<8x128xf32>
      %108 = tpu.matmul %106, %107, %cst_92 {dimension_numbers = #tpu.dot_dimension_numbers<[1], [0], [0], [1], [0, 0, 1, 1], [], []>} : vector<8x4xf32>, vector<4x128xf32>, vector<8x128xf32> -> vector<8x128xf32>
      %c0_93 = arith.constant 0 : index
      %c0_94 = arith.constant 0 : index
      %109 = vector.load %arg3[%c0_93, %c0_94] : memref<1x128xf32, #tpu.memory_space<vmem>>, vector<1x128xf32>
      %110 = vector.broadcast %109 : vector<1x128xf32> to vector<8x128xf32>
      %111 = arith.addf %108, %110 : vector<8x128xf32>
      %cst_95 = arith.constant 0.000000e+00 : f32
      %112 = vector.broadcast %cst_95 : f32 to vector<8x128xf32>
      %113 = arith.maximumf %111, %112 : vector<8x128xf32>
      %114 = arith.truncf %113 : vector<8x128xf32> to vector<8x128xbf16>
      %c0_96 = arith.constant 0 : index
      %c1024 = arith.constant 1024 : index
      %115 = vector.load %arg9[%c0_96, %c1024] : memref<8x2048xbf16, #tpu.memory_space<vmem>>, vector<8x128xbf16>
      tpu.vector_store %arg9[%c0_96, %c1024], %114 {strides = array<i32>} : memref<8x2048xbf16, #tpu.memory_space<vmem>>, vector<8x128xbf16>,
      %c9 = arith.constant 9 : index
      %c0_97 = arith.constant 0 : index
      %c0_98 = arith.constant 0 : index
      %116 = vector.load %arg1[%c9, %c0_97, %c0_98] : memref<16x8x4xf32, #tpu.memory_space<vmem>>, vector<1x8x4xf32>
      %117 = vector.shape_cast %116 : vector<1x8x4xf32> to vector<8x4xf32>
      %c0_99 = arith.constant 0 : index
      %c0_100 = arith.constant 0 : index
      %118 = vector.load %arg2[%c0_99, %c0_100] : memref<4x128xf32, #tpu.memory_space<vmem>>, vector<4x128xf32>
      %cst_101 = arith.constant dense<0.000000e+00> : vector<8x128xf32>
      %119 = tpu.matmul %117, %118, %cst_101 {dimension_numbers = #tpu.dot_dimension_numbers<[1], [0], [0], [1], [0, 0, 1, 1], [], []>} : vector<8x4xf32>, vector<4x128xf32>, vector<8x128xf32> -> vector<8x128xf32>
      %c0_102 = arith.constant 0 : index
      %c0_103 = arith.constant 0 : index
      %120 = vector.load %arg3[%c0_102, %c0_103] : memref<1x128xf32, #tpu.memory_space<vmem>>, vector<1x128xf32>
      %121 = vector.broadcast %120 : vector<1x128xf32> to vector<8x128xf32>
      %122 = arith.addf %119, %121 : vector<8x128xf32>
      %cst_104 = arith.constant 0.000000e+00 : f32
      %123 = vector.broadcast %cst_104 : f32 to vector<8x128xf32>
      %124 = arith.maximumf %122, %123 : vector<8x128xf32>
      %125 = arith.truncf %124 : vector<8x128xf32> to vector<8x128xbf16>
      %c0_105 = arith.constant 0 : index
      %c1152 = arith.constant 1152 : index
      %126 = vector.load %arg9[%c0_105, %c1152] : memref<8x2048xbf16, #tpu.memory_space<vmem>>, vector<8x128xbf16>
      tpu.vector_store %arg9[%c0_105, %c1152], %125 {strides = array<i32>} : memref<8x2048xbf16, #tpu.memory_space<vmem>>, vector<8x128xbf16>,
      %c10 = arith.constant 10 : index
      %c0_106 = arith.constant 0 : index
      %c0_107 = arith.constant 0 : index
      %127 = vector.load %arg1[%c10, %c0_106, %c0_107] : memref<16x8x4xf32, #tpu.memory_space<vmem>>, vector<1x8x4xf32>
      %128 = vector.shape_cast %127 : vector<1x8x4xf32> to vector<8x4xf32>
      %c0_108 = arith.constant 0 : index
      %c0_109 = arith.constant 0 : index
      %129 = vector.load %arg2[%c0_108, %c0_109] : memref<4x128xf32, #tpu.memory_space<vmem>>, vector<4x128xf32>
      %cst_110 = arith.constant dense<0.000000e+00> : vector<8x128xf32>
      %130 = tpu.matmul %128, %129, %cst_110 {dimension_numbers = #tpu.dot_dimension_numbers<[1], [0], [0], [1], [0, 0, 1, 1], [], []>} : vector<8x4xf32>, vector<4x128xf32>, vector<8x128xf32> -> vector<8x128xf32>
      %c0_111 = arith.constant 0 : index
      %c0_112 = arith.constant 0 : index
      %131 = vector.load %arg3[%c0_111, %c0_112] : memref<1x128xf32, #tpu.memory_space<vmem>>, vector<1x128xf32>
      %132 = vector.broadcast %131 : vector<1x128xf32> to vector<8x128xf32>
      %133 = arith.addf %130, %132 : vector<8x128xf32>
      %cst_113 = arith.constant 0.000000e+00 : f32
      %134 = vector.broadcast %cst_113 : f32 to vector<8x128xf32>
      %135 = arith.maximumf %133, %134 : vector<8x128xf32>
      %136 = arith.truncf %135 : vector<8x128xf32> to vector<8x128xbf16>
      %c0_114 = arith.constant 0 : index
      %c1280 = arith.constant 1280 : index
      %137 = vector.load %arg9[%c0_114, %c1280] : memref<8x2048xbf16, #tpu.memory_space<vmem>>, vector<8x128xbf16>
      tpu.vector_store %arg9[%c0_114, %c1280], %136 {strides = array<i32>} : memref<8x2048xbf16, #tpu.memory_space<vmem>>, vector<8x128xbf16>,
      %c11 = arith.constant 11 : index
      %c0_115 = arith.constant 0 : index
      %c0_116 = arith.constant 0 : index
      %138 = vector.load %arg1[%c11, %c0_115, %c0_116] : memref<16x8x4xf32, #tpu.memory_space<vmem>>, vector<1x8x4xf32>
      %139 = vector.shape_cast %138 : vector<1x8x4xf32> to vector<8x4xf32>
      %c0_117 = arith.constant 0 : index
      %c0_118 = arith.constant 0 : index
      %140 = vector.load %arg2[%c0_117, %c0_118] : memref<4x128xf32, #tpu.memory_space<vmem>>, vector<4x128xf32>
      %cst_119 = arith.constant dense<0.000000e+00> : vector<8x128xf32>
      %141 = tpu.matmul %139, %140, %cst_119 {dimension_numbers = #tpu.dot_dimension_numbers<[1], [0], [0], [1], [0, 0, 1, 1], [], []>} : vector<8x4xf32>, vector<4x128xf32>, vector<8x128xf32> -> vector<8x128xf32>
      %c0_120 = arith.constant 0 : index
      %c0_121 = arith.constant 0 : index
      %142 = vector.load %arg3[%c0_120, %c0_121] : memref<1x128xf32, #tpu.memory_space<vmem>>, vector<1x128xf32>
      %143 = vector.broadcast %142 : vector<1x128xf32> to vector<8x128xf32>
      %144 = arith.addf %141, %143 : vector<8x128xf32>
      %cst_122 = arith.constant 0.000000e+00 : f32
      %145 = vector.broadcast %cst_122 : f32 to vector<8x128xf32>
      %146 = arith.maximumf %144, %145 : vector<8x128xf32>
      %147 = arith.truncf %146 : vector<8x128xf32> to vector<8x128xbf16>
      %c0_123 = arith.constant 0 : index
      %c1408 = arith.constant 1408 : index
      %148 = vector.load %arg9[%c0_123, %c1408] : memref<8x2048xbf16, #tpu.memory_space<vmem>>, vector<8x128xbf16>
      tpu.vector_store %arg9[%c0_123, %c1408], %147 {strides = array<i32>} : memref<8x2048xbf16, #tpu.memory_space<vmem>>, vector<8x128xbf16>,
      %c12 = arith.constant 12 : index
      %c0_124 = arith.constant 0 : index
      %c0_125 = arith.constant 0 : index
      %149 = vector.load %arg1[%c12, %c0_124, %c0_125] : memref<16x8x4xf32, #tpu.memory_space<vmem>>, vector<1x8x4xf32>
      %150 = vector.shape_cast %149 : vector<1x8x4xf32> to vector<8x4xf32>
      %c0_126 = arith.constant 0 : index
      %c0_127 = arith.constant 0 : index
      %151 = vector.load %arg2[%c0_126, %c0_127] : memref<4x128xf32, #tpu.memory_space<vmem>>, vector<4x128xf32>
      %cst_128 = arith.constant dense<0.000000e+00> : vector<8x128xf32>
      %152 = tpu.matmul %150, %151, %cst_128 {dimension_numbers = #tpu.dot_dimension_numbers<[1], [0], [0], [1], [0, 0, 1, 1], [], []>} : vector<8x4xf32>, vector<4x128xf32>, vector<8x128xf32> -> vector<8x128xf32>
      %c0_129 = arith.constant 0 : index
      %c0_130 = arith.constant 0 : index
      %153 = vector.load %arg3[%c0_129, %c0_130] : memref<1x128xf32, #tpu.memory_space<vmem>>, vector<1x128xf32>
      %154 = vector.broadcast %153 : vector<1x128xf32> to vector<8x128xf32>
      %155 = arith.addf %152, %154 : vector<8x128xf32>
      %cst_131 = arith.constant 0.000000e+00 : f32
      %156 = vector.broadcast %cst_131 : f32 to vector<8x128xf32>
      %157 = arith.maximumf %155, %156 : vector<8x128xf32>
      %158 = arith.truncf %157 : vector<8x128xf32> to vector<8x128xbf16>
      %c0_132 = arith.constant 0 : index
      %c1536 = arith.constant 1536 : index
      %159 = vector.load %arg9[%c0_132, %c1536] : memref<8x2048xbf16, #tpu.memory_space<vmem>>, vector<8x128xbf16>
      tpu.vector_store %arg9[%c0_132, %c1536], %158 {strides = array<i32>} : memref<8x2048xbf16, #tpu.memory_space<vmem>>, vector<8x128xbf16>,
      %c13 = arith.constant 13 : index
      %c0_133 = arith.constant 0 : index
      %c0_134 = arith.constant 0 : index
      %160 = vector.load %arg1[%c13, %c0_133, %c0_134] : memref<16x8x4xf32, #tpu.memory_space<vmem>>, vector<1x8x4xf32>
      %161 = vector.shape_cast %160 : vector<1x8x4xf32> to vector<8x4xf32>
      %c0_135 = arith.constant 0 : index
      %c0_136 = arith.constant 0 : index
      %162 = vector.load %arg2[%c0_135, %c0_136] : memref<4x128xf32, #tpu.memory_space<vmem>>, vector<4x128xf32>
      %cst_137 = arith.constant dense<0.000000e+00> : vector<8x128xf32>
      %163 = tpu.matmul %161, %162, %cst_137 {dimension_numbers = #tpu.dot_dimension_numbers<[1], [0], [0], [1], [0, 0, 1, 1], [], []>} : vector<8x4xf32>, vector<4x128xf32>, vector<8x128xf32> -> vector<8x128xf32>
      %c0_138 = arith.constant 0 : index
      %c0_139 = arith.constant 0 : index
      %164 = vector.load %arg3[%c0_138, %c0_139] : memref<1x128xf32, #tpu.memory_space<vmem>>, vector<1x128xf32>
      %165 = vector.broadcast %164 : vector<1x128xf32> to vector<8x128xf32>
      %166 = arith.addf %163, %165 : vector<8x128xf32>
      %cst_140 = arith.constant 0.000000e+00 : f32
      %167 = vector.broadcast %cst_140 : f32 to vector<8x128xf32>
      %168 = arith.maximumf %166, %167 : vector<8x128xf32>
      %169 = arith.truncf %168 : vector<8x128xf32> to vector<8x128xbf16>
      %c0_141 = arith.constant 0 : index
      %c1664 = arith.constant 1664 : index
      %170 = vector.load %arg9[%c0_141, %c1664] : memref<8x2048xbf16, #tpu.memory_space<vmem>>, vector<8x128xbf16>
      tpu.vector_store %arg9[%c0_141, %c1664], %169 {strides = array<i32>} : memref<8x2048xbf16, #tpu.memory_space<vmem>>, vector<8x128xbf16>,
      %c14 = arith.constant 14 : index
      %c0_142 = arith.constant 0 : index
      %c0_143 = arith.constant 0 : index
      %171 = vector.load %arg1[%c14, %c0_142, %c0_143] : memref<16x8x4xf32, #tpu.memory_space<vmem>>, vector<1x8x4xf32>
      %172 = vector.shape_cast %171 : vector<1x8x4xf32> to vector<8x4xf32>
      %c0_144 = arith.constant 0 : index
      %c0_145 = arith.constant 0 : index
      %173 = vector.load %arg2[%c0_144, %c0_145] : memref<4x128xf32, #tpu.memory_space<vmem>>, vector<4x128xf32>
      %cst_146 = arith.constant dense<0.000000e+00> : vector<8x128xf32>
      %174 = tpu.matmul %172, %173, %cst_146 {dimension_numbers = #tpu.dot_dimension_numbers<[1], [0], [0], [1], [0, 0, 1, 1], [], []>} : vector<8x4xf32>, vector<4x128xf32>, vector<8x128xf32> -> vector<8x128xf32>
      %c0_147 = arith.constant 0 : index
      %c0_148 = arith.constant 0 : index
      %175 = vector.load %arg3[%c0_147, %c0_148] : memref<1x128xf32, #tpu.memory_space<vmem>>, vector<1x128xf32>
      %176 = vector.broadcast %175 : vector<1x128xf32> to vector<8x128xf32>
      %177 = arith.addf %174, %176 : vector<8x128xf32>
      %cst_149 = arith.constant 0.000000e+00 : f32
      %178 = vector.broadcast %cst_149 : f32 to vector<8x128xf32>
      %179 = arith.maximumf %177, %178 : vector<8x128xf32>
      %180 = arith.truncf %179 : vector<8x128xf32> to vector<8x128xbf16>
      %c0_150 = arith.constant 0 : index
      %c1792 = arith.constant 1792 : index
      %181 = vector.load %arg9[%c0_150, %c1792] : memref<8x2048xbf16, #tpu.memory_space<vmem>>, vector<8x128xbf16>
      tpu.vector_store %arg9[%c0_150, %c1792], %180 {strides = array<i32>} : memref<8x2048xbf16, #tpu.memory_space<vmem>>, vector<8x128xbf16>,
      %c15 = arith.constant 15 : index
      %c0_151 = arith.constant 0 : index
      %c0_152 = arith.constant 0 : index
      %182 = vector.load %arg1[%c15, %c0_151, %c0_152] : memref<16x8x4xf32, #tpu.memory_space<vmem>>, vector<1x8x4xf32>
      %183 = vector.shape_cast %182 : vector<1x8x4xf32> to vector<8x4xf32>
      %c0_153 = arith.constant 0 : index
      %c0_154 = arith.constant 0 : index
      %184 = vector.load %arg2[%c0_153, %c0_154] : memref<4x128xf32, #tpu.memory_space<vmem>>, vector<4x128xf32>
      %cst_155 = arith.constant dense<0.000000e+00> : vector<8x128xf32>
      %185 = tpu.matmul %183, %184, %cst_155 {dimension_numbers = #tpu.dot_dimension_numbers<[1], [0], [0], [1], [0, 0, 1, 1], [], []>} : vector<8x4xf32>, vector<4x128xf32>, vector<8x128xf32> -> vector<8x128xf32>
      %c0_156 = arith.constant 0 : index
      %c0_157 = arith.constant 0 : index
      %186 = vector.load %arg3[%c0_156, %c0_157] : memref<1x128xf32, #tpu.memory_space<vmem>>, vector<1x128xf32>
      %187 = vector.broadcast %186 : vector<1x128xf32> to vector<8x128xf32>
      %188 = arith.addf %185, %187 : vector<8x128xf32>
      %cst_158 = arith.constant 0.000000e+00 : f32
      %189 = vector.broadcast %cst_158 : f32 to vector<8x128xf32>
      %190 = arith.maximumf %188, %189 : vector<8x128xf32>
      %191 = arith.truncf %190 : vector<8x128xf32> to vector<8x128xbf16>
      %c0_159 = arith.constant 0 : index
      %c1920 = arith.constant 1920 : index
      %192 = vector.load %arg9[%c0_159, %c1920] : memref<8x2048xbf16, #tpu.memory_space<vmem>>, vector<8x128xbf16>
      tpu.vector_store %arg9[%c0_159, %c1920], %191 {strides = array<i32>} : memref<8x2048xbf16, #tpu.memory_space<vmem>>, vector<8x128xbf16>,
      %cst_160 = arith.constant 0.000000e+00 : f32
      %193 = vector.broadcast %cst_160 : f32 to vector<8x128xf32>
      %c0_161 = arith.constant 0 : index
      %c0_162 = arith.constant 0 : index
      %194 = vector.load %arg7[%c0_161, %c0_162] : memref<1x128xf32, #tpu.memory_space<vmem>>, vector<1x128xf32>
      %195 = vector.broadcast %194 : vector<1x128xf32> to vector<8x128xf32>
      %196 = arith.addf %193, %195 : vector<8x128xf32>
      %c0_163 = arith.constant 0 : index
      %c0_164 = arith.constant 0 : index
      %197 = vector.load %arg8[%c0_163, %c0_164] : memref<8x128xf32, #tpu.memory_space<vmem>>, vector<8x128xf32>
      tpu.vector_store %arg8[%c0_163, %c0_164], %196 {strides = array<i32>} : memref<8x128xf32, #tpu.memory_space<vmem>>, vector<8x128xf32>,
    } else {
    }
    %c0 = arith.constant 0 : index
    %c0_1 = arith.constant 0 : index
    %3 = vector.load %arg9[%c0, %c0_1] : memref<8x2048xbf16, #tpu.memory_space<vmem>>, vector<8x2048xbf16>
    %c0_2 = arith.constant 0 : index
    %c0_3 = arith.constant 0 : index
    %4 = vector.load %arg4[%c0_2, %c0_3] : memref<2048x1024xbf16, #tpu.memory_space<vmem>>, vector<2048x1024xbf16>
    %cst = arith.constant dense<0.000000e+00> : vector<8x1024xf32>
    %5 = tpu.matmul %3, %4, %cst {dimension_numbers = #tpu.dot_dimension_numbers<[1], [0], [0], [1], [0, 0, 1, 1], [], []>} : vector<8x2048xbf16>, vector<2048x1024xbf16>, vector<8x1024xf32> -> vector<8x1024xf32>
    %c0_4 = arith.constant 0 : index
    %c0_5 = arith.constant 0 : index
    %6 = vector.load %arg5[%c0_4, %c0_5] : memref<1x1024xf32, #tpu.memory_space<vmem>>, vector<1x1024xf32>
    %7 = vector.broadcast %6 : vector<1x1024xf32> to vector<8x1024xf32>
    %8 = arith.addf %5, %7 : vector<8x1024xf32>
    %cst_6 = arith.constant 0.000000e+00 : f32
    %9 = vector.broadcast %cst_6 : f32 to vector<8x1024xf32>
    %10 = arith.maximumf %8, %9 : vector<8x1024xf32>
    %c0_7 = arith.constant 0 : index
    %c0_8 = arith.constant 0 : index
    %11 = vector.load %arg8[%c0_7, %c0_8] : memref<8x128xf32, #tpu.memory_space<vmem>>, vector<8x128xf32>
    %12 = arith.truncf %10 : vector<8x1024xf32> to vector<8x1024xbf16>
    %c0_9 = arith.constant 0 : index
    %c0_10 = arith.constant 0 : index
    %13 = vector.load %arg6[%c0_9, %c0_10] : memref<1024x128xbf16, #tpu.memory_space<vmem>>, vector<1024x128xbf16>
    %cst_11 = arith.constant dense<0.000000e+00> : vector<8x128xf32>
    %14 = tpu.matmul %12, %13, %cst_11 {dimension_numbers = #tpu.dot_dimension_numbers<[1], [0], [0], [1], [0, 0, 1, 1], [], []>} : vector<8x1024xbf16>, vector<1024x128xbf16>, vector<8x128xf32> -> vector<8x128xf32>
    %15 = arith.addf %11, %14 : vector<8x128xf32>
    %c0_12 = arith.constant 0 : index
    %c0_13 = arith.constant 0 : index
    %16 = vector.load %arg8[%c0_12, %c0_13] : memref<8x128xf32, #tpu.memory_space<vmem>>, vector<8x128xf32>
    tpu.vector_store %arg8[%c0_12, %c0_13], %15 {strides = array<i32>} : memref<8x128xf32, #tpu.memory_space<vmem>>, vector<8x128xf32>,
    return
  }
  func.func @transform_0(%arg0: i32) -> (i32, i32, i32) {
    %c0_i32 = arith.constant 0 : i32
    %c0_i32_0 = arith.constant 0 : i32
    %c0_i32_1 = arith.constant 0 : i32
    %c0_i32_2 = arith.constant 0 : i32
    return %c0_i32, %c0_i32_0, %c0_i32_1 : i32, i32, i32
  }
  func.func @transform_1(%arg0: i32) -> (i32, i32) {
    %c0_i32 = arith.constant 0 : i32
    %c0_i32_0 = arith.constant 0 : i32
    %c0_i32_1 = arith.constant 0 : i32
    return %c0_i32, %c0_i32_0 : i32, i32
  }
  func.func @transform_2(%arg0: i32) -> (i32, i32) {
    %c0_i32 = arith.constant 0 : i32
    %c0_i32_0 = arith.constant 0 : i32
    %c0_i32_1 = arith.constant 0 : i32
    return %c0_i32, %c0_i32_0 : i32, i32
  }
  func.func @transform_3(%arg0: i32) -> (i32, i32) {
    %c0_i32 = arith.constant 0 : i32
    %c0_i32_0 = arith.constant 0 : i32
    return %c0_i32, %arg0 : i32, i32
  }
  func.func @transform_4(%arg0: i32) -> (i32, i32) {
    %c0_i32 = arith.constant 0 : i32
    %c0_i32_0 = arith.constant 0 : i32
    return %c0_i32, %arg0 : i32, i32
  }
  func.func @transform_5(%arg0: i32) -> (i32, i32) {
    %c0_i32 = arith.constant 0 : i32
    %c0_i32_0 = arith.constant 0 : i32
    return %arg0, %c0_i32 : i32, i32
  }
  func.func @transform_6(%arg0: i32) -> (i32, i32) {
    %c0_i32 = arith.constant 0 : i32
    %c0_i32_0 = arith.constant 0 : i32
    %c0_i32_1 = arith.constant 0 : i32
    return %c0_i32, %c0_i32_0 : i32, i32
  }
  func.func @transform_7(%arg0: i32) -> (i32, i32) {
    %c0_i32 = arith.constant 0 : i32
    %c0_i32_0 = arith.constant 0 : i32
    %c0_i32_1 = arith.constant 0 : i32
    return %c0_i32, %c0_i32_0 : i32, i32
  }
}

</mosaic_0001>

<bundles_post_ra>
// kernel: inception_aux_forward.1
= control target key start
LH: loop header
LB: loop body
LE: loop exit
PB: predicated region body
PF: predicated region fallthrough
CT: control target
= control target key end

     0   :  { %12 = vsyncpa [#allocation4], 0  ;;  %s15315_s0 = inlined_call_operand.vmem [shape: f32[16,8,4], index: 0, kind: input, shape index: {}]   ;;  %s15316_s1 = inlined_call_operand.hbm [shape: f32[4,128], index: 1, kind: input, shape index: {}]   ;;  %s15317_s2 = inlined_call_operand.hbm [shape: f32[1,128], index: 2, kind: input, shape index: {}]   ;;  %s15318_s3 = inlined_call_operand.hbm [shape: bf16[2048,1024], index: 3, kind: input, shape index: {}]   ;;  %s15319_s4 = inlined_call_operand.hbm [shape: f32[1,1024], index: 4, kind: input, shape index: {}]   ;;  %s15320_s5 = inlined_call_operand.hbm [shape: bf16[1024,128], index: 5, kind: input, shape index: {}]   ;;  %s15321_s6 = inlined_call_operand.hbm [shape: f32[1,128], index: 6, kind: input, shape index: {}]   ;;  %s15322_s7 = inlined_call_operand.vmem [shape: f32[8,128], index: 7, kind: output, shape index: {}]  }
   0x1   :  { %13 = vsyncpa [#allocation6], 0 }
   0x2   :  { %14 = vsyncpa [#allocation9], 0  ;;  %s34_s26 = sshll.u32 %s15317_s2, 4  ;;  %s35_s26 = int_to_ptr.hbm [resolvable:$true] %s34_s26 }
   0x3   :  { %15 = vsyncpa [#allocation12], 0  ;;  %s14903_s27 = smov [#allocation5]   ;;  %s58_s8 = sshll.u32 %s15319_s4, 4  ;;  %s59_s8 = int_to_ptr.hbm [resolvable:$true] %s58_s8 }
   0x4   :  { %s36_s28 = sshll.u32 %s14903_s27, 4  ;;  %s14904_s9 = smov [#allocation8]   ;;  %s37_s28 = int_to_ptr.vmem [resolvable:$true] %s36_s28 }
   0x5   :  { %39 = dma.hbm_to_vmem [thread:$0]  %s35_s26, 16, %s37_s28, [#allocation6]  }
   0x6   :  { %s60_s10 = sshll.u32 %s14904_s9, 4  ;;  %s23_s13 = sshll.u32 %s15316_s1, 4  ;;  %s61_s10 = int_to_ptr.vmem [resolvable:$true] %s60_s10  ;;  %s24_s13 = int_to_ptr.hbm [resolvable:$true] %s23_s13 }
   0x7   :  { %63 = dma.hbm_to_vmem [thread:$0]  %s59_s8, 128, %s61_s10, [#allocation9]  }
   0x8   :  { %s44_s15 = sshll.u32 %s15318_s3, 4  ;;  %s14905_s16 = smov [#allocation3]   ;;  %s45_s15 = int_to_ptr.hbm [resolvable:$true] %s44_s15 }
   0x9   :  { %s25_s17 = sshll.u32 %s14905_s16, 4  ;;  %s14906_s4 = smov [#allocation7]   ;;  %s26_s17 = int_to_ptr.vmem [resolvable:$true] %s25_s17 }
   0xa   :  { %28 = dma.hbm_to_vmem [thread:$0]  %s24_s13, 64, %s26_s17, [#allocation4]  }
   0xb   :  { %s46_s18 = sshll.u32 %s14906_s4, 4  ;;  %s14907_s19 = smov 512   ;;  %s47_s18 = int_to_ptr.vmem [resolvable:$true] %s46_s18 }
   0xc   :  { %s14908_s20 = smov 32   ;;  %s68_s22 = sshll.u32 %s15320_s5, 4  ;;  %s69_s22 = int_to_ptr.hbm [resolvable:$true] %s68_s22 }
   0xd   :  { %52 = dma.hbm_to_vmem [thread:$0]  %s45_s15, 131072, %s47_s18, [#allocation6], %s14907_s19, %s14907_s19, %s14908_s20  }
   0xe   :  { %s14909_s23 = smov [#allocation10]   ;;  %s82_s26 = sshll.u32 %s15321_s6, 4  ;;  %s83_s26 = int_to_ptr.hbm [resolvable:$true] %s82_s26 }
   0xf   :  { %s70_s24 = sshll.u32 %s14909_s23, 4  ;;  %s14910_s27 = smov 64   ;;  %s71_s24 = int_to_ptr.vmem [resolvable:$true] %s70_s24 }
  0x10   :  { %s14911_s28 = smov 4   ;;  %s14912_s29 = smov [#allocation11]  }
  0x11   :  { %76 = dma.hbm_to_vmem [thread:$0]  %s69_s22, 8192, %s71_s24, [#allocation9], %s14910_s27, %s14910_s27, %s14911_s28  }
  0x12   :  { %s84_s30 = sshll.u32 %s14912_s29, 4  ;;  %s85_s30 = int_to_ptr.vmem [resolvable:$true] %s84_s30 }
  0x13   :  { %87 = dma.hbm_to_vmem [thread:$0]  %s83_s26, 16, %s85_s30, [#allocation12]  }
  0x14   :  { %14895 = dma.done.wait [#allocation4], 64  }
  0x15   :  { %14896 = vsyncadd [#allocation4], 4294967232 }
  0x16   :  { %14897 = dma.done.wait [#allocation6], 131088  }
  0x17   :  { %14898 = vsyncadd [#allocation6], 4294836208 }
  0x18   :  { %14899 = dma.done.wait [#allocation9], 8320  }
  0x19   :  { %14900 = vsyncadd [#allocation9], 4294958976 }
  0x1a   :  { %14901 = dma.done.wait [#allocation12], 16  }
  0x1b   :  { %14902 = vsyncadd [#allocation12], 4294967280  ;;  %vm126_vm0 = vcmask 1043456   ;;  %vm122_vm1 = vcmask 31744   ;;  %v117_v0 = vld [vmem:[#allocation3] sm:$0xf] }
  0x1c   :  { %v155_v1 = vld [vmem:[#allocation3] sm:$0xf]  ;;  %9232 = vmatpush.msk.msra.mxu0 %vm126_vm0, %v117_v0  ;;  %v9234_v5 = vld [vmem:[%s15315_s0 + $0x8] sm:$0xff]  ;;  %v9237_v6 = vld [vmem:[%s15315_s0 + $0x10] sm:$0xff] }
  0x1d   :  { %v191_v2 = vld [vmem:[#allocation3] sm:$0xf]  ;;  %9235 = vmatpush.msk.msra.mxu1 %vm126_vm0, %v155_v1  ;;  %v9240_v7 = vld [vmem:[%s15315_s0 + $0x18] sm:$0xff]  ;;  %v9246_v17 = vld [vmem:[%s15315_s0 + $0x28] sm:$0xff] }
  0x1e   :  { %v227_v3 = vld [vmem:[#allocation3] sm:$0xf]  ;;  %9238 = vmatpush.msk.msra.mxu2 %vm126_vm0, %v191_v2  ;;  %9236 = vmatmul.msk.f32.vlgmr.msra.gmra.mxu1 %vm122_vm1, %v9234_v5  ;;  %v9249_v18 = vld [vmem:[%s15315_s0 + $0x30] sm:$0xff]  ;;  %v9252_v19 = vld [vmem:[%s15315_s0 + $0x38] sm:$0xff] }
  0x1f   :  { %v116_v4 = vld [vmem:[%s15315_s0] sm:$0xff]  ;;  %9241 = vmatpush.msk.msra.mxu3 %vm126_vm0, %v227_v3  ;;  %9239 = vmatmul.msk.f32.vlgmr.msra.gmra.mxu2 %vm122_vm1, %v9237_v6  ;;  %v9258_v33 = vld [vmem:[%s15315_s0 + $0x48] sm:$0xff]  ;;  %v9261_v34 = vld [vmem:[%s15315_s0 + $0x50] sm:$0xff] }
  0x20   :  { %v263_v8 = vld [vmem:[#allocation3] sm:$0xf]  ;;  %9233 = vmatmul.msk.f32.vlgmr.msra.gmra.mxu0 %vm122_vm1, %v116_v4  ;;  %9242 = vmatmul.msk.f32.vlgmr.msra.gmra.mxu3 %vm122_vm1, %v9240_v7  ;;  %v9505_v24 = vld [vmem:[#allocation7 + $0x1c0] sm:$0xf]  ;;  %v9264_v35 = vld [vmem:[%s15315_s0 + $0x58] sm:$0xff] }
  0x21   :  { %v299_v9 = vld [vmem:[#allocation3] sm:$0xf]  ;;  %9244 = vmatpush.msk.msrb.mxu0 %vm126_vm0, %v263_v8  ;;  %v13691_v25 = vld [vmem:[#allocation7 + $0x1dc] sm:$0xf0]  ;;  %v9273_v62 = vld [vmem:[%s15315_s0 + $0x70] sm:$0xff] }
  0x22   :  { %v335_v10 = vld [vmem:[#allocation3] sm:$0xf]  ;;  %9247 = vmatpush.msk.msrb.mxu1 %vm126_vm0, %v299_v9  ;;  %v9761_v26 = vld [vmem:[#allocation7 + $0x3c0] sm:$0xf]  ;;  %v9506_v36 = vor.u32 %v13691_v25, %v9505_v24  ;;  %v9276_v63 = vld [vmem:[%s15315_s0 + $0x78] sm:$0xff] }
  0x23   :  { %v371_v11 = vld [vmem:[#allocation3] sm:$0xf]  ;;  %9250 = vmatpush.msk.msrb.mxu2 %vm126_vm0, %v335_v10  ;;  %v13755_v27 = vld [vmem:[#allocation7 + $0x3dc] sm:$0xf0] }
  0x24   :  { %v407_v12 = vld [vmem:[#allocation3] sm:$0xf]  ;;  %9253 = vmatpush.msk.msrb.mxu3 %vm126_vm0, %v371_v11  ;;  %v10017_v28 = vld [vmem:[#allocation7 + $0x5c0] sm:$0xf]  ;;  %v9762_v37 = vor.u32 %v13755_v27, %v9761_v26 }
  0x25   :  { %v443_v13 = vld [vmem:[#allocation3] sm:$0xf]  ;;  %9256 = vmatpush.msk.msra.mxu0 %vm126_vm0, %v407_v12  ;;  %v13819_v29 = vld [vmem:[#allocation7 + $0x5dc] sm:$0xf0] }
  0x26   :  { %v479_v14 = vld [vmem:[#allocation3] sm:$0xf]  ;;  %9259 = vmatpush.msk.msra.mxu1 %vm126_vm0, %v443_v13  ;;  %v10273_v30 = vld [vmem:[#allocation7 + $0x7c0] sm:$0xf]  ;;  %v10018_v42 = vor.u32 %v13819_v29, %v10017_v28 }
  0x27   :  { %v515_v15 = vld [vmem:[#allocation3] sm:$0xf]  ;;  %9262 = vmatpush.msk.msra.mxu2 %vm126_vm0, %v479_v14  ;;  %9248 = vmatmul.msk.f32.vlgmr.msrb.gmra.mxu1 %vm122_vm1, %v9246_v17  ;;  %v13883_v31 = vld [vmem:[#allocation7 + $0x7dc] sm:$0xf0] }
  0x28   :  { %v9243_v16 = vld [vmem:[%s15315_s0 + $0x20] sm:$0xff]  ;;  %9265 = vmatpush.msk.msra.mxu3 %vm126_vm0, %v515_v15  ;;  %9251 = vmatmul.msk.f32.vlgmr.msrb.gmra.mxu2 %vm122_vm1, %v9249_v18  ;;  %v10274_v43 = vor.u32 %v13883_v31, %v10273_v30  ;;  %v9270_v61 = vld [vmem:[%s15315_s0 + $0x68] sm:$0xff] }
  0x29   :  { %v551_v20 = vld [vmem:[#allocation3] sm:$0xf]  ;;  %9245 = vmatmul.msk.f32.vlgmr.msrb.gmra.mxu0 %vm122_vm1, %v9243_v16  ;;  %9254 = vmatmul.msk.f32.vlgmr.msrb.gmra.mxu3 %vm122_vm1, %v9252_v19  ;;  %v9473_v38 = vld [vmem:[#allocation7 + $0x180] sm:$0xf] }
  0x2a   :  { %v587_v21 = vld [vmem:[#allocation3] sm:$0xf]  ;;  %9268 = vmatpush.msk.msrb.mxu0 %vm126_vm0, %v551_v20  ;;  %v13683_v39 = vld [vmem:[#allocation7 + $0x19c] sm:$0xf0] }
  0x2b   :  { %v623_v22 = vld [vmem:[#allocation3] sm:$0xf]  ;;  %9271 = vmatpush.msk.msrb.mxu1 %vm126_vm0, %v587_v21  ;;  %v9729_v40 = vld [vmem:[#allocation7 + $0x380] sm:$0xf]  ;;  %v9474_v48 = vor.u32 %v13683_v39, %v9473_v38 }
  0x2c   :  { %v659_v23 = vld [vmem:[#allocation3] sm:$0xf]  ;;  %9274 = vmatpush.msk.msrb.mxu2 %vm126_vm0, %v623_v22  ;;  %v13747_v41 = vld [vmem:[#allocation7 + $0x39c] sm:$0xf0] }
  0x2d   :  { %9277 = vmatpush.msk.msrb.mxu3 %vm126_vm0, %v659_v23  ;;  %v9255_v32 = vld [vmem:[%s15315_s0 + $0x40] sm:$0xff]  ;;  %v9730_v49 = vor.u32 %v13747_v41, %v9729_v40 }
  0x2e   :  { %v9985_v44 = vld [vmem:[#allocation7 + $0x580] sm:$0xf] }
  0x2f   :  { %9260 = vmatmul.msk.f32.vlgmr.msra.gmra.mxu1 %vm122_vm1, %v9258_v33  ;;  %v13811_v45 = vld [vmem:[#allocation7 + $0x59c] sm:$0xf0] }
  0x30   :  { %v10241_v46 = vld [vmem:[#allocation7 + $0x780] sm:$0xf]  ;;  %9263 = vmatmul.msk.f32.vlgmr.msra.gmra.mxu2 %vm122_vm1, %v9261_v34  ;;  %6938 = vmatpush.bf16.msra.mxu1 %v9762_v37  ;;  %v9986_v54 = vor.u32 %v13811_v45, %v9985_v44 }
  0x31   :  { %9257 = vmatmul.msk.f32.vlgmr.msra.gmra.mxu0 %vm122_vm1, %v9255_v32  ;;  %v13875_v47 = vld [vmem:[#allocation7 + $0x79c] sm:$0xf0]  ;;  %9266 = vmatmul.msk.f32.vlgmr.msra.gmra.mxu3 %vm122_vm1, %v9264_v35 }
  0x32   :  { %6925 = vmatpush.bf16.msra.mxu0 %v9506_v36  ;;  %v9441_v50 = vld [vmem:[#allocation7 + $0x140] sm:$0xf]  ;;  %6951 = vmatpush.bf16.msra.mxu2 %v10018_v42  ;;  %v10242_v55 = vor.u32 %v13875_v47, %v10241_v46 }
  0x33   :  { %v13675_v51 = vld [vmem:[#allocation7 + $0x15c] sm:$0xf0]  ;;  %6964 = vmatpush.bf16.msra.mxu3 %v10274_v43 }
  0x34   :  { %v9697_v52 = vld [vmem:[#allocation7 + $0x340] sm:$0xf]  ;;  %6939 = vmatpush.bf16.msra.mxu1 %v9730_v49  ;;  %v9442_v0 = vor.u32 %v13675_v51, %v9441_v50 }
  0x35   :  { %v13739_v53 = vld [vmem:[#allocation7 + $0x35c] sm:$0xf0] }
  0x36   :  { %v9953_v56 = vld [vmem:[#allocation7 + $0x540] sm:$0xf]  ;;  %6926 = vmatpush.bf16.msra.mxu0 %v9474_v48  ;;  %v9698_v1 = vor.u32 %v13739_v53, %v9697_v52  ;;  %6952 = vmatpush.bf16.msra.mxu2 %v9986_v54 }
  0x37   :  { %v13803_v57 = vld [vmem:[#allocation7 + $0x55c] sm:$0xf0]  ;;  %6965 = vmatpush.bf16.msra.mxu3 %v10242_v55  ;;  %9272 = vmatmul.msk.f32.vlgmr.msrb.gmra.mxu1 %vm122_vm1, %v9270_v61 }
  0x38   :  { %v10209_v58 = vld [vmem:[#allocation7 + $0x740] sm:$0xf]  ;;  %v9954_v6 = vor.u32 %v13803_v57, %v9953_v56  ;;  %9275 = vmatmul.msk.f32.vlgmr.msrb.gmra.mxu2 %vm122_vm1, %v9273_v62  ;;  %6940 = vmatpush.bf16.msra.mxu1 %v9698_v1 }
  0x39   :  { %v13867_v59 = vld [vmem:[#allocation7 + $0x75c] sm:$0xf0]  ;;  %9278 = vmatmul.msk.f32.vlgmr.msrb.gmra.mxu3 %vm122_vm1, %v9276_v63 }
  0x3a   :  { %v9267_v60 = vld [vmem:[%s15315_s0 + $0x60] sm:$0xff]  ;;  %v10210_v7 = vor.u32 %v13867_v59, %v10209_v58  ;;  %6927 = vmatpush.bf16.msra.mxu0 %v9442_v0  ;;  %6953 = vmatpush.bf16.msra.mxu2 %v9954_v6 }
  0x3b   :  { %v9409_v2 = vld [vmem:[#allocation7 + $0x100] sm:$0xf]  ;;  %9269 = vmatmul.msk.f32.vlgmr.msrb.gmra.mxu0 %vm122_vm1, %v9267_v60 }
  0x3c   :  { %v13667_v3 = vld [vmem:[#allocation7 + $0x11c] sm:$0xf0]  ;;  %6966 = vmatpush.bf16.msra.mxu3 %v10210_v7 }
  0x3d   :  { %v9665_v4 = vld [vmem:[#allocation7 + $0x300] sm:$0xf]  ;;  %v9410_v12 = vor.u32 %v13667_v3, %v9409_v2 }
  0x3e   :  { %v13731_v5 = vld [vmem:[#allocation7 + $0x31c] sm:$0xf0] }
  0x3f   :  { %v9921_v8 = vld [vmem:[#allocation7 + $0x500] sm:$0xf]  ;;  %v9666_v13 = vor.u32 %v13731_v5, %v9665_v4  ;;  %6928 = vmatpush.bf16.msra.mxu0 %v9410_v12 }
  0x40   :  { %v13795_v9 = vld [vmem:[#allocation7 + $0x51c] sm:$0xf0] }
  0x41   :  { %v10177_v10 = vld [vmem:[#allocation7 + $0x700] sm:$0xf]  ;;  %v9922_v18 = vor.u32 %v13795_v9, %v9921_v8  ;;  %6941 = vmatpush.bf16.msra.mxu1 %v9666_v13 }
  0x42   :  { %v13859_v11 = vld [vmem:[#allocation7 + $0x71c] sm:$0xf0] }
  0x43   :  { %v9377_v14 = vld [vmem:[#allocation7 + $0xc0] sm:$0xf]  ;;  %v10178_v19 = vor.u32 %v13859_v11, %v10177_v10  ;;  %6954 = vmatpush.bf16.msra.mxu2 %v9922_v18 }
  0x44   :  { %v13659_v15 = vld [vmem:[#allocation7 + $0xdc] sm:$0xf0] }
  0x45   :  { %v9633_v16 = vld [vmem:[#allocation7 + $0x2c0] sm:$0xf]  ;;  %v9378_v24 = vor.u32 %v13659_v15, %v9377_v14  ;;  %6967 = vmatpush.bf16.msra.mxu3 %v10178_v19 }
  0x46   :  { %v13723_v17 = vld [vmem:[#allocation7 + $0x2dc] sm:$0xf0] }
  0x47   :  { %v9889_v20 = vld [vmem:[#allocation7 + $0x4c0] sm:$0xf]  ;;  %v9634_v25 = vor.u32 %v13723_v17, %v9633_v16  ;;  %6929 = vmatpush.bf16.msra.mxu0 %v9378_v24 }
  0x48   :  { %v13787_v21 = vld [vmem:[#allocation7 + $0x4dc] sm:$0xf0] }
  0x49   :  { %v10145_v22 = vld [vmem:[#allocation7 + $0x6c0] sm:$0xf]  ;;  %v9890_v30 = vor.u32 %v13787_v21, %v9889_v20  ;;  %6942 = vmatpush.bf16.msra.mxu1 %v9634_v25 }
  0x4a   :  { %v13851_v23 = vld [vmem:[#allocation7 + $0x6dc] sm:$0xf0] }
  0x4b   :  { %v9345_v26 = vld [vmem:[#allocation7 + $0x80] sm:$0xf]  ;;  %v10146_v31 = vor.u32 %v13851_v23, %v10145_v22  ;;  %6955 = vmatpush.bf16.msra.mxu2 %v9890_v30 }
  0x4c   :  { %v13651_v27 = vld [vmem:[#allocation7 + $0x9c] sm:$0xf0] }
  0x4d   :  { %v9601_v28 = vld [vmem:[#allocation7 + $0x280] sm:$0xf]  ;;  %v9346_v40 = vor.u32 %v13651_v27, %v9345_v26  ;;  %6968 = vmatpush.bf16.msra.mxu3 %v10146_v31 }
  0x4e   :  { %v13715_v29 = vld [vmem:[#allocation7 + $0x29c] sm:$0xf0] }
  0x4f   :  { %v9857_v32 = vld [vmem:[#allocation7 + $0x480] sm:$0xf]  ;;  %v9602_v41 = vor.u32 %v13715_v29, %v9601_v28  ;;  %6930 = vmatpush.bf16.msra.mxu0 %v9346_v40 }
  0x50   :  { %v13779_v33 = vld [vmem:[#allocation7 + $0x49c] sm:$0xf0] }
  0x51   :  { %v10113_v34 = vld [vmem:[#allocation7 + $0x680] sm:$0xf]  ;;  %v9858_v46 = vor.u32 %v13779_v33, %v9857_v32  ;;  %6943 = vmatpush.bf16.msra.mxu1 %v9602_v41 }
  0x52   :  { %v13843_v35 = vld [vmem:[#allocation7 + $0x69c] sm:$0xf0] }
  0x53   :  { %v9313_v36 = vld [vmem:[#allocation7 + $0x40] sm:$0xf]  ;;  %v10114_v47 = vor.u32 %v13843_v35, %v10113_v34  ;;  %6956 = vmatpush.bf16.msra.mxu2 %v9858_v46 }
  0x54   :  { %v13643_v37 = vld [vmem:[#allocation7 + $0x5c] sm:$0xf0] }
  0x55   :  { %v9569_v38 = vld [vmem:[#allocation7 + $0x240] sm:$0xf]  ;;  %v9314_v52 = vor.u32 %v13643_v37, %v9313_v36  ;;  %6969 = vmatpush.bf16.msra.mxu3 %v10114_v47 }
  0x56   :  { %v13707_v39 = vld [vmem:[#allocation7 + $0x25c] sm:$0xf0] }
  0x57   :  { %v9825_v42 = vld [vmem:[#allocation7 + $0x440] sm:$0xf]  ;;  %v9570_v53 = vor.u32 %v13707_v39, %v9569_v38  ;;  %6931 = vmatpush.bf16.msra.mxu0 %v9314_v52 }
  0x58   :  { %v13771_v43 = vld [vmem:[#allocation7 + $0x45c] sm:$0xf0] }
  0x59   :  { %v10081_v44 = vld [vmem:[#allocation7 + $0x640] sm:$0xf]  ;;  %v9826_v58 = vor.u32 %v13771_v43, %v9825_v42  ;;  %6944 = vmatpush.bf16.msra.mxu1 %v9570_v53 }
  0x5a   :  { %v13835_v45 = vld [vmem:[#allocation7 + $0x65c] sm:$0xf0] }
  0x5b   :  { %v9281_v48 = vld [vmem:[#allocation7] sm:$0xf]  ;;  %v10082_v59 = vor.u32 %v13835_v45, %v10081_v44  ;;  %6957 = vmatpush.bf16.msra.mxu2 %v9826_v58 }
  0x5c   :  { %v13635_v49 = vld [vmem:[#allocation7 + $0x1c] sm:$0xf0] }
  0x5d   :  { %v9537_v50 = vld [vmem:[#allocation7 + $0x200] sm:$0xf]  ;;  %v9282_v1 = vor.u32 %v13635_v49, %v9281_v48  ;;  %6970 = vmatpush.bf16.msra.mxu3 %v10082_v59 }
  0x5e   :  { %v13699_v51 = vld [vmem:[#allocation7 + $0x21c] sm:$0xf0] }
  0x5f   :  { %v10529_v54 = vld [vmem:[#allocation7 + $0x9c0] sm:$0xf]  ;;  %v9538_v2 = vor.u32 %v13699_v51, %v9537_v50  ;;  %6932 = vmatpush.bf16.msra.mxu0 %v9282_v1 }
  0x60   :  { %v13947_v55 = vld [vmem:[#allocation7 + $0x9dc] sm:$0xf0] }
  0x61   :  { %v10785_v56 = vld [vmem:[#allocation7 + $0xbc0] sm:$0xf]  ;;  %v10530_v6 = vor.u32 %v13947_v55, %v10529_v54  ;;  %6945 = vmatpush.bf16.msra.mxu1 %v9538_v2 }
  0x62   :  { %v14011_v57 = vld [vmem:[#allocation7 + $0xbdc] sm:$0xf0] }
  0x63   :  { %v9793_v60 = vld [vmem:[#allocation7 + $0x400] sm:$0xf]  ;;  %v10786_v7 = vor.u32 %v14011_v57, %v10785_v56  ;;  %6977 = vmatpush.bf16.msrb.mxu0 %v10530_v6 }
  0x64   :  { %v13763_v61 = vld [vmem:[#allocation7 + $0x41c] sm:$0xf0] }
  0x65   :  { %v10049_v62 = vld [vmem:[#allocation7 + $0x600] sm:$0xf]  ;;  %v9794_v12 = vor.u32 %v13763_v61, %v9793_v60  ;;  %6990 = vmatpush.bf16.msrb.mxu1 %v10786_v7 }
  0x66   :  { %v13827_v63 = vld [vmem:[#allocation7 + $0x61c] sm:$0xf0] }
  0x67   :  { %v11041_v0 = vld [vmem:[#allocation7 + $0xdc0] sm:$0xf]  ;;  %v10050_v13 = vor.u32 %v13827_v63, %v10049_v62  ;;  %6958 = vmatpush.bf16.msra.mxu2 %v9794_v12 }
  0x68   :  { %v14075_v3 = vld [vmem:[#allocation7 + $0xddc] sm:$0xf0] }
  0x69   :  { %v11297_v4 = vld [vmem:[#allocation7 + $0xfc0] sm:$0xf]  ;;  %v11042_v14 = vor.u32 %v14075_v3, %v11041_v0  ;;  %6971 = vmatpush.bf16.msra.mxu3 %v10050_v13 }
  0x6a   :  { %v14139_v5 = vld [vmem:[#allocation7 + $0xfdc] sm:$0xf0] }
  0x6b   :  { %v10497_v8 = vld [vmem:[#allocation7 + $0x980] sm:$0xf]  ;;  %v11298_v15 = vor.u32 %v14139_v5, %v11297_v4  ;;  %7003 = vmatpush.bf16.msrb.mxu2 %v11042_v14 }
  0x6c   :  { %v13939_v9 = vld [vmem:[#allocation7 + $0x99c] sm:$0xf0] }
  0x6d   :  { %v10753_v10 = vld [vmem:[#allocation7 + $0xb80] sm:$0xf]  ;;  %v10498_v16 = vor.u32 %v13939_v9, %v10497_v8  ;;  %7016 = vmatpush.bf16.msrb.mxu3 %v11298_v15 }
  0x6e   :  { %v14003_v11 = vld [vmem:[#allocation7 + $0xb9c] sm:$0xf0] }
  0x6f   :  { %v10754_v17 = vor.u32 %v14003_v11, %v10753_v10  ;;  %v10465_v18 = vld [vmem:[#allocation7 + $0x940] sm:$0xf]  ;;  %6978 = vmatpush.bf16.msrb.mxu0 %v10498_v16 }
  0x70   :  { %v13931_v19 = vld [vmem:[#allocation7 + $0x95c] sm:$0xf0] }
  0x71   :  { %v10721_v20 = vld [vmem:[#allocation7 + $0xb40] sm:$0xf]  ;;  %6991 = vmatpush.bf16.msrb.mxu1 %v10754_v17  ;;  %v10466_v22 = vor.u32 %v13931_v19, %v10465_v18 }
  0x72   :  { %v13995_v21 = vld [vmem:[#allocation7 + $0xb5c] sm:$0xf0] }
  0x73   :  { %v10722_v23 = vor.u32 %v13995_v21, %v10721_v20  ;;  %6979 = vmatpush.bf16.msrb.mxu0 %v10466_v22  ;;  %v11009_v24 = vld [vmem:[#allocation7 + $0xd80] sm:$0xf] }
  0x74   :  { %v14067_v25 = vld [vmem:[#allocation7 + $0xd9c] sm:$0xf0] }
  0x75   :  { %6992 = vmatpush.bf16.msrb.mxu1 %v10722_v23  ;;  %v11265_v26 = vld [vmem:[#allocation7 + $0xf80] sm:$0xf]  ;;  %v11010_v27 = vor.u32 %v14067_v25, %v11009_v24 }
  0x76   :  { %v14131_v28 = vld [vmem:[#allocation7 + $0xf9c] sm:$0xf0] }
  0x77   :  { %v11266_v29 = vor.u32 %v14131_v28, %v11265_v26  ;;  %v10433_v30 = vld [vmem:[#allocation7 + $0x900] sm:$0xf]  ;;  %7004 = vmatpush.bf16.msrb.mxu2 %v11010_v27 }
  0x78   :  { %v13923_v31 = vld [vmem:[#allocation7 + $0x91c] sm:$0xf0] }
  0x79   :  { %v10434_v32 = vor.u32 %v13923_v31, %v10433_v30  ;;  %v10689_v33 = vld [vmem:[#allocation7 + $0xb00] sm:$0xf]  ;;  %7017 = vmatpush.bf16.msrb.mxu3 %v11266_v29 }
  0x7a   :  { %v13987_v34 = vld [vmem:[#allocation7 + $0xb1c] sm:$0xf0] }
  0x7b   :  { %v10690_v35 = vor.u32 %v13987_v34, %v10689_v33  ;;  %v10977_v36 = vld [vmem:[#allocation7 + $0xd40] sm:$0xf]  ;;  %6980 = vmatpush.bf16.msrb.mxu0 %v10434_v32  ;;  %v14729_v32 = vld [vmem:[#allocation5] ss:$0 sm:$0xff] }
  0x7c   :  { %v14059_v37 = vld [vmem:[#allocation7 + $0xd5c] sm:$0xf0]  ;;  %v14730_v33 = vld [vmem:[#allocation5] ss:$0 sm:$0xff] }
  0x7d   :  { %v11233_v38 = vld [vmem:[#allocation7 + $0xf40] sm:$0xf]  ;;  %v10978_v39 = vor.u32 %v14059_v37, %v10977_v36  ;;  %6993 = vmatpush.bf16.msrb.mxu1 %v10690_v35 }
  0x7e   :  { %v14123_v40 = vld [vmem:[#allocation7 + $0xf5c] sm:$0xf0] }
  0x7f   :  { %v11234_v41 = vor.u32 %v14123_v40, %v11233_v38  ;;  %7005 = vmatpush.bf16.msrb.mxu2 %v10978_v39  ;;  %v10401_v42 = vld [vmem:[#allocation7 + $0x8c0] sm:$0xf]  ;;  %v14731_v40 = vld [vmem:[#allocation5] ss:$0 sm:$0xff] }
  0x80   :  { %v13915_v43 = vld [vmem:[#allocation7 + $0x8dc] sm:$0xf0] }
  0x81   :  { %v10657_v44 = vld [vmem:[#allocation7 + $0xac0] sm:$0xf]  ;;  %7018 = vmatpush.bf16.msrb.mxu3 %v11234_v41  ;;  %v10402_v45 = vor.u32 %v13915_v43, %v10401_v42  ;;  %v14732_v41 = vld [vmem:[#allocation5] ss:$0 sm:$0xff] }
  0x82   :  { %v13979_v46 = vld [vmem:[#allocation7 + $0xadc] sm:$0xf0] }
  0x83   :  { %v10658_v47 = vor.u32 %v13979_v46, %v10657_v44  ;;  %v10945_v48 = vld [vmem:[#allocation7 + $0xd00] sm:$0xf]  ;;  %6981 = vmatpush.bf16.msrb.mxu0 %v10402_v45  ;;  %v14733_v44 = vld [vmem:[#allocation5] ss:$0 sm:$0xff] }
  0x84   :  { %v14051_v49 = vld [vmem:[#allocation7 + $0xd1c] sm:$0xf0]  ;;  %v14734_v45 = vld [vmem:[#allocation5] ss:$0 sm:$0xff] }
  0x85   :  { %v11201_v50 = vld [vmem:[#allocation7 + $0xf00] sm:$0xf]  ;;  %v10946_v51 = vor.u32 %v14051_v49, %v10945_v48  ;;  %6994 = vmatpush.bf16.msrb.mxu1 %v10658_v47 }
  0x86   :  { %v14115_v52 = vld [vmem:[#allocation7 + $0xf1c] sm:$0xf0] }
  0x87   :  { %v11202_v53 = vor.u32 %v14115_v52, %v11201_v50  ;;  %v10369_v54 = vld [vmem:[#allocation7 + $0x880] sm:$0xf]  ;;  %7006 = vmatpush.bf16.msrb.mxu2 %v10946_v51 }
  0x88   :  { %v13907_v55 = vld [vmem:[#allocation7 + $0x89c] sm:$0xf0] }
  0x89   :  { %v10625_v56 = vld [vmem:[#allocation7 + $0xa80] sm:$0xf]  ;;  %v10370_v57 = vor.u32 %v13907_v55, %v10369_v54  ;;  %7019 = vmatpush.bf16.msrb.mxu3 %v11202_v53 }
  0x8a   :  { %v13971_v58 = vld [vmem:[#allocation7 + $0xa9c] sm:$0xf0] }
  0x8b   :  { %v10626_v59 = vor.u32 %v13971_v58, %v10625_v56  ;;  %v10913_v60 = vld [vmem:[#allocation7 + $0xcc0] sm:$0xf]  ;;  %6982 = vmatpush.bf16.msrb.mxu0 %v10370_v57 }
  0x8c   :  { %v14043_v61 = vld [vmem:[#allocation7 + $0xcdc] sm:$0xf0] }
  0x8d   :  { %v11169_v62 = vld [vmem:[#allocation7 + $0xec0] sm:$0xf]  ;;  %v10914_v63 = vor.u32 %v14043_v61, %v10913_v60  ;;  %6995 = vmatpush.bf16.msrb.mxu1 %v10626_v59  ;;  %v14735_v61 = vld [vmem:[#allocation5] ss:$0 sm:$0xff] }
  0x8e   :  { %v14107_v0 = vld [vmem:[#allocation7 + $0xedc] sm:$0xf0] }
  0x8f   :  { %v11170_v1 = vor.u32 %v14107_v0, %v11169_v62  ;;  %v10337_v2 = vld [vmem:[#allocation7 + $0x840] sm:$0xf]  ;;  %7007 = vmatpush.bf16.msrb.mxu2 %v10914_v63  ;;  %v14736_v62 = vld [vmem:[#allocation5] ss:$0 sm:$0xff] }
  0x90   :  { %v13899_v3 = vld [vmem:[#allocation7 + $0x85c] sm:$0xf0] }
  0x91   :  { %v10593_v4 = vld [vmem:[#allocation7 + $0xa40] sm:$0xf]  ;;  %v10338_v5 = vor.u32 %v13899_v3, %v10337_v2  ;;  %7020 = vmatpush.bf16.msrb.mxu3 %v11170_v1  ;;  %v14737_v2 = vld [vmem:[#allocation5] ss:$0 sm:$0xff] }
  0x92   :  { %v13963_v6 = vld [vmem:[#allocation7 + $0xa5c] sm:$0xf0]  ;;  %v14738_v3 = vld [vmem:[#allocation5] ss:$0 sm:$0xff] }
  0x93   :  { %v10594_v7 = vor.u32 %v13963_v6, %v10593_v4  ;;  %v10881_v8 = vld [vmem:[#allocation7 + $0xc80] sm:$0xf]  ;;  %6983 = vmatpush.bf16.msrb.mxu0 %v10338_v5 }
  0x94   :  { %v14035_v9 = vld [vmem:[#allocation7 + $0xc9c] sm:$0xf0] }
  0x95   :  { %v10882_v10 = vor.u32 %v14035_v9, %v10881_v8  ;;  %v11137_v11 = vld [vmem:[#allocation7 + $0xe80] sm:$0xf]  ;;  %6996 = vmatpush.bf16.msrb.mxu1 %v10594_v7 }
  0x96   :  { %v14099_v12 = vld [vmem:[#allocation7 + $0xe9c] sm:$0xf0] }
  0x97   :  { %v11138_v13 = vor.u32 %v14099_v12, %v11137_v11  ;;  %v10305_v14 = vld [vmem:[#allocation7 + $0x800] sm:$0xf]  ;;  %7008 = vmatpush.bf16.msrb.mxu2 %v10882_v10 }
  0x98   :  { %v13891_v15 = vld [vmem:[#allocation7 + $0x81c] sm:$0xf0] }
  0x99   :  { %v10561_v16 = vld [vmem:[#allocation7 + $0xa00] sm:$0xf]  ;;  %v10306_v17 = vor.u32 %v13891_v15, %v10305_v14  ;;  %7021 = vmatpush.bf16.msrb.mxu3 %v11138_v13 }
  0x9a   :  { %v13955_v18 = vld [vmem:[#allocation7 + $0xa1c] sm:$0xf0] }
  0x9b   :  { %v10562_v19 = vor.u32 %v13955_v18, %v10561_v16  ;;  %v10849_v20 = vld [vmem:[#allocation7 + $0xc40] sm:$0xf]  ;;  %6984 = vmatpush.bf16.msrb.mxu0 %v10306_v17  ;;  %v183_v35 = vpop.f32.mrf.mxu1 }
  0x9c   :  { %v14027_v21 = vld [vmem:[#allocation7 + $0xc5c] sm:$0xf0]  ;;  %v184_v37 = vadd.f32 %v14730_v33, %v183_v35 }
  0x9d   :  { %v11105_v22 = vld [vmem:[#allocation7 + $0xe40] sm:$0xf]  ;;  %6997 = vmatpush.bf16.msrb.mxu1 %v10562_v19  ;;  %v10850_v24 = vor.u32 %v14027_v21, %v10849_v20  ;;  %v147_v34 = vpop.f32.mrf.mxu0 }
  0x9e   :  { %v14091_v23 = vld [vmem:[#allocation7 + $0xe5c] sm:$0xf0]  ;;  %v148_v36 = vadd.f32 %v14729_v32, %v147_v34  ;;  %v186_v39 = vmax.f32 %v184_v37, 0.0  ;;  %v14739_v37 = vld [vmem:[#allocation5] ss:$0 sm:$0xff] }
  0x9f   :  { %v11106_v25 = vor.u32 %v14091_v23, %v11105_v22  ;;  %7009 = vmatpush.bf16.msrb.mxu2 %v10850_v24  ;;  %v10817_v26 = vld [vmem:[#allocation7 + $0xc00] sm:$0xf] }
  0xa0   :  { %v14019_v27 = vld [vmem:[#allocation7 + $0xc1c] sm:$0xf0]  ;;  %v150_v38 = vmax.f32 %v148_v36, 0.0  ;;  %v187_v43 = vpack.c.bf16 %v186_v39, %v186_v39 }
  0xa1   :  { %7022 = vmatpush.bf16.msrb.mxu3 %v11106_v25  ;;  %v11073_v28 = vld [vmem:[#allocation7 + $0xe00] sm:$0xf]  ;;  %v10818_v30 = vor.u32 %v14019_v27, %v10817_v26 }
  0xa2   :  { %v14083_v29 = vld [vmem:[#allocation7 + $0xe1c] sm:$0xf0]  ;;  %v151_v42 = vpack.c.bf16 %v150_v38, %v150_v38  ;;  %v219_v46 = vpop.f32.mrf.mxu2  ;;  %188 = vst [vmem:[#allocation2 + $0x4] sm:$0xf] %v187_v43  ;;  %v14740_v38 = vld [vmem:[#allocation5] ss:$0 sm:$0xff] }
  0xa3   :  { %v11074_v31 = vor.u32 %v14083_v29, %v11073_v28  ;;  %7010 = vmatpush.bf16.msrb.mxu2 %v10818_v30  ;;  %v255_v47 = vpop.f32.mrf.mxu3  ;;  %v220_v48 = vadd.f32 %v14731_v40, %v219_v46  ;;  %v11553_v60 = vld [vmem:[#allocation7 + $0x11c0] sm:$0xf] }
  0xa4   :  { %152 = vst [vmem:[#allocation2] sm:$0xf] %v151_v42  ;;  %v256_v49 = vadd.f32 %v14732_v41, %v255_v47  ;;  %v327_v51 = vpop.f32.mrf.mxu1  ;;  %v14203_v1 = vld [vmem:[#allocation7 + $0x11dc] sm:$0xf0] }
  0xa5   :  { %7023 = vmatpush.bf16.msrb.mxu3 %v11074_v31  ;;  %v328_v53 = vadd.f32 %v14734_v45, %v327_v51  ;;  %v222_v54 = vmax.f32 %v220_v48, 0.0  ;;  %v11809_v4 = vld [vmem:[#allocation7 + $0x13c0] sm:$0xf]  ;;  %v11554_v17 = vor.u32 %v14203_v1, %v11553_v60 }
  0xa6   :  { %v291_v50 = vpop.f32.mrf.mxu0  ;;  %v258_v55 = vmax.f32 %v256_v49, 0.0  ;;  %v14267_v5 = vld [vmem:[#allocation7 + $0x13dc] sm:$0xf0] }
  0xa7   :  { %v292_v52 = vadd.f32 %v14733_v44, %v291_v50  ;;  %v330_v57 = vmax.f32 %v328_v53, 0.0  ;;  %v223_v58 = vpack.c.bf16 %v222_v54, %v222_v54  ;;  %v11521_v13 = vld [vmem:[#allocation7 + $0x1180] sm:$0xf]  ;;  %v11810_v18 = vor.u32 %v14267_v5, %v11809_v4 }
  0xa8   :  { %v259_v59 = vpack.c.bf16 %v258_v55, %v258_v55  ;;  %v14195_v14 = vld [vmem:[#allocation7 + $0x119c] sm:$0xf0] }
  0xa9   :  { %v294_v56 = vmax.f32 %v292_v52, 0.0  ;;  %v331_v0 = vpack.c.bf16 %v330_v57, %v330_v57  ;;  %224 = vst [vmem:[#allocation2 + $0x8] sm:$0xf] %v223_v58  ;;  %v11777_v19 = vld [vmem:[#allocation7 + $0x1380] sm:$0xf]  ;;  %v11522_v35 = vor.u32 %v14195_v14, %v11521_v13 }
  0xaa   :  { %260 = vst [vmem:[#allocation2 + $0xc] sm:$0xf] %v259_v59  ;;  %v14259_v20 = vld [vmem:[#allocation7 + $0x139c] sm:$0xf0] }
  0xab   :  { %v295_v63 = vpack.c.bf16 %v294_v56, %v294_v56  ;;  %v699_v6 = vld [vmem:[#allocation2] sm:$0xff]  ;;  %v363_v7 = vpop.f32.mrf.mxu2  ;;  %332 = vst [vmem:[#allocation2 + $0x14] sm:$0xf] %v331_v0  ;;  %v11778_v39 = vor.u32 %v14259_v20, %v11777_v19 }
  0xac   :  { %v399_v8 = vpop.f32.mrf.mxu3  ;;  %v1757_v9 = vunpack.c.l.b16 %v699_v6  ;;  %v1758_v10 = vunpack.c.h.b16 %v699_v6  ;;  %v364_v11 = vadd.f32 %v14735_v61, %v363_v7  ;;  %v471_v16 = vpop.f32.mrf.mxu1  ;;  %v12065_v27 = vld [vmem:[#allocation7 + $0x15c0] sm:$0xf] }
  0xad   :  { %296 = vst [vmem:[#allocation2 + $0x10] sm:$0xf] %v295_v63  ;;  %v400_v12 = vadd.f32 %v14736_v62, %v399_v8  ;;  %v472_v22 = vadd.f32 %v14738_v3, %v471_v16  ;;  %v14331_v28 = vld [vmem:[#allocation7 + $0x15dc] sm:$0xf0] }
  0xae   :  { %v435_v15 = vpop.f32.mrf.mxu0  ;;  %v15051_v23 = vpack.c.b16 %v1757_v9, %v1757_v9  ;;  %v15053_v24 = vpack.c.b16 %v1758_v10, %v1758_v10  ;;  %v366_v25 = vmax.f32 %v364_v11, 0.0  ;;  %v12321_v29 = vld [vmem:[#allocation7 + $0x17c0] sm:$0xf]  ;;  %v12066_v49 = vor.u32 %v14331_v28, %v12065_v27 }
  0xaf   :  { %v436_v21 = vadd.f32 %v14737_v2, %v435_v15  ;;  %v402_v26 = vmax.f32 %v400_v12, 0.0  ;;  %v14395_v30 = vld [vmem:[#allocation7 + $0x17dc] sm:$0xf0]  ;;  %v474_v32 = vmax.f32 %v472_v22, 0.0  ;;  %v14741_v22 = vld [vmem:[#allocation5] ss:$0 sm:$0xff] }
  0xb0   :  { %6933 = vmatmul.bf16.vlgmr.msra.gmra.mxu0 %v15051_v23  ;;  %6946 = vmatmul.bf16.vlgmr.msra.gmra.mxu1 %v15053_v24  ;;  %v367_v33 = vpack.c.bf16 %v366_v25, %v366_v25  ;;  %v11489_v36 = vld [vmem:[#allocation7 + $0x1140] sm:$0xf]  ;;  %v12322_v54 = vor.u32 %v14395_v30, %v12321_v29 }
  0xb1   :  { %v438_v31 = vmax.f32 %v436_v21, 0.0  ;;  %v403_v34 = vpack.c.bf16 %v402_v26, %v402_v26  ;;  %7029 = vmatpush.bf16.msra.mxu0 %v11554_v17  ;;  %7042 = vmatpush.bf16.msra.mxu1 %v11810_v18  ;;  %v14187_v40 = vld [vmem:[#allocation7 + $0x115c] sm:$0xf0]  ;;  %v475_v44 = vpack.c.bf16 %v474_v32, %v474_v32  ;;  %v14742_v26 = vld [vmem:[#allocation5] ss:$0 sm:$0xff] }
  0xb2   :  { %v11745_v41 = vld [vmem:[#allocation7 + $0x1340] sm:$0xf]  ;;  %368 = vst [vmem:[#allocation2 + $0x18] sm:$0xf] %v367_v33  ;;  %v11490_v55 = vor.u32 %v14187_v40, %v11489_v36 }
  0xb3   :  { %v14251_v42 = vld [vmem:[#allocation7 + $0x135c] sm:$0xf0]  ;;  %v439_v43 = vpack.c.bf16 %v438_v31, %v438_v31  ;;  %404 = vst [vmem:[#allocation2 + $0x1c] sm:$0xf] %v403_v34  ;;  %v507_v52 = vpop.f32.mrf.mxu2 }
  0xb4   :  { %v700_v45 = vld [vmem:[#allocation2 + $0x8] sm:$0xff]  ;;  %v543_v53 = vpop.f32.mrf.mxu3  ;;  %v508_v58 = vadd.f32 %v14739_v37, %v507_v52  ;;  %v11746_v62 = vor.u32 %v14251_v42, %v11745_v41  ;;  %476 = vst [vmem:[#allocation2 + $0x24] sm:$0xf] %v475_v44  ;;  %v701_v2 = vld [vmem:[#allocation2 + $0x10] sm:$0xff]  ;;  %v615_v27 = vpop.f32.mrf.mxu1 }
  0xb5   :  { %v12033_v46 = vld [vmem:[#allocation7 + $0x1580] sm:$0xf]  ;;  %v1759_v47 = vunpack.c.l.b16 %v700_v45  ;;  %v1760_v48 = vunpack.c.h.b16 %v700_v45  ;;  %440 = vst [vmem:[#allocation2 + $0x20] sm:$0xf] %v439_v43  ;;  %v544_v59 = vadd.f32 %v14740_v38, %v543_v53  ;;  %7030 = vmatpush.bf16.msra.mxu0 %v11522_v35  ;;  %7043 = vmatpush.bf16.msra.mxu1 %v11778_v39  ;;  %v1761_v15 = vunpack.c.l.b16 %v701_v2 }
  0xb6   :  { %v14323_v50 = vld [vmem:[#allocation7 + $0x159c] sm:$0xf0]  ;;  %v510_v3 = vmax.f32 %v508_v58, 0.0  ;;  %v1762_v21 = vunpack.c.h.b16 %v701_v2  ;;  %v616_v44 = vadd.f32 %v14742_v26, %v615_v27 }
  0xb7   :  { %v12289_v51 = vld [vmem:[#allocation7 + $0x1780] sm:$0xf]  ;;  %v15057_v60 = vpack.c.b16 %v1759_v47, %v1759_v47  ;;  %v15059_v61 = vpack.c.b16 %v1760_v48, %v1760_v48  ;;  %v546_v4 = vmax.f32 %v544_v59, 0.0  ;;  %v12034_v5 = vor.u32 %v14323_v50, %v12033_v46 }
  0xb8   :  { %v14387_v56 = vld [vmem:[#allocation7 + $0x179c] sm:$0xf0]  ;;  %v511_v11 = vpack.c.bf16 %v510_v3, %v510_v3  ;;  %v579_v19 = vpop.f32.mrf.mxu0  ;;  %v15063_v34 = vpack.c.b16 %v1761_v15, %v1761_v15  ;;  %v15065_v40 = vpack.c.b16 %v1762_v21, %v1762_v21 }
  0xb9   :  { %v11457_v57 = vld [vmem:[#allocation7 + $0x1100] sm:$0xf]  ;;  %6959 = vmatmul.bf16.vlgmr.msra.gmra.mxu2 %v15057_v60  ;;  %6972 = vmatmul.bf16.vlgmr.msra.gmra.mxu3 %v15059_v61  ;;  %v12290_v7 = vor.u32 %v14387_v56, %v12289_v51  ;;  %v547_v12 = vpack.c.bf16 %v546_v4, %v546_v4  ;;  %v580_v33 = vadd.f32 %v14741_v22, %v579_v19  ;;  %v14743_v56 = vld [vmem:[#allocation5] ss:$0 sm:$0xff] }
  0xba   :  { %v14179_v63 = vld [vmem:[#allocation7 + $0x111c] sm:$0xf0]  ;;  %7055 = vmatpush.bf16.msra.mxu2 %v12066_v49  ;;  %7068 = vmatpush.bf16.msra.mxu3 %v12322_v54  ;;  %512 = vst [vmem:[#allocation2 + $0x28] sm:$0xf] %v511_v11  ;;  %v702_v32 = vld [vmem:[#allocation2 + $0x18] sm:$0xff] }
  0xbb   :  { %v11713_v0 = vld [vmem:[#allocation7 + $0x1300] sm:$0xf]  ;;  %7031 = vmatpush.bf16.msra.mxu0 %v11490_v55  ;;  %7044 = vmatpush.bf16.msra.mxu1 %v11746_v62  ;;  %v11458_v13 = vor.u32 %v14179_v63, %v11457_v57  ;;  %548 = vst [vmem:[#allocation2 + $0x2c] sm:$0xf] %v547_v12  ;;  %v582_v43 = vmax.f32 %v580_v33, 0.0  ;;  %v1763_v45 = vunpack.c.l.b16 %v702_v32  ;;  %v1764_v49 = vunpack.c.h.b16 %v702_v32  ;;  %v651_v50 = vpop.f32.mrf.mxu2 }
  0xbc   :  { %v14243_v1 = vld [vmem:[#allocation7 + $0x131c] sm:$0xf0]  ;;  %v618_v55 = vmax.f32 %v616_v44, 0.0  ;;  %v687_v57 = vpop.f32.mrf.mxu3  ;;  %v14744_v63 = vld [vmem:[#allocation5] ss:$0 sm:$0xff]  ;;  %v652_v4 = vadd.f32 %v14743_v56, %v651_v50 }
  0xbd   :  { %v12001_v6 = vld [vmem:[#allocation7 + $0x1540] sm:$0xf]  ;;  %v11714_v14 = vor.u32 %v14243_v1, %v11713_v0  ;;  %v583_v54 = vpack.c.bf16 %v582_v43, %v582_v43 }
  0xbe   :  { %v14315_v8 = vld [vmem:[#allocation7 + $0x155c] sm:$0xf0]  ;;  %7056 = vmatpush.bf16.msra.mxu2 %v12034_v5  ;;  %7069 = vmatpush.bf16.msra.mxu3 %v12290_v7  ;;  %v619_v3 = vpack.c.bf16 %v618_v55, %v618_v55  ;;  %v15069_v5 = vpack.c.b16 %v1763_v45, %v1763_v45 }
  0xbf   :  { %v12257_v9 = vld [vmem:[#allocation7 + $0x1740] sm:$0xf]  ;;  %v12002_v28 = vor.u32 %v14315_v8, %v12001_v6  ;;  %7032 = vmatpush.bf16.msra.mxu0 %v11458_v13  ;;  %7045 = vmatpush.bf16.msra.mxu1 %v11714_v14  ;;  %584 = vst [vmem:[#allocation2 + $0x30] sm:$0xf] %v583_v54  ;;  %v15071_v6 = vpack.c.b16 %v1764_v49, %v1764_v49  ;;  %v654_v14 = vmax.f32 %v652_v4, 0.0 }
  0xc0   :  { %v14379_v10 = vld [vmem:[#allocation7 + $0x175c] sm:$0xf0]  ;;  %6985 = vmatmul.bf16.vlgmr.msrb.gmra.mxu0 %v15063_v34  ;;  %6998 = vmatmul.bf16.vlgmr.msrb.gmra.mxu1 %v15065_v40  ;;  %620 = vst [vmem:[#allocation2 + $0x34] sm:$0xf] %v619_v3 }
  0xc1   :  { %v11425_v16 = vld [vmem:[#allocation7 + $0x10c0] sm:$0xf]  ;;  %v12258_v29 = vor.u32 %v14379_v10, %v12257_v9  ;;  %v688_v10 = vadd.f32 %v14744_v63, %v687_v57  ;;  %v655_v26 = vpack.c.bf16 %v654_v14, %v654_v14 }
  0xc2   :  { %v14171_v17 = vld [vmem:[#allocation7 + $0x10dc] sm:$0xf0]  ;;  %7057 = vmatpush.bf16.msra.mxu2 %v12002_v28 }
  0xc3   :  { %v11681_v18 = vld [vmem:[#allocation7 + $0x12c0] sm:$0xf]  ;;  %v11426_v39 = vor.u32 %v14171_v17, %v11425_v16  ;;  %7070 = vmatpush.bf16.msra.mxu3 %v12258_v29  ;;  %v690_v19 = vmax.f32 %v688_v10, 0.0  ;;  %656 = vst [vmem:[#allocation2 + $0x38] sm:$0xf] %v655_v26 }
  0xc4   :  { %v14235_v20 = vld [vmem:[#allocation7 + $0x12dc] sm:$0xf0] }
  0xc5   :  { %v11969_v25 = vld [vmem:[#allocation7 + $0x1500] sm:$0xf]  ;;  %v11682_v35 = vor.u32 %v14235_v20, %v11681_v18  ;;  %7033 = vmatpush.bf16.msra.mxu0 %v11426_v39 }
  0xc6   :  { %v14307_v30 = vld [vmem:[#allocation7 + $0x151c] sm:$0xf0] }
  0xc7   :  { %v12225_v31 = vld [vmem:[#allocation7 + $0x1700] sm:$0xf]  ;;  %v11970_v51 = vor.u32 %v14307_v30, %v11969_v25  ;;  %7046 = vmatpush.bf16.msra.mxu1 %v11682_v35  ;;  %v691_v30 = vpack.c.bf16 %v690_v19, %v690_v19 }
  0xc8   :  { %v14371_v36 = vld [vmem:[#allocation7 + $0x171c] sm:$0xf0] }
  0xc9   :  { %v11393_v37 = vld [vmem:[#allocation7 + $0x1080] sm:$0xf]  ;;  %v12226_v52 = vor.u32 %v14371_v36, %v12225_v31  ;;  %7058 = vmatpush.bf16.msra.mxu2 %v11970_v51  ;;  %7024 = vmatmul.bf16.vlgmr.msrb.gmra.mxu3 %v15071_v6  ;;  %692 = vst [vmem:[#allocation2 + $0x3c] sm:$0xf] %v691_v30 }
  0xca   :  { %v14163_v38 = vld [vmem:[#allocation7 + $0x109c] sm:$0xf0]  ;;  %7011 = vmatmul.bf16.vlgmr.msrb.gmra.mxu2 %v15069_v5 }
  0xcb   :  { %v11649_v41 = vld [vmem:[#allocation7 + $0x1280] sm:$0xf]  ;;  %v11394_v0 = vor.u32 %v14163_v38, %v11393_v37  ;;  %7071 = vmatpush.bf16.msra.mxu3 %v12226_v52 }
  0xcc   :  { %v14227_v42 = vld [vmem:[#allocation7 + $0x129c] sm:$0xf0] }
  0xcd   :  { %v11937_v46 = vld [vmem:[#allocation7 + $0x14c0] sm:$0xf]  ;;  %v11650_v58 = vor.u32 %v14227_v42, %v11649_v41  ;;  %7034 = vmatpush.bf16.msra.mxu0 %v11394_v0 }
  0xce   :  { %v14299_v47 = vld [vmem:[#allocation7 + $0x14dc] sm:$0xf0] }
  0xcf   :  { %v12193_v48 = vld [vmem:[#allocation7 + $0x16c0] sm:$0xf]  ;;  %v11938_v11 = vor.u32 %v14299_v47, %v11937_v46  ;;  %7047 = vmatpush.bf16.msra.mxu1 %v11650_v58 }
  0xd0   :  { %v14363_v53 = vld [vmem:[#allocation7 + $0x16dc] sm:$0xf0] }
  0xd1   :  { %v11361_v59 = vld [vmem:[#allocation7 + $0x1040] sm:$0xf]  ;;  %v12194_v12 = vor.u32 %v14363_v53, %v12193_v48  ;;  %7059 = vmatpush.bf16.msra.mxu2 %v11938_v11 }
  0xd2   :  { %v14155_v62 = vld [vmem:[#allocation7 + $0x105c] sm:$0xf0] }
  0xd3   :  { %v11617_v1 = vld [vmem:[#allocation7 + $0x1240] sm:$0xf]  ;;  %v11362_v20 = vor.u32 %v14155_v62, %v11361_v59  ;;  %7072 = vmatpush.bf16.msra.mxu3 %v12194_v12 }
  0xd4   :  { %v14219_v2 = vld [vmem:[#allocation7 + $0x125c] sm:$0xf0] }
  0xd5   :  { %v11905_v7 = vld [vmem:[#allocation7 + $0x1480] sm:$0xf]  ;;  %v11618_v15 = vor.u32 %v14219_v2, %v11617_v1  ;;  %7035 = vmatpush.bf16.msra.mxu0 %v11362_v20 }
  0xd6   :  { %v14291_v8 = vld [vmem:[#allocation7 + $0x149c] sm:$0xf0] }
  0xd7   :  { %v12161_v9 = vld [vmem:[#allocation7 + $0x1680] sm:$0xf]  ;;  %v11906_v31 = vor.u32 %v14291_v8, %v11905_v7  ;;  %7048 = vmatpush.bf16.msra.mxu1 %v11618_v15 }
  0xd8   :  { %v14355_v13 = vld [vmem:[#allocation7 + $0x169c] sm:$0xf0] }
  0xd9   :  { %v11329_v16 = vld [vmem:[#allocation7 + $0x1000] sm:$0xf]  ;;  %v12162_v32 = vor.u32 %v14355_v13, %v12161_v9  ;;  %7060 = vmatpush.bf16.msra.mxu2 %v11906_v31 }
  0xda   :  { %v14147_v17 = vld [vmem:[#allocation7 + $0x101c] sm:$0xf0] }
  0xdb   :  { %v11585_v18 = vld [vmem:[#allocation7 + $0x1200] sm:$0xf]  ;;  %v11330_v41 = vor.u32 %v14147_v17, %v11329_v16  ;;  %7073 = vmatpush.bf16.msra.mxu3 %v12162_v32 }
  0xdc   :  { %v14211_v21 = vld [vmem:[#allocation7 + $0x121c] sm:$0xf0] }
  0xdd   :  { %v12577_v22 = vld [vmem:[#allocation7 + $0x19c0] sm:$0xf]  ;;  %v11586_v36 = vor.u32 %v14211_v21, %v11585_v18  ;;  %7036 = vmatpush.bf16.msra.mxu0 %v11330_v41 }
  0xde   :  { %v703_v25 = vld [vmem:[#allocation2 + $0x20] sm:$0xff]  ;;  %v704_v53 = vld [vmem:[#allocation2 + $0x28] sm:$0xff] }
  0xdf   :  { %v14459_v27 = vld [vmem:[#allocation7 + $0x19dc] sm:$0xf0]  ;;  %v1765_v39 = vunpack.c.l.b16 %v703_v25  ;;  %v1766_v48 = vunpack.c.h.b16 %v703_v25  ;;  %7049 = vmatpush.bf16.msra.mxu1 %v11586_v36  ;;  %v1767_v4 = vunpack.c.l.b16 %v704_v53  ;;  %v1768_v11 = vunpack.c.h.b16 %v704_v53 }
  0xe0   :  { %v12833_v28 = vld [vmem:[#allocation7 + $0x1bc0] sm:$0xf]  ;;  %v12578_v44 = vor.u32 %v14459_v27, %v12577_v22 }
  0xe1   :  { %v14523_v29 = vld [vmem:[#allocation7 + $0x1bdc] sm:$0xf0]  ;;  %v15075_v54 = vpack.c.b16 %v1765_v39, %v1765_v39  ;;  %v15077_v1 = vpack.c.b16 %v1766_v48, %v1766_v48  ;;  %v15081_v20 = vpack.c.b16 %v1767_v4, %v1767_v4  ;;  %v15083_v25 = vpack.c.b16 %v1768_v11, %v1768_v11 }
  0xe2   :  { %v11873_v33 = vld [vmem:[#allocation7 + $0x1440] sm:$0xf]  ;;  %v12834_v42 = vor.u32 %v14523_v29, %v12833_v28  ;;  %7081 = vmatpush.bf16.msrb.mxu0 %v12578_v44 }
  0xe3   :  { %v14283_v35 = vld [vmem:[#allocation7 + $0x145c] sm:$0xf0]  ;;  %7037 = vmatmul.bf16.vlgmr.msra.gmra.mxu0 %v15075_v54  ;;  %7050 = vmatmul.bf16.vlgmr.msra.gmra.mxu1 %v15077_v1 }
  0xe4   :  { %v12129_v37 = vld [vmem:[#allocation7 + $0x1640] sm:$0xf]  ;;  %v11874_v49 = vor.u32 %v14283_v35, %v11873_v33  ;;  %7094 = vmatpush.bf16.msrb.mxu1 %v12834_v42 }
  0xe5   :  { %v14347_v38 = vld [vmem:[#allocation7 + $0x165c] sm:$0xf0] }
  0xe6   :  { %v12545_v43 = vld [vmem:[#allocation7 + $0x1980] sm:$0xf]  ;;  %v12130_v50 = vor.u32 %v14347_v38, %v12129_v37  ;;  %7061 = vmatpush.bf16.msra.mxu2 %v11874_v49 }
  0xe7   :  { %v14451_v45 = vld [vmem:[#allocation7 + $0x199c] sm:$0xf0] }
  0xe8   :  { %v12801_v46 = vld [vmem:[#allocation7 + $0x1b80] sm:$0xf]  ;;  %v12546_v0 = vor.u32 %v14451_v45, %v12545_v43  ;;  %7074 = vmatpush.bf16.msra.mxu3 %v12130_v50 }
  0xe9   :  { %v14515_v47 = vld [vmem:[#allocation7 + $0x1b9c] sm:$0xf0] }
  0xea   :  { %v11841_v51 = vld [vmem:[#allocation7 + $0x1400] sm:$0xf]  ;;  %v12802_v58 = vor.u32 %v14515_v47, %v12801_v46  ;;  %7082 = vmatpush.bf16.msrb.mxu0 %v12546_v0 }
  0xeb   :  { %v14275_v52 = vld [vmem:[#allocation7 + $0x141c] sm:$0xf0] }
  0xec   :  { %v12097_v55 = vld [vmem:[#allocation7 + $0x1600] sm:$0xf]  ;;  %v11842_v7 = vor.u32 %v14275_v52, %v11841_v51  ;;  %7095 = vmatpush.bf16.msrb.mxu1 %v12802_v58 }
  0xed   :  { %v14339_v56 = vld [vmem:[#allocation7 + $0x161c] sm:$0xf0] }
  0xee   :  { %v13089_v57 = vld [vmem:[#allocation7 + $0x1dc0] sm:$0xf]  ;;  %v12098_v8 = vor.u32 %v14339_v56, %v12097_v55  ;;  %7062 = vmatpush.bf16.msra.mxu2 %v11842_v7 }
  0xef   :  { %v14587_v59 = vld [vmem:[#allocation7 + $0x1ddc] sm:$0xf0] }
  0xf0   :  { %v13345_v62 = vld [vmem:[#allocation7 + $0x1fc0] sm:$0xf]  ;;  %v13090_v12 = vor.u32 %v14587_v59, %v13089_v57  ;;  %7075 = vmatpush.bf16.msra.mxu3 %v12098_v8 }
  0xf1   :  { %v14651_v63 = vld [vmem:[#allocation7 + $0x1fdc] sm:$0xf0]  ;;  %7063 = vmatmul.bf16.vlgmr.msra.gmra.mxu2 %v15081_v20 }
  0xf2   :  { %v12769_v2 = vld [vmem:[#allocation7 + $0x1b40] sm:$0xf]  ;;  %v13346_v13 = vor.u32 %v14651_v63, %v13345_v62  ;;  %7107 = vmatpush.bf16.msrb.mxu2 %v13090_v12 }
  0xf3   :  { %v14507_v3 = vld [vmem:[#allocation7 + $0x1b5c] sm:$0xf0]  ;;  %7076 = vmatmul.bf16.vlgmr.msra.gmra.mxu3 %v15083_v25 }
  0xf4   :  { %v12513_v9 = vld [vmem:[#allocation7 + $0x1940] sm:$0xf]  ;;  %v12770_v15 = vor.u32 %v14507_v3, %v12769_v2  ;;  %7120 = vmatpush.bf16.msrb.mxu3 %v13346_v13 }
  0xf5   :  { %v14443_v10 = vld [vmem:[#allocation7 + $0x195c] sm:$0xf0] }
  0xf6   :  { %v13057_v14 = vld [vmem:[#allocation7 + $0x1d80] sm:$0xf]  ;;  %v12514_v19 = vor.u32 %v14443_v10, %v12513_v9  ;;  %7096 = vmatpush.bf16.msrb.mxu1 %v12770_v15 }
  0xf7   :  { %v14579_v16 = vld [vmem:[#allocation7 + $0x1d9c] sm:$0xf0] }
  0xf8   :  { %v13313_v17 = vld [vmem:[#allocation7 + $0x1f80] sm:$0xf]  ;;  %v13058_v28 = vor.u32 %v14579_v16, %v13057_v14  ;;  %7083 = vmatpush.bf16.msrb.mxu0 %v12514_v19  ;;  %v705_v19 = vld [vmem:[#allocation2 + $0x30] sm:$0xff] }
  0xf9   :  { %v14643_v18 = vld [vmem:[#allocation7 + $0x1f9c] sm:$0xf0] }
  0xfa   :  { %v12737_v21 = vld [vmem:[#allocation7 + $0x1b00] sm:$0xf]  ;;  %v13314_v29 = vor.u32 %v14643_v18, %v13313_v17  ;;  %7108 = vmatpush.bf16.msrb.mxu2 %v13058_v28 }
  0xfb   :  { %v14499_v22 = vld [vmem:[#allocation7 + $0x1b1c] sm:$0xf0] }
  0xfc   :  { %v12481_v26 = vld [vmem:[#allocation7 + $0x1900] sm:$0xf]  ;;  %v12738_v31 = vor.u32 %v14499_v22, %v12737_v21  ;;  %7121 = vmatpush.bf16.msrb.mxu3 %v13314_v29  ;;  %v13751_v22 = vld [vmem:[#allocation7 + $0x3c4] sm:$0xf] }
  0xfd   :  { %v14435_v27 = vld [vmem:[#allocation7 + $0x191c] sm:$0xf0]  ;;  %v13687_v29 = vld [vmem:[#allocation7 + $0x1c4] sm:$0xf] }
  0xfe   :  { %v13025_v30 = vld [vmem:[#allocation7 + $0x1d40] sm:$0xf]  ;;  %v12482_v36 = vor.u32 %v14435_v27, %v12481_v26  ;;  %7097 = vmatpush.bf16.msrb.mxu1 %v12738_v31  ;;  %v9763_v26 = vld [vmem:[#allocation7 + $0x3e0] sm:$0xf0] }
  0xff   :  { %v14571_v32 = vld [vmem:[#allocation7 + $0x1d5c] sm:$0xf0] }
 0x100   :  { %v13281_v33 = vld [vmem:[#allocation7 + $0x1f40] sm:$0xf]  ;;  %v13026_v42 = vor.u32 %v14571_v32, %v13025_v30  ;;  %7084 = vmatpush.bf16.msrb.mxu0 %v12482_v36  ;;  %v9507_v30 = vld [vmem:[#allocation7 + $0x1e0] sm:$0xf0] }
 0x101   :  { %v14635_v35 = vld [vmem:[#allocation7 + $0x1f5c] sm:$0xf0] }
 0x102   :  { %v12705_v37 = vld [vmem:[#allocation7 + $0x1ac0] sm:$0xf]  ;;  %v13282_v43 = vor.u32 %v14635_v35, %v13281_v33  ;;  %7109 = vmatpush.bf16.msrb.mxu2 %v13026_v42  ;;  %v13679_v42 = vld [vmem:[#allocation7 + $0x184] sm:$0xf] }
 0x103   :  { %v14491_v38 = vld [vmem:[#allocation7 + $0x1adc] sm:$0xf0] }
 0x104   :  { %v12449_v39 = vld [vmem:[#allocation7 + $0x18c0] sm:$0xf]  ;;  %v12706_v45 = vor.u32 %v14491_v38, %v12705_v37  ;;  %7122 = vmatpush.bf16.msrb.mxu3 %v13282_v43  ;;  %v1769_v37 = vunpack.c.l.b16 %v705_v19  ;;  %v1770_v38 = vunpack.c.h.b16 %v705_v19  ;;  %v9510_v43 = vor.u32 %v13687_v29, %v9507_v30  ;;  %v9411_v29 = vld [vmem:[#allocation7 + $0x120] sm:$0xf0] }
 0x105   :  { %v14427_v41 = vld [vmem:[#allocation7 + $0x18dc] sm:$0xf0] }
 0x106   :  { %v12993_v44 = vld [vmem:[#allocation7 + $0x1d00] sm:$0xf]  ;;  %v12450_v49 = vor.u32 %v14427_v41, %v12449_v39  ;;  %7098 = vmatpush.bf16.msrb.mxu1 %v12706_v45  ;;  %v9766_v41 = vor.u32 %v13751_v22, %v9763_v26  ;;  %v13743_v45 = vld [vmem:[#allocation7 + $0x384] sm:$0xf] }
 0x107   :  { %v14563_v46 = vld [vmem:[#allocation7 + $0x1d1c] sm:$0xf0]  ;;  %v13727_v22 = vld [vmem:[#allocation7 + $0x304] sm:$0xf] }
 0x108   :  { %v13249_v47 = vld [vmem:[#allocation7 + $0x1f00] sm:$0xf]  ;;  %v12994_v55 = vor.u32 %v14563_v46, %v12993_v44  ;;  %7085 = vmatpush.bf16.msrb.mxu0 %v12450_v49  ;;  %v9475_v44 = vld [vmem:[#allocation7 + $0x1a0] sm:$0xf0] }
 0x109   :  { %v14627_v48 = vld [vmem:[#allocation7 + $0x1f1c] sm:$0xf0]  ;;  %v9731_v46 = vld [vmem:[#allocation7 + $0x3a0] sm:$0xf0] }
 0x10a   :  { %v12673_v50 = vld [vmem:[#allocation7 + $0x1a80] sm:$0xf]  ;;  %v13250_v56 = vor.u32 %v14627_v48, %v13249_v47  ;;  %7110 = vmatpush.bf16.msrb.mxu2 %v12994_v55  ;;  %v9667_v26 = vld [vmem:[#allocation7 + $0x320] sm:$0xf0] }
 0x10b   :  { %v14483_v51 = vld [vmem:[#allocation7 + $0x1a9c] sm:$0xf0] }
 0x10c   :  { %v12417_v52 = vld [vmem:[#allocation7 + $0x1880] sm:$0xf]  ;;  %v12674_v58 = vor.u32 %v14483_v51, %v12673_v50  ;;  %7123 = vmatpush.bf16.msrb.mxu3 %v13250_v56  ;;  %v706_v51 = vld [vmem:[#allocation2 + $0x38] sm:$0xff] }
 0x10d   :  { %v14419_v53 = vld [vmem:[#allocation7 + $0x189c] sm:$0xf0] }
 0x10e   :  { %v12961_v57 = vld [vmem:[#allocation7 + $0x1cc0] sm:$0xf]  ;;  %v12418_v0 = vor.u32 %v14419_v53, %v12417_v52  ;;  %7099 = vmatpush.bf16.msrb.mxu1 %v12674_v58  ;;  %v15087_v52 = vpack.c.b16 %v1769_v37, %v1769_v37  ;;  %v15089_v53 = vpack.c.b16 %v1770_v38, %v1770_v38  ;;  %v9734_v58 = vor.u32 %v13743_v45, %v9731_v46  ;;  %v10211_v37 = vld [vmem:[#allocation7 + $0x760] sm:$0xf0] }
 0x10f   :  { %v14555_v59 = vld [vmem:[#allocation7 + $0x1cdc] sm:$0xf0]  ;;  %v13791_v46 = vld [vmem:[#allocation7 + $0x504] sm:$0xf] }
 0x110   :  { %v13217_v62 = vld [vmem:[#allocation7 + $0x1ec0] sm:$0xf]  ;;  %v12962_v8 = vor.u32 %v14555_v59, %v12961_v57  ;;  %7086 = vmatpush.bf16.msrb.mxu0 %v12418_v0  ;;  %v13815_v57 = vld [vmem:[#allocation7 + $0x5c4] sm:$0xf]  ;;  %v9478_v0 = vor.u32 %v13679_v42, %v9475_v44 }
 0x111   :  { %v14619_v63 = vld [vmem:[#allocation7 + $0x1edc] sm:$0xf0]  ;;  %v10019_v59 = vld [vmem:[#allocation7 + $0x5e0] sm:$0xf0] }
 0x112   :  { %v12641_v2 = vld [vmem:[#allocation7 + $0x1a40] sm:$0xf]  ;;  %v13218_v9 = vor.u32 %v14619_v63, %v13217_v62  ;;  %7111 = vmatpush.bf16.msrb.mxu2 %v12962_v8  ;;  %v13879_v62 = vld [vmem:[#allocation7 + $0x7c4] sm:$0xf] }
 0x113   :  { %v14475_v3 = vld [vmem:[#allocation7 + $0x1a5c] sm:$0xf0]  ;;  %v10275_v63 = vld [vmem:[#allocation7 + $0x7e0] sm:$0xf0] }
 0x114   :  { %v12385_v4 = vld [vmem:[#allocation7 + $0x1840] sm:$0xf]  ;;  %v12642_v12 = vor.u32 %v14475_v3, %v12641_v2  ;;  %7124 = vmatpush.bf16.msrb.mxu3 %v13218_v9  ;;  %v1771_v2 = vunpack.c.l.b16 %v706_v51  ;;  %v13735_v3 = vld [vmem:[#allocation7 + $0x344] sm:$0xf] }
 0x115   :  { %v14411_v7 = vld [vmem:[#allocation7 + $0x185c] sm:$0xf0]  ;;  %v13671_v9 = vld [vmem:[#allocation7 + $0x144] sm:$0xf] }
 0x116   :  { %v12929_v10 = vld [vmem:[#allocation7 + $0x1c80] sm:$0xf]  ;;  %v12386_v16 = vor.u32 %v14411_v7, %v12385_v4  ;;  %7100 = vmatpush.bf16.msrb.mxu1 %v12642_v12  ;;  %v9699_v4 = vld [vmem:[#allocation7 + $0x360] sm:$0xf0]  ;;  %v10022_v12 = vor.u32 %v13815_v57, %v10019_v59  ;;  %v15093_v19 = vpack.c.b16 %v1771_v2, %v1771_v2 }
 0x117   :  { %v14547_v11 = vld [vmem:[#allocation7 + $0x1c9c] sm:$0xf0]  ;;  %v13655_v42 = vld [vmem:[#allocation7 + $0xc4] sm:$0xf] }
 0x118   :  { %v13185_v13 = vld [vmem:[#allocation7 + $0x1e80] sm:$0xf]  ;;  %v12930_v27 = vor.u32 %v14547_v11, %v12929_v10  ;;  %7087 = vmatpush.bf16.msrb.mxu0 %v12386_v16  ;;  %v9443_v10 = vld [vmem:[#allocation7 + $0x160] sm:$0xf0]  ;;  %v1772_v11 = vunpack.c.h.b16 %v706_v51 }
 0x119   :  { %v14611_v14 = vld [vmem:[#allocation7 + $0x1e9c] sm:$0xf0]  ;;  %v9987_v16 = vld [vmem:[#allocation7 + $0x5a0] sm:$0xf0] }
 0x11a   :  { %v12353_v15 = vld [vmem:[#allocation7 + $0x1800] sm:$0xf]  ;;  %v13186_v28 = vor.u32 %v14611_v14, %v13185_v13  ;;  %7112 = vmatpush.bf16.msrb.mxu2 %v12930_v27  ;;  %v10278_v13 = vor.u32 %v13879_v62, %v10275_v63  ;;  %v13807_v14 = vld [vmem:[#allocation7 + $0x584] sm:$0xf]  ;;  %v15095_v27 = vpack.c.b16 %v1772_v11, %v1772_v11 }
 0x11b   :  { %v12609_v17 = vld [vmem:[#allocation7 + $0x1a00] sm:$0xf]  ;;  %v9990_v30 = vor.u32 %v13807_v14, %v9987_v16  ;;  %v13647_v57 = vld [vmem:[#allocation7 + $0x84] sm:$0xf] }
 0x11c   :  { %v14467_v18 = vld [vmem:[#allocation7 + $0x1a1c] sm:$0xf0]  ;;  %7125 = vmatpush.bf16.msrb.mxu3 %v13186_v28  ;;  %v13663_v28 = vld [vmem:[#allocation7 + $0x104] sm:$0xf] }
 0x11d   :  { %v14403_v21 = vld [vmem:[#allocation7 + $0x181c] sm:$0xf0]  ;;  %v12610_v32 = vor.u32 %v14467_v18, %v12609_v17  ;;  %v13871_v17 = vld [vmem:[#allocation7 + $0x784] sm:$0xf]  ;;  %v9414_v38 = vor.u32 %v13663_v28, %v9411_v29 }
 0x11e   :  { %v12897_v31 = vld [vmem:[#allocation7 + $0x1c40] sm:$0xf]  ;;  %v12354_v39 = vor.u32 %v14403_v21, %v12353_v15  ;;  %v9702_v15 = vor.u32 %v13735_v3, %v9699_v4  ;;  %v10243_v18 = vld [vmem:[#allocation7 + $0x7a0] sm:$0xf0]  ;;  %v9446_v21 = vor.u32 %v13671_v9, %v9443_v10 }
 0x11f   :  { %v14539_v33 = vld [vmem:[#allocation7 + $0x1c5c] sm:$0xf0]  ;;  %7101 = vmatpush.bf16.msrb.mxu1 %v12610_v32  ;;  %v13799_v32 = vld [vmem:[#allocation7 + $0x544] sm:$0xf] }
 0x120   :  { %v13153_v35 = vld [vmem:[#allocation7 + $0x1e40] sm:$0xf]  ;;  %v12898_v47 = vor.u32 %v14539_v33, %v12897_v31  ;;  %7088 = vmatpush.bf16.msrb.mxu0 %v12354_v39  ;;  %v10246_v31 = vor.u32 %v13871_v17, %v10243_v18  ;;  %v9670_v33 = vor.u32 %v13727_v22, %v9667_v26  ;;  %v13719_v39 = vld [vmem:[#allocation7 + $0x2c4] sm:$0xf] }
 0x121   :  { %v14603_v36 = vld [vmem:[#allocation7 + $0x1e5c] sm:$0xf0]  ;;  %v13783_v63 = vld [vmem:[#allocation7 + $0x4c4] sm:$0xf] }
 0x122   :  { %v13154_v48 = vor.u32 %v14603_v36, %v13153_v35  ;;  %v12865_v49 = vld [vmem:[#allocation7 + $0x1c00] sm:$0xf]  ;;  %7113 = vmatpush.bf16.msrb.mxu2 %v12898_v47  ;;  %7102 = vmatmul.bf16.vlgmr.msrb.gmra.mxu1 %v15089_v53  ;;  %v9955_v35 = vld [vmem:[#allocation7 + $0x560] sm:$0xf0] }
 0x123   :  { %v14531_v50 = vld [vmem:[#allocation7 + $0x1c1c] sm:$0xf0]  ;;  %7146 = vmatpush.bf16.msra.mxu1 %v9766_v41  ;;  %7089 = vmatmul.bf16.vlgmr.msrb.gmra.mxu0 %v15087_v52  ;;  %v13863_v36 = vld [vmem:[#allocation7 + $0x744] sm:$0xf]  ;;  %v9958_v44 = vor.u32 %v13799_v32, %v9955_v35 }
 0x124   :  { %v13121_v55 = vld [vmem:[#allocation7 + $0x1e00] sm:$0xf]  ;;  %7133 = vmatpush.bf16.msra.mxu0 %v9510_v43  ;;  %7126 = vmatpush.bf16.msrb.mxu3 %v13154_v48  ;;  %v12866_v7 = vor.u32 %v14531_v50, %v12865_v49  ;;  %v9635_v41 = vld [vmem:[#allocation7 + $0x2e0] sm:$0xf0]  ;;  %v10214_v45 = vor.u32 %v13863_v36, %v10211_v37 }
 0x125   :  { %v14595_v56 = vld [vmem:[#allocation7 + $0x1e1c] sm:$0xf0]  ;;  %v9379_v43 = vld [vmem:[#allocation7 + $0xe0] sm:$0xf0]  ;;  %v9638_v47 = vor.u32 %v13719_v39, %v9635_v41 }
 0x126   :  { %v13122_v8 = vor.u32 %v14595_v56, %v13121_v55  ;;  %7114 = vmatpush.bf16.msrb.mxu2 %v12866_v7  ;;  %v9923_v48 = vld [vmem:[#allocation7 + $0x520] sm:$0xf0]  ;;  %v9382_v51 = vor.u32 %v13655_v42, %v9379_v43 }
 0x127   :  { %7147 = vmatpush.bf16.msra.mxu1 %v9734_v58  ;;  %v13855_v49 = vld [vmem:[#allocation7 + $0x704] sm:$0xf]  ;;  %v9926_v59 = vor.u32 %v13791_v46, %v9923_v48 }
 0x128   :  { %7134 = vmatpush.bf16.msra.mxu0 %v9478_v0  ;;  %7127 = vmatpush.bf16.msrb.mxu3 %v13122_v8  ;;  %v10179_v50 = vld [vmem:[#allocation7 + $0x720] sm:$0xf0] }
 0x129   :  { %7115 = vmatmul.bf16.vlgmr.msrb.gmra.mxu2 %v15093_v19  ;;  %v13711_v55 = vld [vmem:[#allocation7 + $0x284] sm:$0xf]  ;;  %v10182_v62 = vor.u32 %v13855_v49, %v10179_v50 }
 0x12a   :  { %7159 = vmatpush.bf16.msra.mxu2 %v10022_v12  ;;  %v9603_v56 = vld [vmem:[#allocation7 + $0x2a0] sm:$0xf0] }
 0x12b   :  { %7148 = vmatpush.bf16.msra.mxu1 %v9702_v15  ;;  %7128 = vmatmul.bf16.vlgmr.msrb.gmra.mxu3 %v15095_v27  ;;  %v9347_v58 = vld [vmem:[#allocation7 + $0xa0] sm:$0xf0]  ;;  %v9606_v0 = vor.u32 %v13711_v55, %v9603_v56 }
 0x12c   :  { %7172 = vmatpush.bf16.msra.mxu3 %v10278_v13  ;;  %7135 = vmatpush.bf16.msra.mxu0 %v9446_v21  ;;  %v9891_v2 = vld [vmem:[#allocation7 + $0x4e0] sm:$0xf0]  ;;  %v9350_v7 = vor.u32 %v13647_v57, %v9347_v58 }
 0x12d   :  { %v13847_v3 = vld [vmem:[#allocation7 + $0x6c4] sm:$0xf]  ;;  %v9894_v12 = vor.u32 %v13783_v63, %v9891_v2 }
 0x12e   :  { %7160 = vmatpush.bf16.msra.mxu2 %v9990_v30  ;;  %v10147_v4 = vld [vmem:[#allocation7 + $0x6e0] sm:$0xf0] }
 0x12f   :  { %7149 = vmatpush.bf16.msra.mxu1 %v9670_v33  ;;  %v13703_v8 = vld [vmem:[#allocation7 + $0x244] sm:$0xf]  ;;  %v10150_v13 = vor.u32 %v13847_v3, %v10147_v4 }
 0x130   :  { %7173 = vmatpush.bf16.msra.mxu3 %v10246_v31  ;;  %7136 = vmatpush.bf16.msra.mxu0 %v9414_v38  ;;  %v9571_v9 = vld [vmem:[#allocation7 + $0x260] sm:$0xf0] }
 0x131   :  { %v13639_v10 = vld [vmem:[#allocation7 + $0x44] sm:$0xf]  ;;  %v9574_v15 = vor.u32 %v13703_v8, %v9571_v9 }
 0x132   :  { %7161 = vmatpush.bf16.msra.mxu2 %v9958_v44  ;;  %v9315_v11 = vld [vmem:[#allocation7 + $0x60] sm:$0xf0] }
 0x133   :  { %7150 = vmatpush.bf16.msra.mxu1 %v9638_v47  ;;  %v13775_v14 = vld [vmem:[#allocation7 + $0x484] sm:$0xf]  ;;  %v9318_v21 = vor.u32 %v13639_v10, %v9315_v11 }
 0x134   :  { %7174 = vmatpush.bf16.msra.mxu3 %v10214_v45  ;;  %7137 = vmatpush.bf16.msra.mxu0 %v9382_v51  ;;  %v9859_v16 = vld [vmem:[#allocation7 + $0x4a0] sm:$0xf0] }
 0x135   :  { %v13839_v17 = vld [vmem:[#allocation7 + $0x684] sm:$0xf]  ;;  %v9862_v32 = vor.u32 %v13775_v14, %v9859_v16 }
 0x136   :  { %7162 = vmatpush.bf16.msra.mxu2 %v9926_v59  ;;  %v10115_v18 = vld [vmem:[#allocation7 + $0x6a0] sm:$0xf0] }
 0x137   :  { %7151 = vmatpush.bf16.msra.mxu1 %v9606_v0  ;;  %v13631_v22 = vld [vmem:[#allocation7 + $0x4] sm:$0xf]  ;;  %v10118_v33 = vor.u32 %v13839_v17, %v10115_v18 }
 0x138   :  { %7175 = vmatpush.bf16.msra.mxu3 %v10182_v62  ;;  %7138 = vmatpush.bf16.msra.mxu0 %v9350_v7  ;;  %v13695_v26 = vld [vmem:[#allocation7 + $0x204] sm:$0xf] }
 0x139   :  { %v9539_v28 = vld [vmem:[#allocation7 + $0x220] sm:$0xf0] }
 0x13a   :  { %v9283_v29 = vld [vmem:[#allocation7 + $0x20] sm:$0xf0]  ;;  %7163 = vmatpush.bf16.msra.mxu2 %v9894_v12  ;;  %v9542_v38 = vor.u32 %v13695_v26, %v9539_v28 }
 0x13b   :  { %v14007_v30 = vld [vmem:[#allocation7 + $0xbc4] sm:$0xf]  ;;  %7152 = vmatpush.bf16.msra.mxu1 %v9574_v15  ;;  %v9286_v43 = vor.u32 %v13631_v22, %v9283_v29 }
 0x13c   :  { %v10787_v31 = vld [vmem:[#allocation7 + $0xbe0] sm:$0xf0]  ;;  %7176 = vmatpush.bf16.msra.mxu3 %v10150_v13  ;;  %7139 = vmatpush.bf16.msra.mxu0 %v9318_v21 }
 0x13d   :  { %v13943_v35 = vld [vmem:[#allocation7 + $0x9c4] sm:$0xf]  ;;  %v10790_v44 = vor.u32 %v14007_v30, %v10787_v31 }
 0x13e   :  { %v10531_v36 = vld [vmem:[#allocation7 + $0x9e0] sm:$0xf0]  ;;  %7164 = vmatpush.bf16.msra.mxu2 %v9862_v32 }
 0x13f   :  { %v13767_v37 = vld [vmem:[#allocation7 + $0x444] sm:$0xf]  ;;  %v10534_v45 = vor.u32 %v13943_v35, %v10531_v36  ;;  %7153 = vmatpush.bf16.msra.mxu1 %v9542_v38 }
 0x140   :  { %v9827_v39 = vld [vmem:[#allocation7 + $0x460] sm:$0xf0]  ;;  %7177 = vmatpush.bf16.msra.mxu3 %v10118_v33  ;;  %7140 = vmatpush.bf16.msra.mxu0 %v9286_v43 }
 0x141   :  { %v13831_v41 = vld [vmem:[#allocation7 + $0x644] sm:$0xf]  ;;  %v9830_v49 = vor.u32 %v13767_v37, %v9827_v39 }
 0x142   :  { %v10083_v42 = vld [vmem:[#allocation7 + $0x660] sm:$0xf0]  ;;  %7154 = vmatmul.bf16.vlgmr.msra.gmra.mxu1 %v15053_v24 }
 0x143   :  { %v13935_v46 = vld [vmem:[#allocation7 + $0x984] sm:$0xf]  ;;  %v10086_v50 = vor.u32 %v13831_v41, %v10083_v42  ;;  %7198 = vmatpush.bf16.msrb.mxu1 %v10790_v44  ;;  %7165 = vmatpush.bf16.msra.mxu2 %v9830_v49 }
 0x144   :  { %v13999_v47 = vld [vmem:[#allocation7 + $0xb84] sm:$0xf]  ;;  %7185 = vmatpush.bf16.msrb.mxu0 %v10534_v45 }
 0x145   :  { %v10755_v48 = vld [vmem:[#allocation7 + $0xba0] sm:$0xf0]  ;;  %7178 = vmatpush.bf16.msra.mxu3 %v10086_v50  ;;  %7141 = vmatmul.bf16.vlgmr.msra.gmra.mxu0 %v15051_v23 }
 0x146   :  { %v10499_v51 = vld [vmem:[#allocation7 + $0x9a0] sm:$0xf0]  ;;  %v10758_v62 = vor.u32 %v13999_v47, %v10755_v48 }
 0x147   :  { %v13759_v55 = vld [vmem:[#allocation7 + $0x404] sm:$0xf]  ;;  %v10502_v3 = vor.u32 %v13935_v46, %v10499_v51 }
 0x148   :  { %v9795_v56 = vld [vmem:[#allocation7 + $0x420] sm:$0xf0]  ;;  %7199 = vmatpush.bf16.msrb.mxu1 %v10758_v62 }
 0x149   :  { %v13823_v57 = vld [vmem:[#allocation7 + $0x604] sm:$0xf]  ;;  %v9798_v8 = vor.u32 %v13759_v55, %v9795_v56  ;;  %7186 = vmatpush.bf16.msrb.mxu0 %v10502_v3 }
 0x14a   :  { %v10051_v58 = vld [vmem:[#allocation7 + $0x620] sm:$0xf0] }
 0x14b   :  { %v14071_v59 = vld [vmem:[#allocation7 + $0xdc4] sm:$0xf]  ;;  %v10054_v9 = vor.u32 %v13823_v57, %v10051_v58  ;;  %7166 = vmatpush.bf16.msra.mxu2 %v9798_v8 }
 0x14c   :  { %v11043_v63 = vld [vmem:[#allocation7 + $0xde0] sm:$0xf0] }
 0x14d   :  { %v14135_v0 = vld [vmem:[#allocation7 + $0xfc4] sm:$0xf]  ;;  %v11046_v10 = vor.u32 %v14071_v59, %v11043_v63  ;;  %7179 = vmatpush.bf16.msra.mxu3 %v10054_v9 }
 0x14e   :  { %v11299_v2 = vld [vmem:[#allocation7 + $0xfe0] sm:$0xf0]  ;;  %7167 = vmatmul.bf16.vlgmr.msra.gmra.mxu2 %v15057_v60 }
 0x14f   :  { %v13991_v4 = vld [vmem:[#allocation7 + $0xb44] sm:$0xf]  ;;  %v11302_v11 = vor.u32 %v14135_v0, %v11299_v2  ;;  %7211 = vmatpush.bf16.msrb.mxu2 %v11046_v10 }
 0x150   :  { %v10723_v7 = vld [vmem:[#allocation7 + $0xb60] sm:$0xf0]  ;;  %7180 = vmatmul.bf16.vlgmr.msra.gmra.mxu3 %v15059_v61 }
 0x151   :  { %v13927_v12 = vld [vmem:[#allocation7 + $0x944] sm:$0xf]  ;;  %v10726_v15 = vor.u32 %v13991_v4, %v10723_v7  ;;  %7224 = vmatpush.bf16.msrb.mxu3 %v11302_v11 }
 0x152   :  { %v10467_v13 = vld [vmem:[#allocation7 + $0x960] sm:$0xf0] }
 0x153   :  { %v14063_v14 = vld [vmem:[#allocation7 + $0xd84] sm:$0xf]  ;;  %v10470_v26 = vor.u32 %v13927_v12, %v10467_v13  ;;  %7200 = vmatpush.bf16.msrb.mxu1 %v10726_v15 }
 0x154   :  { %v11011_v16 = vld [vmem:[#allocation7 + $0xda0] sm:$0xf0] }
 0x155   :  { %v14127_v17 = vld [vmem:[#allocation7 + $0xf84] sm:$0xf]  ;;  %v11014_v28 = vor.u32 %v14063_v14, %v11011_v16  ;;  %7187 = vmatpush.bf16.msrb.mxu0 %v10470_v26 }
 0x156   :  { %v11267_v18 = vld [vmem:[#allocation7 + $0xfa0] sm:$0xf0] }
 0x157   :  { %v13983_v21 = vld [vmem:[#allocation7 + $0xb04] sm:$0xf]  ;;  %v11270_v29 = vor.u32 %v14127_v17, %v11267_v18  ;;  %7212 = vmatpush.bf16.msrb.mxu2 %v11014_v28 }
 0x158   :  { %v10691_v22 = vld [vmem:[#allocation7 + $0xb20] sm:$0xf0] }
 0x159   :  { %v13919_v30 = vld [vmem:[#allocation7 + $0x904] sm:$0xf]  ;;  %v10694_v33 = vor.u32 %v13983_v21, %v10691_v22  ;;  %7225 = vmatpush.bf16.msrb.mxu3 %v11270_v29 }
 0x15a   :  { %v10435_v31 = vld [vmem:[#allocation7 + $0x920] sm:$0xf0] }
 0x15b   :  { %v14055_v32 = vld [vmem:[#allocation7 + $0xd44] sm:$0xf]  ;;  %v10438_v41 = vor.u32 %v13919_v30, %v10435_v31  ;;  %7201 = vmatpush.bf16.msrb.mxu1 %v10694_v33 }
 0x15c   :  { %v10979_v35 = vld [vmem:[#allocation7 + $0xd60] sm:$0xf0] }
 0x15d   :  { %v14119_v36 = vld [vmem:[#allocation7 + $0xf44] sm:$0xf]  ;;  %v10982_v42 = vor.u32 %v14055_v32, %v10979_v35  ;;  %7188 = vmatpush.bf16.msrb.mxu0 %v10438_v41 }
 0x15e   :  { %v11235_v37 = vld [vmem:[#allocation7 + $0xf60] sm:$0xf0] }
 0x15f   :  { %v13975_v38 = vld [vmem:[#allocation7 + $0xac4] sm:$0xf]  ;;  %v11238_v43 = vor.u32 %v14119_v36, %v11235_v37  ;;  %7213 = vmatpush.bf16.msrb.mxu2 %v10982_v42 }
 0x160   :  { %v10659_v39 = vld [vmem:[#allocation7 + $0xae0] sm:$0xf0] }
 0x161   :  { %v13911_v44 = vld [vmem:[#allocation7 + $0x8c4] sm:$0xf]  ;;  %v10662_v47 = vor.u32 %v13975_v38, %v10659_v39  ;;  %7226 = vmatpush.bf16.msrb.mxu3 %v11238_v43 }
 0x162   :  { %v10403_v45 = vld [vmem:[#allocation7 + $0x8e0] sm:$0xf0] }
 0x163   :  { %v14047_v46 = vld [vmem:[#allocation7 + $0xd04] sm:$0xf]  ;;  %v10406_v56 = vor.u32 %v13911_v44, %v10403_v45  ;;  %7202 = vmatpush.bf16.msrb.mxu1 %v10662_v47 }
 0x164   :  { %v10947_v48 = vld [vmem:[#allocation7 + $0xd20] sm:$0xf0] }
 0x165   :  { %v14111_v49 = vld [vmem:[#allocation7 + $0xf04] sm:$0xf]  ;;  %v10950_v57 = vor.u32 %v14047_v46, %v10947_v48  ;;  %7189 = vmatpush.bf16.msrb.mxu0 %v10406_v56 }
 0x166   :  { %v11203_v50 = vld [vmem:[#allocation7 + $0xf20] sm:$0xf0] }
 0x167   :  { %v13967_v51 = vld [vmem:[#allocation7 + $0xa84] sm:$0xf]  ;;  %v11206_v58 = vor.u32 %v14111_v49, %v11203_v50  ;;  %7214 = vmatpush.bf16.msrb.mxu2 %v10950_v57 }
 0x168   :  { %v10627_v55 = vld [vmem:[#allocation7 + $0xaa0] sm:$0xf0] }
 0x169   :  { %v13903_v59 = vld [vmem:[#allocation7 + $0x884] sm:$0xf]  ;;  %v10630_v0 = vor.u32 %v13967_v51, %v10627_v55  ;;  %7227 = vmatpush.bf16.msrb.mxu3 %v11206_v58 }
 0x16a   :  { %v10371_v62 = vld [vmem:[#allocation7 + $0x8a0] sm:$0xf0] }
 0x16b   :  { %v14039_v63 = vld [vmem:[#allocation7 + $0xcc4] sm:$0xf]  ;;  %v10374_v9 = vor.u32 %v13903_v59, %v10371_v62  ;;  %7203 = vmatpush.bf16.msrb.mxu1 %v10630_v0 }
 0x16c   :  { %v10915_v2 = vld [vmem:[#allocation7 + $0xce0] sm:$0xf0] }
 0x16d   :  { %v14103_v3 = vld [vmem:[#allocation7 + $0xec4] sm:$0xf]  ;;  %v10918_v10 = vor.u32 %v14039_v63, %v10915_v2  ;;  %7190 = vmatpush.bf16.msrb.mxu0 %v10374_v9 }
 0x16e   :  { %v11171_v4 = vld [vmem:[#allocation7 + $0xee0] sm:$0xf0] }
 0x16f   :  { %v13959_v7 = vld [vmem:[#allocation7 + $0xa44] sm:$0xf]  ;;  %v11174_v11 = vor.u32 %v14103_v3, %v11171_v4  ;;  %7215 = vmatpush.bf16.msrb.mxu2 %v10918_v10 }
 0x170   :  { %v10595_v8 = vld [vmem:[#allocation7 + $0xa60] sm:$0xf0] }
 0x171   :  { %v13895_v12 = vld [vmem:[#allocation7 + $0x844] sm:$0xf]  ;;  %v10598_v15 = vor.u32 %v13959_v7, %v10595_v8  ;;  %7228 = vmatpush.bf16.msrb.mxu3 %v11174_v11 }
 0x172   :  { %v10339_v13 = vld [vmem:[#allocation7 + $0x860] sm:$0xf0] }
 0x173   :  { %v14031_v14 = vld [vmem:[#allocation7 + $0xc84] sm:$0xf]  ;;  %v10342_v26 = vor.u32 %v13895_v12, %v10339_v13  ;;  %7204 = vmatpush.bf16.msrb.mxu1 %v10598_v15 }
 0x174   :  { %v10883_v16 = vld [vmem:[#allocation7 + $0xca0] sm:$0xf0] }
 0x175   :  { %v14095_v17 = vld [vmem:[#allocation7 + $0xe84] sm:$0xf]  ;;  %v10886_v30 = vor.u32 %v14031_v14, %v10883_v16  ;;  %7191 = vmatpush.bf16.msrb.mxu0 %v10342_v26 }
 0x176   :  { %v11139_v18 = vld [vmem:[#allocation7 + $0xea0] sm:$0xf0] }
 0x177   :  { %v13951_v21 = vld [vmem:[#allocation7 + $0xa04] sm:$0xf]  ;;  %v11142_v31 = vor.u32 %v14095_v17, %v11139_v18  ;;  %7216 = vmatpush.bf16.msrb.mxu2 %v10886_v30 }
 0x178   :  { %v10563_v22 = vld [vmem:[#allocation7 + $0xa20] sm:$0xf0] }
 0x179   :  { %v14263_v28 = vld [vmem:[#allocation7 + $0x13c4] sm:$0xf]  ;;  %v10566_v36 = vor.u32 %v13951_v21, %v10563_v22  ;;  %7229 = vmatpush.bf16.msrb.mxu3 %v11142_v31 }
 0x17a   :  { %v11811_v29 = vld [vmem:[#allocation7 + $0x13e0] sm:$0xf0] }
 0x17b   :  { %v13887_v32 = vld [vmem:[#allocation7 + $0x804] sm:$0xf]  ;;  %v11814_v41 = vor.u32 %v14263_v28, %v11811_v29  ;;  %7205 = vmatpush.bf16.msrb.mxu1 %v10566_v36 }
 0x17c   :  { %v10307_v33 = vld [vmem:[#allocation7 + $0x820] sm:$0xf0] }
 0x17d   :  { %v14199_v35 = vld [vmem:[#allocation7 + $0x11c4] sm:$0xf]  ;;  %v10310_v44 = vor.u32 %v13887_v32, %v10307_v33  ;;  %v6934_v33 = vpop.f32.mrf.mxu0 }
 0x17e   :  { %v11555_v37 = vld [vmem:[#allocation7 + $0x11e0] sm:$0xf0]  ;;  %7206 = vmatmul.bf16.vlgmr.msrb.gmra.mxu1 %v15065_v40 }
 0x17f   :  { %v14023_v38 = vld [vmem:[#allocation7 + $0xc44] sm:$0xf]  ;;  %v11558_v47 = vor.u32 %v14199_v35, %v11555_v37  ;;  %7250 = vmatpush.bf16.msra.mxu1 %v11814_v41  ;;  %7192 = vmatpush.bf16.msrb.mxu0 %v10310_v44  ;;  %v6947_v35 = vpop.f32.mrf.mxu1 }
 0x180   :  { %v10851_v39 = vld [vmem:[#allocation7 + $0xc60] sm:$0xf0] }
 0x181   :  { %v14087_v42 = vld [vmem:[#allocation7 + $0xe44] sm:$0xf]  ;;  %v10854_v48 = vor.u32 %v14023_v38, %v10851_v39 }
 0x182   :  { %v11107_v43 = vld [vmem:[#allocation7 + $0xe60] sm:$0xf0]  ;;  %7193 = vmatmul.bf16.vlgmr.msrb.gmra.mxu0 %v15063_v34 }
 0x183   :  { %v14255_v45 = vld [vmem:[#allocation7 + $0x1384] sm:$0xf]  ;;  %v11110_v55 = vor.u32 %v14087_v42, %v11107_v43  ;;  %7237 = vmatpush.bf16.msra.mxu0 %v11558_v47  ;;  %7217 = vmatpush.bf16.msrb.mxu2 %v10854_v48 }
 0x184   :  { %v11779_v46 = vld [vmem:[#allocation7 + $0x13a0] sm:$0xf0] }
 0x185   :  { %v14191_v49 = vld [vmem:[#allocation7 + $0x1184] sm:$0xf]  ;;  %v11782_v59 = vor.u32 %v14255_v45, %v11779_v46  ;;  %7230 = vmatpush.bf16.msrb.mxu3 %v11110_v55 }
 0x186   :  { %v11523_v50 = vld [vmem:[#allocation7 + $0x11a0] sm:$0xf0] }
 0x187   :  { %v14015_v51 = vld [vmem:[#allocation7 + $0xc04] sm:$0xf]  ;;  %v11526_v7 = vor.u32 %v14191_v49, %v11523_v50  ;;  %7251 = vmatpush.bf16.msra.mxu1 %v11782_v59 }
 0x188   :  { %v10819_v56 = vld [vmem:[#allocation7 + $0xc20] sm:$0xf0] }
 0x189   :  { %v14079_v57 = vld [vmem:[#allocation7 + $0xe04] sm:$0xf]  ;;  %v10822_v8 = vor.u32 %v14015_v51, %v10819_v56  ;;  %7238 = vmatpush.bf16.msra.mxu0 %v11526_v7  ;;  %v6936_v7 = vpop.f32.mrf.mxu0 }
 0x18a   :  { %v11075_v58 = vld [vmem:[#allocation7 + $0xe20] sm:$0xf0] }
 0x18b   :  { %v14327_v62 = vld [vmem:[#allocation7 + $0x15c4] sm:$0xf]  ;;  %v11078_v10 = vor.u32 %v14079_v57, %v11075_v58  ;;  %7218 = vmatpush.bf16.msrb.mxu2 %v10822_v8  ;;  %v6949_v8 = vpop.f32.mrf.mxu1 }
 0x18c   :  { %v12067_v63 = vld [vmem:[#allocation7 + $0x15e0] sm:$0xf0] }
 0x18d   :  { %v14391_v0 = vld [vmem:[#allocation7 + $0x17c4] sm:$0xf]  ;;  %v12070_v11 = vor.u32 %v14327_v62, %v12067_v63  ;;  %7231 = vmatpush.bf16.msrb.mxu3 %v11078_v10 }
 0x18e   :  { %v12323_v2 = vld [vmem:[#allocation7 + $0x17e0] sm:$0xf0]  ;;  %7219 = vmatmul.bf16.vlgmr.msrb.gmra.mxu2 %v15069_v5 }
 0x18f   :  { %v14247_v3 = vld [vmem:[#allocation7 + $0x1344] sm:$0xf]  ;;  %v12326_v15 = vor.u32 %v14391_v0, %v12323_v2  ;;  %7263 = vmatpush.bf16.msra.mxu2 %v12070_v11 }
 0x190   :  { %v11747_v4 = vld [vmem:[#allocation7 + $0x1360] sm:$0xf0]  ;;  %7232 = vmatmul.bf16.vlgmr.msrb.gmra.mxu3 %v15071_v6 }
 0x191   :  { %v15103_v9 = vld [vmem:[#allocation8] sm:$0xff]  ;;  %v11750_v16 = vor.u32 %v14247_v3, %v11747_v4  ;;  %7276 = vmatpush.bf16.msra.mxu3 %v12326_v15 }
 0x192   :  { %v14183_v12 = vld [vmem:[#allocation7 + $0x1144] sm:$0xf]  ;;  %v1733_v22 = vperm.slane %v15103_v9, 0 }
 0x193   :  { %v11491_v13 = vld [vmem:[#allocation7 + $0x1160] sm:$0xf0]  ;;  %7252 = vmatpush.bf16.msra.mxu1 %v11750_v16 }
 0x194   :  { %v14319_v14 = vld [vmem:[#allocation7 + $0x1584] sm:$0xf]  ;;  %v11494_v29 = vor.u32 %v14183_v12, %v11491_v13  ;;  %v6935_v42 = vadd.f32 %v6934_v33, %v1733_v22  ;;  %v6960_v33 = vpop.f32.mrf.mxu2 }
 0x195   :  { %v12035_v17 = vld [vmem:[#allocation7 + $0x15a0] sm:$0xf0] }
 0x196   :  { %v14383_v18 = vld [vmem:[#allocation7 + $0x1784] sm:$0xf]  ;;  %v12038_v30 = vor.u32 %v14319_v14, %v12035_v17  ;;  %7239 = vmatpush.bf16.msra.mxu0 %v11494_v29  ;;  %v6948_v47 = vadd.f32 %v6947_v35, %v6935_v42  ;;  %v6973_v35 = vpop.f32.mrf.mxu3 }
 0x197   :  { %v12291_v21 = vld [vmem:[#allocation7 + $0x17a0] sm:$0xf0] }
 0x198   :  { %v14239_v26 = vld [vmem:[#allocation7 + $0x1304] sm:$0xf]  ;;  %v12294_v36 = vor.u32 %v14383_v18, %v12291_v21  ;;  %7264 = vmatpush.bf16.msra.mxu2 %v12038_v30 }
 0x199   :  { %v11715_v28 = vld [vmem:[#allocation7 + $0x1320] sm:$0xf0] }
 0x19a   :  { %v14175_v31 = vld [vmem:[#allocation7 + $0x1104] sm:$0xf]  ;;  %v11718_v37 = vor.u32 %v14239_v26, %v11715_v28  ;;  %7277 = vmatpush.bf16.msra.mxu3 %v12294_v36 }
 0x19b   :  { %v11459_v32 = vld [vmem:[#allocation7 + $0x1120] sm:$0xf0] }
 0x19c   :  { %v14311_v38 = vld [vmem:[#allocation7 + $0x1544] sm:$0xf]  ;;  %v11462_v46 = vor.u32 %v14175_v31, %v11459_v32  ;;  %7253 = vmatpush.bf16.msra.mxu1 %v11718_v37 }
 0x19d   :  { %v12003_v39 = vld [vmem:[#allocation7 + $0x1560] sm:$0xf0] }
 0x19e   :  { %v14375_v41 = vld [vmem:[#allocation7 + $0x1744] sm:$0xf]  ;;  %v12006_v48 = vor.u32 %v14311_v38, %v12003_v39  ;;  %7240 = vmatpush.bf16.msra.mxu0 %v11462_v46  ;;  %v6961_v39 = vadd.f32 %v6960_v33, %v6948_v47 }
 0x19f   :  { %v12259_v43 = vld [vmem:[#allocation7 + $0x1760] sm:$0xf0] }
 0x1a0   :  { %v14231_v44 = vld [vmem:[#allocation7 + $0x12c4] sm:$0xf]  ;;  %v12262_v51 = vor.u32 %v14375_v41, %v12259_v43  ;;  %7265 = vmatpush.bf16.msra.mxu2 %v12006_v48 }
 0x1a1   :  { %v11683_v45 = vld [vmem:[#allocation7 + $0x12e0] sm:$0xf0] }
 0x1a2   :  { %v14167_v49 = vld [vmem:[#allocation7 + $0x10c4] sm:$0xf]  ;;  %v11686_v55 = vor.u32 %v14231_v44, %v11683_v45  ;;  %7278 = vmatpush.bf16.msra.mxu3 %v12262_v51 }
 0x1a3   :  { %v11427_v50 = vld [vmem:[#allocation7 + $0x10e0] sm:$0xf0] }
 0x1a4   :  { %v14303_v56 = vld [vmem:[#allocation7 + $0x1504] sm:$0xf]  ;;  %v11430_v0 = vor.u32 %v14167_v49, %v11427_v50  ;;  %7254 = vmatpush.bf16.msra.mxu1 %v11686_v55  ;;  %v6974_v49 = vadd.f32 %v6973_v35, %v6961_v39 }
 0x1a5   :  { %v11971_v57 = vld [vmem:[#allocation7 + $0x1520] sm:$0xf0] }
 0x1a6   :  { %v14367_v58 = vld [vmem:[#allocation7 + $0x1704] sm:$0xf]  ;;  %v11974_v2 = vor.u32 %v14303_v56, %v11971_v57  ;;  %7241 = vmatpush.bf16.msra.mxu0 %v11430_v0  ;;  %v6999_v0 = vpop.f32.mrf.mxu1 }
 0x1a7   :  { %v12227_v59 = vld [vmem:[#allocation7 + $0x1720] sm:$0xf0] }
 0x1a8   :  { %v14223_v62 = vld [vmem:[#allocation7 + $0x1284] sm:$0xf]  ;;  %v12230_v10 = vor.u32 %v14367_v58, %v12227_v59  ;;  %7266 = vmatpush.bf16.msra.mxu2 %v11974_v2  ;;  %v6986_v58 = vpop.f32.mrf.mxu0 }
 0x1a9   :  { %v11651_v63 = vld [vmem:[#allocation7 + $0x12a0] sm:$0xf0] }
 0x1aa   :  { %v14159_v3 = vld [vmem:[#allocation7 + $0x1084] sm:$0xf]  ;;  %v11654_v11 = vor.u32 %v14223_v62, %v11651_v63  ;;  %7279 = vmatpush.bf16.msra.mxu3 %v12230_v10  ;;  %v6987_v63 = vadd.f32 %v6986_v58, %v6974_v49 }
 0x1ab   :  { %v11395_v4 = vld [vmem:[#allocation7 + $0x10a0] sm:$0xf0] }
 0x1ac   :  { %v14295_v12 = vld [vmem:[#allocation7 + $0x14c4] sm:$0xf]  ;;  %v11398_v18 = vor.u32 %v14159_v3, %v11395_v4  ;;  %7255 = vmatpush.bf16.msra.mxu1 %v11654_v11 }
 0x1ad   :  { %v11939_v13 = vld [vmem:[#allocation7 + $0x14e0] sm:$0xf0] }
 0x1ae   :  { %v14359_v14 = vld [vmem:[#allocation7 + $0x16c4] sm:$0xf]  ;;  %v11942_v21 = vor.u32 %v14295_v12, %v11939_v13  ;;  %7242 = vmatpush.bf16.msra.mxu0 %v11398_v18  ;;  %v7000_v13 = vadd.f32 %v6999_v0, %v6987_v63  ;;  %v6962_v18 = vpop.f32.mrf.mxu2 }
 0x1af   :  { %v12195_v15 = vld [vmem:[#allocation7 + $0x16e0] sm:$0xf0] }
 0x1b0   :  { %v14215_v16 = vld [vmem:[#allocation7 + $0x1244] sm:$0xf]  ;;  %v12198_v28 = vor.u32 %v14359_v14, %v12195_v15  ;;  %7267 = vmatpush.bf16.msra.mxu2 %v11942_v21  ;;  %v6975_v21 = vpop.f32.mrf.mxu3 }
 0x1b1   :  { %v11619_v17 = vld [vmem:[#allocation7 + $0x1260] sm:$0xf0] }
 0x1b2   :  { %v14151_v22 = vld [vmem:[#allocation7 + $0x1044] sm:$0xf]  ;;  %v11622_v29 = vor.u32 %v14215_v16, %v11619_v17  ;;  %7280 = vmatpush.bf16.msra.mxu3 %v12198_v28 }
 0x1b3   :  { %v11363_v26 = vld [vmem:[#allocation7 + $0x1060] sm:$0xf0] }
 0x1b4   :  { %v14287_v30 = vld [vmem:[#allocation7 + $0x1484] sm:$0xf]  ;;  %v11366_v41 = vor.u32 %v14151_v22, %v11363_v26  ;;  %7256 = vmatpush.bf16.msra.mxu1 %v11622_v29 }
 0x1b5   :  { %v11907_v31 = vld [vmem:[#allocation7 + $0x14a0] sm:$0xf0] }
 0x1b6   :  { %v14351_v32 = vld [vmem:[#allocation7 + $0x1684] sm:$0xf]  ;;  %v11910_v44 = vor.u32 %v14287_v30, %v11907_v31  ;;  %7243 = vmatpush.bf16.msra.mxu0 %v11366_v41  ;;  %v6988_v41 = vpop.f32.mrf.mxu0 }
 0x1b7   :  { %v12163_v36 = vld [vmem:[#allocation7 + $0x16a0] sm:$0xf0] }
 0x1b8   :  { %v14207_v37 = vld [vmem:[#allocation7 + $0x1204] sm:$0xf]  ;;  %v12166_v50 = vor.u32 %v14351_v32, %v12163_v36  ;;  %7268 = vmatpush.bf16.msra.mxu2 %v11910_v44 }
 0x1b9   :  { %v11587_v38 = vld [vmem:[#allocation7 + $0x1220] sm:$0xf0] }
 0x1ba   :  { %v14519_v42 = vld [vmem:[#allocation7 + $0x1bc4] sm:$0xf]  ;;  %v11590_v51 = vor.u32 %v14207_v37, %v11587_v38  ;;  %7281 = vmatpush.bf16.msra.mxu3 %v12166_v50 }
 0x1bb   :  { %v12835_v43 = vld [vmem:[#allocation7 + $0x1be0] sm:$0xf0] }
 0x1bc   :  { %v14143_v45 = vld [vmem:[#allocation7 + $0x1004] sm:$0xf]  ;;  %v12838_v59 = vor.u32 %v14519_v42, %v12835_v43  ;;  %7257 = vmatpush.bf16.msra.mxu1 %v11590_v51 }
 0x1bd   :  { %v11331_v46 = vld [vmem:[#allocation7 + $0x1020] sm:$0xf0] }
 0x1be   :  { %v14455_v48 = vld [vmem:[#allocation7 + $0x19c4] sm:$0xf]  ;;  %v11334_v2 = vor.u32 %v14143_v45, %v11331_v46 }
 0x1bf   :  { %v12579_v55 = vld [vmem:[#allocation7 + $0x19e0] sm:$0xf0]  ;;  %7258 = vmatmul.bf16.vlgmr.msra.gmra.mxu1 %v15077_v1 }
 0x1c0   :  { %v14279_v56 = vld [vmem:[#allocation7 + $0x1444] sm:$0xf]  ;;  %v12582_v7 = vor.u32 %v14455_v48, %v12579_v55  ;;  %7302 = vmatpush.bf16.msrb.mxu1 %v12838_v59  ;;  %7244 = vmatpush.bf16.msra.mxu0 %v11334_v2  ;;  %v7001_v48 = vpop.f32.mrf.mxu1  ;;  %v7012_v59 = vpop.f32.mrf.mxu2 }
 0x1c1   :  { %v11875_v57 = vld [vmem:[#allocation7 + $0x1460] sm:$0xf0] }
 0x1c2   :  { %v14343_v62 = vld [vmem:[#allocation7 + $0x1644] sm:$0xf]  ;;  %v11878_v8 = vor.u32 %v14279_v56, %v11875_v57 }
 0x1c3   :  { %v12131_v47 = vld [vmem:[#allocation7 + $0x1660] sm:$0xf0]  ;;  %7245 = vmatmul.bf16.vlgmr.msra.gmra.mxu0 %v15075_v54 }
 0x1c4   :  { %v14511_v3 = vld [vmem:[#allocation7 + $0x1b84] sm:$0xf]  ;;  %v12134_v14 = vor.u32 %v14343_v62, %v12131_v47  ;;  %7289 = vmatpush.bf16.msrb.mxu0 %v12582_v7  ;;  %7269 = vmatpush.bf16.msra.mxu2 %v11878_v8  ;;  %v7025_v62 = vpop.f32.mrf.mxu3 }
 0x1c5   :  { %v12803_v4 = vld [vmem:[#allocation7 + $0x1ba0] sm:$0xf0] }
 0x1c6   :  { %v14447_v10 = vld [vmem:[#allocation7 + $0x1984] sm:$0xf]  ;;  %v12806_v22 = vor.u32 %v14511_v3, %v12803_v4  ;;  %7282 = vmatpush.bf16.msra.mxu3 %v12134_v14  ;;  %v7013_v4 = vadd.f32 %v7012_v59, %v7000_v13 }
 0x1c7   :  { %v12547_v11 = vld [vmem:[#allocation7 + $0x19a0] sm:$0xf0] }
 0x1c8   :  { %v14271_v12 = vld [vmem:[#allocation7 + $0x1404] sm:$0xf]  ;;  %v12550_v33 = vor.u32 %v14447_v10, %v12547_v11  ;;  %7303 = vmatpush.bf16.msrb.mxu1 %v12806_v22 }
 0x1c9   :  { %v11843_v15 = vld [vmem:[#allocation7 + $0x1420] sm:$0xf0] }
 0x1ca   :  { %v14335_v16 = vld [vmem:[#allocation7 + $0x1604] sm:$0xf]  ;;  %v11846_v35 = vor.u32 %v14271_v12, %v11843_v15  ;;  %7290 = vmatpush.bf16.msrb.mxu0 %v12550_v33  ;;  %v7026_v12 = vadd.f32 %v7025_v62, %v7013_v4 }
 0x1cb   :  { %v12099_v17 = vld [vmem:[#allocation7 + $0x1620] sm:$0xf0] }
 0x1cc   :  { %v14583_v26 = vld [vmem:[#allocation7 + $0x1dc4] sm:$0xf]  ;;  %v12102_v36 = vor.u32 %v14335_v16, %v12099_v17  ;;  %7270 = vmatpush.bf16.msra.mxu2 %v11846_v35  ;;  %v7038_v17 = vpop.f32.mrf.mxu0  ;;  %v7027_v41 = vpop.f32.mrf.mxu3 }
 0x1cd   :  { %v13091_v28 = vld [vmem:[#allocation7 + $0x1de0] sm:$0xf0] }
 0x1ce   :  { %v14647_v29 = vld [vmem:[#allocation7 + $0x1fc4] sm:$0xf]  ;;  %v13094_v37 = vor.u32 %v14583_v26, %v13091_v28  ;;  %7283 = vmatpush.bf16.msra.mxu3 %v12102_v36  ;;  %v7039_v28 = vadd.f32 %v7038_v17, %v7026_v12 }
 0x1cf   :  { %v13347_v30 = vld [vmem:[#allocation7 + $0x1fe0] sm:$0xf0]  ;;  %7271 = vmatmul.bf16.vlgmr.msra.gmra.mxu2 %v15081_v20 }
 0x1d0   :  { %v14503_v31 = vld [vmem:[#allocation7 + $0x1b44] sm:$0xf]  ;;  %v13350_v42 = vor.u32 %v14647_v29, %v13347_v30  ;;  %7315 = vmatpush.bf16.msrb.mxu2 %v13094_v37 }
 0x1d1   :  { %v12771_v32 = vld [vmem:[#allocation7 + $0x1b60] sm:$0xf0]  ;;  %7284 = vmatmul.bf16.vlgmr.msra.gmra.mxu3 %v15083_v25 }
 0x1d2   :  { %v14439_v38 = vld [vmem:[#allocation7 + $0x1944] sm:$0xf]  ;;  %v12774_v43 = vor.u32 %v14503_v31, %v12771_v32  ;;  %7328 = vmatpush.bf16.msrb.mxu3 %v13350_v42  ;;  %v7051_v32 = vpop.f32.mrf.mxu1 }
 0x1d3   :  { %v12515_v39 = vld [vmem:[#allocation7 + $0x1960] sm:$0xf0]  ;;  %v7052_v35 = vadd.f32 %v7051_v32, %v7039_v28 }
 0x1d4   :  { %v14575_v44 = vld [vmem:[#allocation7 + $0x1d84] sm:$0xf]  ;;  %v12518_v55 = vor.u32 %v14439_v38, %v12515_v39  ;;  %7304 = vmatpush.bf16.msrb.mxu1 %v12774_v43  ;;  %v7014_v39 = vpop.f32.mrf.mxu2 }
 0x1d5   :  { %v13059_v45 = vld [vmem:[#allocation7 + $0x1da0] sm:$0xf0] }
 0x1d6   :  { %v14639_v46 = vld [vmem:[#allocation7 + $0x1f84] sm:$0xf]  ;;  %v13062_v56 = vor.u32 %v14575_v44, %v13059_v45  ;;  %7291 = vmatpush.bf16.msrb.mxu0 %v12518_v55 }
 0x1d7   :  { %v13315_v49 = vld [vmem:[#allocation7 + $0x1fa0] sm:$0xf0] }
 0x1d8   :  { %v14495_v50 = vld [vmem:[#allocation7 + $0x1b04] sm:$0xf]  ;;  %v13318_v47 = vor.u32 %v14639_v46, %v13315_v49  ;;  %7316 = vmatpush.bf16.msrb.mxu2 %v13062_v56 }
 0x1d9   :  { %v12739_v51 = vld [vmem:[#allocation7 + $0x1b20] sm:$0xf0] }
 0x1da   :  { %v14431_v57 = vld [vmem:[#allocation7 + $0x1904] sm:$0xf]  ;;  %v12742_v63 = vor.u32 %v14495_v50, %v12739_v51  ;;  %7329 = vmatpush.bf16.msrb.mxu3 %v13318_v47 }
 0x1db   :  { %v12483_v58 = vld [vmem:[#allocation7 + $0x1920] sm:$0xf0] }
 0x1dc   :  { %v14567_v0 = vld [vmem:[#allocation7 + $0x1d44] sm:$0xf]  ;;  %v12486_v11 = vor.u32 %v14431_v57, %v12483_v58  ;;  %7305 = vmatpush.bf16.msrb.mxu1 %v12742_v63  ;;  %v7064_v17 = vpop.f32.mrf.mxu2 }
 0x1dd   :  { %v13027_v2 = vld [vmem:[#allocation7 + $0x1d60] sm:$0xf0]  ;;  %v7065_v28 = vadd.f32 %v7064_v17, %v7052_v35 }
 0x1de   :  { %v14631_v3 = vld [vmem:[#allocation7 + $0x1f44] sm:$0xf]  ;;  %v13030_v14 = vor.u32 %v14567_v0, %v13027_v2  ;;  %7292 = vmatpush.bf16.msrb.mxu0 %v12486_v11  ;;  %v7040_v0 = vpop.f32.mrf.mxu0  ;;  %v7053_v11 = vpop.f32.mrf.mxu1 }
 0x1df   :  { %v13283_v7 = vld [vmem:[#allocation7 + $0x1f60] sm:$0xf0]  ;;  %v9449_v0 = vld [vmem:[#allocation7 + $0x148] sm:$0xf] }
 0x1e0   :  { %v14487_v8 = vld [vmem:[#allocation7 + $0x1ac4] sm:$0xf]  ;;  %v13286_v18 = vor.u32 %v14631_v3, %v13283_v7  ;;  %7317 = vmatpush.bf16.msrb.mxu2 %v13030_v14  ;;  %v10249_v11 = vld [vmem:[#allocation7 + $0x788] sm:$0xf] }
 0x1e1   :  { %v12707_v10 = vld [vmem:[#allocation7 + $0x1ae0] sm:$0xf0] }
 0x1e2   :  { %v14423_v15 = vld [vmem:[#allocation7 + $0x18c4] sm:$0xf]  ;;  %v12710_v21 = vor.u32 %v14487_v8, %v12707_v10  ;;  %7330 = vmatpush.bf16.msrb.mxu3 %v13286_v18  ;;  %v9769_v8 = vld [vmem:[#allocation7 + $0x3c8] sm:$0xf] }
 0x1e3   :  { %v12451_v16 = vld [vmem:[#allocation7 + $0x18e0] sm:$0xf0]  ;;  %v13756_v10 = vld [vmem:[#allocation7 + $0x3e4] sm:$0xf0] }
 0x1e4   :  { %v14559_v13 = vld [vmem:[#allocation7 + $0x1d04] sm:$0xf]  ;;  %v12454_v33 = vor.u32 %v14423_v15, %v12451_v16  ;;  %7306 = vmatpush.bf16.msrb.mxu1 %v12710_v21  ;;  %v9513_v16 = vld [vmem:[#allocation7 + $0x1c8] sm:$0xf] }
 0x1e5   :  { %v12995_v22 = vld [vmem:[#allocation7 + $0x1d20] sm:$0xf0] }
 0x1e6   :  { %v14623_v26 = vld [vmem:[#allocation7 + $0x1f04] sm:$0xf]  ;;  %v12998_v36 = vor.u32 %v14559_v13, %v12995_v22  ;;  %7293 = vmatpush.bf16.msrb.mxu0 %v12454_v33  ;;  %v13692_v13 = vld [vmem:[#allocation7 + $0x1e4] sm:$0xf0] }
 0x1e7   :  { %v13251_v29 = vld [vmem:[#allocation7 + $0x1f20] sm:$0xf0]  ;;  %v9514_v39 = vor.u32 %v13692_v13, %v9513_v16  ;;  %v13732_v16 = vld [vmem:[#allocation7 + $0x324] sm:$0xf0] }
 0x1e8   :  { %v14479_v30 = vld [vmem:[#allocation7 + $0x1a84] sm:$0xf]  ;;  %v13254_v42 = vor.u32 %v14623_v26, %v13251_v29  ;;  %7318 = vmatpush.bf16.msrb.mxu2 %v12998_v36  ;;  %v7077_v29 = vpop.f32.mrf.mxu3  ;;  %v9737_v36 = vld [vmem:[#allocation7 + $0x388] sm:$0xf] }
 0x1e9   :  { %v12675_v31 = vld [vmem:[#allocation7 + $0x1aa0] sm:$0xf0]  ;;  %v13668_v13 = vld [vmem:[#allocation7 + $0x124] sm:$0xf0] }
 0x1ea   :  { %v14415_v37 = vld [vmem:[#allocation7 + $0x1884] sm:$0xf]  ;;  %v12678_v43 = vor.u32 %v14479_v30, %v12675_v31  ;;  %7331 = vmatpush.bf16.msrb.mxu3 %v13254_v42  ;;  %v9770_v30 = vor.u32 %v13756_v10, %v9769_v8  ;;  %v9481_v42 = vld [vmem:[#allocation7 + $0x188] sm:$0xf] }
 0x1eb   :  { %v12419_v38 = vld [vmem:[#allocation7 + $0x18a0] sm:$0xf0]  ;;  %v9993_v8 = vld [vmem:[#allocation7 + $0x588] sm:$0xf] }
 0x1ec   :  { %v14551_v44 = vld [vmem:[#allocation7 + $0x1cc4] sm:$0xf]  ;;  %v12422_v51 = vor.u32 %v14415_v37, %v12419_v38  ;;  %7307 = vmatpush.bf16.msrb.mxu1 %v12678_v43  ;;  %v13748_v37 = vld [vmem:[#allocation7 + $0x3a4] sm:$0xf0]  ;;  %v15114_v38 = vadd.f32 %v7077_v29, %v7065_v28 }
 0x1ed   :  { %v12963_v45 = vld [vmem:[#allocation7 + $0x1ce0] sm:$0xf0]  ;;  %v13684_v43 = vld [vmem:[#allocation7 + $0x1a4] sm:$0xf0] }
 0x1ee   :  { %v14615_v46 = vld [vmem:[#allocation7 + $0x1ec4] sm:$0xf]  ;;  %v12966_v55 = vor.u32 %v14551_v44, %v12963_v45  ;;  %7294 = vmatpush.bf16.msrb.mxu0 %v12422_v51  ;;  %v13820_v51 = vld [vmem:[#allocation7 + $0x5e4] sm:$0xf0] }
 0x1ef   :  { %v13219_v48 = vld [vmem:[#allocation7 + $0x1ee0] sm:$0xf0]  ;;  %v13812_v10 = vld [vmem:[#allocation7 + $0x5a4] sm:$0xf0] }
 0x1f0   :  { %v14471_v49 = vld [vmem:[#allocation7 + $0x1a44] sm:$0xf]  ;;  %v13222_v58 = vor.u32 %v14615_v46, %v13219_v48  ;;  %7319 = vmatpush.bf16.msrb.mxu2 %v12966_v55  ;;  %v10281_v55 = vld [vmem:[#allocation7 + $0x7c8] sm:$0xf] }
 0x1f1   :  { %v12643_v50 = vld [vmem:[#allocation7 + $0x1a60] sm:$0xf0]  ;;  %v9961_v28 = vld [vmem:[#allocation7 + $0x548] sm:$0xf] }
 0x1f2   :  { %v14407_v56 = vld [vmem:[#allocation7 + $0x1844] sm:$0xf]  ;;  %v12646_v59 = vor.u32 %v14471_v49, %v12643_v50  ;;  %7332 = vmatpush.bf16.msrb.mxu3 %v13222_v58  ;;  %v9738_v49 = vor.u32 %v13748_v37, %v9737_v36  ;;  %v10025_v50 = vld [vmem:[#allocation7 + $0x5c8] sm:$0xf] }
 0x1f3   :  { %v12387_v57 = vld [vmem:[#allocation7 + $0x1860] sm:$0xf0]  ;;  %v13740_v58 = vld [vmem:[#allocation7 + $0x364] sm:$0xf0] }
 0x1f4   :  { %v14543_v62 = vld [vmem:[#allocation7 + $0x1c84] sm:$0xf]  ;;  %v12390_v7 = vor.u32 %v14407_v56, %v12387_v57  ;;  %7308 = vmatpush.bf16.msrb.mxu1 %v12646_v59  ;;  %v13884_v56 = vld [vmem:[#allocation7 + $0x7e4] sm:$0xf0]  ;;  %v9482_v59 = vor.u32 %v13684_v43, %v9481_v42  ;;  %v7090_v42 = vpop.f32.mrf.mxu0  ;;  %v7103_v43 = vpop.f32.mrf.mxu1 }
 0x1f5   :  { %v12931_v47 = vld [vmem:[#allocation7 + $0x1ca0] sm:$0xf0]  ;;  %v9705_v57 = vld [vmem:[#allocation7 + $0x348] sm:$0xf] }
 0x1f6   :  { %v14607_v63 = vld [vmem:[#allocation7 + $0x1e84] sm:$0xf]  ;;  %v12934_v12 = vor.u32 %v14543_v62, %v12931_v47  ;;  %7295 = vmatpush.bf16.msrb.mxu0 %v12390_v7  ;;  %v9706_v7 = vor.u32 %v13740_v58, %v9705_v57  ;;  %v13804_v29 = vld [vmem:[#allocation7 + $0x564] sm:$0xf0] }
 0x1f7   :  { %v13187_v2 = vld [vmem:[#allocation7 + $0x1ea0] sm:$0xf0]  ;;  %v9962_v37 = vor.u32 %v13804_v29, %v9961_v28  ;;  %v13700_v28 = vld [vmem:[#allocation7 + $0x224] sm:$0xf0] }
 0x1f8   :  { %v14463_v3 = vld [vmem:[#allocation7 + $0x1a04] sm:$0xf]  ;;  %v13190_v18 = vor.u32 %v14607_v63, %v13187_v2  ;;  %7320 = vmatpush.bf16.msrb.mxu2 %v12934_v12  ;;  %v10026_v63 = vor.u32 %v13820_v51, %v10025_v50  ;;  %v13676_v2 = vld [vmem:[#allocation7 + $0x164] sm:$0xf0]  ;;  %v7079_v12 = vpop.f32.mrf.mxu3 }
 0x1f9   :  { %v12611_v4 = vld [vmem:[#allocation7 + $0x1a20] sm:$0xf0]  ;;  %v9450_v17 = vor.u32 %v13676_v2, %v9449_v0  ;;  %v13860_v50 = vld [vmem:[#allocation7 + $0x724] sm:$0xf0] }
 0x1fa   :  { %v14399_v14 = vld [vmem:[#allocation7 + $0x1804] sm:$0xf]  ;;  %v12614_v21 = vor.u32 %v14463_v3, %v12611_v4  ;;  %7333 = vmatpush.bf16.msrb.mxu3 %v13190_v18  ;;  %v7066_v3 = vpop.f32.mrf.mxu2  ;;  %v10282_v4 = vor.u32 %v13884_v56, %v10281_v55  ;;  %v9994_v18 = vor.u32 %v13812_v10, %v9993_v8  ;;  %v9609_v51 = vld [vmem:[#allocation7 + $0x288] sm:$0xf] }
 0x1fb   :  { %v12355_v15 = vld [vmem:[#allocation7 + $0x1820] sm:$0xf0]  ;;  %v13716_v55 = vld [vmem:[#allocation7 + $0x2a4] sm:$0xf0] }
 0x1fc   :  { %v14535_v22 = vld [vmem:[#allocation7 + $0x1c44] sm:$0xf]  ;;  %v12358_v33 = vor.u32 %v14399_v14, %v12355_v15  ;;  %7309 = vmatpush.bf16.msrb.mxu1 %v12614_v21  ;;  %v13876_v14 = vld [vmem:[#allocation7 + $0x7a4] sm:$0xf0] }
 0x1fd   :  { %v12899_v26 = vld [vmem:[#allocation7 + $0x1c60] sm:$0xf0]  ;;  %v9673_v15 = vld [vmem:[#allocation7 + $0x308] sm:$0xf] }
 0x1fe   :  { %v14599_v31 = vld [vmem:[#allocation7 + $0x1e44] sm:$0xf]  ;;  %v12902_v41 = vor.u32 %v14535_v22, %v12899_v26  ;;  %7296 = vmatpush.bf16.msrb.mxu0 %v12358_v33  ;;  %v9417_v21 = vld [vmem:[#allocation7 + $0x108] sm:$0xf]  ;;  %v10250_v22 = vor.u32 %v13876_v14, %v10249_v11  ;;  %v9674_v26 = vor.u32 %v13732_v16, %v9673_v15 }
 0x1ff   :  { %v13155_v32 = vld [vmem:[#allocation7 + $0x1e60] sm:$0xf0]  ;;  %7310 = vmatmul.bf16.vlgmr.msrb.gmra.mxu1 %v15089_v53  ;;  %v13724_v33 = vld [vmem:[#allocation7 + $0x2e4] sm:$0xf0]  ;;  %v9418_v36 = vor.u32 %v13668_v13, %v9417_v21  ;;  %v7092_v21 = vpop.f32.mrf.mxu0  ;;  %v7105_v13 = vpop.f32.mrf.mxu1 }
 0x200   :  { %v14527_v44 = vld [vmem:[#allocation7 + $0x1c04] sm:$0xf]  ;;  %v13158_v45 = vor.u32 %v14599_v31, %v13155_v32  ;;  %7354 = vmatpush.bf16.msra.mxu1 %v9770_v30  ;;  %7321 = vmatpush.bf16.msrb.mxu2 %v12902_v41  ;;  %v10217_v30 = vld [vmem:[#allocation7 + $0x748] sm:$0xf] }
 0x201   :  { %v12867_v35 = vld [vmem:[#allocation7 + $0x1c20] sm:$0xf0]  ;;  %7297 = vmatmul.bf16.vlgmr.msrb.gmra.mxu0 %v15087_v52  ;;  %v13868_v31 = vld [vmem:[#allocation7 + $0x764] sm:$0xf0] }
 0x202   :  { %v14591_v46 = vld [vmem:[#allocation7 + $0x1e04] sm:$0xf]  ;;  %7341 = vmatpush.bf16.msra.mxu0 %v9514_v39  ;;  %v12870_v62 = vor.u32 %v14527_v44, %v12867_v35  ;;  %7334 = vmatpush.bf16.msrb.mxu3 %v13158_v45  ;;  %v9641_v32 = vld [vmem:[#allocation7 + $0x2c8] sm:$0xf]  ;;  %v10218_v44 = vor.u32 %v13868_v31, %v10217_v30 }
 0x203   :  { %v13123_v48 = vld [vmem:[#allocation7 + $0x1e20] sm:$0xf0]  ;;  %v9385_v39 = vld [vmem:[#allocation7 + $0xc8] sm:$0xf]  ;;  %v9642_v45 = vor.u32 %v13724_v33, %v9641_v32 }
 0x204   :  { %v13126_v47 = vor.u32 %v14591_v46, %v13123_v48  ;;  %7355 = vmatpush.bf16.msra.mxu1 %v9738_v49  ;;  %7322 = vmatpush.bf16.msrb.mxu2 %v12870_v62  ;;  %v13660_v41 = vld [vmem:[#allocation7 + $0xe4] sm:$0xf0]  ;;  %v7091_v49 = vadd.f32 %v7090_v42, %v15114_v38 }
 0x205   :  { %v9929_v35 = vld [vmem:[#allocation7 + $0x508] sm:$0xf]  ;;  %v9386_v56 = vor.u32 %v13660_v41, %v9385_v39  ;;  %v7116_v39 = vpop.f32.mrf.mxu2 }
 0x206   :  { %7342 = vmatpush.bf16.msra.mxu0 %v9482_v59  ;;  %7335 = vmatpush.bf16.msrb.mxu3 %v13126_v47  ;;  %v13796_v46 = vld [vmem:[#allocation7 + $0x524] sm:$0xf0]  ;;  %v7104_v57 = vadd.f32 %v7103_v43, %v7091_v49 }
 0x207   :  { %7323 = vmatmul.bf16.vlgmr.msrb.gmra.mxu2 %v15093_v19  ;;  %v10185_v48 = vld [vmem:[#allocation7 + $0x708] sm:$0xf]  ;;  %v9930_v58 = vor.u32 %v13796_v46, %v9929_v35  ;;  %v7129_v46 = vpop.f32.mrf.mxu3 }
 0x208   :  { %7367 = vmatpush.bf16.msra.mxu2 %v10026_v63  ;;  %7356 = vmatpush.bf16.msra.mxu1 %v9706_v7  ;;  %v9353_v59 = vld [vmem:[#allocation7 + $0x88] sm:$0xf]  ;;  %v10186_v47 = vor.u32 %v13860_v50, %v10185_v48  ;;  %v9610_v63 = vor.u32 %v13716_v55, %v9609_v51  ;;  %v7117_v35 = vadd.f32 %v7116_v39, %v7104_v57 }
 0x209   :  { %7336 = vmatmul.bf16.vlgmr.msrb.gmra.mxu3 %v15095_v27  ;;  %v13652_v62 = vld [vmem:[#allocation7 + $0xa4] sm:$0xf0] }
 0x20a   :  { %7380 = vmatpush.bf16.msra.mxu3 %v10282_v4  ;;  %7343 = vmatpush.bf16.msra.mxu0 %v9450_v17  ;;  %v9897_v0 = vld [vmem:[#allocation7 + $0x4c8] sm:$0xf]  ;;  %v9354_v8 = vor.u32 %v13652_v62, %v9353_v59 }
 0x20b   :  { %v13788_v2 = vld [vmem:[#allocation7 + $0x4e4] sm:$0xf0] }
 0x20c   :  { %7368 = vmatpush.bf16.msra.mxu2 %v9994_v18  ;;  %7357 = vmatpush.bf16.msra.mxu1 %v9674_v26  ;;  %v10153_v3 = vld [vmem:[#allocation7 + $0x6c8] sm:$0xf]  ;;  %v9898_v10 = vor.u32 %v13788_v2, %v9897_v0 }
 0x20d   :  { %v13852_v4 = vld [vmem:[#allocation7 + $0x6e4] sm:$0xf0] }
 0x20e   :  { %7381 = vmatpush.bf16.msra.mxu3 %v10250_v22  ;;  %7344 = vmatpush.bf16.msra.mxu0 %v9418_v36  ;;  %v9577_v7 = vld [vmem:[#allocation7 + $0x248] sm:$0xf]  ;;  %v10154_v14 = vor.u32 %v13852_v4, %v10153_v3 }
 0x20f   :  { %v13708_v38 = vld [vmem:[#allocation7 + $0x264] sm:$0xf0] }
 0x210   :  { %7369 = vmatpush.bf16.msra.mxu2 %v9962_v37  ;;  %7358 = vmatpush.bf16.msra.mxu1 %v9642_v45  ;;  %v9321_v11 = vld [vmem:[#allocation7 + $0x48] sm:$0xf]  ;;  %v9578_v15 = vor.u32 %v13708_v38, %v9577_v7 }
 0x211   :  { %v13644_v12 = vld [vmem:[#allocation7 + $0x64] sm:$0xf0] }
 0x212   :  { %7382 = vmatpush.bf16.msra.mxu3 %v10218_v44  ;;  %7345 = vmatpush.bf16.msra.mxu0 %v9386_v56  ;;  %v9865_v16 = vld [vmem:[#allocation7 + $0x488] sm:$0xf]  ;;  %v9322_v29 = vor.u32 %v13644_v12, %v9321_v11 }
 0x213   :  { %v13780_v17 = vld [vmem:[#allocation7 + $0x4a4] sm:$0xf0] }
 0x214   :  { %7370 = vmatpush.bf16.msra.mxu2 %v9930_v58  ;;  %7359 = vmatpush.bf16.msra.mxu1 %v9610_v63  ;;  %v10121_v18 = vld [vmem:[#allocation7 + $0x688] sm:$0xf]  ;;  %v9866_v32 = vor.u32 %v13780_v17, %v9865_v16  ;;  %v15121_v58 = vadd.f32 %v7129_v46, %v7117_v35 }
 0x215   :  { %v13844_v22 = vld [vmem:[#allocation7 + $0x6a4] sm:$0xf0] }
 0x216   :  { %7383 = vmatpush.bf16.msra.mxu3 %v10186_v47  ;;  %v9545_v26 = vld [vmem:[#allocation7 + $0x208] sm:$0xf]  ;;  %7346 = vmatpush.bf16.msra.mxu0 %v9354_v8  ;;  %v10122_v41 = vor.u32 %v13844_v22, %v10121_v18  ;;  %v7118_v22 = vpop.f32.mrf.mxu2 }
 0x217   :  { %v10793_v30 = vld [vmem:[#allocation7 + $0xbc8] sm:$0xf]  ;;  %v9546_v42 = vor.u32 %v13700_v28, %v9545_v26 }
 0x218   :  { %v14012_v31 = vld [vmem:[#allocation7 + $0xbe4] sm:$0xf0]  ;;  %7371 = vmatpush.bf16.msra.mxu2 %v9898_v10  ;;  %7360 = vmatpush.bf16.msra.mxu1 %v9578_v15 }
 0x219   :  { %v9289_v33 = vld [vmem:[#allocation7 + $0x8] sm:$0xf]  ;;  %v10794_v48 = vor.u32 %v14012_v31, %v10793_v30 }
 0x21a   :  { %v13636_v36 = vld [vmem:[#allocation7 + $0x24] sm:$0xf0]  ;;  %7384 = vmatpush.bf16.msra.mxu3 %v10154_v14  ;;  %7347 = vmatpush.bf16.msra.mxu0 %v9322_v29 }
 0x21b   :  { %v10537_v37 = vld [vmem:[#allocation7 + $0x9c8] sm:$0xf]  ;;  %v9290_v51 = vor.u32 %v13636_v36, %v9289_v33 }
 0x21c   :  { %v13948_v43 = vld [vmem:[#allocation7 + $0x9e4] sm:$0xf0]  ;;  %7372 = vmatpush.bf16.msra.mxu2 %v9866_v32  ;;  %7361 = vmatpush.bf16.msra.mxu1 %v9546_v42  ;;  %v7131_v32 = vpop.f32.mrf.mxu3  ;;  %v1734_v42 = vperm.slane %v15103_v9, 1 }
 0x21d   :  { %v9833_v44 = vld [vmem:[#allocation7 + $0x448] sm:$0xf]  ;;  %v10538_v59 = vor.u32 %v13948_v43, %v10537_v37 }
 0x21e   :  { %v13772_v45 = vld [vmem:[#allocation7 + $0x464] sm:$0xf0]  ;;  %7385 = vmatpush.bf16.msra.mxu3 %v10122_v41  ;;  %7348 = vmatpush.bf16.msra.mxu0 %v9290_v51 }
 0x21f   :  { %v10089_v49 = vld [vmem:[#allocation7 + $0x648] sm:$0xf]  ;;  %v9834_v62 = vor.u32 %v13772_v45, %v9833_v44  ;;  %7362 = vmatmul.bf16.vlgmr.msra.gmra.mxu1 %v15053_v24 }
 0x220   :  { %v13836_v50 = vld [vmem:[#allocation7 + $0x664] sm:$0xf0]  ;;  %7406 = vmatpush.bf16.msrb.mxu1 %v10794_v48 }
 0x221   :  { %v10761_v55 = vld [vmem:[#allocation7 + $0xb88] sm:$0xf]  ;;  %v10090_v2 = vor.u32 %v13836_v50, %v10089_v49  ;;  %7373 = vmatpush.bf16.msra.mxu2 %v9834_v62  ;;  %7349 = vmatmul.bf16.vlgmr.msra.gmra.mxu0 %v15051_v23 }
 0x222   :  { %v14004_v56 = vld [vmem:[#allocation7 + $0xba4] sm:$0xf0]  ;;  %7393 = vmatpush.bf16.msrb.mxu0 %v10538_v59 }
 0x223   :  { %v10505_v47 = vld [vmem:[#allocation7 + $0x988] sm:$0xf]  ;;  %v10762_v7 = vor.u32 %v14004_v56, %v10761_v55  ;;  %7386 = vmatpush.bf16.msra.mxu3 %v10090_v2 }
 0x224   :  { %v13940_v63 = vld [vmem:[#allocation7 + $0x9a4] sm:$0xf0] }
 0x225   :  { %v9801_v0 = vld [vmem:[#allocation7 + $0x408] sm:$0xf]  ;;  %v10506_v15 = vor.u32 %v13940_v63, %v10505_v47  ;;  %7407 = vmatpush.bf16.msrb.mxu1 %v10762_v7  ;;  %v7142_v47 = vpop.f32.mrf.mxu0  ;;  %v7155_v63 = vpop.f32.mrf.mxu1 }
 0x226   :  { %v13764_v57 = vld [vmem:[#allocation7 + $0x424] sm:$0xf0]  ;;  %v7143_v7 = vadd.f32 %v7142_v47, %v1734_v42 }
 0x227   :  { %v10057_v3 = vld [vmem:[#allocation7 + $0x608] sm:$0xf]  ;;  %v9802_v16 = vor.u32 %v13764_v57, %v9801_v0  ;;  %7394 = vmatpush.bf16.msrb.mxu0 %v10506_v15 }
 0x228   :  { %v13828_v4 = vld [vmem:[#allocation7 + $0x624] sm:$0xf0] }
 0x229   :  { %v11049_v38 = vld [vmem:[#allocation7 + $0xdc8] sm:$0xf]  ;;  %v10058_v17 = vor.u32 %v13828_v4, %v10057_v3  ;;  %7374 = vmatpush.bf16.msra.mxu2 %v9802_v16 }
 0x22a   :  { %v14076_v8 = vld [vmem:[#allocation7 + $0xde4] sm:$0xf0] }
 0x22b   :  { %v11305_v10 = vld [vmem:[#allocation7 + $0xfc8] sm:$0xf]  ;;  %v11050_v18 = vor.u32 %v14076_v8, %v11049_v38  ;;  %7387 = vmatpush.bf16.msra.mxu3 %v10058_v17 }
 0x22c   :  { %v14140_v11 = vld [vmem:[#allocation7 + $0xfe4] sm:$0xf0]  ;;  %7375 = vmatmul.bf16.vlgmr.msra.gmra.mxu2 %v15057_v60 }
 0x22d   :  { %v10729_v12 = vld [vmem:[#allocation7 + $0xb48] sm:$0xf]  ;;  %v11306_v26 = vor.u32 %v14140_v11, %v11305_v10  ;;  %7419 = vmatpush.bf16.msrb.mxu2 %v11050_v18 }
 0x22e   :  { %v13996_v14 = vld [vmem:[#allocation7 + $0xb64] sm:$0xf0]  ;;  %7388 = vmatmul.bf16.vlgmr.msra.gmra.mxu3 %v15059_v61 }
 0x22f   :  { %v10473_v21 = vld [vmem:[#allocation7 + $0x948] sm:$0xf]  ;;  %v10730_v28 = vor.u32 %v13996_v14, %v10729_v12  ;;  %7432 = vmatpush.bf16.msrb.mxu3 %v11306_v26  ;;  %v7156_v12 = vadd.f32 %v7155_v63, %v7143_v7 }
 0x230   :  { %v13932_v13 = vld [vmem:[#allocation7 + $0x964] sm:$0xf0] }
 0x231   :  { %v11017_v29 = vld [vmem:[#allocation7 + $0xd88] sm:$0xf]  ;;  %v10474_v39 = vor.u32 %v13932_v13, %v10473_v21  ;;  %7408 = vmatpush.bf16.msrb.mxu1 %v10730_v28 }
 0x232   :  { %v14068_v30 = vld [vmem:[#allocation7 + $0xda4] sm:$0xf0] }
 0x233   :  { %v11273_v31 = vld [vmem:[#allocation7 + $0xf88] sm:$0xf]  ;;  %v11018_v41 = vor.u32 %v14068_v30, %v11017_v29  ;;  %7395 = vmatpush.bf16.msrb.mxu0 %v10474_v39 }
 0x234   :  { %v14132_v33 = vld [vmem:[#allocation7 + $0xfa4] sm:$0xf0] }
 0x235   :  { %v10697_v36 = vld [vmem:[#allocation7 + $0xb08] sm:$0xf]  ;;  %v11274_v45 = vor.u32 %v14132_v33, %v11273_v31  ;;  %7420 = vmatpush.bf16.msrb.mxu2 %v11018_v41 }
 0x236   :  { %v13988_v37 = vld [vmem:[#allocation7 + $0xb24] sm:$0xf0] }
 0x237   :  { %v10441_v43 = vld [vmem:[#allocation7 + $0x908] sm:$0xf]  ;;  %v10698_v35 = vor.u32 %v13988_v37, %v10697_v36  ;;  %7433 = vmatpush.bf16.msrb.mxu3 %v11274_v45  ;;  %v7144_v36 = vpop.f32.mrf.mxu0  ;;  %v7157_v37 = vpop.f32.mrf.mxu1 }
 0x238   :  { %v13924_v44 = vld [vmem:[#allocation7 + $0x924] sm:$0xf0] }
 0x239   :  { %v10985_v46 = vld [vmem:[#allocation7 + $0xd48] sm:$0xf]  ;;  %v10442_v56 = vor.u32 %v13924_v44, %v10441_v43  ;;  %7409 = vmatpush.bf16.msrb.mxu1 %v10698_v35 }
 0x23a   :  { %v14060_v48 = vld [vmem:[#allocation7 + $0xd64] sm:$0xf0] }
 0x23b   :  { %v11241_v49 = vld [vmem:[#allocation7 + $0xf48] sm:$0xf]  ;;  %v10986_v9 = vor.u32 %v14060_v48, %v10985_v46  ;;  %7396 = vmatpush.bf16.msrb.mxu0 %v10442_v56 }
 0x23c   :  { %v14124_v50 = vld [vmem:[#allocation7 + $0xf64] sm:$0xf0] }
 0x23d   :  { %v10665_v51 = vld [vmem:[#allocation7 + $0xac8] sm:$0xf]  ;;  %v11242_v0 = vor.u32 %v14124_v50, %v11241_v49  ;;  %7421 = vmatpush.bf16.msrb.mxu2 %v10986_v9 }
 0x23e   :  { %v13980_v55 = vld [vmem:[#allocation7 + $0xae4] sm:$0xf0] }
 0x23f   :  { %v10409_v59 = vld [vmem:[#allocation7 + $0x8c8] sm:$0xf]  ;;  %v10666_v2 = vor.u32 %v13980_v55, %v10665_v51  ;;  %7434 = vmatpush.bf16.msrb.mxu3 %v11242_v0 }
 0x240   :  { %v13916_v62 = vld [vmem:[#allocation7 + $0x8e4] sm:$0xf0] }
 0x241   :  { %v10953_v57 = vld [vmem:[#allocation7 + $0xd08] sm:$0xf]  ;;  %v10410_v11 = vor.u32 %v13916_v62, %v10409_v59  ;;  %7410 = vmatpush.bf16.msrb.mxu1 %v10666_v2  ;;  %v7168_v59 = vpop.f32.mrf.mxu2  ;;  %v7181_v62 = vpop.f32.mrf.mxu3 }
 0x242   :  { %v14052_v3 = vld [vmem:[#allocation7 + $0xd24] sm:$0xf0] }
 0x243   :  { %v11209_v4 = vld [vmem:[#allocation7 + $0xf08] sm:$0xf]  ;;  %v10954_v14 = vor.u32 %v14052_v3, %v10953_v57  ;;  %7397 = vmatpush.bf16.msrb.mxu0 %v10410_v11  ;;  %v7169_v3 = vadd.f32 %v7168_v59, %v7156_v12 }
 0x244   :  { %v14116_v38 = vld [vmem:[#allocation7 + $0xf24] sm:$0xf0] }
 0x245   :  { %v10633_v8 = vld [vmem:[#allocation7 + $0xa88] sm:$0xf]  ;;  %v11210_v17 = vor.u32 %v14116_v38, %v11209_v4  ;;  %7422 = vmatpush.bf16.msrb.mxu2 %v10954_v14  ;;  %v15128_v14 = vadd.f32 %v7181_v62, %v7169_v3 }
 0x246   :  { %v13972_v10 = vld [vmem:[#allocation7 + $0xaa4] sm:$0xf0] }
 0x247   :  { %v10377_v15 = vld [vmem:[#allocation7 + $0x888] sm:$0xf]  ;;  %v10634_v18 = vor.u32 %v13972_v10, %v10633_v8  ;;  %7435 = vmatpush.bf16.msrb.mxu3 %v11210_v17 }
 0x248   :  { %v13908_v16 = vld [vmem:[#allocation7 + $0x8a4] sm:$0xf0] }
 0x249   :  { %v10921_v21 = vld [vmem:[#allocation7 + $0xcc8] sm:$0xf]  ;;  %v10378_v30 = vor.u32 %v13908_v16, %v10377_v15  ;;  %7411 = vmatpush.bf16.msrb.mxu1 %v10634_v18 }
 0x24a   :  { %v14044_v13 = vld [vmem:[#allocation7 + $0xce4] sm:$0xf0] }
 0x24b   :  { %v11177_v22 = vld [vmem:[#allocation7 + $0xec8] sm:$0xf]  ;;  %v10922_v31 = vor.u32 %v14044_v13, %v10921_v21  ;;  %7398 = vmatpush.bf16.msrb.mxu0 %v10378_v30 }
 0x24c   :  { %v14108_v26 = vld [vmem:[#allocation7 + $0xee4] sm:$0xf0] }
 0x24d   :  { %v10601_v28 = vld [vmem:[#allocation7 + $0xa48] sm:$0xf]  ;;  %v11178_v39 = vor.u32 %v14108_v26, %v11177_v22  ;;  %7423 = vmatpush.bf16.msrb.mxu2 %v10922_v31 }
 0x24e   :  { %v13964_v29 = vld [vmem:[#allocation7 + $0xa64] sm:$0xf0] }
 0x24f   :  { %v10345_v32 = vld [vmem:[#allocation7 + $0x848] sm:$0xf]  ;;  %v10602_v41 = vor.u32 %v13964_v29, %v10601_v28  ;;  %7436 = vmatpush.bf16.msrb.mxu3 %v11178_v39 }
 0x250   :  { %v13900_v33 = vld [vmem:[#allocation7 + $0x864] sm:$0xf0] }
 0x251   :  { %v10889_v42 = vld [vmem:[#allocation7 + $0xc88] sm:$0xf]  ;;  %v10346_v48 = vor.u32 %v13900_v33, %v10345_v32  ;;  %7412 = vmatpush.bf16.msrb.mxu1 %v10602_v41  ;;  %v7170_v41 = vpop.f32.mrf.mxu2 }
 0x252   :  { %v14036_v43 = vld [vmem:[#allocation7 + $0xca4] sm:$0xf0] }
 0x253   :  { %v11145_v44 = vld [vmem:[#allocation7 + $0xe88] sm:$0xf]  ;;  %v10890_v51 = vor.u32 %v14036_v43, %v10889_v42  ;;  %7399 = vmatpush.bf16.msrb.mxu0 %v10346_v48  ;;  %v7183_v42 = vpop.f32.mrf.mxu3 }
 0x254   :  { %v14100_v45 = vld [vmem:[#allocation7 + $0xea4] sm:$0xf0] }
 0x255   :  { %v10569_v35 = vld [vmem:[#allocation7 + $0xa08] sm:$0xf]  ;;  %v11146_v47 = vor.u32 %v14100_v45, %v11145_v44  ;;  %7424 = vmatpush.bf16.msrb.mxu2 %v10890_v51 }
 0x256   :  { %v13956_v46 = vld [vmem:[#allocation7 + $0xa24] sm:$0xf0] }
 0x257   :  { %v11817_v49 = vld [vmem:[#allocation7 + $0x13c8] sm:$0xf]  ;;  %v10570_v63 = vor.u32 %v13956_v46, %v10569_v35  ;;  %7437 = vmatpush.bf16.msrb.mxu3 %v11146_v47 }
 0x258   :  { %v14268_v50 = vld [vmem:[#allocation7 + $0x13e4] sm:$0xf0] }
 0x259   :  { %v10313_v55 = vld [vmem:[#allocation7 + $0x808] sm:$0xf]  ;;  %v11818_v4 = vor.u32 %v14268_v50, %v11817_v49  ;;  %7413 = vmatpush.bf16.msrb.mxu1 %v10570_v63 }
 0x25a   :  { %v13892_v56 = vld [vmem:[#allocation7 + $0x824] sm:$0xf0] }
 0x25b   :  { %v11561_v9 = vld [vmem:[#allocation7 + $0x11c8] sm:$0xf]  ;;  %v10314_v8 = vor.u32 %v13892_v56, %v10313_v55 }
 0x25c   :  { %v14204_v0 = vld [vmem:[#allocation7 + $0x11e4] sm:$0xf0]  ;;  %7414 = vmatmul.bf16.vlgmr.msrb.gmra.mxu1 %v15065_v40 }
 0x25d   :  { %v10857_v2 = vld [vmem:[#allocation7 + $0xc48] sm:$0xf]  ;;  %v11562_v15 = vor.u32 %v14204_v0, %v11561_v9  ;;  %7458 = vmatpush.bf16.msra.mxu1 %v11818_v4  ;;  %7400 = vmatpush.bf16.msrb.mxu0 %v10314_v8 }
 0x25e   :  { %v14028_v57 = vld [vmem:[#allocation7 + $0xc64] sm:$0xf0] }
 0x25f   :  { %v11113_v7 = vld [vmem:[#allocation7 + $0xe48] sm:$0xf]  ;;  %v10858_v16 = vor.u32 %v14028_v57, %v10857_v2 }
 0x260   :  { %v14092_v38 = vld [vmem:[#allocation7 + $0xe64] sm:$0xf0]  ;;  %7401 = vmatmul.bf16.vlgmr.msrb.gmra.mxu0 %v15063_v34 }
 0x261   :  { %v11785_v10 = vld [vmem:[#allocation7 + $0x1388] sm:$0xf]  ;;  %v11114_v13 = vor.u32 %v14092_v38, %v11113_v7  ;;  %7445 = vmatpush.bf16.msra.mxu0 %v11562_v15  ;;  %7425 = vmatpush.bf16.msrb.mxu2 %v10858_v16 }
 0x262   :  { %v14260_v11 = vld [vmem:[#allocation7 + $0x13a4] sm:$0xf0] }
 0x263   :  { %v11529_v17 = vld [vmem:[#allocation7 + $0x1188] sm:$0xf]  ;;  %v11786_v28 = vor.u32 %v14260_v11, %v11785_v10  ;;  %7438 = vmatpush.bf16.msrb.mxu3 %v11114_v13 }
 0x264   :  { %v14196_v18 = vld [vmem:[#allocation7 + $0x11a4] sm:$0xf0] }
 0x265   :  { %v10825_v21 = vld [vmem:[#allocation7 + $0xc08] sm:$0xf]  ;;  %v11530_v37 = vor.u32 %v14196_v18, %v11529_v17  ;;  %7459 = vmatpush.bf16.msra.mxu1 %v11786_v28  ;;  %v7207_v17 = vpop.f32.mrf.mxu1 }
 0x266   :  { %v14020_v22 = vld [vmem:[#allocation7 + $0xc24] sm:$0xf0] }
 0x267   :  { %v11081_v12 = vld [vmem:[#allocation7 + $0xe08] sm:$0xf]  ;;  %v10826_v39 = vor.u32 %v14020_v22, %v10825_v21  ;;  %7446 = vmatpush.bf16.msra.mxu0 %v11530_v37 }
 0x268   :  { %v14084_v26 = vld [vmem:[#allocation7 + $0xe24] sm:$0xf0] }
 0x269   :  { %v12073_v29 = vld [vmem:[#allocation7 + $0x15c8] sm:$0xf]  ;;  %v11082_v43 = vor.u32 %v14084_v26, %v11081_v12  ;;  %7426 = vmatpush.bf16.msrb.mxu2 %v10826_v39  ;;  %v7194_v26 = vpop.f32.mrf.mxu0 }
 0x26a   :  { %v14332_v30 = vld [vmem:[#allocation7 + $0x15e4] sm:$0xf0] }
 0x26b   :  { %v12329_v31 = vld [vmem:[#allocation7 + $0x17c8] sm:$0xf]  ;;  %v12074_v44 = vor.u32 %v14332_v30, %v12073_v29  ;;  %7439 = vmatpush.bf16.msrb.mxu3 %v11082_v43 }
 0x26c   :  { %v14396_v32 = vld [vmem:[#allocation7 + $0x17e4] sm:$0xf0]  ;;  %7427 = vmatmul.bf16.vlgmr.msrb.gmra.mxu2 %v15069_v5 }
 0x26d   :  { %v11753_v33 = vld [vmem:[#allocation7 + $0x1348] sm:$0xf]  ;;  %v12330_v46 = vor.u32 %v14396_v32, %v12329_v31  ;;  %7471 = vmatpush.bf16.msra.mxu2 %v12074_v44  ;;  %v7195_v31 = vadd.f32 %v7194_v26, %v15128_v14 }
 0x26e   :  { %v14252_v36 = vld [vmem:[#allocation7 + $0x1364] sm:$0xf0]  ;;  %7440 = vmatmul.bf16.vlgmr.msrb.gmra.mxu3 %v15071_v6 }
 0x26f   :  { %v11497_v45 = vld [vmem:[#allocation7 + $0x1148] sm:$0xf]  ;;  %v11754_v48 = vor.u32 %v14252_v36, %v11753_v33  ;;  %7484 = vmatpush.bf16.msra.mxu3 %v12330_v46  ;;  %v7208_v39 = vadd.f32 %v7207_v17, %v7195_v31 }
 0x270   :  { %v14188_v35 = vld [vmem:[#allocation7 + $0x1164] sm:$0xf0] }
 0x271   :  { %v12041_v49 = vld [vmem:[#allocation7 + $0x1588] sm:$0xf]  ;;  %v11498_v59 = vor.u32 %v14188_v35, %v11497_v45  ;;  %7460 = vmatpush.bf16.msra.mxu1 %v11754_v48 }
 0x272   :  { %v14324_v50 = vld [vmem:[#allocation7 + $0x15a4] sm:$0xf0] }
 0x273   :  { %v12297_v51 = vld [vmem:[#allocation7 + $0x1788] sm:$0xf]  ;;  %v12042_v62 = vor.u32 %v14324_v50, %v12041_v49  ;;  %7447 = vmatpush.bf16.msra.mxu0 %v11498_v59 }
 0x274   :  { %v14388_v55 = vld [vmem:[#allocation7 + $0x17a4] sm:$0xf0] }
 0x275   :  { %v11721_v56 = vld [vmem:[#allocation7 + $0x1308] sm:$0xf]  ;;  %v12298_v0 = vor.u32 %v14388_v55, %v12297_v51  ;;  %7472 = vmatpush.bf16.msra.mxu2 %v12042_v62  ;;  %v7209_v55 = vpop.f32.mrf.mxu1 }
 0x276   :  { %v14244_v9 = vld [vmem:[#allocation7 + $0x1324] sm:$0xf0] }
 0x277   :  { %v11465_v47 = vld [vmem:[#allocation7 + $0x1108] sm:$0xf]  ;;  %v11722_v2 = vor.u32 %v14244_v9, %v11721_v56  ;;  %7485 = vmatpush.bf16.msra.mxu3 %v12298_v0 }
 0x278   :  { %v14180_v63 = vld [vmem:[#allocation7 + $0x1124] sm:$0xf0] }
 0x279   :  { %v12009_v57 = vld [vmem:[#allocation7 + $0x1548] sm:$0xf]  ;;  %v11466_v10 = vor.u32 %v14180_v63, %v11465_v47  ;;  %7461 = vmatpush.bf16.msra.mxu1 %v11722_v2  ;;  %v7196_v63 = vpop.f32.mrf.mxu0 }
 0x27a   :  { %v14316_v3 = vld [vmem:[#allocation7 + $0x1564] sm:$0xf0] }
 0x27b   :  { %v12265_v4 = vld [vmem:[#allocation7 + $0x1748] sm:$0xf]  ;;  %v12010_v11 = vor.u32 %v14316_v3, %v12009_v57  ;;  %7448 = vmatpush.bf16.msra.mxu0 %v11466_v10 }
 0x27c   :  { %v14380_v7 = vld [vmem:[#allocation7 + $0x1764] sm:$0xf0] }
 0x27d   :  { %v11689_v38 = vld [vmem:[#allocation7 + $0x12c8] sm:$0xf]  ;;  %v12266_v18 = vor.u32 %v14380_v7, %v12265_v4  ;;  %7473 = vmatpush.bf16.msra.mxu2 %v12010_v11 }
 0x27e   :  { %v14236_v8 = vld [vmem:[#allocation7 + $0x12e4] sm:$0xf0] }
 0x27f   :  { %v11433_v15 = vld [vmem:[#allocation7 + $0x10c8] sm:$0xf]  ;;  %v11690_v21 = vor.u32 %v14236_v8, %v11689_v38  ;;  %7486 = vmatpush.bf16.msra.mxu3 %v12266_v18 }
 0x280   :  { %v14172_v16 = vld [vmem:[#allocation7 + $0x10e4] sm:$0xf0] }
 0x281   :  { %v11977_v13 = vld [vmem:[#allocation7 + $0x1508] sm:$0xf]  ;;  %v11434_v32 = vor.u32 %v14172_v16, %v11433_v15  ;;  %7462 = vmatpush.bf16.msra.mxu1 %v11690_v21  ;;  %v7220_v15 = vpop.f32.mrf.mxu2 }
 0x282   :  { %v14308_v22 = vld [vmem:[#allocation7 + $0x1524] sm:$0xf0] }
 0x283   :  { %v12233_v12 = vld [vmem:[#allocation7 + $0x1708] sm:$0xf]  ;;  %v11978_v33 = vor.u32 %v14308_v22, %v11977_v13  ;;  %7449 = vmatpush.bf16.msra.mxu0 %v11434_v32  ;;  %v7221_v22 = vadd.f32 %v7220_v15, %v7208_v39 }
 0x284   :  { %v14372_v28 = vld [vmem:[#allocation7 + $0x1724] sm:$0xf0] }
 0x285   :  { %v11657_v29 = vld [vmem:[#allocation7 + $0x1288] sm:$0xf]  ;;  %v12234_v41 = vor.u32 %v14372_v28, %v12233_v12  ;;  %7474 = vmatpush.bf16.msra.mxu2 %v11978_v33  ;;  %v7233_v12 = vpop.f32.mrf.mxu3 }
 0x286   :  { %v14228_v30 = vld [vmem:[#allocation7 + $0x12a4] sm:$0xf0]  ;;  %v15135_v33 = vadd.f32 %v7233_v12, %v7221_v22 }
 0x287   :  { %v11401_v36 = vld [vmem:[#allocation7 + $0x1088] sm:$0xf]  ;;  %v11658_v42 = vor.u32 %v14228_v30, %v11657_v29  ;;  %7487 = vmatpush.bf16.msra.mxu3 %v12234_v41 }
 0x288   :  { %v14164_v37 = vld [vmem:[#allocation7 + $0x10a4] sm:$0xf0] }
 0x289   :  { %v11945_v43 = vld [vmem:[#allocation7 + $0x14c8] sm:$0xf]  ;;  %v11402_v49 = vor.u32 %v14164_v37, %v11401_v36  ;;  %7463 = vmatpush.bf16.msra.mxu1 %v11658_v42 }
 0x28a   :  { %v14300_v44 = vld [vmem:[#allocation7 + $0x14e4] sm:$0xf0] }
 0x28b   :  { %v12201_v45 = vld [vmem:[#allocation7 + $0x16c8] sm:$0xf]  ;;  %v11946_v14 = vor.u32 %v14300_v44, %v11945_v43  ;;  %7450 = vmatpush.bf16.msra.mxu0 %v11402_v49 }
 0x28c   :  { %v14364_v35 = vld [vmem:[#allocation7 + $0x16e4] sm:$0xf0] }
 0x28d   :  { %v11625_v46 = vld [vmem:[#allocation7 + $0x1248] sm:$0xf]  ;;  %v12202_v56 = vor.u32 %v14364_v35, %v12201_v45  ;;  %7475 = vmatpush.bf16.msra.mxu2 %v11946_v14 }
 0x28e   :  { %v14220_v48 = vld [vmem:[#allocation7 + $0x1264] sm:$0xf0] }
 0x28f   :  { %v11369_v50 = vld [vmem:[#allocation7 + $0x1048] sm:$0xf]  ;;  %v11626_v9 = vor.u32 %v14220_v48, %v11625_v46  ;;  %7488 = vmatpush.bf16.msra.mxu3 %v12202_v56 }
 0x290   :  { %v14156_v51 = vld [vmem:[#allocation7 + $0x1064] sm:$0xf0] }
 0x291   :  { %v11913_v59 = vld [vmem:[#allocation7 + $0x1488] sm:$0xf]  ;;  %v11370_v3 = vor.u32 %v14156_v51, %v11369_v50  ;;  %7464 = vmatpush.bf16.msra.mxu1 %v11626_v9 }
 0x292   :  { %v14292_v62 = vld [vmem:[#allocation7 + $0x14a4] sm:$0xf0] }
 0x293   :  { %v12169_v47 = vld [vmem:[#allocation7 + $0x1688] sm:$0xf]  ;;  %v11914_v38 = vor.u32 %v14292_v62, %v11913_v59  ;;  %7451 = vmatpush.bf16.msra.mxu0 %v11370_v3  ;;  %v7222_v59 = vpop.f32.mrf.mxu2 }
 0x294   :  { %v14356_v0 = vld [vmem:[#allocation7 + $0x16a4] sm:$0xf0] }
 0x295   :  { %v11593_v2 = vld [vmem:[#allocation7 + $0x1208] sm:$0xf]  ;;  %v12170_v16 = vor.u32 %v14356_v0, %v12169_v47  ;;  %7476 = vmatpush.bf16.msra.mxu2 %v11914_v38 }
 0x296   :  { %v14212_v57 = vld [vmem:[#allocation7 + $0x1224] sm:$0xf0] }
 0x297   :  { %v12841_v4 = vld [vmem:[#allocation7 + $0x1bc8] sm:$0xf]  ;;  %v11594_v17 = vor.u32 %v14212_v57, %v11593_v2  ;;  %7489 = vmatpush.bf16.msra.mxu3 %v12170_v16  ;;  %v7235_v2 = vpop.f32.mrf.mxu3 }
 0x298   :  { %v14524_v7 = vld [vmem:[#allocation7 + $0x1be4] sm:$0xf0] }
 0x299   :  { %v11337_v8 = vld [vmem:[#allocation7 + $0x1008] sm:$0xf]  ;;  %v12842_v26 = vor.u32 %v14524_v7, %v12841_v4  ;;  %7465 = vmatpush.bf16.msra.mxu1 %v11594_v17 }
 0x29a   :  { %v14148_v10 = vld [vmem:[#allocation7 + $0x1024] sm:$0xf0] }
 0x29b   :  { %v12585_v11 = vld [vmem:[#allocation7 + $0x19c8] sm:$0xf]  ;;  %v11338_v30 = vor.u32 %v14148_v10, %v11337_v8 }
 0x29c   :  { %v14460_v18 = vld [vmem:[#allocation7 + $0x19e4] sm:$0xf0]  ;;  %7466 = vmatmul.bf16.vlgmr.msra.gmra.mxu1 %v15077_v1 }
 0x29d   :  { %v11881_v21 = vld [vmem:[#allocation7 + $0x1448] sm:$0xf]  ;;  %v12586_v36 = vor.u32 %v14460_v18, %v12585_v11  ;;  %7510 = vmatpush.bf16.msrb.mxu1 %v12842_v26  ;;  %7452 = vmatpush.bf16.msra.mxu0 %v11338_v30 }
 0x29e   :  { %v14284_v13 = vld [vmem:[#allocation7 + $0x1464] sm:$0xf0] }
 0x29f   :  { %v12137_v28 = vld [vmem:[#allocation7 + $0x1648] sm:$0xf]  ;;  %v11882_v37 = vor.u32 %v14284_v13, %v11881_v21 }
 0x2a0   :  { %v14348_v29 = vld [vmem:[#allocation7 + $0x1664] sm:$0xf0]  ;;  %7453 = vmatmul.bf16.vlgmr.msra.gmra.mxu0 %v15075_v54 }
 0x2a1   :  { %v12809_v31 = vld [vmem:[#allocation7 + $0x1b88] sm:$0xf]  ;;  %v12138_v44 = vor.u32 %v14348_v29, %v12137_v28  ;;  %7497 = vmatpush.bf16.msrb.mxu0 %v12586_v36  ;;  %7477 = vmatpush.bf16.msra.mxu2 %v11882_v37 }
 0x2a2   :  { %v14516_v32 = vld [vmem:[#allocation7 + $0x1ba4] sm:$0xf0] }
 0x2a3   :  { %v12553_v41 = vld [vmem:[#allocation7 + $0x1988] sm:$0xf]  ;;  %v12810_v46 = vor.u32 %v14516_v32, %v12809_v31  ;;  %7490 = vmatpush.bf16.msra.mxu3 %v12138_v44 }
 0x2a4   :  { %v14452_v42 = vld [vmem:[#allocation7 + $0x19a4] sm:$0xf0] }
 0x2a5   :  { %v11849_v43 = vld [vmem:[#allocation7 + $0x1408] sm:$0xf]  ;;  %v12554_v56 = vor.u32 %v14452_v42, %v12553_v41  ;;  %7511 = vmatpush.bf16.msrb.mxu1 %v12810_v46  ;;  %v7259_v41 = vpop.f32.mrf.mxu1 }
 0x2a6   :  { %v14276_v39 = vld [vmem:[#allocation7 + $0x1424] sm:$0xf0] }
 0x2a7   :  { %v12105_v45 = vld [vmem:[#allocation7 + $0x1608] sm:$0xf]  ;;  %v11850_v9 = vor.u32 %v14276_v39, %v11849_v43  ;;  %7498 = vmatpush.bf16.msrb.mxu0 %v12554_v56 }
 0x2a8   :  { %v14340_v35 = vld [vmem:[#allocation7 + $0x1624] sm:$0xf0] }
 0x2a9   :  { %v13097_v48 = vld [vmem:[#allocation7 + $0x1dc8] sm:$0xf]  ;;  %v12106_v62 = vor.u32 %v14340_v35, %v12105_v45  ;;  %7478 = vmatpush.bf16.msra.mxu2 %v11850_v9  ;;  %v7246_v35 = vpop.f32.mrf.mxu0 }
 0x2aa   :  { %v14588_v49 = vld [vmem:[#allocation7 + $0x1de4] sm:$0xf0] }
 0x2ab   :  { %v13353_v14 = vld [vmem:[#allocation7 + $0x1fc8] sm:$0xf]  ;;  %v13098_v47 = vor.u32 %v14588_v49, %v13097_v48  ;;  %7491 = vmatpush.bf16.msra.mxu3 %v12106_v62 }
 0x2ac   :  { %v14652_v50 = vld [vmem:[#allocation7 + $0x1fe4] sm:$0xf0]  ;;  %7479 = vmatmul.bf16.vlgmr.msra.gmra.mxu2 %v15081_v20 }
 0x2ad   :  { %v12777_v51 = vld [vmem:[#allocation7 + $0x1b48] sm:$0xf]  ;;  %v13354_v57 = vor.u32 %v14652_v50, %v13353_v14  ;;  %7523 = vmatpush.bf16.msrb.mxu2 %v13098_v47  ;;  %v7247_v14 = vadd.f32 %v7246_v35, %v15135_v33 }
 0x2ae   :  { %v14508_v55 = vld [vmem:[#allocation7 + $0x1b64] sm:$0xf0]  ;;  %7492 = vmatmul.bf16.vlgmr.msra.gmra.mxu3 %v15083_v25 }
 0x2af   :  { %v12521_v63 = vld [vmem:[#allocation7 + $0x1948] sm:$0xf]  ;;  %v12778_v3 = vor.u32 %v14508_v55, %v12777_v51  ;;  %7536 = vmatpush.bf16.msrb.mxu3 %v13354_v57  ;;  %v7260_v9 = vadd.f32 %v7259_v41, %v7247_v14  ;;  %v13744_v14 = vld [vmem:[#allocation7 + $0x38c] sm:$0xf] }
 0x2b0   :  { %v14444_v0 = vld [vmem:[#allocation7 + $0x1964] sm:$0xf0] }
 0x2b1   :  { %v13065_v4 = vld [vmem:[#allocation7 + $0x1d88] sm:$0xf]  ;;  %v12522_v15 = vor.u32 %v14444_v0, %v12521_v63  ;;  %7512 = vmatpush.bf16.msrb.mxu1 %v12778_v3 }
 0x2b2   :  { %v14580_v7 = vld [vmem:[#allocation7 + $0x1da4] sm:$0xf0] }
 0x2b3   :  { %v13321_v38 = vld [vmem:[#allocation7 + $0x1f88] sm:$0xf]  ;;  %v13066_v16 = vor.u32 %v14580_v7, %v13065_v4  ;;  %7499 = vmatpush.bf16.msrb.mxu0 %v12522_v15 }
 0x2b4   :  { %v14644_v8 = vld [vmem:[#allocation7 + $0x1fa4] sm:$0xf0] }
 0x2b5   :  { %v12745_v10 = vld [vmem:[#allocation7 + $0x1b08] sm:$0xf]  ;;  %v13322_v21 = vor.u32 %v14644_v8, %v13321_v38  ;;  %7524 = vmatpush.bf16.msrb.mxu2 %v13066_v16  ;;  %v7261_v8 = vpop.f32.mrf.mxu1 }
 0x2b6   :  { %v14500_v11 = vld [vmem:[#allocation7 + $0x1b24] sm:$0xf0]  ;;  %v9707_v8 = vld [vmem:[#allocation7 + $0x368] sm:$0xf0] }
 0x2b7   :  { %v12489_v17 = vld [vmem:[#allocation7 + $0x1908] sm:$0xf]  ;;  %v12746_v13 = vor.u32 %v14500_v11, %v12745_v10  ;;  %7537 = vmatpush.bf16.msrb.mxu3 %v13322_v21 }
 0x2b8   :  { %v14436_v18 = vld [vmem:[#allocation7 + $0x1924] sm:$0xf0] }
 0x2b9   :  { %v13033_v22 = vld [vmem:[#allocation7 + $0x1d48] sm:$0xf]  ;;  %v12490_v31 = vor.u32 %v14436_v18, %v12489_v17  ;;  %7513 = vmatpush.bf16.msrb.mxu1 %v12746_v13  ;;  %v7248_v18 = vpop.f32.mrf.mxu0 }
 0x2ba   :  { %v14572_v12 = vld [vmem:[#allocation7 + $0x1d64] sm:$0xf0]  ;;  %v13672_v18 = vld [vmem:[#allocation7 + $0x14c] sm:$0xf] }
 0x2bb   :  { %v13289_v26 = vld [vmem:[#allocation7 + $0x1f48] sm:$0xf]  ;;  %v13034_v32 = vor.u32 %v14572_v12, %v13033_v22  ;;  %7500 = vmatpush.bf16.msrb.mxu0 %v12490_v31 }
 0x2bc   :  { %v14636_v28 = vld [vmem:[#allocation7 + $0x1f64] sm:$0xf0] }
 0x2bd   :  { %v12713_v29 = vld [vmem:[#allocation7 + $0x1ac8] sm:$0xf]  ;;  %v13290_v42 = vor.u32 %v14636_v28, %v13289_v26  ;;  %7525 = vmatpush.bf16.msrb.mxu2 %v13034_v32  ;;  %v13752_v26 = vld [vmem:[#allocation7 + $0x3cc] sm:$0xf] }
 0x2be   :  { %v14492_v30 = vld [vmem:[#allocation7 + $0x1ae4] sm:$0xf0]  ;;  %v9771_v28 = vld [vmem:[#allocation7 + $0x3e8] sm:$0xf0] }
 0x2bf   :  { %v12457_v36 = vld [vmem:[#allocation7 + $0x18c8] sm:$0xf]  ;;  %v12714_v43 = vor.u32 %v14492_v30, %v12713_v29  ;;  %7538 = vmatpush.bf16.msrb.mxu3 %v13290_v42  ;;  %v13688_v32 = vld [vmem:[#allocation7 + $0x1cc] sm:$0xf]  ;;  %v9774_v35 = vor.u32 %v13752_v26, %v9771_v28 }
 0x2c0   :  { %v14428_v37 = vld [vmem:[#allocation7 + $0x18e4] sm:$0xf0]  ;;  %v9515_v42 = vld [vmem:[#allocation7 + $0x1e8] sm:$0xf0] }
 0x2c1   :  { %v13001_v44 = vld [vmem:[#allocation7 + $0x1d08] sm:$0xf]  ;;  %v12458_v50 = vor.u32 %v14428_v37, %v12457_v36  ;;  %7514 = vmatpush.bf16.msrb.mxu1 %v12714_v43  ;;  %v7272_v36 = vpop.f32.mrf.mxu2  ;;  %v13808_v26 = vld [vmem:[#allocation7 + $0x58c] sm:$0xf] }
 0x2c2   :  { %v14564_v39 = vld [vmem:[#allocation7 + $0x1d24] sm:$0xf0]  ;;  %v9995_v28 = vld [vmem:[#allocation7 + $0x5a8] sm:$0xf0] }
 0x2c3   :  { %v13257_v45 = vld [vmem:[#allocation7 + $0x1f08] sm:$0xf]  ;;  %v13002_v51 = vor.u32 %v14564_v39, %v13001_v44  ;;  %7501 = vmatpush.bf16.msrb.mxu0 %v12458_v50  ;;  %v7273_v39 = vadd.f32 %v7272_v36, %v7260_v9  ;;  %v9739_v50 = vld [vmem:[#allocation7 + $0x3a8] sm:$0xf0] }
 0x2c4   :  { %v14628_v46 = vld [vmem:[#allocation7 + $0x1f24] sm:$0xf0] }
 0x2c5   :  { %v12681_v48 = vld [vmem:[#allocation7 + $0x1a88] sm:$0xf]  ;;  %v13258_v59 = vor.u32 %v14628_v46, %v13257_v45  ;;  %7526 = vmatpush.bf16.msrb.mxu2 %v13002_v51  ;;  %v7285_v45 = vpop.f32.mrf.mxu3 }
 0x2c6   :  { %v14484_v49 = vld [vmem:[#allocation7 + $0x1aa4] sm:$0xf0]  ;;  %v15142_v51 = vadd.f32 %v7285_v45, %v7273_v39  ;;  %v13800_v39 = vld [vmem:[#allocation7 + $0x54c] sm:$0xf] }
 0x2c7   :  { %v12425_v55 = vld [vmem:[#allocation7 + $0x1888] sm:$0xf]  ;;  %v12682_v62 = vor.u32 %v14484_v49, %v12681_v48  ;;  %7539 = vmatpush.bf16.msrb.mxu3 %v13258_v59  ;;  %v13680_v59 = vld [vmem:[#allocation7 + $0x18c] sm:$0xf] }
 0x2c8   :  { %v14420_v56 = vld [vmem:[#allocation7 + $0x18a4] sm:$0xf0]  ;;  %v9963_v45 = vld [vmem:[#allocation7 + $0x568] sm:$0xf0] }
 0x2c9   :  { %v12969_v47 = vld [vmem:[#allocation7 + $0x1cc8] sm:$0xf]  ;;  %v12426_v4 = vor.u32 %v14420_v56, %v12425_v55  ;;  %7515 = vmatpush.bf16.msrb.mxu1 %v12682_v62  ;;  %v9518_v55 = vor.u32 %v13688_v32, %v9515_v42  ;;  %v9483_v62 = vld [vmem:[#allocation7 + $0x1a8] sm:$0xf0] }
 0x2ca   :  { %v14556_v63 = vld [vmem:[#allocation7 + $0x1ce4] sm:$0xf0]  ;;  %v9675_v32 = vld [vmem:[#allocation7 + $0x328] sm:$0xf0] }
 0x2cb   :  { %v13225_v0 = vld [vmem:[#allocation7 + $0x1ec8] sm:$0xf]  ;;  %v12970_v33 = vor.u32 %v14556_v63, %v12969_v47  ;;  %7502 = vmatpush.bf16.msrb.mxu0 %v12426_v4  ;;  %v10027_v4 = vld [vmem:[#allocation7 + $0x5e8] sm:$0xf0] }
 0x2cc   :  { %v14620_v2 = vld [vmem:[#allocation7 + $0x1ee4] sm:$0xf0]  ;;  %v9419_v42 = vld [vmem:[#allocation7 + $0x128] sm:$0xf0] }
 0x2cd   :  { %v12649_v57 = vld [vmem:[#allocation7 + $0x1a48] sm:$0xf]  ;;  %v13226_v10 = vor.u32 %v14620_v2, %v13225_v0  ;;  %7527 = vmatpush.bf16.msrb.mxu2 %v12970_v33  ;;  %v13880_v33 = vld [vmem:[#allocation7 + $0x7cc] sm:$0xf] }
 0x2ce   :  { %v14476_v3 = vld [vmem:[#allocation7 + $0x1a64] sm:$0xf0] }
 0x2cf   :  { %v12393_v7 = vld [vmem:[#allocation7 + $0x1848] sm:$0xf]  ;;  %v12650_v11 = vor.u32 %v14476_v3, %v12649_v57  ;;  %7540 = vmatpush.bf16.msrb.mxu3 %v13226_v10  ;;  %v9742_v57 = vor.u32 %v13744_v14, %v9739_v50  ;;  %v13816_v3 = vld [vmem:[#allocation7 + $0x5cc] sm:$0xf]  ;;  %v9486_v10 = vor.u32 %v13680_v59, %v9483_v62  ;;  %v9966_v50 = vor.u32 %v13800_v39, %v9963_v45  ;;  %v7311_v59 = vpop.f32.mrf.mxu1 }
 0x2d0   :  { %v14412_v38 = vld [vmem:[#allocation7 + $0x1864] sm:$0xf0]  ;;  %v9547_v39 = vld [vmem:[#allocation7 + $0x228] sm:$0xf0] }
 0x2d1   :  { %v12937_v15 = vld [vmem:[#allocation7 + $0x1c88] sm:$0xf]  ;;  %v12394_v12 = vor.u32 %v14412_v38, %v12393_v7  ;;  %7516 = vmatpush.bf16.msrb.mxu1 %v12650_v11  ;;  %v10283_v7 = vld [vmem:[#allocation7 + $0x7e8] sm:$0xf0] }
 0x2d2   :  { %v14548_v16 = vld [vmem:[#allocation7 + $0x1ca4] sm:$0xf0]  ;;  %v13736_v38 = vld [vmem:[#allocation7 + $0x34c] sm:$0xf] }
 0x2d3   :  { %v13193_v17 = vld [vmem:[#allocation7 + $0x1e88] sm:$0xf]  ;;  %v12938_v29 = vor.u32 %v14548_v16, %v12937_v15  ;;  %7503 = vmatpush.bf16.msrb.mxu0 %v12394_v12  ;;  %v7274_v15 = vpop.f32.mrf.mxu2  ;;  %v9710_v12 = vor.u32 %v13736_v38, %v9707_v8  ;;  %v13648_v8 = vld [vmem:[#allocation7 + $0x8c] sm:$0xf] }
 0x2d4   :  { %v14612_v21 = vld [vmem:[#allocation7 + $0x1ea4] sm:$0xf0] }
 0x2d5   :  { %v12617_v13 = vld [vmem:[#allocation7 + $0x1a08] sm:$0xf]  ;;  %v13194_v37 = vor.u32 %v14612_v21, %v13193_v17  ;;  %7528 = vmatpush.bf16.msrb.mxu2 %v12938_v29  ;;  %v10030_v17 = vor.u32 %v13816_v3, %v10027_v4  ;;  %v9451_v21 = vld [vmem:[#allocation7 + $0x168] sm:$0xf0] }
 0x2d6   :  { %v14468_v22 = vld [vmem:[#allocation7 + $0x1a24] sm:$0xf0]  ;;  %v13872_v29 = vld [vmem:[#allocation7 + $0x78c] sm:$0xf]  ;;  %v9454_v36 = vor.u32 %v13672_v18, %v9451_v21 }
 0x2d7   :  { %v12361_v30 = vld [vmem:[#allocation7 + $0x1808] sm:$0xf]  ;;  %v12618_v41 = vor.u32 %v14468_v22, %v12617_v13  ;;  %7541 = vmatpush.bf16.msrb.mxu3 %v13194_v37  ;;  %v7287_v13 = vpop.f32.mrf.mxu3  ;;  %v10286_v22 = vor.u32 %v13880_v33, %v10283_v7  ;;  %v9998_v37 = vor.u32 %v13808_v26, %v9995_v28  ;;  %v13712_v3 = vld [vmem:[#allocation7 + $0x28c] sm:$0xf] }
 0x2d8   :  { %v14404_v31 = vld [vmem:[#allocation7 + $0x1824] sm:$0xf0]  ;;  %v9611_v4 = vld [vmem:[#allocation7 + $0x2a8] sm:$0xf0] }
 0x2d9   :  { %v12905_v43 = vld [vmem:[#allocation7 + $0x1c48] sm:$0xf]  ;;  %v12362_v49 = vor.u32 %v14404_v31, %v12361_v30  ;;  %7517 = vmatpush.bf16.msrb.mxu1 %v12618_v41  ;;  %v10251_v30 = vld [vmem:[#allocation7 + $0x7a8] sm:$0xf0] }
 0x2da   :  { %v14540_v44 = vld [vmem:[#allocation7 + $0x1c64] sm:$0xf0]  ;;  %v13728_v31 = vld [vmem:[#allocation7 + $0x30c] sm:$0xf] }
 0x2db   :  { %v13161_v46 = vld [vmem:[#allocation7 + $0x1e48] sm:$0xf]  ;;  %v12906_v56 = vor.u32 %v14540_v44, %v12905_v43  ;;  %7504 = vmatpush.bf16.msrb.mxu0 %v12362_v49  ;;  %v13664_v41 = vld [vmem:[#allocation7 + $0x10c] sm:$0xf]  ;;  %v10254_v43 = vor.u32 %v13872_v29, %v10251_v30  ;;  %v9678_v44 = vor.u32 %v13728_v31, %v9675_v32  ;;  %v7313_v30 = vpop.f32.mrf.mxu1 }
 0x2dc   :  { %v14604_v48 = vld [vmem:[#allocation7 + $0x1e64] sm:$0xf0]  ;;  %7518 = vmatmul.bf16.vlgmr.msrb.gmra.mxu1 %v15089_v53  ;;  %v9643_v49 = vld [vmem:[#allocation7 + $0x2e8] sm:$0xf0]  ;;  %v9422_v14 = vor.u32 %v13664_v41, %v9419_v42 }
 0x2dd   :  { %v12873_v47 = vld [vmem:[#allocation7 + $0x1c08] sm:$0xf]  ;;  %v13162_v63 = vor.u32 %v14604_v48, %v13161_v46  ;;  %7562 = vmatpush.bf16.msra.mxu1 %v9774_v35  ;;  %7529 = vmatpush.bf16.msrb.mxu2 %v12906_v56  ;;  %v13864_v35 = vld [vmem:[#allocation7 + $0x74c] sm:$0xf] }
 0x2de   :  { %v14532_v9 = vld [vmem:[#allocation7 + $0x1c24] sm:$0xf0]  ;;  %7505 = vmatmul.bf16.vlgmr.msrb.gmra.mxu0 %v15087_v52  ;;  %v10219_v46 = vld [vmem:[#allocation7 + $0x768] sm:$0xf0] }
 0x2df   :  { %v13129_v0 = vld [vmem:[#allocation7 + $0x1e08] sm:$0xf]  ;;  %7549 = vmatpush.bf16.msra.mxu0 %v9518_v55  ;;  %v12874_v11 = vor.u32 %v14532_v9, %v12873_v47  ;;  %7542 = vmatpush.bf16.msrb.mxu3 %v13162_v63  ;;  %v13720_v48 = vld [vmem:[#allocation7 + $0x2cc] sm:$0xf]  ;;  %v10222_v62 = vor.u32 %v13864_v35, %v10219_v46 }
 0x2e0   :  { %v14596_v2 = vld [vmem:[#allocation7 + $0x1e24] sm:$0xf0]  ;;  %v13656_v55 = vld [vmem:[#allocation7 + $0xcc] sm:$0xf]  ;;  %v9646_v47 = vor.u32 %v13720_v48, %v9643_v49 }
 0x2e1   :  { %v13130_v16 = vor.u32 %v14596_v2, %v13129_v0  ;;  %7563 = vmatpush.bf16.msra.mxu1 %v9742_v57  ;;  %7530 = vmatpush.bf16.msrb.mxu2 %v12874_v11  ;;  %v9387_v56 = vld [vmem:[#allocation7 + $0xe8] sm:$0xf0]  ;;  %v7298_v2 = vpop.f32.mrf.mxu0 }
 0x2e2   :  { %v13792_v63 = vld [vmem:[#allocation7 + $0x50c] sm:$0xf]  ;;  %v7299_v33 = vadd.f32 %v7298_v2, %v15142_v51  ;;  %v9390_v7 = vor.u32 %v13656_v55, %v9387_v56  ;;  %v7324_v55 = vpop.f32.mrf.mxu2 }
 0x2e3   :  { %7550 = vmatpush.bf16.msra.mxu0 %v9486_v10  ;;  %7543 = vmatpush.bf16.msrb.mxu3 %v13130_v16  ;;  %v9931_v9 = vld [vmem:[#allocation7 + $0x528] sm:$0xf0]  ;;  %v9614_v16 = vor.u32 %v13712_v3, %v9611_v4 }
 0x2e4   :  { %7531 = vmatmul.bf16.vlgmr.msrb.gmra.mxu2 %v15093_v19  ;;  %v13856_v0 = vld [vmem:[#allocation7 + $0x70c] sm:$0xf]  ;;  %v9934_v38 = vor.u32 %v13792_v63, %v9931_v9  ;;  %v7312_v11 = vadd.f32 %v7311_v59, %v7299_v33 }
 0x2e5   :  { %7575 = vmatpush.bf16.msra.mxu2 %v10030_v17  ;;  %7564 = vmatpush.bf16.msra.mxu1 %v9710_v12  ;;  %v10187_v57 = vld [vmem:[#allocation7 + $0x728] sm:$0xf0] }
 0x2e6   :  { %7544 = vmatmul.bf16.vlgmr.msrb.gmra.mxu3 %v15095_v27  ;;  %v9355_v10 = vld [vmem:[#allocation7 + $0xa8] sm:$0xf0]  ;;  %v10190_v15 = vor.u32 %v13856_v0, %v10187_v57  ;;  %v7325_v9 = vadd.f32 %v7324_v55, %v7312_v11  ;;  %v7337_v0 = vpop.f32.mrf.mxu3 }
 0x2e7   :  { %7588 = vmatpush.bf16.msra.mxu3 %v10286_v22  ;;  %7551 = vmatpush.bf16.msra.mxu0 %v9454_v36  ;;  %v13784_v17 = vld [vmem:[#allocation7 + $0x4cc] sm:$0xf]  ;;  %v9358_v26 = vor.u32 %v13648_v8, %v9355_v10 }
 0x2e8   :  { %v9899_v18 = vld [vmem:[#allocation7 + $0x4e8] sm:$0xf0] }
 0x2e9   :  { %7576 = vmatpush.bf16.msra.mxu2 %v9998_v37  ;;  %7565 = vmatpush.bf16.msra.mxu1 %v9678_v44  ;;  %v13848_v21 = vld [vmem:[#allocation7 + $0x6cc] sm:$0xf]  ;;  %v9902_v51 = vor.u32 %v13784_v17, %v9899_v18  ;;  %v7300_v42 = vpop.f32.mrf.mxu0 }
 0x2ea   :  { %v10155_v13 = vld [vmem:[#allocation7 + $0x6e8] sm:$0xf0] }
 0x2eb   :  { %7589 = vmatpush.bf16.msra.mxu3 %v10254_v43  ;;  %7552 = vmatpush.bf16.msra.mxu0 %v9422_v14  ;;  %v13704_v22 = vld [vmem:[#allocation7 + $0x24c] sm:$0xf]  ;;  %v10158_v31 = vor.u32 %v13848_v21, %v10155_v13 }
 0x2ec   :  { %v9579_v12 = vld [vmem:[#allocation7 + $0x268] sm:$0xf0] }
 0x2ed   :  { %7577 = vmatpush.bf16.msra.mxu2 %v9966_v50  ;;  %7566 = vmatpush.bf16.msra.mxu1 %v9646_v47  ;;  %v13640_v28 = vld [vmem:[#allocation7 + $0x4c] sm:$0xf]  ;;  %v9582_v32 = vor.u32 %v13704_v22, %v9579_v12 }
 0x2ee   :  { %v9323_v29 = vld [vmem:[#allocation7 + $0x68] sm:$0xf0] }
 0x2ef   :  { %7590 = vmatpush.bf16.msra.mxu3 %v10222_v62  ;;  %7553 = vmatpush.bf16.msra.mxu0 %v9390_v7  ;;  %v13776_v36 = vld [vmem:[#allocation7 + $0x48c] sm:$0xf]  ;;  %v9326_v45 = vor.u32 %v13640_v28, %v9323_v29 }
 0x2f0   :  { %v9867_v37 = vld [vmem:[#allocation7 + $0x4a8] sm:$0xf0] }
 0x2f1   :  { %7578 = vmatpush.bf16.msra.mxu2 %v9934_v38  ;;  %7567 = vmatpush.bf16.msra.mxu1 %v9614_v16  ;;  %v13840_v41 = vld [vmem:[#allocation7 + $0x68c] sm:$0xf]  ;;  %v9870_v48 = vor.u32 %v13776_v36, %v9867_v37  ;;  %v15149_v38 = vadd.f32 %v7337_v0, %v7325_v9  ;;  %v7326_v36 = vpop.f32.mrf.mxu2 }
 0x2f2   :  { %v10123_v43 = vld [vmem:[#allocation7 + $0x6a8] sm:$0xf0] }
 0x2f3   :  { %7591 = vmatpush.bf16.msra.mxu3 %v10190_v15  ;;  %v13696_v44 = vld [vmem:[#allocation7 + $0x20c] sm:$0xf]  ;;  %7554 = vmatpush.bf16.msra.mxu0 %v9358_v26  ;;  %v10126_v56 = vor.u32 %v13840_v41, %v10123_v43 }
 0x2f4   :  { %v14008_v35 = vld [vmem:[#allocation7 + $0xbcc] sm:$0xf]  ;;  %v9550_v59 = vor.u32 %v13696_v44, %v9547_v39  ;;  %v7339_v44 = vpop.f32.mrf.mxu3 }
 0x2f5   :  { %v10795_v46 = vld [vmem:[#allocation7 + $0xbe8] sm:$0xf0]  ;;  %7579 = vmatpush.bf16.msra.mxu2 %v9902_v51  ;;  %7568 = vmatpush.bf16.msra.mxu1 %v9582_v32 }
 0x2f6   :  { %v13632_v49 = vld [vmem:[#allocation7 + $0xc] sm:$0xf]  ;;  %v10798_v2 = vor.u32 %v14008_v35, %v10795_v46 }
 0x2f7   :  { %v9291_v14 = vld [vmem:[#allocation7 + $0x28] sm:$0xf0]  ;;  %7592 = vmatpush.bf16.msra.mxu3 %v10158_v31  ;;  %7555 = vmatpush.bf16.msra.mxu0 %v9326_v45 }
 0x2f8   :  { %v13944_v50 = vld [vmem:[#allocation7 + $0x9cc] sm:$0xf]  ;;  %v9294_v4 = vor.u32 %v13632_v49, %v9291_v14 }
 0x2f9   :  { %v10539_v62 = vld [vmem:[#allocation7 + $0x9e8] sm:$0xf0]  ;;  %7580 = vmatpush.bf16.msra.mxu2 %v9870_v48  ;;  %7569 = vmatpush.bf16.msra.mxu1 %v9550_v59 }
 0x2fa   :  { %v13768_v47 = vld [vmem:[#allocation7 + $0x44c] sm:$0xf]  ;;  %v10542_v8 = vor.u32 %v13944_v50, %v10539_v62 }
 0x2fb   :  { %v9835_v63 = vld [vmem:[#allocation7 + $0x468] sm:$0xf0]  ;;  %7593 = vmatpush.bf16.msra.mxu3 %v10126_v56  ;;  %7556 = vmatpush.bf16.msra.mxu0 %v9294_v4 }
 0x2fc   :  { %v13832_v57 = vld [vmem:[#allocation7 + $0x64c] sm:$0xf]  ;;  %v9838_v10 = vor.u32 %v13768_v47, %v9835_v63  ;;  %7570 = vmatmul.bf16.vlgmr.msra.gmra.mxu1 %v15053_v24 }
 0x2fd   :  { %v10091_v3 = vld [vmem:[#allocation7 + $0x668] sm:$0xf0]  ;;  %7614 = vmatpush.bf16.msrb.mxu1 %v10798_v2 }
 0x2fe   :  { %v14000_v33 = vld [vmem:[#allocation7 + $0xb8c] sm:$0xf]  ;;  %v10094_v18 = vor.u32 %v13832_v57, %v10091_v3  ;;  %7581 = vmatpush.bf16.msra.mxu2 %v9838_v10  ;;  %7557 = vmatmul.bf16.vlgmr.msra.gmra.mxu0 %v15051_v23 }
 0x2ff   :  { %v10763_v7 = vld [vmem:[#allocation7 + $0xba8] sm:$0xf0]  ;;  %7601 = vmatpush.bf16.msrb.mxu0 %v10542_v8 }
 0x300   :  { %v13936_v15 = vld [vmem:[#allocation7 + $0x98c] sm:$0xf]  ;;  %v10766_v22 = vor.u32 %v14000_v33, %v10763_v7  ;;  %7594 = vmatpush.bf16.msra.mxu3 %v10094_v18  ;;  %v14746_v33 = vld [vmem:[#allocation8] sm:$0xff] }
 0x301   :  { %v10507_v16 = vld [vmem:[#allocation7 + $0x9a8] sm:$0xf0]  ;;  %v1735_v7 = vperm.slane %v14746_v33, 2 }
 0x302   :  { %v13760_v17 = vld [vmem:[#allocation7 + $0x40c] sm:$0xf]  ;;  %v10510_v31 = vor.u32 %v13936_v15, %v10507_v16  ;;  %7615 = vmatpush.bf16.msrb.mxu1 %v10766_v22 }
 0x303   :  { %v9803_v11 = vld [vmem:[#allocation7 + $0x428] sm:$0xf0] }
 0x304   :  { %v13824_v21 = vld [vmem:[#allocation7 + $0x60c] sm:$0xf]  ;;  %v9806_v32 = vor.u32 %v13760_v17, %v9803_v11  ;;  %7602 = vmatpush.bf16.msrb.mxu0 %v10510_v31  ;;  %v7363_v17 = vpop.f32.mrf.mxu1 }
 0x305   :  { %v10059_v13 = vld [vmem:[#allocation7 + $0x628] sm:$0xf0] }
 0x306   :  { %v14072_v12 = vld [vmem:[#allocation7 + $0xdcc] sm:$0xf]  ;;  %v10062_v37 = vor.u32 %v13824_v21, %v10059_v13  ;;  %7582 = vmatpush.bf16.msra.mxu2 %v9806_v32 }
 0x307   :  { %v11051_v26 = vld [vmem:[#allocation7 + $0xde8] sm:$0xf0] }
 0x308   :  { %v14136_v51 = vld [vmem:[#allocation7 + $0xfcc] sm:$0xf]  ;;  %v11054_v41 = vor.u32 %v14072_v12, %v11051_v26  ;;  %7595 = vmatpush.bf16.msra.mxu3 %v10062_v37  ;;  %v7350_v12 = vpop.f32.mrf.mxu0 }
 0x309   :  { %v11307_v28 = vld [vmem:[#allocation7 + $0xfe8] sm:$0xf0]  ;;  %7583 = vmatmul.bf16.vlgmr.msra.gmra.mxu2 %v15057_v60 }
 0x30a   :  { %v13992_v29 = vld [vmem:[#allocation7 + $0xb4c] sm:$0xf]  ;;  %v11310_v39 = vor.u32 %v14136_v51, %v11307_v28  ;;  %7627 = vmatpush.bf16.msrb.mxu2 %v11054_v41 }
 0x30b   :  { %v10731_v30 = vld [vmem:[#allocation7 + $0xb68] sm:$0xf0]  ;;  %7596 = vmatmul.bf16.vlgmr.msra.gmra.mxu3 %v15059_v61 }
 0x30c   :  { %v13928_v42 = vld [vmem:[#allocation7 + $0x94c] sm:$0xf]  ;;  %v10734_v45 = vor.u32 %v13992_v29, %v10731_v30  ;;  %7640 = vmatpush.bf16.msrb.mxu3 %v11310_v39  ;;  %v7351_v29 = vadd.f32 %v7350_v12, %v1735_v7  ;;  %v7389_v12 = vpop.f32.mrf.mxu3 }
 0x30d   :  { %v10475_v43 = vld [vmem:[#allocation7 + $0x968] sm:$0xf0] }
 0x30e   :  { %v14064_v35 = vld [vmem:[#allocation7 + $0xd8c] sm:$0xf]  ;;  %v10478_v55 = vor.u32 %v13928_v42, %v10475_v43  ;;  %7616 = vmatpush.bf16.msrb.mxu1 %v10734_v45  ;;  %v7364_v37 = vadd.f32 %v7363_v17, %v7351_v29 }
 0x30f   :  { %v11019_v46 = vld [vmem:[#allocation7 + $0xda8] sm:$0xf0] }
 0x310   :  { %v14128_v48 = vld [vmem:[#allocation7 + $0xf8c] sm:$0xf]  ;;  %v11022_v56 = vor.u32 %v14064_v35, %v11019_v46  ;;  %7603 = vmatpush.bf16.msrb.mxu0 %v10478_v55  ;;  %v7365_v55 = vpop.f32.mrf.mxu1 }
 0x311   :  { %v11275_v49 = vld [vmem:[#allocation7 + $0xfa8] sm:$0xf0] }
 0x312   :  { %v13984_v14 = vld [vmem:[#allocation7 + $0xb0c] sm:$0xf]  ;;  %v11278_v47 = vor.u32 %v14128_v48, %v11275_v49  ;;  %7628 = vmatpush.bf16.msrb.mxu2 %v11022_v56 }
 0x313   :  { %v10699_v50 = vld [vmem:[#allocation7 + $0xb28] sm:$0xf0] }
 0x314   :  { %v13920_v59 = vld [vmem:[#allocation7 + $0x90c] sm:$0xf]  ;;  %v10702_v63 = vor.u32 %v13984_v14, %v10699_v50  ;;  %7641 = vmatpush.bf16.msrb.mxu3 %v11278_v47 }
 0x315   :  { %v10443_v62 = vld [vmem:[#allocation7 + $0x928] sm:$0xf0] }
 0x316   :  { %v14056_v9 = vld [vmem:[#allocation7 + $0xd4c] sm:$0xf]  ;;  %v10446_v8 = vor.u32 %v13920_v59, %v10443_v62  ;;  %7617 = vmatpush.bf16.msrb.mxu1 %v10702_v63 }
 0x317   :  { %v10987_v0 = vld [vmem:[#allocation7 + $0xd68] sm:$0xf0] }
 0x318   :  { %v14120_v2 = vld [vmem:[#allocation7 + $0xf4c] sm:$0xf]  ;;  %v10990_v10 = vor.u32 %v14056_v9, %v10987_v0  ;;  %7604 = vmatpush.bf16.msrb.mxu0 %v10446_v8  ;;  %v7352_v9 = vpop.f32.mrf.mxu0 }
 0x319   :  { %v11243_v57 = vld [vmem:[#allocation7 + $0xf68] sm:$0xf0] }
 0x31a   :  { %v13976_v3 = vld [vmem:[#allocation7 + $0xacc] sm:$0xf]  ;;  %v11246_v18 = vor.u32 %v14120_v2, %v11243_v57  ;;  %7629 = vmatpush.bf16.msrb.mxu2 %v10990_v10 }
 0x31b   :  { %v10667_v4 = vld [vmem:[#allocation7 + $0xae8] sm:$0xf0] }
 0x31c   :  { %v13912_v15 = vld [vmem:[#allocation7 + $0x8cc] sm:$0xf]  ;;  %v10670_v11 = vor.u32 %v13976_v3, %v10667_v4  ;;  %7642 = vmatpush.bf16.msrb.mxu3 %v11246_v18 }
 0x31d   :  { %v10411_v16 = vld [vmem:[#allocation7 + $0x8e8] sm:$0xf0] }
 0x31e   :  { %v14048_v21 = vld [vmem:[#allocation7 + $0xd0c] sm:$0xf]  ;;  %v10414_v30 = vor.u32 %v13912_v15, %v10411_v16  ;;  %7618 = vmatpush.bf16.msrb.mxu1 %v10670_v11  ;;  %v7376_v16 = vpop.f32.mrf.mxu2 }
 0x31f   :  { %v10955_v13 = vld [vmem:[#allocation7 + $0xd28] sm:$0xf0] }
 0x320   :  { %v14112_v22 = vld [vmem:[#allocation7 + $0xf0c] sm:$0xf]  ;;  %v10958_v31 = vor.u32 %v14048_v21, %v10955_v13  ;;  %7605 = vmatpush.bf16.msrb.mxu0 %v10414_v30 }
 0x321   :  { %v11211_v26 = vld [vmem:[#allocation7 + $0xf28] sm:$0xf0] }
 0x322   :  { %v13968_v51 = vld [vmem:[#allocation7 + $0xa8c] sm:$0xf]  ;;  %v11214_v41 = vor.u32 %v14112_v22, %v11211_v26  ;;  %7630 = vmatpush.bf16.msrb.mxu2 %v10958_v31  ;;  %v7377_v22 = vadd.f32 %v7376_v16, %v7364_v37 }
 0x323   :  { %v10635_v28 = vld [vmem:[#allocation7 + $0xaa8] sm:$0xf0] }
 0x324   :  { %v13904_v32 = vld [vmem:[#allocation7 + $0x88c] sm:$0xf]  ;;  %v10638_v42 = vor.u32 %v13968_v51, %v10635_v28  ;;  %7643 = vmatpush.bf16.msrb.mxu3 %v11214_v41 }
 0x325   :  { %v10379_v36 = vld [vmem:[#allocation7 + $0x8a8] sm:$0xf0] }
 0x326   :  { %v14040_v43 = vld [vmem:[#allocation7 + $0xccc] sm:$0xf]  ;;  %v10382_v48 = vor.u32 %v13904_v32, %v10379_v36  ;;  %7619 = vmatpush.bf16.msrb.mxu1 %v10638_v42  ;;  %v15155_v32 = vadd.f32 %v7389_v12, %v7377_v22 }
 0x327   :  { %v10923_v44 = vld [vmem:[#allocation7 + $0xce8] sm:$0xf0] }
 0x328   :  { %v14104_v39 = vld [vmem:[#allocation7 + $0xecc] sm:$0xf]  ;;  %v10926_v49 = vor.u32 %v14040_v43, %v10923_v44  ;;  %7606 = vmatpush.bf16.msrb.mxu0 %v10382_v48 }
 0x329   :  { %v11179_v45 = vld [vmem:[#allocation7 + $0xee8] sm:$0xf0] }
 0x32a   :  { %v13960_v35 = vld [vmem:[#allocation7 + $0xa4c] sm:$0xf]  ;;  %v11182_v56 = vor.u32 %v14104_v39, %v11179_v45  ;;  %7631 = vmatpush.bf16.msrb.mxu2 %v10926_v49 }
 0x32b   :  { %v10603_v46 = vld [vmem:[#allocation7 + $0xa68] sm:$0xf0] }
 0x32c   :  { %v13896_v14 = vld [vmem:[#allocation7 + $0x84c] sm:$0xf]  ;;  %v10606_v59 = vor.u32 %v13960_v35, %v10603_v46  ;;  %7644 = vmatpush.bf16.msrb.mxu3 %v11182_v56 }
 0x32d   :  { %v10347_v50 = vld [vmem:[#allocation7 + $0x868] sm:$0xf0] }
 0x32e   :  { %v14032_v62 = vld [vmem:[#allocation7 + $0xc8c] sm:$0xf]  ;;  %v10350_v3 = vor.u32 %v13896_v14, %v10347_v50  ;;  %7620 = vmatpush.bf16.msrb.mxu1 %v10606_v59 }
 0x32f   :  { %v10891_v47 = vld [vmem:[#allocation7 + $0xca8] sm:$0xf0] }
 0x330   :  { %v14096_v63 = vld [vmem:[#allocation7 + $0xe8c] sm:$0xf]  ;;  %v10894_v7 = vor.u32 %v14032_v62, %v10891_v47  ;;  %7607 = vmatpush.bf16.msrb.mxu0 %v10350_v3  ;;  %v7378_v47 = vpop.f32.mrf.mxu2 }
 0x331   :  { %v11147_v0 = vld [vmem:[#allocation7 + $0xea8] sm:$0xf0] }
 0x332   :  { %v13952_v2 = vld [vmem:[#allocation7 + $0xa0c] sm:$0xf]  ;;  %v11150_v17 = vor.u32 %v14096_v63, %v11147_v0  ;;  %7632 = vmatpush.bf16.msrb.mxu2 %v10894_v7 }
 0x333   :  { %v10571_v57 = vld [vmem:[#allocation7 + $0xa28] sm:$0xf0] }
 0x334   :  { %v14264_v4 = vld [vmem:[#allocation7 + $0x13cc] sm:$0xf]  ;;  %v10574_v18 = vor.u32 %v13952_v2, %v10571_v57  ;;  %7645 = vmatpush.bf16.msrb.mxu3 %v11150_v17  ;;  %v7391_v57 = vpop.f32.mrf.mxu3 }
 0x335   :  { %v11819_v33 = vld [vmem:[#allocation7 + $0x13e8] sm:$0xf0] }
 0x336   :  { %v13888_v8 = vld [vmem:[#allocation7 + $0x80c] sm:$0xf]  ;;  %v11822_v26 = vor.u32 %v14264_v4, %v11819_v33  ;;  %7621 = vmatpush.bf16.msrb.mxu1 %v10574_v18 }
 0x337   :  { %v10315_v10 = vld [vmem:[#allocation7 + $0x828] sm:$0xf0] }
 0x338   :  { %v14200_v15 = vld [vmem:[#allocation7 + $0x11cc] sm:$0xf]  ;;  %v10318_v29 = vor.u32 %v13888_v8, %v10315_v10 }
 0x339   :  { %v11563_v11 = vld [vmem:[#allocation7 + $0x11e8] sm:$0xf0]  ;;  %7622 = vmatmul.bf16.vlgmr.msrb.gmra.mxu1 %v15065_v40 }
 0x33a   :  { %v14024_v21 = vld [vmem:[#allocation7 + $0xc4c] sm:$0xf]  ;;  %v11566_v36 = vor.u32 %v14200_v15, %v11563_v11  ;;  %7666 = vmatpush.bf16.msra.mxu1 %v11822_v26  ;;  %7608 = vmatpush.bf16.msrb.mxu0 %v10318_v29 }
 0x33b   :  { %v10859_v13 = vld [vmem:[#allocation7 + $0xc68] sm:$0xf0] }
 0x33c   :  { %v14088_v51 = vld [vmem:[#allocation7 + $0xe4c] sm:$0xf]  ;;  %v10862_v41 = vor.u32 %v14024_v21, %v10859_v13 }
 0x33d   :  { %v11115_v28 = vld [vmem:[#allocation7 + $0xe68] sm:$0xf0]  ;;  %7609 = vmatmul.bf16.vlgmr.msrb.gmra.mxu0 %v15063_v34 }
 0x33e   :  { %v14256_v30 = vld [vmem:[#allocation7 + $0x138c] sm:$0xf]  ;;  %v11118_v39 = vor.u32 %v14088_v51, %v11115_v28  ;;  %7653 = vmatpush.bf16.msra.mxu0 %v11566_v36  ;;  %7633 = vmatpush.bf16.msrb.mxu2 %v10862_v41 }
 0x33f   :  { %v11787_v31 = vld [vmem:[#allocation7 + $0x13a8] sm:$0xf0] }
 0x340   :  { %v14192_v42 = vld [vmem:[#allocation7 + $0x118c] sm:$0xf]  ;;  %v11790_v46 = vor.u32 %v14256_v30, %v11787_v31  ;;  %7646 = vmatpush.bf16.msrb.mxu3 %v11118_v39 }
 0x341   :  { %v11531_v43 = vld [vmem:[#allocation7 + $0x11a8] sm:$0xf0] }
 0x342   :  { %v14016_v44 = vld [vmem:[#allocation7 + $0xc0c] sm:$0xf]  ;;  %v11534_v59 = vor.u32 %v14192_v42, %v11531_v43  ;;  %7667 = vmatpush.bf16.msra.mxu1 %v11790_v46  ;;  %v7415_v43 = vpop.f32.mrf.mxu1  ;;  %v7402_v46 = vpop.f32.mrf.mxu0 }
 0x343   :  { %v10827_v37 = vld [vmem:[#allocation7 + $0xc28] sm:$0xf0] }
 0x344   :  { %v14080_v45 = vld [vmem:[#allocation7 + $0xe0c] sm:$0xf]  ;;  %v10830_v62 = vor.u32 %v14016_v44, %v10827_v37  ;;  %7654 = vmatpush.bf16.msra.mxu0 %v11534_v59 }
 0x345   :  { %v11083_v35 = vld [vmem:[#allocation7 + $0xe28] sm:$0xf0] }
 0x346   :  { %v14328_v48 = vld [vmem:[#allocation7 + $0x15cc] sm:$0xf]  ;;  %v11086_v63 = vor.u32 %v14080_v45, %v11083_v35  ;;  %7634 = vmatpush.bf16.msrb.mxu2 %v10830_v62 }
 0x347   :  { %v12075_v49 = vld [vmem:[#allocation7 + $0x15e8] sm:$0xf0] }
 0x348   :  { %v14392_v14 = vld [vmem:[#allocation7 + $0x17cc] sm:$0xf]  ;;  %v12078_v9 = vor.u32 %v14328_v48, %v12075_v49  ;;  %7647 = vmatpush.bf16.msrb.mxu3 %v11086_v63 }
 0x349   :  { %v12331_v50 = vld [vmem:[#allocation7 + $0x17e8] sm:$0xf0]  ;;  %7635 = vmatmul.bf16.vlgmr.msrb.gmra.mxu2 %v15069_v5 }
 0x34a   :  { %v14248_v55 = vld [vmem:[#allocation7 + $0x134c] sm:$0xf]  ;;  %v12334_v3 = vor.u32 %v14392_v14, %v12331_v50  ;;  %7679 = vmatpush.bf16.msra.mxu2 %v12078_v9  ;;  %v7403_v50 = vadd.f32 %v7402_v46, %v15155_v32  ;;  %v7441_v46 = vpop.f32.mrf.mxu3 }
 0x34b   :  { %v11755_v56 = vld [vmem:[#allocation7 + $0x1368] sm:$0xf0]  ;;  %7648 = vmatmul.bf16.vlgmr.msrb.gmra.mxu3 %v15071_v6 }
 0x34c   :  { %v14184_v0 = vld [vmem:[#allocation7 + $0x114c] sm:$0xf]  ;;  %v11758_v4 = vor.u32 %v14248_v55, %v11755_v56  ;;  %7692 = vmatpush.bf16.msra.mxu3 %v12334_v3  ;;  %v7416_v47 = vadd.f32 %v7415_v43, %v7403_v50 }
 0x34d   :  { %v11499_v2 = vld [vmem:[#allocation7 + $0x1168] sm:$0xf0] }
 0x34e   :  { %v14320_v33 = vld [vmem:[#allocation7 + $0x158c] sm:$0xf]  ;;  %v11502_v17 = vor.u32 %v14184_v0, %v11499_v2  ;;  %7668 = vmatpush.bf16.msra.mxu1 %v11758_v4 }
 0x34f   :  { %v12043_v7 = vld [vmem:[#allocation7 + $0x15a8] sm:$0xf0] }
 0x350   :  { %v14384_v8 = vld [vmem:[#allocation7 + $0x178c] sm:$0xf]  ;;  %v12046_v18 = vor.u32 %v14320_v33, %v12043_v7  ;;  %7655 = vmatpush.bf16.msra.mxu0 %v11502_v17 }
 0x351   :  { %v12299_v10 = vld [vmem:[#allocation7 + $0x17a8] sm:$0xf0] }
 0x352   :  { %v14240_v15 = vld [vmem:[#allocation7 + $0x130c] sm:$0xf]  ;;  %v12302_v13 = vor.u32 %v14384_v8, %v12299_v10  ;;  %7680 = vmatpush.bf16.msra.mxu2 %v12046_v18 }
 0x353   :  { %v11723_v16 = vld [vmem:[#allocation7 + $0x1328] sm:$0xf0] }
 0x354   :  { %v14176_v11 = vld [vmem:[#allocation7 + $0x110c] sm:$0xf]  ;;  %v11726_v22 = vor.u32 %v14240_v15, %v11723_v16  ;;  %7693 = vmatpush.bf16.msra.mxu3 %v12302_v13  ;;  %v7417_v15 = vpop.f32.mrf.mxu1  ;;  %v7404_v13 = vpop.f32.mrf.mxu0 }
 0x355   :  { %v11467_v21 = vld [vmem:[#allocation7 + $0x1128] sm:$0xf0] }
 0x356   :  { %v14312_v12 = vld [vmem:[#allocation7 + $0x154c] sm:$0xf]  ;;  %v11470_v31 = vor.u32 %v14176_v11, %v11467_v21  ;;  %7669 = vmatpush.bf16.msra.mxu1 %v11726_v22 }
 0x357   :  { %v12011_v26 = vld [vmem:[#allocation7 + $0x1568] sm:$0xf0] }
 0x358   :  { %v14376_v51 = vld [vmem:[#allocation7 + $0x174c] sm:$0xf]  ;;  %v12014_v36 = vor.u32 %v14312_v12, %v12011_v26  ;;  %7656 = vmatpush.bf16.msra.mxu0 %v11470_v31 }
 0x359   :  { %v12267_v28 = vld [vmem:[#allocation7 + $0x1768] sm:$0xf0] }
 0x35a   :  { %v14232_v29 = vld [vmem:[#allocation7 + $0x12cc] sm:$0xf]  ;;  %v12270_v44 = vor.u32 %v14376_v51, %v12267_v28  ;;  %7681 = vmatpush.bf16.msra.mxu2 %v12014_v36 }
 0x35b   :  { %v11691_v30 = vld [vmem:[#allocation7 + $0x12e8] sm:$0xf0] }
 0x35c   :  { %v14168_v41 = vld [vmem:[#allocation7 + $0x10cc] sm:$0xf]  ;;  %v11694_v39 = vor.u32 %v14232_v29, %v11691_v30  ;;  %7694 = vmatpush.bf16.msra.mxu3 %v12270_v44 }
 0x35d   :  { %v11435_v42 = vld [vmem:[#allocation7 + $0x10e8] sm:$0xf0] }
 0x35e   :  { %v14304_v37 = vld [vmem:[#allocation7 + $0x150c] sm:$0xf]  ;;  %v11438_v55 = vor.u32 %v14168_v41, %v11435_v42  ;;  %7670 = vmatpush.bf16.msra.mxu1 %v11694_v39  ;;  %v7428_v42 = vpop.f32.mrf.mxu2 }
 0x35f   :  { %v11979_v45 = vld [vmem:[#allocation7 + $0x1528] sm:$0xf0] }
 0x360   :  { %v14368_v35 = vld [vmem:[#allocation7 + $0x170c] sm:$0xf]  ;;  %v11982_v56 = vor.u32 %v14304_v37, %v11979_v45  ;;  %7657 = vmatpush.bf16.msra.mxu0 %v11438_v55 }
 0x361   :  { %v12235_v48 = vld [vmem:[#allocation7 + $0x1728] sm:$0xf0] }
 0x362   :  { %v14224_v49 = vld [vmem:[#allocation7 + $0x128c] sm:$0xf]  ;;  %v12238_v63 = vor.u32 %v14368_v35, %v12235_v48  ;;  %7682 = vmatpush.bf16.msra.mxu2 %v11982_v56  ;;  %v7429_v35 = vadd.f32 %v7428_v42, %v7416_v47 }
 0x363   :  { %v11659_v14 = vld [vmem:[#allocation7 + $0x12a8] sm:$0xf0] }
 0x364   :  { %v14160_v59 = vld [vmem:[#allocation7 + $0x108c] sm:$0xf]  ;;  %v11662_v9 = vor.u32 %v14224_v49, %v11659_v14  ;;  %7695 = vmatpush.bf16.msra.mxu3 %v12238_v63 }
 0x365   :  { %v11403_v62 = vld [vmem:[#allocation7 + $0x10a8] sm:$0xf0] }
 0x366   :  { %v14296_v0 = vld [vmem:[#allocation7 + $0x14cc] sm:$0xf]  ;;  %v11406_v7 = vor.u32 %v14160_v59, %v11403_v62  ;;  %7671 = vmatpush.bf16.msra.mxu1 %v11662_v9  ;;  %v15162_v59 = vadd.f32 %v7441_v46, %v7429_v35 }
 0x367   :  { %v11947_v2 = vld [vmem:[#allocation7 + $0x14e8] sm:$0xf0] }
 0x368   :  { %v14360_v57 = vld [vmem:[#allocation7 + $0x16cc] sm:$0xf]  ;;  %v11950_v32 = vor.u32 %v14296_v0, %v11947_v2  ;;  %7658 = vmatpush.bf16.msra.mxu0 %v11406_v7 }
 0x369   :  { %v12203_v3 = vld [vmem:[#allocation7 + $0x16e8] sm:$0xf0] }
 0x36a   :  { %v14216_v4 = vld [vmem:[#allocation7 + $0x124c] sm:$0xf]  ;;  %v12206_v16 = vor.u32 %v14360_v57, %v12203_v3  ;;  %7683 = vmatpush.bf16.msra.mxu2 %v11950_v32 }
 0x36b   :  { %v11627_v33 = vld [vmem:[#allocation7 + $0x1268] sm:$0xf0] }
 0x36c   :  { %v14152_v8 = vld [vmem:[#allocation7 + $0x104c] sm:$0xf]  ;;  %v11630_v17 = vor.u32 %v14216_v4, %v11627_v33  ;;  %7696 = vmatpush.bf16.msra.mxu3 %v12206_v16 }
 0x36d   :  { %v11371_v10 = vld [vmem:[#allocation7 + $0x1068] sm:$0xf0] }
 0x36e   :  { %v14288_v18 = vld [vmem:[#allocation7 + $0x148c] sm:$0xf]  ;;  %v11374_v51 = vor.u32 %v14152_v8, %v11371_v10  ;;  %7672 = vmatpush.bf16.msra.mxu1 %v11630_v17 }
 0x36f   :  { %v11915_v11 = vld [vmem:[#allocation7 + $0x14a8] sm:$0xf0] }
 0x370   :  { %v14352_v21 = vld [vmem:[#allocation7 + $0x168c] sm:$0xf]  ;;  %v11918_v30 = vor.u32 %v14288_v18, %v11915_v11  ;;  %7659 = vmatpush.bf16.msra.mxu0 %v11374_v51  ;;  %v7430_v11 = vpop.f32.mrf.mxu2 }
 0x371   :  { %v12171_v22 = vld [vmem:[#allocation7 + $0x16a8] sm:$0xf0] }
 0x372   :  { %v14208_v12 = vld [vmem:[#allocation7 + $0x120c] sm:$0xf]  ;;  %v12174_v43 = vor.u32 %v14352_v21, %v12171_v22  ;;  %7684 = vmatpush.bf16.msra.mxu2 %v11918_v30 }
 0x373   :  { %v11595_v26 = vld [vmem:[#allocation7 + $0x1228] sm:$0xf0] }
 0x374   :  { %v14520_v28 = vld [vmem:[#allocation7 + $0x1bcc] sm:$0xf]  ;;  %v11598_v44 = vor.u32 %v14208_v12, %v11595_v26  ;;  %7697 = vmatpush.bf16.msra.mxu3 %v12174_v43  ;;  %v7443_v26 = vpop.f32.mrf.mxu3 }
 0x375   :  { %v12843_v29 = vld [vmem:[#allocation7 + $0x1be8] sm:$0xf0] }
 0x376   :  { %v14144_v31 = vld [vmem:[#allocation7 + $0x100c] sm:$0xf]  ;;  %v12846_v48 = vor.u32 %v14520_v28, %v12843_v29  ;;  %7673 = vmatpush.bf16.msra.mxu1 %v11598_v44 }
 0x377   :  { %v11339_v36 = vld [vmem:[#allocation7 + $0x1028] sm:$0xf0] }
 0x378   :  { %v14456_v41 = vld [vmem:[#allocation7 + $0x19cc] sm:$0xf]  ;;  %v11342_v50 = vor.u32 %v14144_v31, %v11339_v36 }
 0x379   :  { %v12587_v39 = vld [vmem:[#allocation7 + $0x19e8] sm:$0xf0]  ;;  %7674 = vmatmul.bf16.vlgmr.msra.gmra.mxu1 %v15077_v1 }
 0x37a   :  { %v14280_v37 = vld [vmem:[#allocation7 + $0x144c] sm:$0xf]  ;;  %v12590_v62 = vor.u32 %v14456_v41, %v12587_v39  ;;  %7718 = vmatpush.bf16.msrb.mxu1 %v12846_v48  ;;  %7660 = vmatpush.bf16.msra.mxu0 %v11342_v50 }
 0x37b   :  { %v11883_v45 = vld [vmem:[#allocation7 + $0x1468] sm:$0xf0] }
 0x37c   :  { %v14344_v49 = vld [vmem:[#allocation7 + $0x164c] sm:$0xf]  ;;  %v11886_v63 = vor.u32 %v14280_v37, %v11883_v45 }
 0x37d   :  { %v12139_v14 = vld [vmem:[#allocation7 + $0x1668] sm:$0xf0]  ;;  %7661 = vmatmul.bf16.vlgmr.msra.gmra.mxu0 %v15075_v54 }
 0x37e   :  { %v14512_v55 = vld [vmem:[#allocation7 + $0x1b8c] sm:$0xf]  ;;  %v12142_v57 = vor.u32 %v14344_v49, %v12139_v14  ;;  %7705 = vmatpush.bf16.msrb.mxu0 %v12590_v62  ;;  %7685 = vmatpush.bf16.msra.mxu2 %v11886_v63 }
 0x37f   :  { %v12811_v56 = vld [vmem:[#allocation7 + $0x1ba8] sm:$0xf0] }
 0x380   :  { %v14448_v9 = vld [vmem:[#allocation7 + $0x198c] sm:$0xf]  ;;  %v12814_v33 = vor.u32 %v14512_v55, %v12811_v56  ;;  %7698 = vmatpush.bf16.msra.mxu3 %v12142_v57 }
 0x381   :  { %v12555_v0 = vld [vmem:[#allocation7 + $0x19a8] sm:$0xf0] }
 0x382   :  { %v14272_v2 = vld [vmem:[#allocation7 + $0x140c] sm:$0xf]  ;;  %v12558_v17 = vor.u32 %v14448_v9, %v12555_v0  ;;  %7719 = vmatpush.bf16.msrb.mxu1 %v12814_v33  ;;  %v7467_v0 = vpop.f32.mrf.mxu1  ;;  %v7454_v33 = vpop.f32.mrf.mxu0 }
 0x383   :  { %v11851_v47 = vld [vmem:[#allocation7 + $0x1428] sm:$0xf0] }
 0x384   :  { %v14336_v3 = vld [vmem:[#allocation7 + $0x160c] sm:$0xf]  ;;  %v11854_v18 = vor.u32 %v14272_v2, %v11851_v47  ;;  %7706 = vmatpush.bf16.msrb.mxu0 %v12558_v17 }
 0x385   :  { %v12107_v4 = vld [vmem:[#allocation7 + $0x1628] sm:$0xf0] }
 0x386   :  { %v14584_v7 = vld [vmem:[#allocation7 + $0x1dcc] sm:$0xf]  ;;  %v12110_v21 = vor.u32 %v14336_v3, %v12107_v4  ;;  %7686 = vmatpush.bf16.msra.mxu2 %v11854_v18 }
 0x387   :  { %v13099_v32 = vld [vmem:[#allocation7 + $0x1de8] sm:$0xf0] }
 0x388   :  { %v14648_v8 = vld [vmem:[#allocation7 + $0x1fcc] sm:$0xf]  ;;  %v13102_v13 = vor.u32 %v14584_v7, %v13099_v32  ;;  %7699 = vmatpush.bf16.msra.mxu3 %v12110_v21 }
 0x389   :  { %v13355_v10 = vld [vmem:[#allocation7 + $0x1fe8] sm:$0xf0]  ;;  %7687 = vmatmul.bf16.vlgmr.msra.gmra.mxu2 %v15081_v20 }
 0x38a   :  { %v14504_v15 = vld [vmem:[#allocation7 + $0x1b4c] sm:$0xf]  ;;  %v13358_v51 = vor.u32 %v14648_v8, %v13355_v10  ;;  %7731 = vmatpush.bf16.msrb.mxu2 %v13102_v13  ;;  %v7455_v10 = vadd.f32 %v7454_v33, %v15162_v59  ;;  %v7493_v33 = vpop.f32.mrf.mxu3 }
 0x38b   :  { %v12779_v16 = vld [vmem:[#allocation7 + $0x1b68] sm:$0xf0]  ;;  %7700 = vmatmul.bf16.vlgmr.msra.gmra.mxu3 %v15083_v25 }
 0x38c   :  { %v14440_v22 = vld [vmem:[#allocation7 + $0x194c] sm:$0xf]  ;;  %v12782_v28 = vor.u32 %v14504_v15, %v12779_v16  ;;  %7744 = vmatpush.bf16.msrb.mxu3 %v13358_v51  ;;  %v7468_v11 = vadd.f32 %v7467_v0, %v7455_v10 }
 0x38d   :  { %v12523_v12 = vld [vmem:[#allocation7 + $0x1968] sm:$0xf0] }
 0x38e   :  { %v14576_v29 = vld [vmem:[#allocation7 + $0x1d8c] sm:$0xf]  ;;  %v12526_v43 = vor.u32 %v14440_v22, %v12523_v12  ;;  %7720 = vmatpush.bf16.msrb.mxu1 %v12782_v28 }
 0x38f   :  { %v13067_v30 = vld [vmem:[#allocation7 + $0x1da8] sm:$0xf0] }
 0x390   :  { %v14640_v31 = vld [vmem:[#allocation7 + $0x1f8c] sm:$0xf]  ;;  %v13070_v44 = vor.u32 %v14576_v29, %v13067_v30  ;;  %7707 = vmatpush.bf16.msrb.mxu0 %v12526_v43 }
 0x391   :  { %v13323_v36 = vld [vmem:[#allocation7 + $0x1fa8] sm:$0xf0] }
 0x392   :  { %v14496_v41 = vld [vmem:[#allocation7 + $0x1b0c] sm:$0xf]  ;;  %v13326_v45 = vor.u32 %v14640_v31, %v13323_v36  ;;  %7732 = vmatpush.bf16.msrb.mxu2 %v13070_v44 }
 0x393   :  { %v12747_v42 = vld [vmem:[#allocation7 + $0x1b28] sm:$0xf0] }
 0x394   :  { %v14432_v39 = vld [vmem:[#allocation7 + $0x190c] sm:$0xf]  ;;  %v12750_v35 = vor.u32 %v14496_v41, %v12747_v42  ;;  %7745 = vmatpush.bf16.msrb.mxu3 %v13326_v45  ;;  %v7469_v41 = vpop.f32.mrf.mxu1  ;;  %v7456_v45 = vpop.f32.mrf.mxu0 }
 0x395   :  { %v12491_v37 = vld [vmem:[#allocation7 + $0x1928] sm:$0xf0]  ;;  %v9713_v41 = vld [vmem:[#allocation7 + $0x350] sm:$0xf] }
 0x396   :  { %v14568_v46 = vld [vmem:[#allocation7 + $0x1d4c] sm:$0xf]  ;;  %v12494_v56 = vor.u32 %v14432_v39, %v12491_v37  ;;  %7721 = vmatpush.bf16.msrb.mxu1 %v12750_v35 }
 0x397   :  { %v13035_v48 = vld [vmem:[#allocation7 + $0x1d68] sm:$0xf0] }
 0x398   :  { %v14632_v49 = vld [vmem:[#allocation7 + $0x1f4c] sm:$0xf]  ;;  %v13038_v62 = vor.u32 %v14568_v46, %v13035_v48  ;;  %7708 = vmatpush.bf16.msrb.mxu0 %v12494_v56 }
 0x399   :  { %v13291_v14 = vld [vmem:[#allocation7 + $0x1f68] sm:$0xf0] }
 0x39a   :  { %v14488_v50 = vld [vmem:[#allocation7 + $0x1acc] sm:$0xf]  ;;  %v13294_v2 = vor.u32 %v14632_v49, %v13291_v14  ;;  %7733 = vmatpush.bf16.msrb.mxu2 %v13038_v62  ;;  %v9777_v14 = vld [vmem:[#allocation7 + $0x3d0] sm:$0xf] }
 0x39b   :  { %v12715_v55 = vld [vmem:[#allocation7 + $0x1ae8] sm:$0xf0] }
 0x39c   :  { %v14424_v63 = vld [vmem:[#allocation7 + $0x18cc] sm:$0xf]  ;;  %v12718_v57 = vor.u32 %v14488_v50, %v12715_v55  ;;  %7746 = vmatpush.bf16.msrb.mxu3 %v13294_v2  ;;  %v13757_v50 = vld [vmem:[#allocation7 + $0x3ec] sm:$0xf0] }
 0x39d   :  { %v12459_v9 = vld [vmem:[#allocation7 + $0x18e8] sm:$0xf0] }
 0x39e   :  { %v14560_v47 = vld [vmem:[#allocation7 + $0x1d0c] sm:$0xf]  ;;  %v12462_v15 = vor.u32 %v14424_v63, %v12459_v9  ;;  %7722 = vmatpush.bf16.msrb.mxu1 %v12718_v57  ;;  %v9521_v63 = vld [vmem:[#allocation7 + $0x1d0] sm:$0xf]  ;;  %v7480_v9 = vpop.f32.mrf.mxu2 }
 0x39f   :  { %v13003_v3 = vld [vmem:[#allocation7 + $0x1d28] sm:$0xf0]  ;;  %v13693_v57 = vld [vmem:[#allocation7 + $0x1ec] sm:$0xf0] }
 0x3a0   :  { %v14624_v4 = vld [vmem:[#allocation7 + $0x1f0c] sm:$0xf]  ;;  %v13006_v16 = vor.u32 %v14560_v47, %v13003_v3  ;;  %7709 = vmatpush.bf16.msrb.mxu0 %v12462_v15  ;;  %v9745_v15 = vld [vmem:[#allocation7 + $0x390] sm:$0xf] }
 0x3a1   :  { %v13259_v7 = vld [vmem:[#allocation7 + $0x1f28] sm:$0xf0] }
 0x3a2   :  { %v14480_v32 = vld [vmem:[#allocation7 + $0x1a8c] sm:$0xf]  ;;  %v13262_v21 = vor.u32 %v14624_v4, %v13259_v7  ;;  %7734 = vmatpush.bf16.msrb.mxu2 %v13006_v16  ;;  %v7481_v4 = vadd.f32 %v7480_v9, %v7468_v11  ;;  %v9778_v7 = vor.u32 %v13757_v50, %v9777_v14  ;;  %v13749_v16 = vld [vmem:[#allocation7 + $0x3ac] sm:$0xf0] }
 0x3a3   :  { %v12683_v8 = vld [vmem:[#allocation7 + $0x1aa8] sm:$0xf0]  ;;  %v10001_v50 = vld [vmem:[#allocation7 + $0x590] sm:$0xf] }
 0x3a4   :  { %v14416_v17 = vld [vmem:[#allocation7 + $0x188c] sm:$0xf]  ;;  %v12686_v13 = vor.u32 %v14480_v32, %v12683_v8  ;;  %7747 = vmatpush.bf16.msrb.mxu3 %v13262_v21  ;;  %v13733_v9 = vld [vmem:[#allocation7 + $0x32c] sm:$0xf0] }
 0x3a5   :  { %v12427_v18 = vld [vmem:[#allocation7 + $0x18a8] sm:$0xf0] }
 0x3a6   :  { %v14552_v22 = vld [vmem:[#allocation7 + $0x1ccc] sm:$0xf]  ;;  %v12430_v30 = vor.u32 %v14416_v17, %v12427_v18  ;;  %7723 = vmatpush.bf16.msrb.mxu1 %v12686_v13  ;;  %v15169_v17 = vadd.f32 %v7493_v33, %v7481_v4  ;;  %v9522_v18 = vor.u32 %v13693_v57, %v9521_v63  ;;  %v9489_v13 = vld [vmem:[#allocation7 + $0x190] sm:$0xf] }
 0x3a7   :  { %v12971_v12 = vld [vmem:[#allocation7 + $0x1ce8] sm:$0xf0]  ;;  %v9681_v63 = vld [vmem:[#allocation7 + $0x310] sm:$0xf] }
 0x3a8   :  { %v14616_v26 = vld [vmem:[#allocation7 + $0x1ecc] sm:$0xf]  ;;  %v12974_v59 = vor.u32 %v14552_v22, %v12971_v12  ;;  %7710 = vmatpush.bf16.msrb.mxu0 %v12430_v30  ;;  %v13685_v22 = vld [vmem:[#allocation7 + $0x1ac] sm:$0xf0]  ;;  %v9682_v4 = vor.u32 %v13733_v9, %v9681_v63 }
 0x3a9   :  { %v13227_v51 = vld [vmem:[#allocation7 + $0x1ee8] sm:$0xf0]  ;;  %v10033_v30 = vld [vmem:[#allocation7 + $0x5d0] sm:$0xf] }
 0x3aa   :  { %v14472_v28 = vld [vmem:[#allocation7 + $0x1a4c] sm:$0xf]  ;;  %v13230_v42 = vor.u32 %v14616_v26, %v13227_v51  ;;  %7735 = vmatpush.bf16.msrb.mxu2 %v12974_v59  ;;  %v13821_v59 = vld [vmem:[#allocation7 + $0x5ec] sm:$0xf0] }
 0x3ab   :  { %v12651_v29 = vld [vmem:[#allocation7 + $0x1a68] sm:$0xf0]  ;;  %v10034_v45 = vor.u32 %v13821_v59, %v10033_v30  ;;  %v9425_v57 = vld [vmem:[#allocation7 + $0x110] sm:$0xf] }
 0x3ac   :  { %v14408_v31 = vld [vmem:[#allocation7 + $0x184c] sm:$0xf]  ;;  %v12654_v43 = vor.u32 %v14472_v28, %v12651_v29  ;;  %7748 = vmatpush.bf16.msrb.mxu3 %v13230_v42  ;;  %v9746_v29 = vor.u32 %v13749_v16, %v9745_v15  ;;  %v13741_v42 = vld [vmem:[#allocation7 + $0x36c] sm:$0xf0] }
 0x3ad   :  { %v12395_v36 = vld [vmem:[#allocation7 + $0x1868] sm:$0xf0]  ;;  %v9714_v14 = vor.u32 %v13741_v42, %v9713_v41  ;;  %v9969_v33 = vld [vmem:[#allocation7 + $0x550] sm:$0xf] }
 0x3ae   :  { %v14544_v44 = vld [vmem:[#allocation7 + $0x1c8c] sm:$0xf]  ;;  %v12398_v49 = vor.u32 %v14408_v31, %v12395_v36  ;;  %7724 = vmatpush.bf16.msrb.mxu1 %v12654_v43  ;;  %v10289_v31 = vld [vmem:[#allocation7 + $0x7d0] sm:$0xf]  ;;  %v9490_v43 = vor.u32 %v13685_v22, %v9489_v13  ;;  %v7519_v22 = vpop.f32.mrf.mxu1 }
 0x3af   :  { %v12939_v39 = vld [vmem:[#allocation7 + $0x1ca8] sm:$0xf0]  ;;  %v13885_v36 = vld [vmem:[#allocation7 + $0x7ec] sm:$0xf0] }
 0x3b0   :  { %v14608_v37 = vld [vmem:[#allocation7 + $0x1e8c] sm:$0xf]  ;;  %v12942_v55 = vor.u32 %v14544_v44, %v12939_v39  ;;  %7711 = vmatpush.bf16.msrb.mxu0 %v12398_v49  ;;  %v7482_v39 = vpop.f32.mrf.mxu2  ;;  %v10290_v49 = vor.u32 %v13885_v36, %v10289_v31  ;;  %v13725_v15 = vld [vmem:[#allocation7 + $0x2ec] sm:$0xf0] }
 0x3b1   :  { %v13195_v35 = vld [vmem:[#allocation7 + $0x1ea8] sm:$0xf0]  ;;  %v13661_v13 = vld [vmem:[#allocation7 + $0xec] sm:$0xf0] }
 0x3b2   :  { %v14464_v46 = vld [vmem:[#allocation7 + $0x1a0c] sm:$0xf]  ;;  %v13198_v0 = vor.u32 %v14608_v37, %v13195_v35  ;;  %7736 = vmatpush.bf16.msrb.mxu2 %v12942_v55  ;;  %v9457_v35 = vld [vmem:[#allocation7 + $0x150] sm:$0xf] }
 0x3b3   :  { %v12619_v48 = vld [vmem:[#allocation7 + $0x1a28] sm:$0xf0]  ;;  %v13813_v55 = vld [vmem:[#allocation7 + $0x5ac] sm:$0xf0] }
 0x3b4   :  { %v14400_v56 = vld [vmem:[#allocation7 + $0x180c] sm:$0xf]  ;;  %v12622_v2 = vor.u32 %v14464_v46, %v12619_v48  ;;  %7749 = vmatpush.bf16.msrb.mxu3 %v13198_v0  ;;  %v13677_v46 = vld [vmem:[#allocation7 + $0x16c] sm:$0xf0]  ;;  %v7495_v48 = vpop.f32.mrf.mxu3 }
 0x3b5   :  { %v12363_v62 = vld [vmem:[#allocation7 + $0x1828] sm:$0xf0]  ;;  %v9458_v0 = vor.u32 %v13677_v46, %v9457_v35  ;;  %v13861_v30 = vld [vmem:[#allocation7 + $0x72c] sm:$0xf0] }
 0x3b6   :  { %v14536_v47 = vld [vmem:[#allocation7 + $0x1c4c] sm:$0xf]  ;;  %v12366_v10 = vor.u32 %v14400_v56, %v12363_v62  ;;  %7725 = vmatpush.bf16.msrb.mxu1 %v12622_v2  ;;  %v10257_v56 = vld [vmem:[#allocation7 + $0x790] sm:$0xf]  ;;  %v10002_v2 = vor.u32 %v13813_v55, %v10001_v50  ;;  %v7521_v63 = vpop.f32.mrf.mxu1 }
 0x3b7   :  { %v12907_v3 = vld [vmem:[#allocation7 + $0x1c68] sm:$0xf0]  ;;  %v13877_v62 = vld [vmem:[#allocation7 + $0x7ac] sm:$0xf0] }
 0x3b8   :  { %v14600_v32 = vld [vmem:[#allocation7 + $0x1e4c] sm:$0xf]  ;;  %v12910_v21 = vor.u32 %v14536_v47, %v12907_v3  ;;  %7712 = vmatpush.bf16.msrb.mxu0 %v12366_v10  ;;  %v13669_v47 = vld [vmem:[#allocation7 + $0x12c] sm:$0xf0]  ;;  %v10258_v3 = vor.u32 %v13877_v62, %v10257_v56 }
 0x3b9   :  { %v13163_v8 = vld [vmem:[#allocation7 + $0x1e68] sm:$0xf0]  ;;  %7726 = vmatmul.bf16.vlgmr.msrb.gmra.mxu1 %v15089_v53  ;;  %v9649_v10 = vld [vmem:[#allocation7 + $0x2d0] sm:$0xf]  ;;  %v9426_v16 = vor.u32 %v13669_v47, %v9425_v57 }
 0x3ba   :  { %v14528_v12 = vld [vmem:[#allocation7 + $0x1c0c] sm:$0xf]  ;;  %v13166_v26 = vor.u32 %v14600_v32, %v13163_v8  ;;  %7770 = vmatpush.bf16.msra.mxu1 %v9778_v7  ;;  %7737 = vmatpush.bf16.msrb.mxu2 %v12910_v21  ;;  %v13805_v7 = vld [vmem:[#allocation7 + $0x56c] sm:$0xf0] }
 0x3bb   :  { %v12875_v11 = vld [vmem:[#allocation7 + $0x1c28] sm:$0xf0]  ;;  %7713 = vmatmul.bf16.vlgmr.msrb.gmra.mxu0 %v15087_v52  ;;  %v10225_v32 = vld [vmem:[#allocation7 + $0x750] sm:$0xf] }
 0x3bc   :  { %v14592_v51 = vld [vmem:[#allocation7 + $0x1e0c] sm:$0xf]  ;;  %7757 = vmatpush.bf16.msra.mxu0 %v9522_v18  ;;  %v12878_v44 = vor.u32 %v14528_v12, %v12875_v11  ;;  %7750 = vmatpush.bf16.msrb.mxu3 %v13166_v26  ;;  %v13869_v8 = vld [vmem:[#allocation7 + $0x76c] sm:$0xf0]  ;;  %v9970_v18 = vor.u32 %v13805_v7, %v9969_v33  ;;  %v9650_v26 = vor.u32 %v13725_v15, %v9649_v10 }
 0x3bd   :  { %v13131_v28 = vld [vmem:[#allocation7 + $0x1e28] sm:$0xf0]  ;;  %v9393_v21 = vld [vmem:[#allocation7 + $0xd0] sm:$0xf]  ;;  %v10226_v12 = vor.u32 %v13869_v8, %v10225_v32 }
 0x3be   :  { %v13134_v37 = vor.u32 %v14592_v51, %v13131_v28  ;;  %7771 = vmatpush.bf16.msra.mxu1 %v9746_v29  ;;  %7738 = vmatpush.bf16.msrb.mxu2 %v12878_v44  ;;  %v9937_v11 = vld [vmem:[#allocation7 + $0x510] sm:$0xf]  ;;  %v7506_v29 = vpop.f32.mrf.mxu0  ;;  %v9394_v41 = vor.u32 %v13661_v13, %v9393_v21  ;;  %v7532_v13 = vpop.f32.mrf.mxu2 }
 0x3bf   :  { %v13797_v51 = vld [vmem:[#allocation7 + $0x52c] sm:$0xf0]  ;;  %v7507_v36 = vadd.f32 %v7506_v29, %v15169_v17  ;;  %v7545_v29 = vpop.f32.mrf.mxu3 }
 0x3c0   :  { %7758 = vmatpush.bf16.msra.mxu0 %v9490_v43  ;;  %7751 = vmatpush.bf16.msrb.mxu3 %v13134_v37  ;;  %v10193_v28 = vld [vmem:[#allocation7 + $0x710] sm:$0xf]  ;;  %v9938_v42 = vor.u32 %v13797_v51, %v9937_v11 }
 0x3c1   :  { %7739 = vmatmul.bf16.vlgmr.msrb.gmra.mxu2 %v15093_v19  ;;  %v9617_v59 = vld [vmem:[#allocation7 + $0x290] sm:$0xf]  ;;  %v7520_v39 = vadd.f32 %v7519_v22, %v7507_v36  ;;  %v10194_v37 = vor.u32 %v13861_v30, %v10193_v28 }
 0x3c2   :  { %7783 = vmatpush.bf16.msra.mxu2 %v10034_v45  ;;  %7772 = vmatpush.bf16.msra.mxu1 %v9714_v14  ;;  %v13717_v31 = vld [vmem:[#allocation7 + $0x2ac] sm:$0xf0] }
 0x3c3   :  { %7752 = vmatmul.bf16.vlgmr.msrb.gmra.mxu3 %v15095_v27  ;;  %v9361_v43 = vld [vmem:[#allocation7 + $0x90] sm:$0xf]  ;;  %v9618_v45 = vor.u32 %v13717_v31, %v9617_v59  ;;  %v7533_v28 = vadd.f32 %v7532_v13, %v7520_v39 }
 0x3c4   :  { %7796 = vmatpush.bf16.msra.mxu3 %v10290_v49  ;;  %7759 = vmatpush.bf16.msra.mxu0 %v9458_v0  ;;  %v13653_v44 = vld [vmem:[#allocation7 + $0xac] sm:$0xf0] }
 0x3c5   :  { %v9905_v35 = vld [vmem:[#allocation7 + $0x4d0] sm:$0xf]  ;;  %v9362_v55 = vor.u32 %v13653_v44, %v9361_v43  ;;  %v15176_v43 = vadd.f32 %v7545_v29, %v7533_v28 }
 0x3c6   :  { %7784 = vmatpush.bf16.msra.mxu2 %v10002_v2  ;;  %7773 = vmatpush.bf16.msra.mxu1 %v9682_v4  ;;  %v13789_v46 = vld [vmem:[#allocation7 + $0x4ec] sm:$0xf0] }
 0x3c7   :  { %v10161_v48 = vld [vmem:[#allocation7 + $0x6d0] sm:$0xf]  ;;  %v9906_v17 = vor.u32 %v13789_v46, %v9905_v35 }
 0x3c8   :  { %7797 = vmatpush.bf16.msra.mxu3 %v10258_v3  ;;  %7760 = vmatpush.bf16.msra.mxu0 %v9426_v16  ;;  %v13853_v49 = vld [vmem:[#allocation7 + $0x6ec] sm:$0xf0]  ;;  %v7508_v3 = vpop.f32.mrf.mxu0 }
 0x3c9   :  { %v9585_v14 = vld [vmem:[#allocation7 + $0x250] sm:$0xf]  ;;  %v10162_v9 = vor.u32 %v13853_v49, %v10161_v48 }
 0x3ca   :  { %7785 = vmatpush.bf16.msra.mxu2 %v9970_v18  ;;  %7774 = vmatpush.bf16.msra.mxu1 %v9650_v26  ;;  %v13709_v50 = vld [vmem:[#allocation7 + $0x26c] sm:$0xf0] }
 0x3cb   :  { %v9329_v56 = vld [vmem:[#allocation7 + $0x50] sm:$0xf]  ;;  %v9586_v0 = vor.u32 %v13709_v50, %v9585_v14 }
 0x3cc   :  { %7798 = vmatpush.bf16.msra.mxu3 %v10226_v12  ;;  %7761 = vmatpush.bf16.msra.mxu0 %v9394_v41  ;;  %v13645_v62 = vld [vmem:[#allocation7 + $0x6c] sm:$0xf0] }
 0x3cd   :  { %v9873_v2 = vld [vmem:[#allocation7 + $0x490] sm:$0xf]  ;;  %v9330_v32 = vor.u32 %v13645_v62, %v9329_v56 }
 0x3ce   :  { %7786 = vmatpush.bf16.msra.mxu2 %v9938_v42  ;;  %7775 = vmatpush.bf16.msra.mxu1 %v9618_v45  ;;  %v13781_v57 = vld [vmem:[#allocation7 + $0x4ac] sm:$0xf0] }
 0x3cf   :  { %v10129_v47 = vld [vmem:[#allocation7 + $0x690] sm:$0xf]  ;;  %v9874_v15 = vor.u32 %v13781_v57, %v9873_v2  ;;  %v7534_v57 = vpop.f32.mrf.mxu2 }
 0x3d0   :  { %7799 = vmatpush.bf16.msra.mxu3 %v10194_v37  ;;  %v13845_v4 = vld [vmem:[#allocation7 + $0x6ac] sm:$0xf0]  ;;  %7762 = vmatpush.bf16.msra.mxu0 %v9362_v55 }
 0x3d1   :  { %v9553_v33 = vld [vmem:[#allocation7 + $0x210] sm:$0xf]  ;;  %v10130_v22 = vor.u32 %v13845_v4, %v10129_v47 }
 0x3d2   :  { %v13701_v7 = vld [vmem:[#allocation7 + $0x22c] sm:$0xf0]  ;;  %7787 = vmatpush.bf16.msra.mxu2 %v9906_v17  ;;  %7776 = vmatpush.bf16.msra.mxu1 %v9586_v0 }
 0x3d3   :  { %v10801_v8 = vld [vmem:[#allocation7 + $0xbd0] sm:$0xf]  ;;  %v9554_v12 = vor.u32 %v13701_v7, %v9553_v33  ;;  %v7547_v7 = vpop.f32.mrf.mxu3 }
 0x3d4   :  { %v14013_v10 = vld [vmem:[#allocation7 + $0xbec] sm:$0xf0]  ;;  %7800 = vmatpush.bf16.msra.mxu3 %v10162_v9  ;;  %7763 = vmatpush.bf16.msra.mxu0 %v9330_v32 }
 0x3d5   :  { %v9297_v16 = vld [vmem:[#allocation7 + $0x10] sm:$0xf]  ;;  %v10802_v30 = vor.u32 %v14013_v10, %v10801_v8 }
 0x3d6   :  { %v13637_v18 = vld [vmem:[#allocation7 + $0x2c] sm:$0xf0]  ;;  %7788 = vmatpush.bf16.msra.mxu2 %v9874_v15  ;;  %7777 = vmatpush.bf16.msra.mxu1 %v9554_v12 }
 0x3d7   :  { %v10545_v21 = vld [vmem:[#allocation7 + $0x9d0] sm:$0xf]  ;;  %v9298_v36 = vor.u32 %v13637_v18, %v9297_v16 }
 0x3d8   :  { %v13949_v26 = vld [vmem:[#allocation7 + $0x9ec] sm:$0xf0]  ;;  %7801 = vmatpush.bf16.msra.mxu3 %v10130_v22 }
 0x3d9   :  { %v9841_v11 = vld [vmem:[#allocation7 + $0x450] sm:$0xf]  ;;  %v10546_v44 = vor.u32 %v13949_v26, %v10545_v21  ;;  %7764 = vmatpush.bf16.msra.mxu0 %v9298_v36  ;;  %7778 = vmatmul.bf16.vlgmr.msra.gmra.mxu1 %v15053_v24 }
 0x3da   :  { %v13773_v51 = vld [vmem:[#allocation7 + $0x46c] sm:$0xf0]  ;;  %7822 = vmatpush.bf16.msrb.mxu1 %v10802_v30 }
 0x3db   :  { %v10097_v59 = vld [vmem:[#allocation7 + $0x650] sm:$0xf]  ;;  %v9842_v37 = vor.u32 %v13773_v51, %v9841_v11 }
 0x3dc   :  { %v13837_v31 = vld [vmem:[#allocation7 + $0x66c] sm:$0xf0]  ;;  %7765 = vmatmul.bf16.vlgmr.msra.gmra.mxu0 %v15051_v23 }
 0x3dd   :  { %v10769_v41 = vld [vmem:[#allocation7 + $0xb90] sm:$0xf]  ;;  %v10098_v48 = vor.u32 %v13837_v31, %v10097_v59  ;;  %7809 = vmatpush.bf16.msrb.mxu0 %v10546_v44  ;;  %7789 = vmatpush.bf16.msra.mxu2 %v9842_v37 }
 0x3de   :  { %v14005_v42 = vld [vmem:[#allocation7 + $0xbac] sm:$0xf0] }
 0x3df   :  { %v10513_v45 = vld [vmem:[#allocation7 + $0x990] sm:$0xf]  ;;  %v10770_v50 = vor.u32 %v14005_v42, %v10769_v41  ;;  %7802 = vmatpush.bf16.msra.mxu3 %v10098_v48  ;;  %v14747_v42 = vld [vmem:[#allocation8] sm:$0xff]  ;;  %v7571_v48 = vpop.f32.mrf.mxu1 }
 0x3e0   :  { %v13941_v35 = vld [vmem:[#allocation7 + $0x9ac] sm:$0xf0]  ;;  %v1736_v44 = vperm.slane %v14747_v42, 3 }
 0x3e1   :  { %v9809_v46 = vld [vmem:[#allocation7 + $0x410] sm:$0xf]  ;;  %v10514_v0 = vor.u32 %v13941_v35, %v10513_v45  ;;  %7823 = vmatpush.bf16.msrb.mxu1 %v10770_v50 }
 0x3e2   :  { %v13765_v39 = vld [vmem:[#allocation7 + $0x42c] sm:$0xf0] }
 0x3e3   :  { %v10065_v49 = vld [vmem:[#allocation7 + $0x610] sm:$0xf]  ;;  %v9810_v2 = vor.u32 %v13765_v39, %v9809_v46  ;;  %7810 = vmatpush.bf16.msrb.mxu0 %v10514_v0 }
 0x3e4   :  { %v13829_v14 = vld [vmem:[#allocation7 + $0x62c] sm:$0xf0] }
 0x3e5   :  { %v11057_v55 = vld [vmem:[#allocation7 + $0xdd0] sm:$0xf]  ;;  %v10066_v47 = vor.u32 %v13829_v14, %v10065_v49  ;;  %7790 = vmatpush.bf16.msra.mxu2 %v9810_v2 }
 0x3e6   :  { %v14077_v17 = vld [vmem:[#allocation7 + $0xdec] sm:$0xf0] }
 0x3e7   :  { %v11313_v56 = vld [vmem:[#allocation7 + $0xfd0] sm:$0xf]  ;;  %v11058_v3 = vor.u32 %v14077_v17, %v11057_v55  ;;  %7803 = vmatpush.bf16.msra.mxu3 %v10066_v47  ;;  %v7558_v17 = vpop.f32.mrf.mxu0 }
 0x3e8   :  { %v14141_v62 = vld [vmem:[#allocation7 + $0xfec] sm:$0xf0]  ;;  %7791 = vmatmul.bf16.vlgmr.msra.gmra.mxu2 %v15057_v60 }
 0x3e9   :  { %v10737_v63 = vld [vmem:[#allocation7 + $0xb50] sm:$0xf]  ;;  %v11314_v32 = vor.u32 %v14141_v62, %v11313_v56  ;;  %7835 = vmatpush.bf16.msrb.mxu2 %v11058_v3 }
 0x3ea   :  { %v13997_v9 = vld [vmem:[#allocation7 + $0xb6c] sm:$0xf0]  ;;  %7804 = vmatmul.bf16.vlgmr.msra.gmra.mxu3 %v15059_v61 }
 0x3eb   :  { %v10481_v4 = vld [vmem:[#allocation7 + $0x950] sm:$0xf]  ;;  %v10738_v8 = vor.u32 %v13997_v9, %v10737_v63  ;;  %7848 = vmatpush.bf16.msrb.mxu3 %v11314_v32  ;;  %v7559_v9 = vadd.f32 %v7558_v17, %v1736_v44 }
 0x3ec   :  { %v13933_v33 = vld [vmem:[#allocation7 + $0x96c] sm:$0xf0] }
 0x3ed   :  { %v11025_v10 = vld [vmem:[#allocation7 + $0xd90] sm:$0xf]  ;;  %v10482_v22 = vor.u32 %v13933_v33, %v10481_v4  ;;  %7824 = vmatpush.bf16.msrb.mxu1 %v10738_v8  ;;  %v7572_v3 = vadd.f32 %v7571_v48, %v7559_v9  ;;  %v7584_v48 = vpop.f32.mrf.mxu2 }
 0x3ee   :  { %v14069_v15 = vld [vmem:[#allocation7 + $0xdac] sm:$0xf0] }
 0x3ef   :  { %v11281_v16 = vld [vmem:[#allocation7 + $0xf90] sm:$0xf]  ;;  %v11026_v12 = vor.u32 %v14069_v15, %v11025_v10  ;;  %7811 = vmatpush.bf16.msrb.mxu0 %v10482_v22  ;;  %v7585_v17 = vadd.f32 %v7584_v48, %v7572_v3 }
 0x3f0   :  { %v14133_v18 = vld [vmem:[#allocation7 + $0xfac] sm:$0xf0] }
 0x3f1   :  { %v10705_v21 = vld [vmem:[#allocation7 + $0xb10] sm:$0xf]  ;;  %v11282_v51 = vor.u32 %v14133_v18, %v11281_v16  ;;  %7836 = vmatpush.bf16.msrb.mxu2 %v11026_v12  ;;  %v7573_v12 = vpop.f32.mrf.mxu1 }
 0x3f2   :  { %v13989_v13 = vld [vmem:[#allocation7 + $0xb2c] sm:$0xf0] }
 0x3f3   :  { %v10449_v26 = vld [vmem:[#allocation7 + $0x910] sm:$0xf]  ;;  %v10706_v28 = vor.u32 %v13989_v13, %v10705_v21  ;;  %7849 = vmatpush.bf16.msrb.mxu3 %v11282_v51 }
 0x3f4   :  { %v13925_v11 = vld [vmem:[#allocation7 + $0x92c] sm:$0xf0] }
 0x3f5   :  { %v10993_v29 = vld [vmem:[#allocation7 + $0xd50] sm:$0xf]  ;;  %v10450_v37 = vor.u32 %v13925_v11, %v10449_v26  ;;  %7825 = vmatpush.bf16.msrb.mxu1 %v10706_v28 }
 0x3f6   :  { %v14061_v30 = vld [vmem:[#allocation7 + $0xd6c] sm:$0xf0] }
 0x3f7   :  { %v11249_v59 = vld [vmem:[#allocation7 + $0xf50] sm:$0xf]  ;;  %v10994_v45 = vor.u32 %v14061_v30, %v10993_v29  ;;  %7812 = vmatpush.bf16.msrb.mxu0 %v10450_v37  ;;  %v7560_v30 = vpop.f32.mrf.mxu0 }
 0x3f8   :  { %v14125_v31 = vld [vmem:[#allocation7 + $0xf6c] sm:$0xf0] }
 0x3f9   :  { %v10673_v36 = vld [vmem:[#allocation7 + $0xad0] sm:$0xf]  ;;  %v11250_v39 = vor.u32 %v14125_v31, %v11249_v59  ;;  %7837 = vmatpush.bf16.msrb.mxu2 %v10994_v45 }
 0x3fa   :  { %v13981_v41 = vld [vmem:[#allocation7 + $0xaec] sm:$0xf0] }
 0x3fb   :  { %v10417_v35 = vld [vmem:[#allocation7 + $0x8d0] sm:$0xf]  ;;  %v10674_v49 = vor.u32 %v13981_v41, %v10673_v36  ;;  %7850 = vmatpush.bf16.msrb.mxu3 %v11250_v39 }
 0x3fc   :  { %v13917_v46 = vld [vmem:[#allocation7 + $0x8ec] sm:$0xf0] }
 0x3fd   :  { %v10961_v14 = vld [vmem:[#allocation7 + $0xd10] sm:$0xf]  ;;  %v10418_v0 = vor.u32 %v13917_v46, %v10417_v35  ;;  %7826 = vmatpush.bf16.msrb.mxu1 %v10674_v49 }
 0x3fe   :  { %v14053_v50 = vld [vmem:[#allocation7 + $0xd2c] sm:$0xf0] }
 0x3ff   :  { %v11217_v55 = vld [vmem:[#allocation7 + $0xf10] sm:$0xf]  ;;  %v10962_v2 = vor.u32 %v14053_v50, %v10961_v14  ;;  %7813 = vmatpush.bf16.msrb.mxu0 %v10418_v0 }
 0x400   :  { %v14117_v56 = vld [vmem:[#allocation7 + $0xf2c] sm:$0xf0] }
 0x401   :  { %v10641_v62 = vld [vmem:[#allocation7 + $0xa90] sm:$0xf]  ;;  %v11218_v4 = vor.u32 %v14117_v56, %v11217_v55  ;;  %7838 = vmatpush.bf16.msrb.mxu2 %v10962_v2  ;;  %v7597_v56 = vpop.f32.mrf.mxu3 }
 0x402   :  { %v13973_v63 = vld [vmem:[#allocation7 + $0xaac] sm:$0xf0] }
 0x403   :  { %v10385_v57 = vld [vmem:[#allocation7 + $0x890] sm:$0xf]  ;;  %v10642_v33 = vor.u32 %v13973_v63, %v10641_v62  ;;  %7851 = vmatpush.bf16.msrb.mxu3 %v11218_v4 }
 0x404   :  { %v13909_v47 = vld [vmem:[#allocation7 + $0x8ac] sm:$0xf0] }
 0x405   :  { %v10929_v7 = vld [vmem:[#allocation7 + $0xcd0] sm:$0xf]  ;;  %v10386_v18 = vor.u32 %v13909_v47, %v10385_v57  ;;  %7827 = vmatpush.bf16.msrb.mxu1 %v10642_v33  ;;  %v15182_v47 = vadd.f32 %v7597_v56, %v7585_v17 }
 0x406   :  { %v14045_v32 = vld [vmem:[#allocation7 + $0xcec] sm:$0xf0] }
 0x407   :  { %v11185_v8 = vld [vmem:[#allocation7 + $0xed0] sm:$0xf]  ;;  %v10930_v21 = vor.u32 %v14045_v32, %v10929_v7  ;;  %7814 = vmatpush.bf16.msrb.mxu0 %v10386_v18 }
 0x408   :  { %v14109_v10 = vld [vmem:[#allocation7 + $0xeec] sm:$0xf0] }
 0x409   :  { %v10609_v15 = vld [vmem:[#allocation7 + $0xa50] sm:$0xf]  ;;  %v11186_v26 = vor.u32 %v14109_v10, %v11185_v8  ;;  %7839 = vmatpush.bf16.msrb.mxu2 %v10930_v21 }
 0x40a   :  { %v13965_v16 = vld [vmem:[#allocation7 + $0xa6c] sm:$0xf0] }
 0x40b   :  { %v10353_v13 = vld [vmem:[#allocation7 + $0x850] sm:$0xf]  ;;  %v10610_v11 = vor.u32 %v13965_v16, %v10609_v15  ;;  %7852 = vmatpush.bf16.msrb.mxu3 %v11186_v26 }
 0x40c   :  { %v13901_v22 = vld [vmem:[#allocation7 + $0x86c] sm:$0xf0] }
 0x40d   :  { %v10897_v51 = vld [vmem:[#allocation7 + $0xc90] sm:$0xf]  ;;  %v10354_v41 = vor.u32 %v13901_v22, %v10353_v13  ;;  %7828 = vmatpush.bf16.msrb.mxu1 %v10610_v11 }
 0x40e   :  { %v14037_v28 = vld [vmem:[#allocation7 + $0xcac] sm:$0xf0] }
 0x40f   :  { %v11153_v29 = vld [vmem:[#allocation7 + $0xe90] sm:$0xf]  ;;  %v10898_v37 = vor.u32 %v14037_v28, %v10897_v51  ;;  %7815 = vmatpush.bf16.msrb.mxu0 %v10354_v41  ;;  %v7599_v41 = vpop.f32.mrf.mxu3 }
 0x410   :  { %v14101_v59 = vld [vmem:[#allocation7 + $0xeac] sm:$0xf0] }
 0x411   :  { %v10577_v31 = vld [vmem:[#allocation7 + $0xa10] sm:$0xf]  ;;  %v11154_v39 = vor.u32 %v14101_v59, %v11153_v29  ;;  %7840 = vmatpush.bf16.msrb.mxu2 %v10898_v37  ;;  %v7586_v29 = vpop.f32.mrf.mxu2 }
 0x412   :  { %v13957_v36 = vld [vmem:[#allocation7 + $0xa2c] sm:$0xf0] }
 0x413   :  { %v11825_v42 = vld [vmem:[#allocation7 + $0x13d0] sm:$0xf]  ;;  %v10578_v49 = vor.u32 %v13957_v36, %v10577_v31  ;;  %7853 = vmatpush.bf16.msrb.mxu3 %v11154_v39 }
 0x414   :  { %v14269_v44 = vld [vmem:[#allocation7 + $0x13ec] sm:$0xf0] }
 0x415   :  { %v10321_v45 = vld [vmem:[#allocation7 + $0x810] sm:$0xf]  ;;  %v11826_v62 = vor.u32 %v14269_v44, %v11825_v42  ;;  %7829 = vmatpush.bf16.msrb.mxu1 %v10578_v49 }
 0x416   :  { %v13893_v35 = vld [vmem:[#allocation7 + $0x82c] sm:$0xf0] }
 0x417   :  { %v11569_v46 = vld [vmem:[#allocation7 + $0x11d0] sm:$0xf]  ;;  %v10322_v0 = vor.u32 %v13893_v35, %v10321_v45 }
 0x418   :  { %v14205_v14 = vld [vmem:[#allocation7 + $0x11ec] sm:$0xf0]  ;;  %7830 = vmatmul.bf16.vlgmr.msrb.gmra.mxu1 %v15065_v40 }
 0x419   :  { %v10865_v50 = vld [vmem:[#allocation7 + $0xc50] sm:$0xf]  ;;  %v11570_v4 = vor.u32 %v14205_v14, %v11569_v46  ;;  %7874 = vmatpush.bf16.msra.mxu1 %v11826_v62  ;;  %7816 = vmatpush.bf16.msrb.mxu0 %v10322_v0 }
 0x41a   :  { %v14029_v55 = vld [vmem:[#allocation7 + $0xc6c] sm:$0xf0] }
 0x41b   :  { %v11121_v63 = vld [vmem:[#allocation7 + $0xe50] sm:$0xf]  ;;  %v10866_v33 = vor.u32 %v14029_v55, %v10865_v50 }
 0x41c   :  { %v14093_v9 = vld [vmem:[#allocation7 + $0xe6c] sm:$0xf0]  ;;  %7817 = vmatmul.bf16.vlgmr.msrb.gmra.mxu0 %v15063_v34 }
 0x41d   :  { %v11793_v2 = vld [vmem:[#allocation7 + $0x1390] sm:$0xf]  ;;  %v11122_v10 = vor.u32 %v14093_v9, %v11121_v63  ;;  %7861 = vmatpush.bf16.msra.mxu0 %v11570_v4  ;;  %7841 = vmatpush.bf16.msrb.mxu2 %v10866_v33 }
 0x41e   :  { %v14261_v57 = vld [vmem:[#allocation7 + $0x13ac] sm:$0xf0] }
 0x41f   :  { %v11537_v7 = vld [vmem:[#allocation7 + $0x1190] sm:$0xf]  ;;  %v11794_v18 = vor.u32 %v14261_v57, %v11793_v2  ;;  %7854 = vmatpush.bf16.msrb.mxu3 %v11122_v10 }
 0x420   :  { %v14197_v32 = vld [vmem:[#allocation7 + $0x11ac] sm:$0xf0] }
 0x421   :  { %v10833_v8 = vld [vmem:[#allocation7 + $0xc10] sm:$0xf]  ;;  %v11538_v51 = vor.u32 %v14197_v32, %v11537_v7  ;;  %7875 = vmatpush.bf16.msra.mxu1 %v11794_v18 }
 0x422   :  { %v14021_v3 = vld [vmem:[#allocation7 + $0xc2c] sm:$0xf0] }
 0x423   :  { %v11089_v15 = vld [vmem:[#allocation7 + $0xe10] sm:$0xf]  ;;  %v10834_v28 = vor.u32 %v14021_v3, %v10833_v8  ;;  %7862 = vmatpush.bf16.msra.mxu0 %v11538_v51  ;;  %v7623_v8 = vpop.f32.mrf.mxu1 }
 0x424   :  { %v14085_v16 = vld [vmem:[#allocation7 + $0xe2c] sm:$0xf0] }
 0x425   :  { %v12081_v21 = vld [vmem:[#allocation7 + $0x15d0] sm:$0xf]  ;;  %v11090_v30 = vor.u32 %v14085_v16, %v11089_v15  ;;  %7842 = vmatpush.bf16.msrb.mxu2 %v10834_v28 }
 0x426   :  { %v14333_v13 = vld [vmem:[#allocation7 + $0x15ec] sm:$0xf0] }
 0x427   :  { %v12337_v22 = vld [vmem:[#allocation7 + $0x17d0] sm:$0xf]  ;;  %v12082_v59 = vor.u32 %v14333_v13, %v12081_v21  ;;  %7855 = vmatpush.bf16.msrb.mxu3 %v11090_v30  ;;  %v7610_v21 = vpop.f32.mrf.mxu0 }
 0x428   :  { %v14397_v12 = vld [vmem:[#allocation7 + $0x17ec] sm:$0xf0]  ;;  %7843 = vmatmul.bf16.vlgmr.msrb.gmra.mxu2 %v15069_v5 }
 0x429   :  { %v11761_v26 = vld [vmem:[#allocation7 + $0x1350] sm:$0xf]  ;;  %v12338_v42 = vor.u32 %v14397_v12, %v12337_v22  ;;  %7887 = vmatpush.bf16.msra.mxu2 %v12082_v59 }
 0x42a   :  { %v14253_v11 = vld [vmem:[#allocation7 + $0x136c] sm:$0xf0]  ;;  %7856 = vmatmul.bf16.vlgmr.msrb.gmra.mxu3 %v15071_v6 }
 0x42b   :  { %v11505_v31 = vld [vmem:[#allocation7 + $0x1150] sm:$0xf]  ;;  %v11762_v44 = vor.u32 %v14253_v11, %v11761_v26  ;;  %7900 = vmatpush.bf16.msra.mxu3 %v12338_v42  ;;  %v7611_v26 = vadd.f32 %v7610_v21, %v15182_v47 }
 0x42c   :  { %v14189_v36 = vld [vmem:[#allocation7 + $0x116c] sm:$0xf0] }
 0x42d   :  { %v12049_v37 = vld [vmem:[#allocation7 + $0x1590] sm:$0xf]  ;;  %v11506_v49 = vor.u32 %v14189_v36, %v11505_v31  ;;  %7876 = vmatpush.bf16.msra.mxu1 %v11762_v44  ;;  %v7624_v30 = vadd.f32 %v7623_v8, %v7611_v26  ;;  %v7636_v8 = vpop.f32.mrf.mxu2 }
 0x42e   :  { %v14325_v45 = vld [vmem:[#allocation7 + $0x15ac] sm:$0xf0] }
 0x42f   :  { %v12305_v35 = vld [vmem:[#allocation7 + $0x1790] sm:$0xf]  ;;  %v12050_v14 = vor.u32 %v14325_v45, %v12049_v37  ;;  %7863 = vmatpush.bf16.msra.mxu0 %v11506_v49  ;;  %v7637_v21 = vadd.f32 %v7636_v8, %v7624_v30 }
 0x430   :  { %v14389_v46 = vld [vmem:[#allocation7 + $0x17ac] sm:$0xf0] }
 0x431   :  { %v11729_v48 = vld [vmem:[#allocation7 + $0x1310] sm:$0xf]  ;;  %v12306_v17 = vor.u32 %v14389_v46, %v12305_v35  ;;  %7888 = vmatpush.bf16.msra.mxu2 %v12050_v14 }
 0x432   :  { %v14245_v39 = vld [vmem:[#allocation7 + $0x132c] sm:$0xf0] }
 0x433   :  { %v11473_v50 = vld [vmem:[#allocation7 + $0x1110] sm:$0xf]  ;;  %v11730_v56 = vor.u32 %v14245_v39, %v11729_v48  ;;  %7901 = vmatpush.bf16.msra.mxu3 %v12306_v17  ;;  %v7625_v39 = vpop.f32.mrf.mxu1 }
 0x434   :  { %v14181_v55 = vld [vmem:[#allocation7 + $0x112c] sm:$0xf0] }
 0x435   :  { %v12017_v62 = vld [vmem:[#allocation7 + $0x1550] sm:$0xf]  ;;  %v11474_v4 = vor.u32 %v14181_v55, %v11473_v50  ;;  %7877 = vmatpush.bf16.msra.mxu1 %v11730_v56  ;;  %v7612_v56 = vpop.f32.mrf.mxu0 }
 0x436   :  { %v14317_v63 = vld [vmem:[#allocation7 + $0x156c] sm:$0xf0] }
 0x437   :  { %v12273_v9 = vld [vmem:[#allocation7 + $0x1750] sm:$0xf]  ;;  %v12018_v33 = vor.u32 %v14317_v63, %v12017_v62  ;;  %7864 = vmatpush.bf16.msra.mxu0 %v11474_v4 }
 0x438   :  { %v14381_v0 = vld [vmem:[#allocation7 + $0x176c] sm:$0xf0] }
 0x439   :  { %v11697_v2 = vld [vmem:[#allocation7 + $0x12d0] sm:$0xf]  ;;  %v12274_v10 = vor.u32 %v14381_v0, %v12273_v9  ;;  %7889 = vmatpush.bf16.msra.mxu2 %v12018_v33 }
 0x43a   :  { %v14237_v57 = vld [vmem:[#allocation7 + $0x12ec] sm:$0xf0] }
 0x43b   :  { %v11441_v7 = vld [vmem:[#allocation7 + $0x10d0] sm:$0xf]  ;;  %v11698_v3 = vor.u32 %v14237_v57, %v11697_v2  ;;  %7902 = vmatpush.bf16.msra.mxu3 %v12274_v10 }
 0x43c   :  { %v14173_v32 = vld [vmem:[#allocation7 + $0x10ec] sm:$0xf0] }
 0x43d   :  { %v11985_v15 = vld [vmem:[#allocation7 + $0x1510] sm:$0xf]  ;;  %v11442_v11 = vor.u32 %v14173_v32, %v11441_v7  ;;  %7878 = vmatpush.bf16.msra.mxu1 %v11698_v3 }
 0x43e   :  { %v14309_v16 = vld [vmem:[#allocation7 + $0x152c] sm:$0xf0] }
 0x43f   :  { %v12241_v18 = vld [vmem:[#allocation7 + $0x1710] sm:$0xf]  ;;  %v11986_v51 = vor.u32 %v14309_v16, %v11985_v15  ;;  %7865 = vmatpush.bf16.msra.mxu0 %v11442_v11 }
 0x440   :  { %v14373_v13 = vld [vmem:[#allocation7 + $0x172c] sm:$0xf0] }
 0x441   :  { %v11665_v22 = vld [vmem:[#allocation7 + $0x1290] sm:$0xf]  ;;  %v12242_v59 = vor.u32 %v14373_v13, %v12241_v18  ;;  %7890 = vmatpush.bf16.msra.mxu2 %v11986_v51  ;;  %v7649_v13 = vpop.f32.mrf.mxu3 }
 0x442   :  { %v14229_v12 = vld [vmem:[#allocation7 + $0x12ac] sm:$0xf0] }
 0x443   :  { %v11409_v28 = vld [vmem:[#allocation7 + $0x1090] sm:$0xf]  ;;  %v11666_v31 = vor.u32 %v14229_v12, %v11665_v22  ;;  %7903 = vmatpush.bf16.msra.mxu3 %v12242_v59 }
 0x444   :  { %v14165_v29 = vld [vmem:[#allocation7 + $0x10ac] sm:$0xf0] }
 0x445   :  { %v11953_v36 = vld [vmem:[#allocation7 + $0x14d0] sm:$0xf]  ;;  %v11410_v35 = vor.u32 %v14165_v29, %v11409_v28  ;;  %7879 = vmatpush.bf16.msra.mxu1 %v11666_v31  ;;  %v15189_v29 = vadd.f32 %v7649_v13, %v7637_v21 }
 0x446   :  { %v14301_v41 = vld [vmem:[#allocation7 + $0x14ec] sm:$0xf0] }
 0x447   :  { %v12209_v42 = vld [vmem:[#allocation7 + $0x16d0] sm:$0xf]  ;;  %v11954_v47 = vor.u32 %v14301_v41, %v11953_v36  ;;  %7866 = vmatpush.bf16.msra.mxu0 %v11410_v35 }
 0x448   :  { %v14365_v44 = vld [vmem:[#allocation7 + $0x16ec] sm:$0xf0] }
 0x449   :  { %v11633_v37 = vld [vmem:[#allocation7 + $0x1250] sm:$0xf]  ;;  %v12210_v49 = vor.u32 %v14365_v44, %v12209_v42  ;;  %7891 = vmatpush.bf16.msra.mxu2 %v11954_v47 }
 0x44a   :  { %v14221_v45 = vld [vmem:[#allocation7 + $0x126c] sm:$0xf0] }
 0x44b   :  { %v11377_v46 = vld [vmem:[#allocation7 + $0x1050] sm:$0xf]  ;;  %v11634_v14 = vor.u32 %v14221_v45, %v11633_v37  ;;  %7904 = vmatpush.bf16.msra.mxu3 %v12210_v49 }
 0x44c   :  { %v14157_v48 = vld [vmem:[#allocation7 + $0x106c] sm:$0xf0] }
 0x44d   :  { %v11921_v50 = vld [vmem:[#allocation7 + $0x1490] sm:$0xf]  ;;  %v11378_v0 = vor.u32 %v14157_v48, %v11377_v46  ;;  %7880 = vmatpush.bf16.msra.mxu1 %v11634_v14 }
 0x44e   :  { %v14293_v55 = vld [vmem:[#allocation7 + $0x14ac] sm:$0xf0] }
 0x44f   :  { %v12177_v17 = vld [vmem:[#allocation7 + $0x1690] sm:$0xf]  ;;  %v11922_v4 = vor.u32 %v14293_v55, %v11921_v50  ;;  %7867 = vmatpush.bf16.msra.mxu0 %v11378_v0  ;;  %v7651_v0 = vpop.f32.mrf.mxu3 }
 0x450   :  { %v14357_v62 = vld [vmem:[#allocation7 + $0x16ac] sm:$0xf0] }
 0x451   :  { %v11601_v63 = vld [vmem:[#allocation7 + $0x1210] sm:$0xf]  ;;  %v12178_v10 = vor.u32 %v14357_v62, %v12177_v17  ;;  %7892 = vmatpush.bf16.msra.mxu2 %v11922_v4  ;;  %v7638_v17 = vpop.f32.mrf.mxu2 }
 0x452   :  { %v14213_v9 = vld [vmem:[#allocation7 + $0x122c] sm:$0xf0] }
 0x453   :  { %v12849_v2 = vld [vmem:[#allocation7 + $0x1bd0] sm:$0xf]  ;;  %v11602_v3 = vor.u32 %v14213_v9, %v11601_v63  ;;  %7905 = vmatpush.bf16.msra.mxu3 %v12178_v10 }
 0x454   :  { %v14525_v57 = vld [vmem:[#allocation7 + $0x1bec] sm:$0xf0] }
 0x455   :  { %v11345_v33 = vld [vmem:[#allocation7 + $0x1010] sm:$0xf]  ;;  %v12850_v22 = vor.u32 %v14525_v57, %v12849_v2  ;;  %7881 = vmatpush.bf16.msra.mxu1 %v11602_v3 }
 0x456   :  { %v14149_v7 = vld [vmem:[#allocation7 + $0x102c] sm:$0xf0] }
 0x457   :  { %v12593_v32 = vld [vmem:[#allocation7 + $0x19d0] sm:$0xf]  ;;  %v11346_v11 = vor.u32 %v14149_v7, %v11345_v33 }
 0x458   :  { %v14461_v15 = vld [vmem:[#allocation7 + $0x19ec] sm:$0xf0]  ;;  %7882 = vmatmul.bf16.vlgmr.msra.gmra.mxu1 %v15077_v1 }
 0x459   :  { %v11889_v16 = vld [vmem:[#allocation7 + $0x1450] sm:$0xf]  ;;  %v12594_v59 = vor.u32 %v14461_v15, %v12593_v32  ;;  %7926 = vmatpush.bf16.msrb.mxu1 %v12850_v22  ;;  %7868 = vmatpush.bf16.msra.mxu0 %v11346_v11 }
 0x45a   :  { %v14285_v18 = vld [vmem:[#allocation7 + $0x146c] sm:$0xf0] }
 0x45b   :  { %v12145_v12 = vld [vmem:[#allocation7 + $0x1650] sm:$0xf]  ;;  %v11890_v31 = vor.u32 %v14285_v18, %v11889_v16 }
 0x45c   :  { %v14349_v26 = vld [vmem:[#allocation7 + $0x166c] sm:$0xf0]  ;;  %7869 = vmatmul.bf16.vlgmr.msra.gmra.mxu0 %v15075_v54 }
 0x45d   :  { %v12817_v51 = vld [vmem:[#allocation7 + $0x1b90] sm:$0xf]  ;;  %v12146_v44 = vor.u32 %v14349_v26, %v12145_v12  ;;  %7913 = vmatpush.bf16.msrb.mxu0 %v12594_v59  ;;  %7893 = vmatpush.bf16.msra.mxu2 %v11890_v31 }
 0x45e   :  { %v14517_v28 = vld [vmem:[#allocation7 + $0x1bac] sm:$0xf0] }
 0x45f   :  { %v12561_v36 = vld [vmem:[#allocation7 + $0x1990] sm:$0xf]  ;;  %v12818_v35 = vor.u32 %v14517_v28, %v12817_v51  ;;  %7906 = vmatpush.bf16.msra.mxu3 %v12146_v44 }
 0x460   :  { %v14453_v41 = vld [vmem:[#allocation7 + $0x19ac] sm:$0xf0] }
 0x461   :  { %v11857_v42 = vld [vmem:[#allocation7 + $0x1410] sm:$0xf]  ;;  %v12562_v50 = vor.u32 %v14453_v41, %v12561_v36  ;;  %7927 = vmatpush.bf16.msrb.mxu1 %v12818_v35 }
 0x462   :  { %v14277_v30 = vld [vmem:[#allocation7 + $0x142c] sm:$0xf0] }
 0x463   :  { %v12113_v37 = vld [vmem:[#allocation7 + $0x1610] sm:$0xf]  ;;  %v11858_v55 = vor.u32 %v14277_v30, %v11857_v42  ;;  %7914 = vmatpush.bf16.msrb.mxu0 %v12562_v50  ;;  %v7675_v42 = vpop.f32.mrf.mxu1 }
 0x464   :  { %v14341_v45 = vld [vmem:[#allocation7 + $0x162c] sm:$0xf0] }
 0x465   :  { %v13105_v47 = vld [vmem:[#allocation7 + $0x1dd0] sm:$0xf]  ;;  %v12114_v56 = vor.u32 %v14341_v45, %v12113_v37  ;;  %7894 = vmatpush.bf16.msra.mxu2 %v11858_v55 }
 0x466   :  { %v14589_v46 = vld [vmem:[#allocation7 + $0x1dec] sm:$0xf0] }
 0x467   :  { %v13361_v48 = vld [vmem:[#allocation7 + $0x1fd0] sm:$0xf]  ;;  %v13106_v62 = vor.u32 %v14589_v46, %v13105_v47  ;;  %7907 = vmatpush.bf16.msra.mxu3 %v12114_v56  ;;  %v7662_v47 = vpop.f32.mrf.mxu0 }
 0x468   :  { %v14653_v39 = vld [vmem:[#allocation7 + $0x1fec] sm:$0xf0]  ;;  %7895 = vmatmul.bf16.vlgmr.msra.gmra.mxu2 %v15081_v20 }
 0x469   :  { %v12785_v49 = vld [vmem:[#allocation7 + $0x1b50] sm:$0xf]  ;;  %v13362_v2 = vor.u32 %v14653_v39, %v13361_v48  ;;  %7939 = vmatpush.bf16.msrb.mxu2 %v13106_v62 }
 0x46a   :  { %v14509_v14 = vld [vmem:[#allocation7 + $0x1b6c] sm:$0xf0]  ;;  %7908 = vmatmul.bf16.vlgmr.msra.gmra.mxu3 %v15083_v25 }
 0x46b   :  { %v12529_v63 = vld [vmem:[#allocation7 + $0x1950] sm:$0xf]  ;;  %v12786_v57 = vor.u32 %v14509_v14, %v12785_v49  ;;  %7952 = vmatpush.bf16.msrb.mxu3 %v13362_v2  ;;  %v7663_v49 = vadd.f32 %v7662_v47, %v15189_v29 }
 0x46c   :  { %v14445_v9 = vld [vmem:[#allocation7 + $0x196c] sm:$0xf0] }
 0x46d   :  { %v13073_v4 = vld [vmem:[#allocation7 + $0x1d90] sm:$0xf]  ;;  %v12530_v3 = vor.u32 %v14445_v9, %v12529_v63  ;;  %7928 = vmatpush.bf16.msrb.mxu1 %v12786_v57  ;;  %v7676_v56 = vadd.f32 %v7675_v42, %v7663_v49  ;;  %v7688_v42 = vpop.f32.mrf.mxu2 }
 0x46e   :  { %v14581_v33 = vld [vmem:[#allocation7 + $0x1dac] sm:$0xf0] }
 0x46f   :  { %v13329_v7 = vld [vmem:[#allocation7 + $0x1f90] sm:$0xf]  ;;  %v13074_v15 = vor.u32 %v14581_v33, %v13073_v4  ;;  %7915 = vmatpush.bf16.msrb.mxu0 %v12530_v3  ;;  %v7689_v47 = vadd.f32 %v7688_v42, %v7676_v56  ;;  %v13729_v42 = vld [vmem:[#allocation7 + $0x314] sm:$0xf] }
 0x470   :  { %v14645_v32 = vld [vmem:[#allocation7 + $0x1fac] sm:$0xf0] }
 0x471   :  { %v12753_v8 = vld [vmem:[#allocation7 + $0x1b10] sm:$0xf]  ;;  %v13330_v21 = vor.u32 %v14645_v32, %v13329_v7  ;;  %7940 = vmatpush.bf16.msrb.mxu2 %v13074_v15 }
 0x472   :  { %v14501_v10 = vld [vmem:[#allocation7 + $0x1b2c] sm:$0xf0] }
 0x473   :  { %v12497_v16 = vld [vmem:[#allocation7 + $0x1910] sm:$0xf]  ;;  %v12754_v13 = vor.u32 %v14501_v10, %v12753_v8  ;;  %7953 = vmatpush.bf16.msrb.mxu3 %v13330_v21  ;;  %v7677_v10 = vpop.f32.mrf.mxu1 }
 0x474   :  { %v14437_v18 = vld [vmem:[#allocation7 + $0x192c] sm:$0xf0]  ;;  %v10291_v10 = vld [vmem:[#allocation7 + $0x7f0] sm:$0xf0] }
 0x475   :  { %v13041_v22 = vld [vmem:[#allocation7 + $0x1d50] sm:$0xf]  ;;  %v12498_v59 = vor.u32 %v14437_v18, %v12497_v16  ;;  %7929 = vmatpush.bf16.msrb.mxu1 %v12754_v13  ;;  %v7664_v13 = vpop.f32.mrf.mxu0 }
 0x476   :  { %v14573_v12 = vld [vmem:[#allocation7 + $0x1d6c] sm:$0xf0] }
 0x477   :  { %v13297_v26 = vld [vmem:[#allocation7 + $0x1f50] sm:$0xf]  ;;  %v13042_v31 = vor.u32 %v14573_v12, %v13041_v22  ;;  %7916 = vmatpush.bf16.msrb.mxu0 %v12498_v59 }
 0x478   :  { %v14637_v11 = vld [vmem:[#allocation7 + $0x1f6c] sm:$0xf0] }
 0x479   :  { %v12721_v51 = vld [vmem:[#allocation7 + $0x1ad0] sm:$0xf]  ;;  %v13298_v44 = vor.u32 %v14637_v11, %v13297_v26  ;;  %7941 = vmatpush.bf16.msrb.mxu2 %v13042_v31 }
 0x47a   :  { %v14493_v28 = vld [vmem:[#allocation7 + $0x1aec] sm:$0xf0] }
 0x47b   :  { %v12465_v36 = vld [vmem:[#allocation7 + $0x18d0] sm:$0xf]  ;;  %v12722_v30 = vor.u32 %v14493_v28, %v12721_v51  ;;  %7954 = vmatpush.bf16.msrb.mxu3 %v13298_v44  ;;  %v13753_v51 = vld [vmem:[#allocation7 + $0x3d4] sm:$0xf] }
 0x47c   :  { %v14429_v41 = vld [vmem:[#allocation7 + $0x18ec] sm:$0xf0]  ;;  %v9779_v28 = vld [vmem:[#allocation7 + $0x3f0] sm:$0xf0] }
 0x47d   :  { %v13009_v37 = vld [vmem:[#allocation7 + $0x1d10] sm:$0xf]  ;;  %v12466_v14 = vor.u32 %v14429_v41, %v12465_v36  ;;  %7930 = vmatpush.bf16.msrb.mxu1 %v12722_v30  ;;  %v13689_v41 = vld [vmem:[#allocation7 + $0x1d4] sm:$0xf] }
 0x47e   :  { %v14565_v45 = vld [vmem:[#allocation7 + $0x1d2c] sm:$0xf0] }
 0x47f   :  { %v13265_v35 = vld [vmem:[#allocation7 + $0x1f10] sm:$0xf]  ;;  %v13010_v50 = vor.u32 %v14565_v45, %v13009_v37  ;;  %7917 = vmatpush.bf16.msrb.mxu0 %v12466_v14  ;;  %v9523_v37 = vld [vmem:[#allocation7 + $0x1f0] sm:$0xf0] }
 0x480   :  { %v14629_v46 = vld [vmem:[#allocation7 + $0x1f2c] sm:$0xf0] }
 0x481   :  { %v12689_v48 = vld [vmem:[#allocation7 + $0x1a90] sm:$0xf]  ;;  %v13266_v62 = vor.u32 %v14629_v46, %v13265_v35  ;;  %7942 = vmatpush.bf16.msrb.mxu2 %v13010_v50  ;;  %v7701_v46 = vpop.f32.mrf.mxu3  ;;  %v13745_v50 = vld [vmem:[#allocation7 + $0x394] sm:$0xf] }
 0x482   :  { %v14485_v39 = vld [vmem:[#allocation7 + $0x1aac] sm:$0xf0] }
 0x483   :  { %v12433_v55 = vld [vmem:[#allocation7 + $0x1890] sm:$0xf]  ;;  %v12690_v63 = vor.u32 %v14485_v39, %v12689_v48  ;;  %7955 = vmatpush.bf16.msrb.mxu3 %v13266_v62  ;;  %v9782_v48 = vor.u32 %v13753_v51, %v9779_v28  ;;  %v9526_v62 = vor.u32 %v13689_v41, %v9523_v37  ;;  %v10259_v41 = vld [vmem:[#allocation7 + $0x7b0] sm:$0xf0] }
 0x484   :  { %v14421_v17 = vld [vmem:[#allocation7 + $0x18ac] sm:$0xf0] }
 0x485   :  { %v12977_v9 = vld [vmem:[#allocation7 + $0x1cd0] sm:$0xf]  ;;  %v12434_v7 = vor.u32 %v14421_v17, %v12433_v55  ;;  %7931 = vmatpush.bf16.msrb.mxu1 %v12690_v63  ;;  %v9747_v55 = vld [vmem:[#allocation7 + $0x3b0] sm:$0xf0]  ;;  %v15196_v17 = vadd.f32 %v7701_v46, %v7689_v47 }
 0x486   :  { %v14557_v0 = vld [vmem:[#allocation7 + $0x1cec] sm:$0xf0] }
 0x487   :  { %v13233_v2 = vld [vmem:[#allocation7 + $0x1ed0] sm:$0xf]  ;;  %v12978_v29 = vor.u32 %v14557_v0, %v12977_v9  ;;  %7918 = vmatpush.bf16.msrb.mxu0 %v12434_v7  ;;  %v13681_v9 = vld [vmem:[#allocation7 + $0x194] sm:$0xf]  ;;  %v9750_v7 = vor.u32 %v13745_v50, %v9747_v55 }
 0x488   :  { %v14621_v57 = vld [vmem:[#allocation7 + $0x1eec] sm:$0xf0]  ;;  %v9491_v0 = vld [vmem:[#allocation7 + $0x1b0] sm:$0xf0] }
 0x489   :  { %v12657_v4 = vld [vmem:[#allocation7 + $0x1a50] sm:$0xf]  ;;  %v13234_v3 = vor.u32 %v14621_v57, %v13233_v2  ;;  %7943 = vmatpush.bf16.msrb.mxu2 %v12978_v29  ;;  %v13817_v29 = vld [vmem:[#allocation7 + $0x5d4] sm:$0xf] }
 0x48a   :  { %v14477_v33 = vld [vmem:[#allocation7 + $0x1a6c] sm:$0xf0]  ;;  %v13721_v50 = vld [vmem:[#allocation7 + $0x2d4] sm:$0xf] }
 0x48b   :  { %v12401_v32 = vld [vmem:[#allocation7 + $0x1850] sm:$0xf]  ;;  %v12658_v15 = vor.u32 %v14477_v33, %v12657_v4  ;;  %7956 = vmatpush.bf16.msrb.mxu3 %v13234_v3  ;;  %v13737_v3 = vld [vmem:[#allocation7 + $0x354] sm:$0xf] }
 0x48c   :  { %v14413_v8 = vld [vmem:[#allocation7 + $0x186c] sm:$0xf0]  ;;  %v9651_v55 = vld [vmem:[#allocation7 + $0x2f0] sm:$0xf0] }
 0x48d   :  { %v12945_v16 = vld [vmem:[#allocation7 + $0x1c90] sm:$0xf]  ;;  %v12402_v11 = vor.u32 %v14413_v8, %v12401_v32  ;;  %7932 = vmatpush.bf16.msrb.mxu1 %v12658_v15  ;;  %v10035_v32 = vld [vmem:[#allocation7 + $0x5f0] sm:$0xf0] }
 0x48e   :  { %v14549_v18 = vld [vmem:[#allocation7 + $0x1cac] sm:$0xf0]  ;;  %v13881_v8 = vld [vmem:[#allocation7 + $0x7d4] sm:$0xf] }
 0x48f   :  { %v13201_v21 = vld [vmem:[#allocation7 + $0x1e90] sm:$0xf]  ;;  %v12946_v59 = vor.u32 %v14549_v18, %v12945_v16  ;;  %7919 = vmatpush.bf16.msrb.mxu0 %v12402_v11  ;;  %v9715_v15 = vld [vmem:[#allocation7 + $0x370] sm:$0xf0]  ;;  %v9494_v16 = vor.u32 %v13681_v9, %v9491_v0  ;;  %v7703_v11 = vpop.f32.mrf.mxu3  ;;  %v10294_v51 = vor.u32 %v13881_v8, %v10291_v10 }
 0x490   :  { %v14613_v22 = vld [vmem:[#allocation7 + $0x1eac] sm:$0xf0]  ;;  %v9718_v28 = vor.u32 %v13737_v3, %v9715_v15  ;;  %v13657_v9 = vld [vmem:[#allocation7 + $0xd4] sm:$0xf] }
 0x491   :  { %v12625_v12 = vld [vmem:[#allocation7 + $0x1a10] sm:$0xf]  ;;  %v13202_v44 = vor.u32 %v14613_v22, %v13201_v21  ;;  %7944 = vmatpush.bf16.msrb.mxu2 %v12946_v59  ;;  %v7690_v21 = vpop.f32.mrf.mxu2  ;;  %v10038_v22 = vor.u32 %v13817_v29, %v10035_v32  ;;  %v13809_v59 = vld [vmem:[#allocation7 + $0x594] sm:$0xf]  ;;  %v7714_v29 = vpop.f32.mrf.mxu0 }
 0x492   :  { %v14469_v26 = vld [vmem:[#allocation7 + $0x1a2c] sm:$0xf0]  ;;  %v9395_v0 = vld [vmem:[#allocation7 + $0xf0] sm:$0xf0]  ;;  %v7715_v3 = vadd.f32 %v7714_v29, %v15196_v17 }
 0x493   :  { %v12369_v31 = vld [vmem:[#allocation7 + $0x1810] sm:$0xf]  ;;  %v12626_v30 = vor.u32 %v14469_v26, %v12625_v12  ;;  %7957 = vmatpush.bf16.msrb.mxu3 %v13202_v44  ;;  %v13673_v12 = vld [vmem:[#allocation7 + $0x154] sm:$0xf]  ;;  %v9398_v15 = vor.u32 %v13657_v9, %v9395_v0 }
 0x494   :  { %v14405_v36 = vld [vmem:[#allocation7 + $0x182c] sm:$0xf0]  ;;  %v9459_v26 = vld [vmem:[#allocation7 + $0x170] sm:$0xf0] }
 0x495   :  { %v12913_v45 = vld [vmem:[#allocation7 + $0x1c50] sm:$0xf]  ;;  %v12370_v14 = vor.u32 %v14405_v36, %v12369_v31  ;;  %7933 = vmatpush.bf16.msrb.mxu1 %v12626_v30  ;;  %v10003_v31 = vld [vmem:[#allocation7 + $0x5b0] sm:$0xf0]  ;;  %v9462_v30 = vor.u32 %v13673_v12, %v9459_v26 }
 0x496   :  { %v14541_v35 = vld [vmem:[#allocation7 + $0x1c6c] sm:$0xf0]  ;;  %v13873_v36 = vld [vmem:[#allocation7 + $0x794] sm:$0xf]  ;;  %v10006_v37 = vor.u32 %v13809_v59, %v10003_v31 }
 0x497   :  { %v13169_v39 = vld [vmem:[#allocation7 + $0x1e50] sm:$0xf]  ;;  %v12914_v63 = vor.u32 %v14541_v35, %v12913_v45  ;;  %7920 = vmatpush.bf16.msrb.mxu0 %v12370_v14  ;;  %v9683_v44 = vld [vmem:[#allocation7 + $0x330] sm:$0xf0]  ;;  %v10262_v47 = vor.u32 %v13873_v36, %v10259_v41 }
 0x498   :  { %v14605_v49 = vld [vmem:[#allocation7 + $0x1e6c] sm:$0xf0]  ;;  %7934 = vmatmul.bf16.vlgmr.msrb.gmra.mxu1 %v15089_v53  ;;  %v13665_v45 = vld [vmem:[#allocation7 + $0x114] sm:$0xf]  ;;  %v9686_v46 = vor.u32 %v13729_v42, %v9683_v44 }
 0x499   :  { %v12881_v2 = vld [vmem:[#allocation7 + $0x1c10] sm:$0xf]  ;;  %v13170_v57 = vor.u32 %v14605_v49, %v13169_v39  ;;  %7978 = vmatpush.bf16.msra.mxu1 %v9782_v48  ;;  %7945 = vmatpush.bf16.msrb.mxu2 %v12914_v63  ;;  %v9427_v35 = vld [vmem:[#allocation7 + $0x130] sm:$0xf0] }
 0x49a   :  { %v14533_v56 = vld [vmem:[#allocation7 + $0x1c2c] sm:$0xf0]  ;;  %7921 = vmatmul.bf16.vlgmr.msrb.gmra.mxu0 %v15087_v52  ;;  %v13801_v48 = vld [vmem:[#allocation7 + $0x554] sm:$0xf] }
 0x49b   :  { %v13137_v4 = vld [vmem:[#allocation7 + $0x1e10] sm:$0xf]  ;;  %7965 = vmatpush.bf16.msra.mxu0 %v9526_v62  ;;  %v12882_v18 = vor.u32 %v14533_v56, %v12881_v2  ;;  %7958 = vmatpush.bf16.msrb.mxu3 %v13170_v57  ;;  %v9971_v39 = vld [vmem:[#allocation7 + $0x570] sm:$0xf0]  ;;  %v9430_v62 = vor.u32 %v13665_v45, %v9427_v35  ;;  %v7727_v2 = vpop.f32.mrf.mxu1  ;;  %v9654_v56 = vor.u32 %v13721_v50, %v9651_v55 }
 0x49c   :  { %v14597_v33 = vld [vmem:[#allocation7 + $0x1e2c] sm:$0xf0]  ;;  %v13865_v49 = vld [vmem:[#allocation7 + $0x754] sm:$0xf]  ;;  %v9974_v63 = vor.u32 %v13801_v48, %v9971_v39 }
 0x49d   :  { %v13138_v13 = vor.u32 %v14597_v33, %v13137_v4  ;;  %7979 = vmatpush.bf16.msra.mxu1 %v9750_v7  ;;  %7946 = vmatpush.bf16.msrb.mxu2 %v12882_v18  ;;  %v10227_v14 = vld [vmem:[#allocation7 + $0x770] sm:$0xf0] }
 0x49e   :  { %v10230_v57 = vor.u32 %v13865_v49, %v10227_v14  ;;  %v13793_v4 = vld [vmem:[#allocation7 + $0x514] sm:$0xf] }
 0x49f   :  { %7966 = vmatpush.bf16.msra.mxu0 %v9494_v16  ;;  %7959 = vmatpush.bf16.msrb.mxu3 %v13138_v13  ;;  %v9939_v33 = vld [vmem:[#allocation7 + $0x530] sm:$0xf0]  ;;  %v7728_v13 = vadd.f32 %v7727_v2, %v7715_v3  ;;  %v7740_v2 = vpop.f32.mrf.mxu2 }
 0x4a0   :  { %7947 = vmatmul.bf16.vlgmr.msrb.gmra.mxu2 %v15093_v19  ;;  %v13857_v7 = vld [vmem:[#allocation7 + $0x714] sm:$0xf]  ;;  %v9942_v16 = vor.u32 %v13793_v4, %v9939_v33 }
 0x4a1   :  { %7991 = vmatpush.bf16.msra.mxu2 %v10038_v22  ;;  %7980 = vmatpush.bf16.msra.mxu1 %v9718_v28  ;;  %v10195_v32 = vld [vmem:[#allocation7 + $0x730] sm:$0xf0]  ;;  %v7741_v29 = vadd.f32 %v7740_v2, %v7728_v13 }
 0x4a2   :  { %7960 = vmatmul.bf16.vlgmr.msrb.gmra.mxu3 %v15095_v27  ;;  %v13713_v8 = vld [vmem:[#allocation7 + $0x294] sm:$0xf]  ;;  %v10198_v22 = vor.u32 %v13857_v7, %v10195_v32  ;;  %v7753_v32 = vpop.f32.mrf.mxu3 }
 0x4a3   :  { %8004 = vmatpush.bf16.msra.mxu3 %v10294_v51  ;;  %7967 = vmatpush.bf16.msra.mxu0 %v9462_v30  ;;  %v9619_v10 = vld [vmem:[#allocation7 + $0x2b0] sm:$0xf0]  ;;  %v7729_v44 = vpop.f32.mrf.mxu1 }
 0x4a4   :  { %v13649_v18 = vld [vmem:[#allocation7 + $0x94] sm:$0xf]  ;;  %v9622_v12 = vor.u32 %v13713_v8, %v9619_v10 }
 0x4a5   :  { %7992 = vmatpush.bf16.msra.mxu2 %v10006_v37  ;;  %7981 = vmatpush.bf16.msra.mxu1 %v9686_v46  ;;  %v9363_v21 = vld [vmem:[#allocation7 + $0xb0] sm:$0xf0]  ;;  %v7716_v46 = vpop.f32.mrf.mxu0 }
 0x4a6   :  { %v13785_v26 = vld [vmem:[#allocation7 + $0x4d4] sm:$0xf]  ;;  %v9366_v36 = vor.u32 %v13649_v18, %v9363_v21  ;;  %v15203_v21 = vadd.f32 %v7753_v32, %v7741_v29 }
 0x4a7   :  { %8005 = vmatpush.bf16.msra.mxu3 %v10262_v47  ;;  %7968 = vmatpush.bf16.msra.mxu0 %v9430_v62  ;;  %v9907_v11 = vld [vmem:[#allocation7 + $0x4f0] sm:$0xf0] }
 0x4a8   :  { %v13849_v51 = vld [vmem:[#allocation7 + $0x6d4] sm:$0xf]  ;;  %v9910_v17 = vor.u32 %v13785_v26, %v9907_v11 }
 0x4a9   :  { %7993 = vmatpush.bf16.msra.mxu2 %v9974_v63  ;;  %7982 = vmatpush.bf16.msra.mxu1 %v9654_v56  ;;  %v10163_v28 = vld [vmem:[#allocation7 + $0x6f0] sm:$0xf0] }
 0x4aa   :  { %v13705_v59 = vld [vmem:[#allocation7 + $0x254] sm:$0xf]  ;;  %v10166_v30 = vor.u32 %v13849_v51, %v10163_v28 }
 0x4ab   :  { %8006 = vmatpush.bf16.msra.mxu3 %v10230_v57  ;;  %v9587_v31 = vld [vmem:[#allocation7 + $0x270] sm:$0xf0]  ;;  %7969 = vmatpush.bf16.msra.mxu0 %v9398_v15 }
 0x4ac   :  { %v13641_v41 = vld [vmem:[#allocation7 + $0x54] sm:$0xf]  ;;  %v9590_v37 = vor.u32 %v13705_v59, %v9587_v31 }
 0x4ad   :  { %7994 = vmatpush.bf16.msra.mxu2 %v9942_v16  ;;  %v9331_v42 = vld [vmem:[#allocation7 + $0x70] sm:$0xf0]  ;;  %7983 = vmatpush.bf16.msra.mxu1 %v9622_v12 }
 0x4ae   :  { %v13777_v45 = vld [vmem:[#allocation7 + $0x494] sm:$0xf]  ;;  %v9334_v14 = vor.u32 %v13641_v41, %v9331_v42 }
 0x4af   :  { %8007 = vmatpush.bf16.msra.mxu3 %v10198_v22  ;;  %v9875_v35 = vld [vmem:[#allocation7 + $0x4b0] sm:$0xf0]  ;;  %7970 = vmatpush.bf16.msra.mxu0 %v9366_v36 }
 0x4b0   :  { %v13841_v47 = vld [vmem:[#allocation7 + $0x694] sm:$0xf]  ;;  %v9878_v62 = vor.u32 %v13777_v45, %v9875_v35 }
 0x4b1   :  { %v10131_v48 = vld [vmem:[#allocation7 + $0x6b0] sm:$0xf0]  ;;  %7995 = vmatpush.bf16.msra.mxu2 %v9910_v17  ;;  %7984 = vmatpush.bf16.msra.mxu1 %v9590_v37 }
 0x4b2   :  { %v13697_v39 = vld [vmem:[#allocation7 + $0x214] sm:$0xf]  ;;  %v10134_v57 = vor.u32 %v13841_v47, %v10131_v48  ;;  %v7742_v47 = vpop.f32.mrf.mxu2 }
 0x4b3   :  { %v9555_v49 = vld [vmem:[#allocation7 + $0x230] sm:$0xf0]  ;;  %8008 = vmatpush.bf16.msra.mxu3 %v10166_v30  ;;  %7971 = vmatpush.bf16.msra.mxu0 %v9334_v14  ;;  %v7755_v14 = vpop.f32.mrf.mxu3 }
 0x4b4   :  { %v14009_v50 = vld [vmem:[#allocation7 + $0xbd4] sm:$0xf]  ;;  %v9558_v56 = vor.u32 %v13697_v39, %v9555_v49 }
 0x4b5   :  { %v10803_v55 = vld [vmem:[#allocation7 + $0xbf0] sm:$0xf0]  ;;  %7996 = vmatpush.bf16.msra.mxu2 %v9878_v62 }
 0x4b6   :  { %v13633_v63 = vld [vmem:[#allocation7 + $0x14] sm:$0xf]  ;;  %v10806_v8 = vor.u32 %v14009_v50, %v10803_v55  ;;  %7985 = vmatpush.bf16.msra.mxu1 %v9558_v56 }
 0x4b7   :  { %v9299_v9 = vld [vmem:[#allocation7 + $0x30] sm:$0xf0]  ;;  %8009 = vmatpush.bf16.msra.mxu3 %v10134_v57 }
 0x4b8   :  { %v13945_v0 = vld [vmem:[#allocation7 + $0x9d4] sm:$0xf]  ;;  %v9302_v15 = vor.u32 %v13633_v63, %v9299_v9 }
 0x4b9   :  { %v10547_v4 = vld [vmem:[#allocation7 + $0x9f0] sm:$0xf0]  ;;  %7986 = vmatmul.bf16.vlgmr.msra.gmra.mxu1 %v15053_v24 }
 0x4ba   :  { %v13769_v33 = vld [vmem:[#allocation7 + $0x454] sm:$0xf]  ;;  %v10550_v22 = vor.u32 %v13945_v0, %v10547_v4  ;;  %8030 = vmatpush.bf16.msrb.mxu1 %v10806_v8  ;;  %7972 = vmatpush.bf16.msra.mxu0 %v9302_v15 }
 0x4bb   :  { %v9843_v7 = vld [vmem:[#allocation7 + $0x470] sm:$0xf0] }
 0x4bc   :  { %v13833_v10 = vld [vmem:[#allocation7 + $0x654] sm:$0xf]  ;;  %v9846_v12 = vor.u32 %v13769_v33, %v9843_v7 }
 0x4bd   :  { %v10099_v3 = vld [vmem:[#allocation7 + $0x670] sm:$0xf0]  ;;  %7973 = vmatmul.bf16.vlgmr.msra.gmra.mxu0 %v15051_v23 }
 0x4be   :  { %v14001_v16 = vld [vmem:[#allocation7 + $0xb94] sm:$0xf]  ;;  %v10102_v28 = vor.u32 %v13833_v10, %v10099_v3  ;;  %8017 = vmatpush.bf16.msrb.mxu0 %v10550_v22  ;;  %7997 = vmatpush.bf16.msra.mxu2 %v9846_v12  ;;  %v14748_v22 = vld [vmem:[#allocation8] sm:$0xff] }
 0x4bf   :  { %v10771_v18 = vld [vmem:[#allocation7 + $0xbb0] sm:$0xf0]  ;;  %v1737_v12 = vperm.slane %v14748_v22, 4 }
 0x4c0   :  { %v13937_v26 = vld [vmem:[#allocation7 + $0x994] sm:$0xf]  ;;  %v10774_v36 = vor.u32 %v14001_v16, %v10771_v18  ;;  %8010 = vmatpush.bf16.msra.mxu3 %v10102_v28 }
 0x4c1   :  { %v10515_v11 = vld [vmem:[#allocation7 + $0x9b0] sm:$0xf0] }
 0x4c2   :  { %v13761_v51 = vld [vmem:[#allocation7 + $0x414] sm:$0xf]  ;;  %v10518_v45 = vor.u32 %v13937_v26, %v10515_v11  ;;  %8031 = vmatpush.bf16.msrb.mxu1 %v10774_v36 }
 0x4c3   :  { %v9811_v13 = vld [vmem:[#allocation7 + $0x430] sm:$0xf0] }
 0x4c4   :  { %v13825_v59 = vld [vmem:[#allocation7 + $0x614] sm:$0xf]  ;;  %v9814_v35 = vor.u32 %v13761_v51, %v9811_v13  ;;  %8018 = vmatpush.bf16.msrb.mxu0 %v10518_v45  ;;  %v7779_v13 = vpop.f32.mrf.mxu1 }
 0x4c5   :  { %v10067_v31 = vld [vmem:[#allocation7 + $0x630] sm:$0xf0] }
 0x4c6   :  { %v14073_v17 = vld [vmem:[#allocation7 + $0xdd4] sm:$0xf]  ;;  %v10070_v46 = vor.u32 %v13825_v59, %v10067_v31  ;;  %7998 = vmatpush.bf16.msra.mxu2 %v9814_v35 }
 0x4c7   :  { %v11059_v41 = vld [vmem:[#allocation7 + $0xdf0] sm:$0xf0] }
 0x4c8   :  { %v14137_v42 = vld [vmem:[#allocation7 + $0xfd4] sm:$0xf]  ;;  %v11062_v48 = vor.u32 %v14073_v17, %v11059_v41  ;;  %8011 = vmatpush.bf16.msra.mxu3 %v10070_v46 }
 0x4c9   :  { %v11315_v44 = vld [vmem:[#allocation7 + $0xff0] sm:$0xf0]  ;;  %7999 = vmatmul.bf16.vlgmr.msra.gmra.mxu2 %v15057_v60 }
 0x4ca   :  { %v13993_v30 = vld [vmem:[#allocation7 + $0xb54] sm:$0xf]  ;;  %v11318_v50 = vor.u32 %v14137_v42, %v11315_v44  ;;  %8043 = vmatpush.bf16.msrb.mxu2 %v11062_v48  ;;  %v7766_v42 = vpop.f32.mrf.mxu0 }
 0x4cb   :  { %v10739_v37 = vld [vmem:[#allocation7 + $0xb70] sm:$0xf0]  ;;  %8012 = vmatmul.bf16.vlgmr.msra.gmra.mxu3 %v15059_v61  ;;  %v7767_v45 = vadd.f32 %v7766_v42, %v1737_v12 }
 0x4cc   :  { %v13929_v39 = vld [vmem:[#allocation7 + $0x954] sm:$0xf]  ;;  %v10742_v55 = vor.u32 %v13993_v30, %v10739_v37  ;;  %8056 = vmatpush.bf16.msrb.mxu3 %v11318_v50 }
 0x4cd   :  { %v10483_v49 = vld [vmem:[#allocation7 + $0x970] sm:$0xf0] }
 0x4ce   :  { %v14065_v62 = vld [vmem:[#allocation7 + $0xd94] sm:$0xf]  ;;  %v10486_v56 = vor.u32 %v13929_v39, %v10483_v49  ;;  %8032 = vmatpush.bf16.msrb.mxu1 %v10742_v55  ;;  %v7780_v39 = vadd.f32 %v7779_v13, %v7767_v45 }
 0x4cf   :  { %v11027_v63 = vld [vmem:[#allocation7 + $0xdb0] sm:$0xf0] }
 0x4d0   :  { %v14129_v9 = vld [vmem:[#allocation7 + $0xf94] sm:$0xf]  ;;  %v11030_v4 = vor.u32 %v14065_v62, %v11027_v63  ;;  %8019 = vmatpush.bf16.msrb.mxu0 %v10486_v56 }
 0x4d1   :  { %v11283_v0 = vld [vmem:[#allocation7 + $0xfb0] sm:$0xf0] }
 0x4d2   :  { %v13985_v2 = vld [vmem:[#allocation7 + $0xb14] sm:$0xf]  ;;  %v11286_v29 = vor.u32 %v14129_v9, %v11283_v0  ;;  %8044 = vmatpush.bf16.msrb.mxu2 %v11030_v4 }
 0x4d3   :  { %v10707_v57 = vld [vmem:[#allocation7 + $0xb30] sm:$0xf0] }
 0x4d4   :  { %v13921_v33 = vld [vmem:[#allocation7 + $0x914] sm:$0xf]  ;;  %v10710_v32 = vor.u32 %v13985_v2, %v10707_v57  ;;  %8057 = vmatpush.bf16.msrb.mxu3 %v11286_v29 }
 0x4d5   :  { %v10451_v7 = vld [vmem:[#allocation7 + $0x930] sm:$0xf0] }
 0x4d6   :  { %v14057_v8 = vld [vmem:[#allocation7 + $0xd54] sm:$0xf]  ;;  %v10454_v26 = vor.u32 %v13921_v33, %v10451_v7  ;;  %8033 = vmatpush.bf16.msrb.mxu1 %v10710_v32  ;;  %v7781_v33 = vpop.f32.mrf.mxu1 }
 0x4d7   :  { %v10995_v10 = vld [vmem:[#allocation7 + $0xd70] sm:$0xf0] }
 0x4d8   :  { %v14121_v3 = vld [vmem:[#allocation7 + $0xf54] sm:$0xf]  ;;  %v10998_v11 = vor.u32 %v14057_v8, %v10995_v10  ;;  %8020 = vmatpush.bf16.msrb.mxu0 %v10454_v26 }
 0x4d9   :  { %v11251_v15 = vld [vmem:[#allocation7 + $0xf70] sm:$0xf0] }
 0x4da   :  { %v13977_v16 = vld [vmem:[#allocation7 + $0xad4] sm:$0xf]  ;;  %v11254_v59 = vor.u32 %v14121_v3, %v11251_v15  ;;  %8045 = vmatpush.bf16.msrb.mxu2 %v10998_v11  ;;  %v7768_v3 = vpop.f32.mrf.mxu0 }
 0x4db   :  { %v10675_v18 = vld [vmem:[#allocation7 + $0xaf0] sm:$0xf0] }
 0x4dc   :  { %v13913_v51 = vld [vmem:[#allocation7 + $0x8d4] sm:$0xf]  ;;  %v10678_v31 = vor.u32 %v13977_v16, %v10675_v18  ;;  %8058 = vmatpush.bf16.msrb.mxu3 %v11254_v59  ;;  %v7792_v59 = vpop.f32.mrf.mxu2 }
 0x4dd   :  { %v10419_v28 = vld [vmem:[#allocation7 + $0x8f0] sm:$0xf0] }
 0x4de   :  { %v14049_v36 = vld [vmem:[#allocation7 + $0xd14] sm:$0xf]  ;;  %v10422_v35 = vor.u32 %v13913_v51, %v10419_v28  ;;  %8034 = vmatpush.bf16.msrb.mxu1 %v10678_v31 }
 0x4df   :  { %v10963_v17 = vld [vmem:[#allocation7 + $0xd30] sm:$0xf0] }
 0x4e0   :  { %v14113_v41 = vld [vmem:[#allocation7 + $0xf14] sm:$0xf]  ;;  %v10966_v47 = vor.u32 %v14049_v36, %v10963_v17  ;;  %8021 = vmatpush.bf16.msrb.mxu0 %v10422_v35 }
 0x4e1   :  { %v11219_v44 = vld [vmem:[#allocation7 + $0xf30] sm:$0xf0] }
 0x4e2   :  { %v13969_v30 = vld [vmem:[#allocation7 + $0xa94] sm:$0xf]  ;;  %v11222_v49 = vor.u32 %v14113_v41, %v11219_v44  ;;  %8046 = vmatpush.bf16.msrb.mxu2 %v10966_v47  ;;  %v7793_v44 = vadd.f32 %v7792_v59, %v7780_v39 }
 0x4e3   :  { %v10643_v37 = vld [vmem:[#allocation7 + $0xab0] sm:$0xf0] }
 0x4e4   :  { %v13905_v46 = vld [vmem:[#allocation7 + $0x894] sm:$0xf]  ;;  %v10646_v14 = vor.u32 %v13969_v30, %v10643_v37  ;;  %8059 = vmatpush.bf16.msrb.mxu3 %v11222_v49  ;;  %v7805_v30 = vpop.f32.mrf.mxu3  ;;  %v7794_v3 = vpop.f32.mrf.mxu2 }
 0x4e5   :  { %v10387_v48 = vld [vmem:[#allocation7 + $0x8b0] sm:$0xf0]  ;;  %v15209_v49 = vadd.f32 %v7805_v30, %v7793_v44 }
 0x4e6   :  { %v14041_v50 = vld [vmem:[#allocation7 + $0xcd4] sm:$0xf]  ;;  %v10390_v2 = vor.u32 %v13905_v46, %v10387_v48  ;;  %8035 = vmatpush.bf16.msrb.mxu1 %v10646_v14 }
 0x4e7   :  { %v10931_v55 = vld [vmem:[#allocation7 + $0xcf0] sm:$0xf0] }
 0x4e8   :  { %v14105_v62 = vld [vmem:[#allocation7 + $0xed4] sm:$0xf]  ;;  %v10934_v57 = vor.u32 %v14041_v50, %v10931_v55  ;;  %8022 = vmatpush.bf16.msrb.mxu0 %v10390_v2 }
 0x4e9   :  { %v11187_v63 = vld [vmem:[#allocation7 + $0xef0] sm:$0xf0] }
 0x4ea   :  { %v13961_v9 = vld [vmem:[#allocation7 + $0xa54] sm:$0xf]  ;;  %v11190_v7 = vor.u32 %v14105_v62, %v11187_v63  ;;  %8047 = vmatpush.bf16.msrb.mxu2 %v10934_v57 }
 0x4eb   :  { %v10611_v0 = vld [vmem:[#allocation7 + $0xa70] sm:$0xf0] }
 0x4ec   :  { %v13897_v56 = vld [vmem:[#allocation7 + $0x854] sm:$0xf]  ;;  %v10614_v29 = vor.u32 %v13961_v9, %v10611_v0  ;;  %8060 = vmatpush.bf16.msrb.mxu3 %v11190_v7 }
 0x4ed   :  { %v10355_v4 = vld [vmem:[#allocation7 + $0x870] sm:$0xf0] }
 0x4ee   :  { %v14033_v32 = vld [vmem:[#allocation7 + $0xc94] sm:$0xf]  ;;  %v10358_v22 = vor.u32 %v13897_v56, %v10355_v4  ;;  %8036 = vmatpush.bf16.msrb.mxu1 %v10614_v29 }
 0x4ef   :  { %v10899_v8 = vld [vmem:[#allocation7 + $0xcb0] sm:$0xf0] }
 0x4f0   :  { %v14097_v10 = vld [vmem:[#allocation7 + $0xe94] sm:$0xf]  ;;  %v10902_v11 = vor.u32 %v14033_v32, %v10899_v8  ;;  %8023 = vmatpush.bf16.msrb.mxu0 %v10358_v22 }
 0x4f1   :  { %v11155_v15 = vld [vmem:[#allocation7 + $0xeb0] sm:$0xf0] }
 0x4f2   :  { %v13953_v16 = vld [vmem:[#allocation7 + $0xa14] sm:$0xf]  ;;  %v11158_v31 = vor.u32 %v14097_v10, %v11155_v15  ;;  %8048 = vmatpush.bf16.msrb.mxu2 %v10902_v11 }
 0x4f3   :  { %v10579_v18 = vld [vmem:[#allocation7 + $0xa30] sm:$0xf0] }
 0x4f4   :  { %v14265_v12 = vld [vmem:[#allocation7 + $0x13d4] sm:$0xf]  ;;  %v10582_v36 = vor.u32 %v13953_v16, %v10579_v18  ;;  %8061 = vmatpush.bf16.msrb.mxu3 %v11158_v31 }
 0x4f5   :  { %v11827_v26 = vld [vmem:[#allocation7 + $0x13f0] sm:$0xf0] }
 0x4f6   :  { %v13889_v51 = vld [vmem:[#allocation7 + $0x814] sm:$0xf]  ;;  %v11830_v37 = vor.u32 %v14265_v12, %v11827_v26  ;;  %8037 = vmatpush.bf16.msrb.mxu1 %v10582_v36  ;;  %v7807_v12 = vpop.f32.mrf.mxu3 }
 0x4f7   :  { %v10323_v28 = vld [vmem:[#allocation7 + $0x830] sm:$0xf0] }
 0x4f8   :  { %v14201_v13 = vld [vmem:[#allocation7 + $0x11d4] sm:$0xf]  ;;  %v10326_v47 = vor.u32 %v13889_v51, %v10323_v28 }
 0x4f9   :  { %v11571_v17 = vld [vmem:[#allocation7 + $0x11f0] sm:$0xf0]  ;;  %8038 = vmatmul.bf16.vlgmr.msrb.gmra.mxu1 %v15065_v40 }
 0x4fa   :  { %v14025_v41 = vld [vmem:[#allocation7 + $0xc54] sm:$0xf]  ;;  %v11574_v14 = vor.u32 %v14201_v13, %v11571_v17  ;;  %8082 = vmatpush.bf16.msra.mxu1 %v11830_v37  ;;  %8024 = vmatpush.bf16.msrb.mxu0 %v10326_v47 }
 0x4fb   :  { %v10867_v42 = vld [vmem:[#allocation7 + $0xc70] sm:$0xf0] }
 0x4fc   :  { %v14089_v45 = vld [vmem:[#allocation7 + $0xe54] sm:$0xf]  ;;  %v10870_v50 = vor.u32 %v14025_v41, %v10867_v42 }
 0x4fd   :  { %v11123_v35 = vld [vmem:[#allocation7 + $0xe70] sm:$0xf0]  ;;  %8025 = vmatmul.bf16.vlgmr.msrb.gmra.mxu0 %v15063_v34 }
 0x4fe   :  { %v14257_v46 = vld [vmem:[#allocation7 + $0x1394] sm:$0xf]  ;;  %v11126_v9 = vor.u32 %v14089_v45, %v11123_v35  ;;  %8069 = vmatpush.bf16.msra.mxu0 %v11574_v14  ;;  %8049 = vmatpush.bf16.msrb.mxu2 %v10870_v50 }
 0x4ff   :  { %v11795_v48 = vld [vmem:[#allocation7 + $0x13b0] sm:$0xf0] }
 0x500   :  { %v14193_v55 = vld [vmem:[#allocation7 + $0x1194] sm:$0xf]  ;;  %v11798_v57 = vor.u32 %v14257_v46, %v11795_v48  ;;  %8062 = vmatpush.bf16.msrb.mxu3 %v11126_v9  ;;  %v7831_v9 = vpop.f32.mrf.mxu1 }
 0x501   :  { %v11539_v62 = vld [vmem:[#allocation7 + $0x11b0] sm:$0xf0] }
 0x502   :  { %v14017_v63 = vld [vmem:[#allocation7 + $0xc14] sm:$0xf]  ;;  %v11542_v8 = vor.u32 %v14193_v55, %v11539_v62  ;;  %8083 = vmatpush.bf16.msra.mxu1 %v11798_v57 }
 0x503   :  { %v10835_v39 = vld [vmem:[#allocation7 + $0xc30] sm:$0xf0] }
 0x504   :  { %v14081_v0 = vld [vmem:[#allocation7 + $0xe14] sm:$0xf]  ;;  %v10838_v10 = vor.u32 %v14017_v63, %v10835_v39  ;;  %8070 = vmatpush.bf16.msra.mxu0 %v11542_v8 }
 0x505   :  { %v11091_v2 = vld [vmem:[#allocation7 + $0xe30] sm:$0xf0] }
 0x506   :  { %v14329_v56 = vld [vmem:[#allocation7 + $0x15d4] sm:$0xf]  ;;  %v11094_v15 = vor.u32 %v14081_v0, %v11091_v2  ;;  %8050 = vmatpush.bf16.msrb.mxu2 %v10838_v10 }
 0x507   :  { %v12083_v4 = vld [vmem:[#allocation7 + $0x15f0] sm:$0xf0] }
 0x508   :  { %v14393_v33 = vld [vmem:[#allocation7 + $0x17d4] sm:$0xf]  ;;  %v12086_v16 = vor.u32 %v14329_v56, %v12083_v4  ;;  %8063 = vmatpush.bf16.msrb.mxu3 %v11094_v15  ;;  %v7818_v4 = vpop.f32.mrf.mxu0 }
 0x509   :  { %v12339_v7 = vld [vmem:[#allocation7 + $0x17f0] sm:$0xf0]  ;;  %8051 = vmatmul.bf16.vlgmr.msrb.gmra.mxu2 %v15069_v5 }
 0x50a   :  { %v14249_v29 = vld [vmem:[#allocation7 + $0x1354] sm:$0xf]  ;;  %v12342_v26 = vor.u32 %v14393_v33, %v12339_v7  ;;  %8095 = vmatpush.bf16.msra.mxu2 %v12086_v16 }
 0x50b   :  { %v11763_v32 = vld [vmem:[#allocation7 + $0x1370] sm:$0xf0]  ;;  %8064 = vmatmul.bf16.vlgmr.msrb.gmra.mxu3 %v15071_v6 }
 0x50c   :  { %v14185_v18 = vld [vmem:[#allocation7 + $0x1154] sm:$0xf]  ;;  %v11766_v11 = vor.u32 %v14249_v29, %v11763_v32  ;;  %8108 = vmatpush.bf16.msra.mxu3 %v12342_v26  ;;  %v7819_v32 = vadd.f32 %v7818_v4, %v15209_v49 }
 0x50d   :  { %v11507_v22 = vld [vmem:[#allocation7 + $0x1170] sm:$0xf0] }
 0x50e   :  { %v14321_v51 = vld [vmem:[#allocation7 + $0x1594] sm:$0xf]  ;;  %v11510_v17 = vor.u32 %v14185_v18, %v11507_v22  ;;  %8084 = vmatpush.bf16.msra.mxu1 %v11766_v11  ;;  %v7832_v16 = vadd.f32 %v7831_v9, %v7819_v32 }
 0x50f   :  { %v12051_v28 = vld [vmem:[#allocation7 + $0x15b0] sm:$0xf0] }
 0x510   :  { %v14385_v13 = vld [vmem:[#allocation7 + $0x1794] sm:$0xf]  ;;  %v12054_v41 = vor.u32 %v14321_v51, %v12051_v28  ;;  %8071 = vmatpush.bf16.msra.mxu0 %v11510_v17  ;;  %v7833_v17 = vpop.f32.mrf.mxu1 }
 0x511   :  { %v12307_v59 = vld [vmem:[#allocation7 + $0x17b0] sm:$0xf0] }
 0x512   :  { %v14241_v31 = vld [vmem:[#allocation7 + $0x1314] sm:$0xf]  ;;  %v12310_v30 = vor.u32 %v14385_v13, %v12307_v59  ;;  %8096 = vmatpush.bf16.msra.mxu2 %v12054_v41 }
 0x513   :  { %v11731_v36 = vld [vmem:[#allocation7 + $0x1330] sm:$0xf0] }
 0x514   :  { %v14177_v42 = vld [vmem:[#allocation7 + $0x1114] sm:$0xf]  ;;  %v11734_v37 = vor.u32 %v14241_v31, %v11731_v36  ;;  %8109 = vmatpush.bf16.msra.mxu3 %v12310_v30 }
 0x515   :  { %v11475_v44 = vld [vmem:[#allocation7 + $0x1130] sm:$0xf0] }
 0x516   :  { %v14313_v45 = vld [vmem:[#allocation7 + $0x1554] sm:$0xf]  ;;  %v11478_v50 = vor.u32 %v14177_v42, %v11475_v44  ;;  %8085 = vmatpush.bf16.msra.mxu1 %v11734_v37 }
 0x517   :  { %v12019_v35 = vld [vmem:[#allocation7 + $0x1570] sm:$0xf0] }
 0x518   :  { %v14377_v47 = vld [vmem:[#allocation7 + $0x1754] sm:$0xf]  ;;  %v12022_v55 = vor.u32 %v14313_v45, %v12019_v35  ;;  %8072 = vmatpush.bf16.msra.mxu0 %v11478_v50  ;;  %v7820_v45 = vpop.f32.mrf.mxu0 }
 0x519   :  { %v12275_v46 = vld [vmem:[#allocation7 + $0x1770] sm:$0xf0] }
 0x51a   :  { %v14233_v48 = vld [vmem:[#allocation7 + $0x12d4] sm:$0xf]  ;;  %v12278_v39 = vor.u32 %v14377_v47, %v12275_v46  ;;  %8097 = vmatpush.bf16.msra.mxu2 %v12022_v55 }
 0x51b   :  { %v11699_v14 = vld [vmem:[#allocation7 + $0x12f0] sm:$0xf0] }
 0x51c   :  { %v14169_v62 = vld [vmem:[#allocation7 + $0x10d4] sm:$0xf]  ;;  %v11702_v0 = vor.u32 %v14233_v48, %v11699_v14  ;;  %8110 = vmatpush.bf16.msra.mxu3 %v12278_v39  ;;  %v7844_v39 = vpop.f32.mrf.mxu2 }
 0x51d   :  { %v11443_v63 = vld [vmem:[#allocation7 + $0x10f0] sm:$0xf0] }
 0x51e   :  { %v14305_v2 = vld [vmem:[#allocation7 + $0x1514] sm:$0xf]  ;;  %v11446_v8 = vor.u32 %v14169_v62, %v11443_v63  ;;  %8086 = vmatpush.bf16.msra.mxu1 %v11702_v0 }
 0x51f   :  { %v11987_v57 = vld [vmem:[#allocation7 + $0x1530] sm:$0xf0] }
 0x520   :  { %v14369_v56 = vld [vmem:[#allocation7 + $0x1714] sm:$0xf]  ;;  %v11990_v10 = vor.u32 %v14305_v2, %v11987_v57  ;;  %8073 = vmatpush.bf16.msra.mxu0 %v11446_v8 }
 0x521   :  { %v12243_v33 = vld [vmem:[#allocation7 + $0x1730] sm:$0xf0] }
 0x522   :  { %v14225_v7 = vld [vmem:[#allocation7 + $0x1294] sm:$0xf]  ;;  %v12246_v18 = vor.u32 %v14369_v56, %v12243_v33  ;;  %8098 = vmatpush.bf16.msra.mxu2 %v11990_v10  ;;  %v7845_v33 = vadd.f32 %v7844_v39, %v7832_v16 }
 0x523   :  { %v11667_v29 = vld [vmem:[#allocation7 + $0x12b0] sm:$0xf0] }
 0x524   :  { %v14161_v3 = vld [vmem:[#allocation7 + $0x1094] sm:$0xf]  ;;  %v11670_v22 = vor.u32 %v14225_v7, %v11667_v29  ;;  %8111 = vmatpush.bf16.msra.mxu3 %v12246_v18  ;;  %v7857_v7 = vpop.f32.mrf.mxu3  ;;  %v7846_v45 = vpop.f32.mrf.mxu2 }
 0x525   :  { %v11411_v15 = vld [vmem:[#allocation7 + $0x10b0] sm:$0xf0]  ;;  %v15216_v18 = vadd.f32 %v7857_v7, %v7845_v33 }
 0x526   :  { %v14297_v12 = vld [vmem:[#allocation7 + $0x14d4] sm:$0xf]  ;;  %v11414_v59 = vor.u32 %v14161_v3, %v11411_v15  ;;  %8087 = vmatpush.bf16.msra.mxu1 %v11670_v22 }
 0x527   :  { %v11955_v26 = vld [vmem:[#allocation7 + $0x14f0] sm:$0xf0] }
 0x528   :  { %v14361_v11 = vld [vmem:[#allocation7 + $0x16d4] sm:$0xf]  ;;  %v11958_v49 = vor.u32 %v14297_v12, %v11955_v26  ;;  %8074 = vmatpush.bf16.msra.mxu0 %v11414_v59 }
 0x529   :  { %v12211_v51 = vld [vmem:[#allocation7 + $0x16f0] sm:$0xf0] }
 0x52a   :  { %v14217_v28 = vld [vmem:[#allocation7 + $0x1254] sm:$0xf]  ;;  %v12214_v41 = vor.u32 %v14361_v11, %v12211_v51  ;;  %8099 = vmatpush.bf16.msra.mxu2 %v11958_v49 }
 0x52b   :  { %v11635_v13 = vld [vmem:[#allocation7 + $0x1270] sm:$0xf0] }
 0x52c   :  { %v14153_v31 = vld [vmem:[#allocation7 + $0x1054] sm:$0xf]  ;;  %v11638_v42 = vor.u32 %v14217_v28, %v11635_v13  ;;  %8112 = vmatpush.bf16.msra.mxu3 %v12214_v41 }
 0x52d   :  { %v11379_v36 = vld [vmem:[#allocation7 + $0x1070] sm:$0xf0] }
 0x52e   :  { %v14289_v44 = vld [vmem:[#allocation7 + $0x1494] sm:$0xf]  ;;  %v11382_v48 = vor.u32 %v14153_v31, %v11379_v36  ;;  %8088 = vmatpush.bf16.msra.mxu1 %v11638_v42 }
 0x52f   :  { %v11923_v30 = vld [vmem:[#allocation7 + $0x14b0] sm:$0xf0] }
 0x530   :  { %v14353_v37 = vld [vmem:[#allocation7 + $0x1694] sm:$0xf]  ;;  %v11926_v55 = vor.u32 %v14289_v44, %v11923_v30  ;;  %8075 = vmatpush.bf16.msra.mxu0 %v11382_v48 }
 0x531   :  { %v12179_v35 = vld [vmem:[#allocation7 + $0x16b0] sm:$0xf0] }
 0x532   :  { %v14209_v47 = vld [vmem:[#allocation7 + $0x1214] sm:$0xf]  ;;  %v12182_v0 = vor.u32 %v14353_v37, %v12179_v35  ;;  %8100 = vmatpush.bf16.msra.mxu2 %v11926_v55 }
 0x533   :  { %v11603_v46 = vld [vmem:[#allocation7 + $0x1230] sm:$0xf0] }
 0x534   :  { %v14521_v14 = vld [vmem:[#allocation7 + $0x1bd4] sm:$0xf]  ;;  %v11606_v2 = vor.u32 %v14209_v47, %v11603_v46  ;;  %8113 = vmatpush.bf16.msra.mxu3 %v12182_v0 }
 0x535   :  { %v12851_v50 = vld [vmem:[#allocation7 + $0x1bf0] sm:$0xf0] }
 0x536   :  { %v14145_v62 = vld [vmem:[#allocation7 + $0x1014] sm:$0xf]  ;;  %v12854_v29 = vor.u32 %v14521_v14, %v12851_v50  ;;  %8089 = vmatpush.bf16.msra.mxu1 %v11606_v2  ;;  %v7859_v14 = vpop.f32.mrf.mxu3 }
 0x537   :  { %v11347_v63 = vld [vmem:[#allocation7 + $0x1030] sm:$0xf0] }
 0x538   :  { %v14457_v9 = vld [vmem:[#allocation7 + $0x19d4] sm:$0xf]  ;;  %v11350_v10 = vor.u32 %v14145_v62, %v11347_v63 }
 0x539   :  { %v12595_v57 = vld [vmem:[#allocation7 + $0x19f0] sm:$0xf0]  ;;  %8090 = vmatmul.bf16.vlgmr.msra.gmra.mxu1 %v15077_v1 }
 0x53a   :  { %v14281_v56 = vld [vmem:[#allocation7 + $0x1454] sm:$0xf]  ;;  %v12598_v22 = vor.u32 %v14457_v9, %v12595_v57  ;;  %8134 = vmatpush.bf16.msrb.mxu1 %v12854_v29  ;;  %8076 = vmatpush.bf16.msra.mxu0 %v11350_v10 }
 0x53b   :  { %v11891_v4 = vld [vmem:[#allocation7 + $0x1470] sm:$0xf0] }
 0x53c   :  { %v14345_v32 = vld [vmem:[#allocation7 + $0x1654] sm:$0xf]  ;;  %v11894_v12 = vor.u32 %v14281_v56, %v11891_v4 }
 0x53d   :  { %v12147_v8 = vld [vmem:[#allocation7 + $0x1670] sm:$0xf0]  ;;  %8077 = vmatmul.bf16.vlgmr.msra.gmra.mxu0 %v15075_v54 }
 0x53e   :  { %v14513_v3 = vld [vmem:[#allocation7 + $0x1b94] sm:$0xf]  ;;  %v12150_v28 = vor.u32 %v14345_v32, %v12147_v8  ;;  %8121 = vmatpush.bf16.msrb.mxu0 %v12598_v22  ;;  %8101 = vmatpush.bf16.msra.mxu2 %v11894_v12 }
 0x53f   :  { %v12819_v15 = vld [vmem:[#allocation7 + $0x1bb0] sm:$0xf0] }
 0x540   :  { %v14449_v26 = vld [vmem:[#allocation7 + $0x1994] sm:$0xf]  ;;  %v12822_v49 = vor.u32 %v14513_v3, %v12819_v15  ;;  %8114 = vmatpush.bf16.msra.mxu3 %v12150_v28  ;;  %v7883_v28 = vpop.f32.mrf.mxu1 }
 0x541   :  { %v12563_v11 = vld [vmem:[#allocation7 + $0x19b0] sm:$0xf0] }
 0x542   :  { %v14273_v51 = vld [vmem:[#allocation7 + $0x1414] sm:$0xf]  ;;  %v12566_v30 = vor.u32 %v14449_v26, %v12563_v11  ;;  %8135 = vmatpush.bf16.msrb.mxu1 %v12822_v49 }
 0x543   :  { %v11859_v16 = vld [vmem:[#allocation7 + $0x1430] sm:$0xf0] }
 0x544   :  { %v14337_v13 = vld [vmem:[#allocation7 + $0x1614] sm:$0xf]  ;;  %v11862_v37 = vor.u32 %v14273_v51, %v11859_v16  ;;  %8122 = vmatpush.bf16.msrb.mxu0 %v12566_v30 }
 0x545   :  { %v12115_v59 = vld [vmem:[#allocation7 + $0x1630] sm:$0xf0] }
 0x546   :  { %v14585_v31 = vld [vmem:[#allocation7 + $0x1dd4] sm:$0xf]  ;;  %v12118_v35 = vor.u32 %v14337_v13, %v12115_v59  ;;  %8102 = vmatpush.bf16.msra.mxu2 %v11862_v37 }
 0x547   :  { %v13107_v36 = vld [vmem:[#allocation7 + $0x1df0] sm:$0xf0] }
 0x548   :  { %v14649_v17 = vld [vmem:[#allocation7 + $0x1fd4] sm:$0xf]  ;;  %v13110_v47 = vor.u32 %v14585_v31, %v13107_v36  ;;  %8115 = vmatpush.bf16.msra.mxu3 %v12118_v35  ;;  %v7870_v36 = vpop.f32.mrf.mxu0 }
 0x549   :  { %v13363_v41 = vld [vmem:[#allocation7 + $0x1ff0] sm:$0xf0]  ;;  %8103 = vmatmul.bf16.vlgmr.msra.gmra.mxu2 %v15081_v20 }
 0x54a   :  { %v14505_v42 = vld [vmem:[#allocation7 + $0x1b54] sm:$0xf]  ;;  %v13366_v50 = vor.u32 %v14649_v17, %v13363_v41  ;;  %8147 = vmatpush.bf16.msrb.mxu2 %v13110_v47 }
 0x54b   :  { %v12787_v44 = vld [vmem:[#allocation7 + $0x1b70] sm:$0xf0]  ;;  %8116 = vmatmul.bf16.vlgmr.msra.gmra.mxu3 %v15083_v25 }
 0x54c   :  { %v14441_v46 = vld [vmem:[#allocation7 + $0x1954] sm:$0xf]  ;;  %v12790_v55 = vor.u32 %v14505_v42, %v12787_v44  ;;  %8160 = vmatpush.bf16.msrb.mxu3 %v13366_v50  ;;  %v7871_v44 = vadd.f32 %v7870_v36, %v15216_v18 }
 0x54d   :  { %v12531_v48 = vld [vmem:[#allocation7 + $0x1970] sm:$0xf0] }
 0x54e   :  { %v14577_v62 = vld [vmem:[#allocation7 + $0x1d94] sm:$0xf]  ;;  %v12534_v57 = vor.u32 %v14441_v46, %v12531_v48  ;;  %8136 = vmatpush.bf16.msrb.mxu1 %v12790_v55  ;;  %v7884_v47 = vadd.f32 %v7883_v28, %v7871_v44  ;;  %v9529_v28 = vld [vmem:[#allocation7 + $0x1d8] sm:$0xf] }
 0x54f   :  { %v13075_v63 = vld [vmem:[#allocation7 + $0x1db0] sm:$0xf0] }
 0x550   :  { %v14641_v9 = vld [vmem:[#allocation7 + $0x1f94] sm:$0xf]  ;;  %v13078_v56 = vor.u32 %v14577_v62, %v13075_v63  ;;  %8123 = vmatpush.bf16.msrb.mxu0 %v12534_v57  ;;  %v7885_v57 = vpop.f32.mrf.mxu1 }
 0x551   :  { %v13331_v39 = vld [vmem:[#allocation7 + $0x1fb0] sm:$0xf0]  ;;  %v10297_v57 = vld [vmem:[#allocation7 + $0x7d8] sm:$0xf] }
 0x552   :  { %v14497_v0 = vld [vmem:[#allocation7 + $0x1b14] sm:$0xf]  ;;  %v13334_v7 = vor.u32 %v14641_v9, %v13331_v39  ;;  %8148 = vmatpush.bf16.msrb.mxu2 %v13078_v56 }
 0x553   :  { %v12755_v2 = vld [vmem:[#allocation7 + $0x1b30] sm:$0xf0] }
 0x554   :  { %v14433_v4 = vld [vmem:[#allocation7 + $0x1914] sm:$0xf]  ;;  %v12758_v29 = vor.u32 %v14497_v0, %v12755_v2  ;;  %8161 = vmatpush.bf16.msrb.mxu3 %v13334_v7 }
 0x555   :  { %v12499_v33 = vld [vmem:[#allocation7 + $0x1930] sm:$0xf0] }
 0x556   :  { %v14569_v32 = vld [vmem:[#allocation7 + $0x1d54] sm:$0xf]  ;;  %v12502_v12 = vor.u32 %v14433_v4, %v12499_v33  ;;  %8137 = vmatpush.bf16.msrb.mxu1 %v12758_v29 }
 0x557   :  { %v13043_v8 = vld [vmem:[#allocation7 + $0x1d70] sm:$0xf0] }
 0x558   :  { %v14633_v10 = vld [vmem:[#allocation7 + $0x1f54] sm:$0xf]  ;;  %v13046_v26 = vor.u32 %v14569_v32, %v13043_v8  ;;  %8124 = vmatpush.bf16.msrb.mxu0 %v12502_v12  ;;  %v7872_v32 = vpop.f32.mrf.mxu0  ;;  %v13758_v12 = vld [vmem:[#allocation7 + $0x3f4] sm:$0xf0] }
 0x559   :  { %v13299_v3 = vld [vmem:[#allocation7 + $0x1f70] sm:$0xf0] }
 0x55a   :  { %v14489_v15 = vld [vmem:[#allocation7 + $0x1ad4] sm:$0xf]  ;;  %v13302_v16 = vor.u32 %v14633_v10, %v13299_v3  ;;  %8149 = vmatpush.bf16.msrb.mxu2 %v13046_v26 }
 0x55b   :  { %v12723_v22 = vld [vmem:[#allocation7 + $0x1af0] sm:$0xf0] }
 0x55c   :  { %v14425_v11 = vld [vmem:[#allocation7 + $0x18d4] sm:$0xf]  ;;  %v12726_v13 = vor.u32 %v14489_v15, %v12723_v22  ;;  %8162 = vmatpush.bf16.msrb.mxu3 %v13302_v16  ;;  %v9785_v22 = vld [vmem:[#allocation7 + $0x3d8] sm:$0xf]  ;;  %v7896_v16 = vpop.f32.mrf.mxu2 }
 0x55d   :  { %v12467_v51 = vld [vmem:[#allocation7 + $0x18f0] sm:$0xf0] }
 0x55e   :  { %v14561_v59 = vld [vmem:[#allocation7 + $0x1d14] sm:$0xf]  ;;  %v12470_v30 = vor.u32 %v14425_v11, %v12467_v51  ;;  %8138 = vmatpush.bf16.msrb.mxu1 %v12726_v13 }
 0x55f   :  { %v13011_v49 = vld [vmem:[#allocation7 + $0x1d30] sm:$0xf0] }
 0x560   :  { %v14625_v31 = vld [vmem:[#allocation7 + $0x1f14] sm:$0xf]  ;;  %v13014_v37 = vor.u32 %v14561_v59, %v13011_v49  ;;  %8125 = vmatpush.bf16.msrb.mxu0 %v12470_v30  ;;  %v13694_v49 = vld [vmem:[#allocation7 + $0x1f4] sm:$0xf0] }
 0x561   :  { %v13267_v17 = vld [vmem:[#allocation7 + $0x1f30] sm:$0xf0] }
 0x562   :  { %v14481_v41 = vld [vmem:[#allocation7 + $0x1a94] sm:$0xf]  ;;  %v13270_v46 = vor.u32 %v14625_v31, %v13267_v17  ;;  %8150 = vmatpush.bf16.msrb.mxu2 %v13014_v37  ;;  %v7897_v17 = vadd.f32 %v7896_v16, %v7884_v47  ;;  %v13878_v16 = vld [vmem:[#allocation7 + $0x7b4] sm:$0xf0] }
 0x563   :  { %v12691_v42 = vld [vmem:[#allocation7 + $0x1ab0] sm:$0xf0] }
 0x564   :  { %v14417_v45 = vld [vmem:[#allocation7 + $0x1894] sm:$0xf]  ;;  %v12694_v48 = vor.u32 %v14481_v41, %v12691_v42  ;;  %8163 = vmatpush.bf16.msrb.mxu3 %v13270_v46  ;;  %v7909_v41 = vpop.f32.mrf.mxu3  ;;  %v9786_v42 = vor.u32 %v13758_v12, %v9785_v22  ;;  %v7898_v32 = vpop.f32.mrf.mxu2 }
 0x565   :  { %v12435_v35 = vld [vmem:[#allocation7 + $0x18b0] sm:$0xf0]  ;;  %v15223_v46 = vadd.f32 %v7909_v41, %v7897_v17  ;;  %v13670_v17 = vld [vmem:[#allocation7 + $0x134] sm:$0xf0] }
 0x566   :  { %v14553_v14 = vld [vmem:[#allocation7 + $0x1cd4] sm:$0xf]  ;;  %v12438_v39 = vor.u32 %v14417_v45, %v12435_v35  ;;  %8139 = vmatpush.bf16.msrb.mxu1 %v12694_v48  ;;  %v9753_v45 = vld [vmem:[#allocation7 + $0x398] sm:$0xf]  ;;  %v9530_v48 = vor.u32 %v13694_v49, %v9529_v28 }
 0x567   :  { %v12979_v50 = vld [vmem:[#allocation7 + $0x1cf0] sm:$0xf0]  ;;  %v13750_v35 = vld [vmem:[#allocation7 + $0x3b4] sm:$0xf0] }
 0x568   :  { %v14617_v55 = vld [vmem:[#allocation7 + $0x1ed4] sm:$0xf]  ;;  %v12982_v18 = vor.u32 %v14553_v14, %v12979_v50  ;;  %8126 = vmatpush.bf16.msrb.mxu0 %v12438_v39  ;;  %v9497_v50 = vld [vmem:[#allocation7 + $0x198] sm:$0xf] }
 0x569   :  { %v13235_v62 = vld [vmem:[#allocation7 + $0x1ef0] sm:$0xf0]  ;;  %v10265_v28 = vld [vmem:[#allocation7 + $0x798] sm:$0xf] }
 0x56a   :  { %v14473_v63 = vld [vmem:[#allocation7 + $0x1a54] sm:$0xf]  ;;  %v13238_v56 = vor.u32 %v14617_v55, %v13235_v62  ;;  %8151 = vmatpush.bf16.msrb.mxu2 %v12982_v18  ;;  %v13686_v55 = vld [vmem:[#allocation7 + $0x1b4] sm:$0xf0]  ;;  %v9754_v18 = vor.u32 %v13750_v35, %v9753_v45  ;;  %v10266_v41 = vor.u32 %v13878_v16, %v10265_v28 }
 0x56b   :  { %v12659_v9 = vld [vmem:[#allocation7 + $0x1a70] sm:$0xf0]  ;;  %v13870_v45 = vld [vmem:[#allocation7 + $0x774] sm:$0xf0] }
 0x56c   :  { %v14409_v0 = vld [vmem:[#allocation7 + $0x1854] sm:$0xf]  ;;  %v12662_v4 = vor.u32 %v14473_v63, %v12659_v9  ;;  %8164 = vmatpush.bf16.msrb.mxu3 %v13238_v56  ;;  %v13886_v56 = vld [vmem:[#allocation7 + $0x7f4] sm:$0xf0]  ;;  %v7911_v22 = vpop.f32.mrf.mxu3 }
 0x56d   :  { %v12403_v2 = vld [vmem:[#allocation7 + $0x1870] sm:$0xf0]  ;;  %v10298_v12 = vor.u32 %v13886_v56, %v10297_v57  ;;  %v9657_v35 = vld [vmem:[#allocation7 + $0x2d8] sm:$0xf] }
 0x56e   :  { %v14545_v33 = vld [vmem:[#allocation7 + $0x1c94] sm:$0xf]  ;;  %v12406_v15 = vor.u32 %v14409_v0, %v12403_v2  ;;  %8140 = vmatpush.bf16.msrb.mxu1 %v12662_v4  ;;  %v10041_v0 = vld [vmem:[#allocation7 + $0x5d8] sm:$0xf] }
 0x56f   :  { %v12947_v7 = vld [vmem:[#allocation7 + $0x1cb0] sm:$0xf0]  ;;  %v13822_v2 = vld [vmem:[#allocation7 + $0x5f4] sm:$0xf0] }
 0x570   :  { %v14609_v29 = vld [vmem:[#allocation7 + $0x1e94] sm:$0xf]  ;;  %v12950_v26 = vor.u32 %v14545_v33, %v12947_v7  ;;  %8127 = vmatpush.bf16.msrb.mxu0 %v12406_v15  ;;  %v9721_v4 = vld [vmem:[#allocation7 + $0x358] sm:$0xf]  ;;  %v9498_v7 = vor.u32 %v13686_v55, %v9497_v50 }
 0x571   :  { %v13203_v8 = vld [vmem:[#allocation7 + $0x1eb0] sm:$0xf0]  ;;  %v13742_v33 = vld [vmem:[#allocation7 + $0x374] sm:$0xf0] }
 0x572   :  { %v14465_v10 = vld [vmem:[#allocation7 + $0x1a14] sm:$0xf]  ;;  %v13206_v13 = vor.u32 %v14609_v29, %v13203_v8  ;;  %8152 = vmatpush.bf16.msrb.mxu2 %v12950_v26  ;;  %v13678_v15 = vld [vmem:[#allocation7 + $0x174] sm:$0xf0]  ;;  %v9722_v26 = vor.u32 %v13742_v33, %v9721_v4 }
 0x573   :  { %v12627_v3 = vld [vmem:[#allocation7 + $0x1a30] sm:$0xf0]  ;;  %v9401_v55 = vld [vmem:[#allocation7 + $0xd8] sm:$0xf] }
 0x574   :  { %v14401_v11 = vld [vmem:[#allocation7 + $0x1814] sm:$0xf]  ;;  %v12630_v59 = vor.u32 %v14465_v10, %v12627_v3  ;;  %8165 = vmatpush.bf16.msrb.mxu3 %v13206_v13  ;;  %v10042_v10 = vor.u32 %v13822_v2, %v10041_v0  ;;  %v9465_v3 = vld [vmem:[#allocation7 + $0x158] sm:$0xf]  ;;  %v7922_v2 = vpop.f32.mrf.mxu0 }
 0x575   :  { %v12371_v51 = vld [vmem:[#allocation7 + $0x1830] sm:$0xf0]  ;;  %v9689_v13 = vld [vmem:[#allocation7 + $0x318] sm:$0xf]  ;;  %v9466_v49 = vor.u32 %v13678_v15, %v9465_v3  ;;  %v7923_v33 = vadd.f32 %v7922_v2, %v15223_v46 }
 0x576   :  { %v14537_v31 = vld [vmem:[#allocation7 + $0x1c54] sm:$0xf]  ;;  %v12374_v37 = vor.u32 %v14401_v11, %v12371_v51  ;;  %8141 = vmatpush.bf16.msrb.mxu1 %v12630_v59  ;;  %v10009_v11 = vld [vmem:[#allocation7 + $0x598] sm:$0xf] }
 0x577   :  { %v12915_v36 = vld [vmem:[#allocation7 + $0x1c70] sm:$0xf0]  ;;  %v13814_v51 = vld [vmem:[#allocation7 + $0x5b4] sm:$0xf0] }
 0x578   :  { %v14601_v44 = vld [vmem:[#allocation7 + $0x1e54] sm:$0xf]  ;;  %v12918_v14 = vor.u32 %v14537_v31, %v12915_v36  ;;  %8128 = vmatpush.bf16.msrb.mxu0 %v12374_v37  ;;  %v13734_v59 = vld [vmem:[#allocation7 + $0x334] sm:$0xf0]  ;;  %v10010_v31 = vor.u32 %v13814_v51, %v10009_v11 }
 0x579   :  { %v13171_v30 = vld [vmem:[#allocation7 + $0x1e70] sm:$0xf0]  ;;  %8142 = vmatmul.bf16.vlgmr.msrb.gmra.mxu1 %v15089_v53  ;;  %v9433_v36 = vld [vmem:[#allocation7 + $0x118] sm:$0xf] }
 0x57a   :  { %v14529_v62 = vld [vmem:[#allocation7 + $0x1c14] sm:$0xf]  ;;  %v13174_v63 = vor.u32 %v14601_v44, %v13171_v30  ;;  %8186 = vmatpush.bf16.msra.mxu1 %v9786_v42  ;;  %8153 = vmatpush.bf16.msrb.mxu2 %v12918_v14  ;;  %v9690_v42 = vor.u32 %v13734_v59, %v9689_v13  ;;  %v9977_v44 = vld [vmem:[#allocation7 + $0x558] sm:$0xf]  ;;  %v9434_v14 = vor.u32 %v13670_v17, %v9433_v36 }
 0x57b   :  { %v12883_v47 = vld [vmem:[#allocation7 + $0x1c30] sm:$0xf0]  ;;  %8129 = vmatmul.bf16.vlgmr.msrb.gmra.mxu0 %v15087_v52  ;;  %v13806_v30 = vld [vmem:[#allocation7 + $0x574] sm:$0xf0] }
 0x57c   :  { %v14593_v9 = vld [vmem:[#allocation7 + $0x1e14] sm:$0xf]  ;;  %8173 = vmatpush.bf16.msra.mxu0 %v9530_v48  ;;  %v12886_v29 = vor.u32 %v14529_v62, %v12883_v47  ;;  %8166 = vmatpush.bf16.msrb.mxu3 %v13174_v63  ;;  %v10233_v37 = vld [vmem:[#allocation7 + $0x758] sm:$0xf]  ;;  %v9978_v50 = vor.u32 %v13806_v30, %v9977_v44  ;;  %v7935_v63 = vpop.f32.mrf.mxu1  ;;  %v7924_v44 = vpop.f32.mrf.mxu0 }
 0x57d   :  { %v13139_v39 = vld [vmem:[#allocation7 + $0x1e30] sm:$0xf0]  ;;  %v13726_v48 = vld [vmem:[#allocation7 + $0x2f4] sm:$0xf0]  ;;  %v10234_v47 = vor.u32 %v13870_v45, %v10233_v37 }
 0x57e   :  { %v13142_v8 = vor.u32 %v14593_v9, %v13139_v39  ;;  %8187 = vmatpush.bf16.msra.mxu1 %v9754_v18  ;;  %8154 = vmatpush.bf16.msrb.mxu2 %v12886_v29  ;;  %v13662_v62 = vld [vmem:[#allocation7 + $0xf4] sm:$0xf0]  ;;  %v9658_v9 = vor.u32 %v13726_v48, %v9657_v35 }
 0x57f   :  { %v9945_v39 = vld [vmem:[#allocation7 + $0x518] sm:$0xf] }
 0x580   :  { %8174 = vmatpush.bf16.msra.mxu0 %v9498_v7  ;;  %8167 = vmatpush.bf16.msrb.mxu3 %v13142_v8  ;;  %v13798_v18 = vld [vmem:[#allocation7 + $0x534] sm:$0xf0]  ;;  %v9402_v7 = vor.u32 %v13662_v62, %v9401_v55 }
 0x581   :  { %8155 = vmatmul.bf16.vlgmr.msrb.gmra.mxu2 %v15093_v19  ;;  %v10201_v0 = vld [vmem:[#allocation7 + $0x718] sm:$0xf]  ;;  %v9946_v29 = vor.u32 %v13798_v18, %v9945_v39 }
 0x582   :  { %8199 = vmatpush.bf16.msra.mxu2 %v10042_v10  ;;  %8188 = vmatpush.bf16.msra.mxu1 %v9722_v26  ;;  %v13862_v57 = vld [vmem:[#allocation7 + $0x734] sm:$0xf0]  ;;  %v7936_v10 = vadd.f32 %v7935_v63, %v7923_v33 }
 0x583   :  { %8168 = vmatmul.bf16.vlgmr.msrb.gmra.mxu3 %v15095_v27  ;;  %v9625_v56 = vld [vmem:[#allocation7 + $0x298] sm:$0xf]  ;;  %v10202_v3 = vor.u32 %v13862_v57, %v10201_v0 }
 0x584   :  { %8212 = vmatpush.bf16.msra.mxu3 %v10298_v12  ;;  %8175 = vmatpush.bf16.msra.mxu0 %v9466_v49  ;;  %v13718_v4 = vld [vmem:[#allocation7 + $0x2b4] sm:$0xf0]  ;;  %v7937_v49 = vpop.f32.mrf.mxu1 }
 0x585   :  { %v9369_v32 = vld [vmem:[#allocation7 + $0x98] sm:$0xf]  ;;  %v9626_v15 = vor.u32 %v13718_v4, %v9625_v56  ;;  %v7961_v56 = vpop.f32.mrf.mxu3 }
 0x586   :  { %8200 = vmatpush.bf16.msra.mxu2 %v10010_v31  ;;  %8189 = vmatpush.bf16.msra.mxu1 %v9690_v42  ;;  %v13654_v8 = vld [vmem:[#allocation7 + $0xb4] sm:$0xf0] }
 0x587   :  { %v9913_v22 = vld [vmem:[#allocation7 + $0x4d8] sm:$0xf]  ;;  %v9370_v16 = vor.u32 %v13654_v8, %v9369_v32 }
 0x588   :  { %8213 = vmatpush.bf16.msra.mxu3 %v10266_v41  ;;  %8176 = vmatpush.bf16.msra.mxu0 %v9434_v14  ;;  %v13790_v12 = vld [vmem:[#allocation7 + $0x4f4] sm:$0xf0] }
 0x589   :  { %v10169_v26 = vld [vmem:[#allocation7 + $0x6d8] sm:$0xf]  ;;  %v9914_v46 = vor.u32 %v13790_v12, %v9913_v22 }
 0x58a   :  { %8201 = vmatpush.bf16.msra.mxu2 %v9978_v50  ;;  %8190 = vmatpush.bf16.msra.mxu1 %v9658_v9  ;;  %v13854_v11 = vld [vmem:[#allocation7 + $0x6f4] sm:$0xf0] }
 0x58b   :  { %v9593_v51 = vld [vmem:[#allocation7 + $0x258] sm:$0xf]  ;;  %v10170_v31 = vor.u32 %v13854_v11, %v10169_v26 }
 0x58c   :  { %8214 = vmatpush.bf16.msra.mxu3 %v10234_v47  ;;  %v13710_v28 = vld [vmem:[#allocation7 + $0x274] sm:$0xf0]  ;;  %8177 = vmatpush.bf16.msra.mxu0 %v9402_v7  ;;  %v7948_v47 = vpop.f32.mrf.mxu2 }
 0x58d   :  { %v9337_v13 = vld [vmem:[#allocation7 + $0x58] sm:$0xf]  ;;  %v9594_v36 = vor.u32 %v13710_v28, %v9593_v51  ;;  %v7949_v57 = vadd.f32 %v7948_v47, %v7936_v10 }
 0x58e   :  { %8202 = vmatpush.bf16.msra.mxu2 %v9946_v29  ;;  %v13646_v59 = vld [vmem:[#allocation7 + $0x74] sm:$0xf0]  ;;  %8191 = vmatpush.bf16.msra.mxu1 %v9626_v15 }
 0x58f   :  { %v9881_v17 = vld [vmem:[#allocation7 + $0x498] sm:$0xf]  ;;  %v9338_v35 = vor.u32 %v13646_v59, %v9337_v13 }
 0x590   :  { %8215 = vmatpush.bf16.msra.mxu3 %v10202_v3  ;;  %v13782_v41 = vld [vmem:[#allocation7 + $0x4b4] sm:$0xf0]  ;;  %8178 = vmatpush.bf16.msra.mxu0 %v9370_v16  ;;  %v15230_v3 = vadd.f32 %v7961_v56, %v7949_v57 }
 0x591   :  { %v10137_v42 = vld [vmem:[#allocation7 + $0x698] sm:$0xf]  ;;  %v9882_v50 = vor.u32 %v13782_v41, %v9881_v17 }
 0x592   :  { %v13846_v30 = vld [vmem:[#allocation7 + $0x6b4] sm:$0xf0]  ;;  %8203 = vmatpush.bf16.msra.mxu2 %v9914_v46  ;;  %8192 = vmatpush.bf16.msra.mxu1 %v9594_v36 }
 0x593   :  { %v9561_v37 = vld [vmem:[#allocation7 + $0x218] sm:$0xf]  ;;  %v10138_v9 = vor.u32 %v13846_v30, %v10137_v42 }
 0x594   :  { %v13702_v45 = vld [vmem:[#allocation7 + $0x234] sm:$0xf0]  ;;  %8216 = vmatpush.bf16.msra.mxu3 %v10170_v31  ;;  %8179 = vmatpush.bf16.msra.mxu0 %v9338_v35  ;;  %v7950_v44 = vpop.f32.mrf.mxu2 }
 0x595   :  { %v10809_v48 = vld [vmem:[#allocation7 + $0xbd8] sm:$0xf]  ;;  %v9562_v39 = vor.u32 %v13702_v45, %v9561_v37 }
 0x596   :  { %v14014_v14 = vld [vmem:[#allocation7 + $0xbf4] sm:$0xf0]  ;;  %8204 = vmatpush.bf16.msra.mxu2 %v9882_v50 }
 0x597   :  { %v9305_v55 = vld [vmem:[#allocation7 + $0x18] sm:$0xf]  ;;  %v10810_v4 = vor.u32 %v14014_v14, %v10809_v48  ;;  %8193 = vmatpush.bf16.msra.mxu1 %v9562_v39  ;;  %v7963_v48 = vpop.f32.mrf.mxu3 }
 0x598   :  { %v13638_v62 = vld [vmem:[#allocation7 + $0x34] sm:$0xf0]  ;;  %8217 = vmatpush.bf16.msra.mxu3 %v10138_v9 }
 0x599   :  { %v10553_v63 = vld [vmem:[#allocation7 + $0x9d8] sm:$0xf]  ;;  %v9306_v29 = vor.u32 %v13638_v62, %v9305_v55 }
 0x59a   :  { %v13950_v18 = vld [vmem:[#allocation7 + $0x9f4] sm:$0xf0]  ;;  %8194 = vmatmul.bf16.vlgmr.msra.gmra.mxu1 %v15053_v24 }
 0x59b   :  { %v9849_v0 = vld [vmem:[#allocation7 + $0x458] sm:$0xf]  ;;  %v10554_v15 = vor.u32 %v13950_v18, %v10553_v63  ;;  %8238 = vmatpush.bf16.msrb.mxu1 %v10810_v4  ;;  %8180 = vmatpush.bf16.msra.mxu0 %v9306_v29 }
 0x59c   :  { %v13774_v2 = vld [vmem:[#allocation7 + $0x474] sm:$0xf0] }
 0x59d   :  { %v10105_v33 = vld [vmem:[#allocation7 + $0x658] sm:$0xf]  ;;  %v9850_v22 = vor.u32 %v13774_v2, %v9849_v0 }
 0x59e   :  { %v13838_v7 = vld [vmem:[#allocation7 + $0x674] sm:$0xf0]  ;;  %8181 = vmatmul.bf16.vlgmr.msra.gmra.mxu0 %v15051_v23 }
 0x59f   :  { %v10777_v32 = vld [vmem:[#allocation7 + $0xb98] sm:$0xf]  ;;  %v10106_v51 = vor.u32 %v13838_v7, %v10105_v33  ;;  %8225 = vmatpush.bf16.msrb.mxu0 %v10554_v15  ;;  %8205 = vmatpush.bf16.msra.mxu2 %v9850_v22  ;;  %v14749_v22 = vld [vmem:[#allocation8] sm:$0xff] }
 0x5a0   :  { %v14006_v8 = vld [vmem:[#allocation7 + $0xbb4] sm:$0xf0] }
 0x5a1   :  { %v10521_v12 = vld [vmem:[#allocation7 + $0x998] sm:$0xf]  ;;  %v10778_v46 = vor.u32 %v14006_v8, %v10777_v32  ;;  %8218 = vmatpush.bf16.msra.mxu3 %v10106_v51 }
 0x5a2   :  { %v13942_v26 = vld [vmem:[#allocation7 + $0x9b4] sm:$0xf0] }
 0x5a3   :  { %v9817_v11 = vld [vmem:[#allocation7 + $0x418] sm:$0xf]  ;;  %v10522_v41 = vor.u32 %v13942_v26, %v10521_v12  ;;  %8239 = vmatpush.bf16.msrb.mxu1 %v10778_v46  ;;  %v1738_v12 = vperm.slane %v14749_v22, 5 }
 0x5a4   :  { %v13766_v10 = vld [vmem:[#allocation7 + $0x434] sm:$0xf0] }
 0x5a5   :  { %v10073_v28 = vld [vmem:[#allocation7 + $0x618] sm:$0xf]  ;;  %v9818_v42 = vor.u32 %v13766_v10, %v9817_v11  ;;  %8226 = vmatpush.bf16.msrb.mxu0 %v10522_v41 }
 0x5a6   :  { %v13830_v16 = vld [vmem:[#allocation7 + $0x634] sm:$0xf0] }
 0x5a7   :  { %v11065_v13 = vld [vmem:[#allocation7 + $0xdd8] sm:$0xf]  ;;  %v10074_v30 = vor.u32 %v13830_v16, %v10073_v28  ;;  %8206 = vmatpush.bf16.msra.mxu2 %v9818_v42  ;;  %v7987_v28 = vpop.f32.mrf.mxu1 }
 0x5a8   :  { %v14078_v59 = vld [vmem:[#allocation7 + $0xdf4] sm:$0xf0] }
 0x5a9   :  { %v11321_v49 = vld [vmem:[#allocation7 + $0xfd8] sm:$0xf]  ;;  %v11066_v37 = vor.u32 %v14078_v59, %v11065_v13  ;;  %8219 = vmatpush.bf16.msra.mxu3 %v10074_v30 }
 0x5aa   :  { %v14142_v31 = vld [vmem:[#allocation7 + $0xff4] sm:$0xf0]  ;;  %8207 = vmatmul.bf16.vlgmr.msra.gmra.mxu2 %v15057_v60 }
 0x5ab   :  { %v10745_v36 = vld [vmem:[#allocation7 + $0xb58] sm:$0xf]  ;;  %v11322_v14 = vor.u32 %v14142_v31, %v11321_v49  ;;  %8251 = vmatpush.bf16.msrb.mxu2 %v11066_v37  ;;  %v7974_v31 = vpop.f32.mrf.mxu0 }
 0x5ac   :  { %v13998_v17 = vld [vmem:[#allocation7 + $0xb74] sm:$0xf0]  ;;  %8220 = vmatmul.bf16.vlgmr.msra.gmra.mxu3 %v15059_v61  ;;  %v7975_v42 = vadd.f32 %v7974_v31, %v1738_v12 }
 0x5ad   :  { %v10489_v45 = vld [vmem:[#allocation7 + $0x958] sm:$0xf]  ;;  %v10746_v50 = vor.u32 %v13998_v17, %v10745_v36  ;;  %8264 = vmatpush.bf16.msrb.mxu3 %v11322_v14 }
 0x5ae   :  { %v13934_v35 = vld [vmem:[#allocation7 + $0x974] sm:$0xf0] }
 0x5af   :  { %v11033_v55 = vld [vmem:[#allocation7 + $0xd98] sm:$0xf]  ;;  %v10490_v18 = vor.u32 %v13934_v35, %v10489_v45  ;;  %8240 = vmatpush.bf16.msrb.mxu1 %v10746_v50  ;;  %v7988_v35 = vadd.f32 %v7987_v28, %v7975_v42 }
 0x5b0   :  { %v14070_v62 = vld [vmem:[#allocation7 + $0xdb4] sm:$0xf0] }
 0x5b1   :  { %v11289_v63 = vld [vmem:[#allocation7 + $0xf98] sm:$0xf]  ;;  %v11034_v0 = vor.u32 %v14070_v62, %v11033_v55  ;;  %8227 = vmatpush.bf16.msrb.mxu0 %v10490_v18 }
 0x5b2   :  { %v14134_v47 = vld [vmem:[#allocation7 + $0xfb4] sm:$0xf0] }
 0x5b3   :  { %v10713_v9 = vld [vmem:[#allocation7 + $0xb18] sm:$0xf]  ;;  %v11290_v56 = vor.u32 %v14134_v47, %v11289_v63  ;;  %8252 = vmatpush.bf16.msrb.mxu2 %v11034_v0 }
 0x5b4   :  { %v13990_v39 = vld [vmem:[#allocation7 + $0xb34] sm:$0xf0] }
 0x5b5   :  { %v10457_v2 = vld [vmem:[#allocation7 + $0x918] sm:$0xf]  ;;  %v10714_v4 = vor.u32 %v13990_v39, %v10713_v9  ;;  %8265 = vmatpush.bf16.msrb.mxu3 %v11290_v56 }
 0x5b6   :  { %v13926_v57 = vld [vmem:[#allocation7 + $0x934] sm:$0xf0] }
 0x5b7   :  { %v11001_v33 = vld [vmem:[#allocation7 + $0xd58] sm:$0xf]  ;;  %v10458_v26 = vor.u32 %v13926_v57, %v10457_v2  ;;  %8241 = vmatpush.bf16.msrb.mxu1 %v10714_v4  ;;  %v7989_v57 = vpop.f32.mrf.mxu1 }
 0x5b8   :  { %v14062_v7 = vld [vmem:[#allocation7 + $0xd74] sm:$0xf0] }
 0x5b9   :  { %v11257_v29 = vld [vmem:[#allocation7 + $0xf58] sm:$0xf]  ;;  %v11002_v11 = vor.u32 %v14062_v7, %v11001_v33  ;;  %8228 = vmatpush.bf16.msrb.mxu0 %v10458_v26 }
 0x5ba   :  { %v14126_v32 = vld [vmem:[#allocation7 + $0xf74] sm:$0xf0] }
 0x5bb   :  { %v10681_v8 = vld [vmem:[#allocation7 + $0xad8] sm:$0xf]  ;;  %v11258_v16 = vor.u32 %v14126_v32, %v11257_v29  ;;  %8253 = vmatpush.bf16.msrb.mxu2 %v11002_v11  ;;  %v7976_v32 = vpop.f32.mrf.mxu0 }
 0x5bc   :  { %v13982_v15 = vld [vmem:[#allocation7 + $0xaf4] sm:$0xf0] }
 0x5bd   :  { %v10425_v51 = vld [vmem:[#allocation7 + $0x8d8] sm:$0xf]  ;;  %v10682_v46 = vor.u32 %v13982_v15, %v10681_v8  ;;  %8266 = vmatpush.bf16.msrb.mxu3 %v11258_v16 }
 0x5be   :  { %v13918_v10 = vld [vmem:[#allocation7 + $0x8f4] sm:$0xf0] }
 0x5bf   :  { %v10969_v13 = vld [vmem:[#allocation7 + $0xd18] sm:$0xf]  ;;  %v10426_v44 = vor.u32 %v13918_v10, %v10425_v51  ;;  %8242 = vmatpush.bf16.msrb.mxu1 %v10682_v46  ;;  %v8000_v46 = vpop.f32.mrf.mxu2 }
 0x5c0   :  { %v14054_v59 = vld [vmem:[#allocation7 + $0xd34] sm:$0xf0] }
 0x5c1   :  { %v11225_v49 = vld [vmem:[#allocation7 + $0xf18] sm:$0xf]  ;;  %v10970_v30 = vor.u32 %v14054_v59, %v10969_v13  ;;  %8229 = vmatpush.bf16.msrb.mxu0 %v10426_v44 }
 0x5c2   :  { %v14118_v36 = vld [vmem:[#allocation7 + $0xf34] sm:$0xf0] }
 0x5c3   :  { %v10649_v17 = vld [vmem:[#allocation7 + $0xa98] sm:$0xf]  ;;  %v11226_v48 = vor.u32 %v14118_v36, %v11225_v49  ;;  %8254 = vmatpush.bf16.msrb.mxu2 %v10970_v30 }
 0x5c4   :  { %v13974_v41 = vld [vmem:[#allocation7 + $0xab4] sm:$0xf0] }
 0x5c5   :  { %v10393_v37 = vld [vmem:[#allocation7 + $0x898] sm:$0xf]  ;;  %v10650_v14 = vor.u32 %v13974_v41, %v10649_v17  ;;  %8267 = vmatpush.bf16.msrb.mxu3 %v11226_v48  ;;  %v8001_v17 = vadd.f32 %v8000_v46, %v7988_v35  ;;  %v8013_v41 = vpop.f32.mrf.mxu3 }
 0x5c6   :  { %v13910_v45 = vld [vmem:[#allocation7 + $0x8b4] sm:$0xf0] }
 0x5c7   :  { %v10937_v50 = vld [vmem:[#allocation7 + $0xcd8] sm:$0xf]  ;;  %v10394_v39 = vor.u32 %v13910_v45, %v10393_v37  ;;  %8243 = vmatpush.bf16.msrb.mxu1 %v10650_v14  ;;  %v15236_v14 = vadd.f32 %v8013_v41, %v8001_v17 }
 0x5c8   :  { %v14046_v55 = vld [vmem:[#allocation7 + $0xcf4] sm:$0xf0] }
 0x5c9   :  { %v11193_v62 = vld [vmem:[#allocation7 + $0xed8] sm:$0xf]  ;;  %v10938_v18 = vor.u32 %v14046_v55, %v10937_v50  ;;  %8230 = vmatpush.bf16.msrb.mxu0 %v10394_v39 }
 0x5ca   :  { %v14110_v63 = vld [vmem:[#allocation7 + $0xef4] sm:$0xf0] }
 0x5cb   :  { %v10617_v47 = vld [vmem:[#allocation7 + $0xa58] sm:$0xf]  ;;  %v11194_v56 = vor.u32 %v14110_v63, %v11193_v62  ;;  %8255 = vmatpush.bf16.msrb.mxu2 %v10938_v18 }
 0x5cc   :  { %v13966_v9 = vld [vmem:[#allocation7 + $0xa74] sm:$0xf0] }
 0x5cd   :  { %v10361_v0 = vld [vmem:[#allocation7 + $0x858] sm:$0xf]  ;;  %v10618_v4 = vor.u32 %v13966_v9, %v10617_v47  ;;  %8268 = vmatpush.bf16.msrb.mxu3 %v11194_v56 }
 0x5ce   :  { %v13902_v2 = vld [vmem:[#allocation7 + $0x874] sm:$0xf0] }
 0x5cf   :  { %v10905_v33 = vld [vmem:[#allocation7 + $0xc98] sm:$0xf]  ;;  %v10362_v12 = vor.u32 %v13902_v2, %v10361_v0  ;;  %8244 = vmatpush.bf16.msrb.mxu1 %v10618_v4 }
 0x5d0   :  { %v14038_v7 = vld [vmem:[#allocation7 + $0xcb4] sm:$0xf0] }
 0x5d1   :  { %v11161_v29 = vld [vmem:[#allocation7 + $0xe98] sm:$0xf]  ;;  %v10906_v51 = vor.u32 %v14038_v7, %v10905_v33  ;;  %8231 = vmatpush.bf16.msrb.mxu0 %v10362_v12 }
 0x5d2   :  { %v14102_v8 = vld [vmem:[#allocation7 + $0xeb4] sm:$0xf0] }
 0x5d3   :  { %v10585_v15 = vld [vmem:[#allocation7 + $0xa18] sm:$0xf]  ;;  %v11162_v13 = vor.u32 %v14102_v8, %v11161_v29  ;;  %8256 = vmatpush.bf16.msrb.mxu2 %v10906_v51  ;;  %v8002_v8 = vpop.f32.mrf.mxu2 }
 0x5d4   :  { %v13958_v22 = vld [vmem:[#allocation7 + $0xa34] sm:$0xf0] }
 0x5d5   :  { %v11833_v26 = vld [vmem:[#allocation7 + $0x13d8] sm:$0xf]  ;;  %v10586_v59 = vor.u32 %v13958_v22, %v10585_v15  ;;  %8269 = vmatpush.bf16.msrb.mxu3 %v11162_v13 }
 0x5d6   :  { %v14270_v11 = vld [vmem:[#allocation7 + $0x13f4] sm:$0xf0] }
 0x5d7   :  { %v10329_v10 = vld [vmem:[#allocation7 + $0x818] sm:$0xf]  ;;  %v11834_v42 = vor.u32 %v14270_v11, %v11833_v26  ;;  %8245 = vmatpush.bf16.msrb.mxu1 %v10586_v59  ;;  %v8015_v11 = vpop.f32.mrf.mxu3 }
 0x5d8   :  { %v13894_v28 = vld [vmem:[#allocation7 + $0x834] sm:$0xf0] }
 0x5d9   :  { %v11577_v16 = vld [vmem:[#allocation7 + $0x11d8] sm:$0xf]  ;;  %v10330_v37 = vor.u32 %v13894_v28, %v10329_v10 }
 0x5da   :  { %v14206_v49 = vld [vmem:[#allocation7 + $0x11f4] sm:$0xf0]  ;;  %8246 = vmatmul.bf16.vlgmr.msrb.gmra.mxu1 %v15065_v40 }
 0x5db   :  { %v10873_v31 = vld [vmem:[#allocation7 + $0xc58] sm:$0xf]  ;;  %v11578_v50 = vor.u32 %v14206_v49, %v11577_v16  ;;  %8290 = vmatpush.bf16.msra.mxu1 %v11834_v42  ;;  %8232 = vmatpush.bf16.msrb.mxu0 %v10330_v37 }
 0x5dc   :  { %v14030_v36 = vld [vmem:[#allocation7 + $0xc74] sm:$0xf0] }
 0x5dd   :  { %v11129_v44 = vld [vmem:[#allocation7 + $0xe58] sm:$0xf]  ;;  %v10874_v55 = vor.u32 %v14030_v36, %v10873_v31 }
 0x5de   :  { %v14094_v30 = vld [vmem:[#allocation7 + $0xe74] sm:$0xf0]  ;;  %8233 = vmatmul.bf16.vlgmr.msrb.gmra.mxu0 %v15063_v34 }
 0x5df   :  { %v11801_v45 = vld [vmem:[#allocation7 + $0x1398] sm:$0xf]  ;;  %v11130_v9 = vor.u32 %v14094_v30, %v11129_v44  ;;  %8277 = vmatpush.bf16.msra.mxu0 %v11578_v50  ;;  %8257 = vmatpush.bf16.msrb.mxu2 %v10874_v55 }
 0x5e0   :  { %v14262_v48 = vld [vmem:[#allocation7 + $0x13b4] sm:$0xf0] }
 0x5e1   :  { %v11545_v62 = vld [vmem:[#allocation7 + $0x1198] sm:$0xf]  ;;  %v11802_v0 = vor.u32 %v14262_v48, %v11801_v45  ;;  %8270 = vmatpush.bf16.msrb.mxu3 %v11130_v9 }
 0x5e2   :  { %v14198_v63 = vld [vmem:[#allocation7 + $0x11b4] sm:$0xf0] }
 0x5e3   :  { %v10841_v47 = vld [vmem:[#allocation7 + $0xc18] sm:$0xf]  ;;  %v11546_v29 = vor.u32 %v14198_v63, %v11545_v62  ;;  %8291 = vmatpush.bf16.msra.mxu1 %v11802_v0 }
 0x5e4   :  { %v14022_v35 = vld [vmem:[#allocation7 + $0xc34] sm:$0xf0] }
 0x5e5   :  { %v11097_v39 = vld [vmem:[#allocation7 + $0xe18] sm:$0xf]  ;;  %v10842_v32 = vor.u32 %v14022_v35, %v10841_v47  ;;  %8278 = vmatpush.bf16.msra.mxu0 %v11546_v29  ;;  %v8039_v35 = vpop.f32.mrf.mxu1 }
 0x5e6   :  { %v14086_v18 = vld [vmem:[#allocation7 + $0xe34] sm:$0xf0] }
 0x5e7   :  { %v12089_v2 = vld [vmem:[#allocation7 + $0x15d8] sm:$0xf]  ;;  %v11098_v15 = vor.u32 %v14086_v18, %v11097_v39  ;;  %8258 = vmatpush.bf16.msrb.mxu2 %v10842_v32 }
 0x5e8   :  { %v14334_v57 = vld [vmem:[#allocation7 + $0x15f4] sm:$0xf0] }
 0x5e9   :  { %v12345_v56 = vld [vmem:[#allocation7 + $0x17d8] sm:$0xf]  ;;  %v12090_v22 = vor.u32 %v14334_v57, %v12089_v2  ;;  %8271 = vmatpush.bf16.msrb.mxu3 %v11098_v15 }
 0x5ea   :  { %v14398_v4 = vld [vmem:[#allocation7 + $0x17f4] sm:$0xf0]  ;;  %8259 = vmatmul.bf16.vlgmr.msrb.gmra.mxu2 %v15069_v5 }
 0x5eb   :  { %v11769_v33 = vld [vmem:[#allocation7 + $0x1358] sm:$0xf]  ;;  %v12346_v51 = vor.u32 %v14398_v4, %v12345_v56  ;;  %8303 = vmatpush.bf16.msra.mxu2 %v12090_v22  ;;  %v8026_v56 = vpop.f32.mrf.mxu0 }
 0x5ec   :  { %v14254_v7 = vld [vmem:[#allocation7 + $0x1374] sm:$0xf0]  ;;  %8272 = vmatmul.bf16.vlgmr.msrb.gmra.mxu3 %v15071_v6  ;;  %v8027_v29 = vadd.f32 %v8026_v56, %v15236_v14 }
 0x5ed   :  { %v11513_v12 = vld [vmem:[#allocation7 + $0x1158] sm:$0xf]  ;;  %v11770_v10 = vor.u32 %v14254_v7, %v11769_v33  ;;  %8316 = vmatpush.bf16.msra.mxu3 %v12346_v51 }
 0x5ee   :  { %v14190_v26 = vld [vmem:[#allocation7 + $0x1174] sm:$0xf0] }
 0x5ef   :  { %v12057_v28 = vld [vmem:[#allocation7 + $0x1598] sm:$0xf]  ;;  %v11514_v31 = vor.u32 %v14190_v26, %v11513_v12  ;;  %8292 = vmatpush.bf16.msra.mxu1 %v11770_v10  ;;  %v8040_v12 = vadd.f32 %v8039_v35, %v8027_v29 }
 0x5f0   :  { %v14326_v16 = vld [vmem:[#allocation7 + $0x15b4] sm:$0xf0] }
 0x5f1   :  { %v12313_v46 = vld [vmem:[#allocation7 + $0x1798] sm:$0xf]  ;;  %v12058_v36 = vor.u32 %v14326_v16, %v12057_v28  ;;  %8279 = vmatpush.bf16.msra.mxu0 %v11514_v31 }
 0x5f2   :  { %v14390_v13 = vld [vmem:[#allocation7 + $0x17b4] sm:$0xf0] }
 0x5f3   :  { %v11737_v59 = vld [vmem:[#allocation7 + $0x1318] sm:$0xf]  ;;  %v12314_v42 = vor.u32 %v14390_v13, %v12313_v46  ;;  %8304 = vmatpush.bf16.msra.mxu2 %v12058_v36  ;;  %v8041_v36 = vpop.f32.mrf.mxu1 }
 0x5f4   :  { %v14246_v49 = vld [vmem:[#allocation7 + $0x1334] sm:$0xf0] }
 0x5f5   :  { %v11481_v17 = vld [vmem:[#allocation7 + $0x1118] sm:$0xf]  ;;  %v11738_v44 = vor.u32 %v14246_v49, %v11737_v59  ;;  %8317 = vmatpush.bf16.msra.mxu3 %v12314_v42 }
 0x5f6   :  { %v14182_v41 = vld [vmem:[#allocation7 + $0x1134] sm:$0xf0] }
 0x5f7   :  { %v12025_v30 = vld [vmem:[#allocation7 + $0x1558] sm:$0xf]  ;;  %v11482_v62 = vor.u32 %v14182_v41, %v11481_v17  ;;  %8293 = vmatpush.bf16.msra.mxu1 %v11738_v44 }
 0x5f8   :  { %v14318_v37 = vld [vmem:[#allocation7 + $0x1574] sm:$0xf0] }
 0x5f9   :  { %v12281_v45 = vld [vmem:[#allocation7 + $0x1758] sm:$0xf]  ;;  %v12026_v63 = vor.u32 %v14318_v37, %v12025_v30  ;;  %8280 = vmatpush.bf16.msra.mxu0 %v11482_v62  ;;  %v8028_v37 = vpop.f32.mrf.mxu0 }
 0x5fa   :  { %v14382_v48 = vld [vmem:[#allocation7 + $0x1774] sm:$0xf0] }
 0x5fb   :  { %v11705_v50 = vld [vmem:[#allocation7 + $0x12d8] sm:$0xf]  ;;  %v12282_v39 = vor.u32 %v14382_v48, %v12281_v45  ;;  %8305 = vmatpush.bf16.msra.mxu2 %v12026_v63 }
 0x5fc   :  { %v14238_v55 = vld [vmem:[#allocation7 + $0x12f4] sm:$0xf0] }
 0x5fd   :  { %v11449_v47 = vld [vmem:[#allocation7 + $0x10d8] sm:$0xf]  ;;  %v11706_v18 = vor.u32 %v14238_v55, %v11705_v50  ;;  %8318 = vmatpush.bf16.msra.mxu3 %v12282_v39 }
 0x5fe   :  { %v14174_v9 = vld [vmem:[#allocation7 + $0x10f4] sm:$0xf0] }
 0x5ff   :  { %v11993_v0 = vld [vmem:[#allocation7 + $0x1518] sm:$0xf]  ;;  %v11450_v32 = vor.u32 %v14174_v9, %v11449_v47  ;;  %8294 = vmatpush.bf16.msra.mxu1 %v11706_v18  ;;  %v8052_v18 = vpop.f32.mrf.mxu2 }
 0x600   :  { %v14310_v2 = vld [vmem:[#allocation7 + $0x1534] sm:$0xf0] }
 0x601   :  { %v12249_v57 = vld [vmem:[#allocation7 + $0x1718] sm:$0xf]  ;;  %v11994_v8 = vor.u32 %v14310_v2, %v11993_v0  ;;  %8281 = vmatpush.bf16.msra.mxu0 %v11450_v32 }
 0x602   :  { %v14374_v4 = vld [vmem:[#allocation7 + $0x1734] sm:$0xf0] }
 0x603   :  { %v11673_v33 = vld [vmem:[#allocation7 + $0x1298] sm:$0xf]  ;;  %v12250_v26 = vor.u32 %v14374_v4, %v12249_v57  ;;  %8306 = vmatpush.bf16.msra.mxu2 %v11994_v8 }
 0x604   :  { %v14230_v7 = vld [vmem:[#allocation7 + $0x12b4] sm:$0xf0] }
 0x605   :  { %v11417_v15 = vld [vmem:[#allocation7 + $0x1098] sm:$0xf]  ;;  %v11674_v11 = vor.u32 %v14230_v7, %v11673_v33  ;;  %8319 = vmatpush.bf16.msra.mxu3 %v12250_v26  ;;  %v8053_v33 = vadd.f32 %v8052_v18, %v8040_v12  ;;  %v8065_v7 = vpop.f32.mrf.mxu3 }
 0x606   :  { %v14166_v22 = vld [vmem:[#allocation7 + $0x10b4] sm:$0xf0] }
 0x607   :  { %v11961_v51 = vld [vmem:[#allocation7 + $0x14d8] sm:$0xf]  ;;  %v11418_v59 = vor.u32 %v14166_v22, %v11417_v15  ;;  %8295 = vmatpush.bf16.msra.mxu1 %v11674_v11  ;;  %v15243_v11 = vadd.f32 %v8065_v7, %v8053_v33 }
 0x608   :  { %v14302_v10 = vld [vmem:[#allocation7 + $0x14f4] sm:$0xf0] }
 0x609   :  { %v12217_v28 = vld [vmem:[#allocation7 + $0x16d8] sm:$0xf]  ;;  %v11962_v14 = vor.u32 %v14302_v10, %v11961_v51  ;;  %8282 = vmatpush.bf16.msra.mxu0 %v11418_v59 }
 0x60a   :  { %v14366_v16 = vld [vmem:[#allocation7 + $0x16f4] sm:$0xf0] }
 0x60b   :  { %v11641_v46 = vld [vmem:[#allocation7 + $0x1258] sm:$0xf]  ;;  %v12218_v17 = vor.u32 %v14366_v16, %v12217_v28  ;;  %8307 = vmatpush.bf16.msra.mxu2 %v11962_v14 }
 0x60c   :  { %v14222_v13 = vld [vmem:[#allocation7 + $0x1274] sm:$0xf0] }
 0x60d   :  { %v11385_v49 = vld [vmem:[#allocation7 + $0x1058] sm:$0xf]  ;;  %v11642_v41 = vor.u32 %v14222_v13, %v11641_v46  ;;  %8320 = vmatpush.bf16.msra.mxu3 %v12218_v17 }
 0x60e   :  { %v14158_v31 = vld [vmem:[#allocation7 + $0x1074] sm:$0xf0] }
 0x60f   :  { %v11929_v42 = vld [vmem:[#allocation7 + $0x1498] sm:$0xf]  ;;  %v11386_v55 = vor.u32 %v14158_v31, %v11385_v49  ;;  %8296 = vmatpush.bf16.msra.mxu1 %v11642_v41 }
 0x610   :  { %v14294_v44 = vld [vmem:[#allocation7 + $0x14b4] sm:$0xf0] }
 0x611   :  { %v12185_v30 = vld [vmem:[#allocation7 + $0x1698] sm:$0xf]  ;;  %v11930_v47 = vor.u32 %v14294_v44, %v11929_v42  ;;  %8283 = vmatpush.bf16.msra.mxu0 %v11386_v55 }
 0x612   :  { %v14358_v45 = vld [vmem:[#allocation7 + $0x16b4] sm:$0xf0] }
 0x613   :  { %v11609_v48 = vld [vmem:[#allocation7 + $0x1218] sm:$0xf]  ;;  %v12186_v0 = vor.u32 %v14358_v45, %v12185_v30  ;;  %8308 = vmatpush.bf16.msra.mxu2 %v11930_v47  ;;  %v8054_v45 = vpop.f32.mrf.mxu2 }
 0x614   :  { %v14214_v50 = vld [vmem:[#allocation7 + $0x1234] sm:$0xf0] }
 0x615   :  { %v12857_v62 = vld [vmem:[#allocation7 + $0x1bd8] sm:$0xf]  ;;  %v11610_v2 = vor.u32 %v14214_v50, %v11609_v48  ;;  %8321 = vmatpush.bf16.msra.mxu3 %v12186_v0 }
 0x616   :  { %v14526_v63 = vld [vmem:[#allocation7 + $0x1bf4] sm:$0xf0] }
 0x617   :  { %v11353_v9 = vld [vmem:[#allocation7 + $0x1018] sm:$0xf]  ;;  %v12858_v29 = vor.u32 %v14526_v63, %v12857_v62  ;;  %8297 = vmatpush.bf16.msra.mxu1 %v11610_v2  ;;  %v8067_v63 = vpop.f32.mrf.mxu3 }
 0x618   :  { %v14150_v35 = vld [vmem:[#allocation7 + $0x1034] sm:$0xf0] }
 0x619   :  { %v12601_v39 = vld [vmem:[#allocation7 + $0x19d8] sm:$0xf]  ;;  %v11354_v15 = vor.u32 %v14150_v35, %v11353_v9 }
 0x61a   :  { %v14462_v57 = vld [vmem:[#allocation7 + $0x19f4] sm:$0xf0]  ;;  %8298 = vmatmul.bf16.vlgmr.msra.gmra.mxu1 %v15077_v1 }
 0x61b   :  { %v11897_v56 = vld [vmem:[#allocation7 + $0x1458] sm:$0xf]  ;;  %v12602_v51 = vor.u32 %v14462_v57, %v12601_v39  ;;  %8342 = vmatpush.bf16.msrb.mxu1 %v12858_v29  ;;  %8284 = vmatpush.bf16.msra.mxu0 %v11354_v15 }
 0x61c   :  { %v14286_v4 = vld [vmem:[#allocation7 + $0x1474] sm:$0xf0] }
 0x61d   :  { %v12153_v32 = vld [vmem:[#allocation7 + $0x1658] sm:$0xf]  ;;  %v11898_v10 = vor.u32 %v14286_v4, %v11897_v56 }
 0x61e   :  { %v14350_v8 = vld [vmem:[#allocation7 + $0x1674] sm:$0xf0]  ;;  %8285 = vmatmul.bf16.vlgmr.msra.gmra.mxu0 %v15075_v54 }
 0x61f   :  { %v12825_v22 = vld [vmem:[#allocation7 + $0x1b98] sm:$0xf]  ;;  %v12154_v13 = vor.u32 %v14350_v8, %v12153_v32  ;;  %8329 = vmatpush.bf16.msrb.mxu0 %v12602_v51  ;;  %8309 = vmatpush.bf16.msra.mxu2 %v11898_v10 }
 0x620   :  { %v14518_v26 = vld [vmem:[#allocation7 + $0x1bb4] sm:$0xf0] }
 0x621   :  { %v12569_v28 = vld [vmem:[#allocation7 + $0x1998] sm:$0xf]  ;;  %v12826_v49 = vor.u32 %v14518_v26, %v12825_v22  ;;  %8322 = vmatpush.bf16.msra.mxu3 %v12154_v13 }
 0x622   :  { %v14454_v16 = vld [vmem:[#allocation7 + $0x19b4] sm:$0xf0] }
 0x623   :  { %v11865_v46 = vld [vmem:[#allocation7 + $0x1418] sm:$0xf]  ;;  %v12570_v30 = vor.u32 %v14454_v16, %v12569_v28  ;;  %8343 = vmatpush.bf16.msrb.mxu1 %v12826_v49 }
 0x624   :  { %v14278_v12 = vld [vmem:[#allocation7 + $0x1434] sm:$0xf0] }
 0x625   :  { %v12121_v59 = vld [vmem:[#allocation7 + $0x1618] sm:$0xf]  ;;  %v11866_v37 = vor.u32 %v14278_v12, %v11865_v46  ;;  %8330 = vmatpush.bf16.msrb.mxu0 %v12570_v30  ;;  %v8091_v12 = vpop.f32.mrf.mxu1 }
 0x626   :  { %v14342_v14 = vld [vmem:[#allocation7 + $0x1634] sm:$0xf0] }
 0x627   :  { %v13113_v31 = vld [vmem:[#allocation7 + $0x1dd8] sm:$0xf]  ;;  %v12122_v48 = vor.u32 %v14342_v14, %v12121_v59  ;;  %8310 = vmatpush.bf16.msra.mxu2 %v11866_v37 }
 0x628   :  { %v14590_v36 = vld [vmem:[#allocation7 + $0x1df4] sm:$0xf0] }
 0x629   :  { %v13369_v17 = vld [vmem:[#allocation7 + $0x1fd8] sm:$0xf]  ;;  %v13114_v50 = vor.u32 %v14590_v36, %v13113_v31  ;;  %8323 = vmatpush.bf16.msra.mxu3 %v12122_v48 }
 0x62a   :  { %v14654_v41 = vld [vmem:[#allocation7 + $0x1ff4] sm:$0xf0]  ;;  %8311 = vmatmul.bf16.vlgmr.msra.gmra.mxu2 %v15081_v20 }
 0x62b   :  { %v12793_v42 = vld [vmem:[#allocation7 + $0x1b58] sm:$0xf]  ;;  %v13370_v47 = vor.u32 %v14654_v41, %v13369_v17  ;;  %8355 = vmatpush.bf16.msrb.mxu2 %v13114_v50  ;;  %v8078_v17 = vpop.f32.mrf.mxu0 }
 0x62c   :  { %v14510_v44 = vld [vmem:[#allocation7 + $0x1b74] sm:$0xf0]  ;;  %8324 = vmatmul.bf16.vlgmr.msra.gmra.mxu3 %v15083_v25  ;;  %v8079_v30 = vadd.f32 %v8078_v17, %v15243_v11 }
 0x62d   :  { %v12537_v55 = vld [vmem:[#allocation7 + $0x1958] sm:$0xf]  ;;  %v12794_v9 = vor.u32 %v14510_v44, %v12793_v42  ;;  %8368 = vmatpush.bf16.msrb.mxu3 %v13370_v47 }
 0x62e   :  { %v14446_v62 = vld [vmem:[#allocation7 + $0x1974] sm:$0xf0] }
 0x62f   :  { %v13081_v35 = vld [vmem:[#allocation7 + $0x1d98] sm:$0xf]  ;;  %v12538_v56 = vor.u32 %v14446_v62, %v12537_v55  ;;  %8344 = vmatpush.bf16.msrb.mxu1 %v12794_v9  ;;  %v8092_v55 = vadd.f32 %v8091_v12, %v8079_v30 }
 0x630   :  { %v14582_v39 = vld [vmem:[#allocation7 + $0x1db4] sm:$0xf0] }
 0x631   :  { %v13337_v18 = vld [vmem:[#allocation7 + $0x1f98] sm:$0xf]  ;;  %v13082_v4 = vor.u32 %v14582_v39, %v13081_v35  ;;  %8331 = vmatpush.bf16.msrb.mxu0 %v12538_v56 }
 0x632   :  { %v14646_v0 = vld [vmem:[#allocation7 + $0x1fb4] sm:$0xf0] }
 0x633   :  { %v12761_v2 = vld [vmem:[#allocation7 + $0x1b18] sm:$0xf]  ;;  %v13338_v29 = vor.u32 %v14646_v0, %v13337_v18  ;;  %8356 = vmatpush.bf16.msrb.mxu2 %v13082_v4  ;;  %v8093_v4 = vpop.f32.mrf.mxu1 }
 0x634   :  { %v14502_v57 = vld [vmem:[#allocation7 + $0x1b34] sm:$0xf0]  ;;  %v10043_v4 = vld [vmem:[#allocation7 + $0x5f8] sm:$0xf0] }
 0x635   :  { %v12505_v33 = vld [vmem:[#allocation7 + $0x1918] sm:$0xf]  ;;  %v12762_v32 = vor.u32 %v14502_v57, %v12761_v2  ;;  %8369 = vmatpush.bf16.msrb.mxu3 %v13338_v29 }
 0x636   :  { %v14438_v7 = vld [vmem:[#allocation7 + $0x1934] sm:$0xf0] }
 0x637   :  { %v13049_v8 = vld [vmem:[#allocation7 + $0x1d58] sm:$0xf]  ;;  %v12506_v28 = vor.u32 %v14438_v7, %v12505_v33  ;;  %8345 = vmatpush.bf16.msrb.mxu1 %v12762_v32 }
 0x638   :  { %v14574_v15 = vld [vmem:[#allocation7 + $0x1d74] sm:$0xf0] }
 0x639   :  { %v13305_v22 = vld [vmem:[#allocation7 + $0x1f58] sm:$0xf]  ;;  %v13050_v16 = vor.u32 %v14574_v15, %v13049_v8  ;;  %8332 = vmatpush.bf16.msrb.mxu0 %v12506_v28  ;;  %v8080_v15 = vpop.f32.mrf.mxu0  ;;  %v13754_v28 = vld [vmem:[#allocation7 + $0x3dc] sm:$0xf] }
 0x63a   :  { %v14638_v26 = vld [vmem:[#allocation7 + $0x1f74] sm:$0xf0] }
 0x63b   :  { %v12729_v51 = vld [vmem:[#allocation7 + $0x1ad8] sm:$0xf]  ;;  %v13306_v59 = vor.u32 %v14638_v26, %v13305_v22  ;;  %8357 = vmatpush.bf16.msrb.mxu2 %v13050_v16  ;;  %v9787_v16 = vld [vmem:[#allocation7 + $0x3f8] sm:$0xf0] }
 0x63c   :  { %v14494_v10 = vld [vmem:[#allocation7 + $0x1af4] sm:$0xf0]  ;;  %v9790_v30 = vor.u32 %v13754_v28, %v9787_v16  ;;  %v9467_v28 = vld [vmem:[#allocation7 + $0x178] sm:$0xf0] }
 0x63d   :  { %v12473_v46 = vld [vmem:[#allocation7 + $0x18d8] sm:$0xf]  ;;  %v12730_v14 = vor.u32 %v14494_v10, %v12729_v51  ;;  %8370 = vmatpush.bf16.msrb.mxu3 %v13306_v59  ;;  %v13690_v59 = vld [vmem:[#allocation7 + $0x1dc] sm:$0xf] }
 0x63e   :  { %v14430_v13 = vld [vmem:[#allocation7 + $0x18f4] sm:$0xf0] }
 0x63f   :  { %v13017_v49 = vld [vmem:[#allocation7 + $0x1d18] sm:$0xf]  ;;  %v12474_v37 = vor.u32 %v14430_v13, %v12473_v46  ;;  %8346 = vmatpush.bf16.msrb.mxu1 %v12730_v14  ;;  %v8104_v14 = vpop.f32.mrf.mxu2 }
 0x640   :  { %v14566_v31 = vld [vmem:[#allocation7 + $0x1d34] sm:$0xf0] }
 0x641   :  { %v13273_v36 = vld [vmem:[#allocation7 + $0x1f18] sm:$0xf]  ;;  %v13018_v45 = vor.u32 %v14566_v31, %v13017_v49  ;;  %8333 = vmatpush.bf16.msrb.mxu0 %v12474_v37 }
 0x642   :  { %v14630_v41 = vld [vmem:[#allocation7 + $0x1f34] sm:$0xf0] }
 0x643   :  { %v12697_v42 = vld [vmem:[#allocation7 + $0x1a98] sm:$0xf]  ;;  %v13274_v62 = vor.u32 %v14630_v41, %v13273_v36  ;;  %8358 = vmatpush.bf16.msrb.mxu2 %v13018_v45  ;;  %v9531_v36 = vld [vmem:[#allocation7 + $0x1f8] sm:$0xf0] }
 0x644   :  { %v14486_v44 = vld [vmem:[#allocation7 + $0x1ab4] sm:$0xf0] }
 0x645   :  { %v12441_v48 = vld [vmem:[#allocation7 + $0x1898] sm:$0xf]  ;;  %v12698_v63 = vor.u32 %v14486_v44, %v12697_v42  ;;  %8371 = vmatpush.bf16.msrb.mxu3 %v13274_v62  ;;  %v8105_v42 = vadd.f32 %v8104_v14, %v8092_v55  ;;  %v8117_v44 = vpop.f32.mrf.mxu3  ;;  %v9755_v62 = vld [vmem:[#allocation7 + $0x3b8] sm:$0xf0] }
 0x646   :  { %v14422_v50 = vld [vmem:[#allocation7 + $0x18b4] sm:$0xf0]  ;;  %v13874_v14 = vld [vmem:[#allocation7 + $0x79c] sm:$0xf] }
 0x647   :  { %v12985_v47 = vld [vmem:[#allocation7 + $0x1cd8] sm:$0xf]  ;;  %v12442_v2 = vor.u32 %v14422_v50, %v12441_v48  ;;  %8347 = vmatpush.bf16.msrb.mxu1 %v12698_v63  ;;  %v13746_v50 = vld [vmem:[#allocation7 + $0x39c] sm:$0xf]  ;;  %v15250_v63 = vadd.f32 %v8117_v44, %v8105_v42 }
 0x648   :  { %v14558_v9 = vld [vmem:[#allocation7 + $0x1cf4] sm:$0xf0]  ;;  %v13666_v42 = vld [vmem:[#allocation7 + $0x11c] sm:$0xf] }
 0x649   :  { %v13241_v35 = vld [vmem:[#allocation7 + $0x1ed8] sm:$0xf]  ;;  %v12986_v11 = vor.u32 %v14558_v9, %v12985_v47  ;;  %8334 = vmatpush.bf16.msrb.mxu0 %v12442_v2  ;;  %v9534_v47 = vor.u32 %v13690_v59, %v9531_v36  ;;  %v10011_v59 = vld [vmem:[#allocation7 + $0x5b8] sm:$0xf0] }
 0x64a   :  { %v14622_v39 = vld [vmem:[#allocation7 + $0x1ef4] sm:$0xf0]  ;;  %v9691_v36 = vld [vmem:[#allocation7 + $0x338] sm:$0xf0] }
 0x64b   :  { %v12665_v18 = vld [vmem:[#allocation7 + $0x1a58] sm:$0xf]  ;;  %v13242_v33 = vor.u32 %v14622_v39, %v13241_v35  ;;  %8359 = vmatpush.bf16.msrb.mxu2 %v12986_v11  ;;  %v13682_v35 = vld [vmem:[#allocation7 + $0x19c] sm:$0xf] }
 0x64c   :  { %v14478_v0 = vld [vmem:[#allocation7 + $0x1a74] sm:$0xf0]  ;;  %v9499_v39 = vld [vmem:[#allocation7 + $0x1b8] sm:$0xf0] }
 0x64d   :  { %v12409_v57 = vld [vmem:[#allocation7 + $0x1858] sm:$0xf]  ;;  %v12666_v7 = vor.u32 %v14478_v0, %v12665_v18  ;;  %8372 = vmatpush.bf16.msrb.mxu3 %v13242_v33  ;;  %v13882_v33 = vld [vmem:[#allocation7 + $0x7dc] sm:$0xf]  ;;  %v8119_v16 = vpop.f32.mrf.mxu3 }
 0x64e   :  { %v14414_v56 = vld [vmem:[#allocation7 + $0x1874] sm:$0xf0]  ;;  %v9435_v44 = vld [vmem:[#allocation7 + $0x138] sm:$0xf0] }
 0x64f   :  { %v12953_v29 = vld [vmem:[#allocation7 + $0x1c98] sm:$0xf]  ;;  %v12410_v10 = vor.u32 %v14414_v56, %v12409_v57  ;;  %8348 = vmatpush.bf16.msrb.mxu1 %v12666_v7  ;;  %v9758_v57 = vor.u32 %v13746_v50, %v9755_v62  ;;  %v13818_v56 = vld [vmem:[#allocation7 + $0x5dc] sm:$0xf] }
 0x650   :  { %v14550_v32 = vld [vmem:[#allocation7 + $0x1cb4] sm:$0xf0]  ;;  %v10299_v7 = vld [vmem:[#allocation7 + $0x7f8] sm:$0xf0] }
 0x651   :  { %v13209_v8 = vld [vmem:[#allocation7 + $0x1e98] sm:$0xf]  ;;  %v12954_v46 = vor.u32 %v14550_v32, %v12953_v29  ;;  %8335 = vmatpush.bf16.msrb.mxu0 %v12410_v10  ;;  %v13738_v29 = vld [vmem:[#allocation7 + $0x35c] sm:$0xf] }
 0x652   :  { %v14614_v22 = vld [vmem:[#allocation7 + $0x1eb4] sm:$0xf0]  ;;  %v9723_v32 = vld [vmem:[#allocation7 + $0x378] sm:$0xf0] }
 0x653   :  { %v12633_v26 = vld [vmem:[#allocation7 + $0x1a18] sm:$0xf]  ;;  %v13210_v49 = vor.u32 %v14614_v22, %v13209_v8  ;;  %8360 = vmatpush.bf16.msrb.mxu2 %v12954_v46  ;;  %v9502_v8 = vor.u32 %v13682_v35, %v9499_v39  ;;  %v8106_v22 = vpop.f32.mrf.mxu2  ;;  %v13674_v10 = vld [vmem:[#allocation7 + $0x15c] sm:$0xf]  ;;  %v10302_v46 = vor.u32 %v13882_v33, %v10299_v7  ;;  %v9438_v35 = vor.u32 %v13666_v42, %v9435_v44  ;;  %v8130_v33 = vpop.f32.mrf.mxu0 }
 0x654   :  { %v14470_v51 = vld [vmem:[#allocation7 + $0x1a34] sm:$0xf0]  ;;  %v13866_v50 = vld [vmem:[#allocation7 + $0x75c] sm:$0xf] }
 0x655   :  { %v12377_v13 = vld [vmem:[#allocation7 + $0x1818] sm:$0xf]  ;;  %v12634_v31 = vor.u32 %v14470_v51, %v12633_v26  ;;  %8373 = vmatpush.bf16.msrb.mxu3 %v13210_v49  ;;  %v10046_v51 = vor.u32 %v13818_v56, %v10043_v4  ;;  %v10267_v49 = vld [vmem:[#allocation7 + $0x7b8] sm:$0xf0] }
 0x656   :  { %v14406_v12 = vld [vmem:[#allocation7 + $0x1834] sm:$0xf0]  ;;  %v10235_v62 = vld [vmem:[#allocation7 + $0x778] sm:$0xf0] }
 0x657   :  { %v12921_v17 = vld [vmem:[#allocation7 + $0x1c58] sm:$0xf]  ;;  %v12378_v48 = vor.u32 %v14406_v12, %v12377_v13  ;;  %8349 = vmatpush.bf16.msrb.mxu1 %v12634_v31  ;;  %v9726_v13 = vor.u32 %v13738_v29, %v9723_v32  ;;  %v13810_v12 = vld [vmem:[#allocation7 + $0x59c] sm:$0xf] }
 0x658   :  { %v14542_v41 = vld [vmem:[#allocation7 + $0x1c74] sm:$0xf0]  ;;  %v13730_v31 = vld [vmem:[#allocation7 + $0x31c] sm:$0xf] }
 0x659   :  { %v13177_v37 = vld [vmem:[#allocation7 + $0x1e58] sm:$0xf]  ;;  %v12922_v9 = vor.u32 %v14542_v41, %v12921_v17  ;;  %8336 = vmatpush.bf16.msrb.mxu0 %v12378_v48  ;;  %v9470_v17 = vor.u32 %v13674_v10, %v9467_v28  ;;  %v10014_v41 = vor.u32 %v13810_v12, %v10011_v59  ;;  %v9979_v48 = vld [vmem:[#allocation7 + $0x578] sm:$0xf0] }
 0x65a   :  { %v14606_v45 = vld [vmem:[#allocation7 + $0x1e74] sm:$0xf0]  ;;  %8350 = vmatmul.bf16.vlgmr.msrb.gmra.mxu1 %v15089_v53  ;;  %v9947_v56 = vld [vmem:[#allocation7 + $0x538] sm:$0xf0] }
 0x65b   :  { %v12889_v18 = vld [vmem:[#allocation7 + $0x1c18] sm:$0xf]  ;;  %v13178_v0 = vor.u32 %v14606_v45, %v13177_v37  ;;  %8394 = vmatpush.bf16.msra.mxu1 %v9790_v30  ;;  %8361 = vmatpush.bf16.msrb.mxu2 %v12922_v9  ;;  %v10270_v30 = vor.u32 %v13874_v14, %v10267_v49  ;;  %v9694_v37 = vor.u32 %v13730_v31, %v9691_v36  ;;  %v13802_v45 = vld [vmem:[#allocation7 + $0x55c] sm:$0xf] }
 0x65c   :  { %v14534_v55 = vld [vmem:[#allocation7 + $0x1c34] sm:$0xf0]  ;;  %8337 = vmatmul.bf16.vlgmr.msrb.gmra.mxu0 %v15087_v52  ;;  %v9659_v9 = vld [vmem:[#allocation7 + $0x2f8] sm:$0xf0]  ;;  %v9982_v39 = vor.u32 %v13802_v45, %v9979_v48  ;;  %v8132_v48 = vpop.f32.mrf.mxu0 }
 0x65d   :  { %v13145_v2 = vld [vmem:[#allocation7 + $0x1e18] sm:$0xf]  ;;  %8381 = vmatpush.bf16.msra.mxu0 %v9534_v47  ;;  %v12890_v15 = vor.u32 %v14534_v55, %v12889_v18  ;;  %8374 = vmatpush.bf16.msrb.mxu3 %v13178_v0  ;;  %v13722_v47 = vld [vmem:[#allocation7 + $0x2dc] sm:$0xf]  ;;  %v8143_v55 = vpop.f32.mrf.mxu1 }
 0x65e   :  { %v14598_v11 = vld [vmem:[#allocation7 + $0x1e34] sm:$0xf0]  ;;  %v13658_v18 = vld [vmem:[#allocation7 + $0xdc] sm:$0xf] }
 0x65f   :  { %v13146_v26 = vor.u32 %v14598_v11, %v13145_v2  ;;  %8395 = vmatpush.bf16.msra.mxu1 %v9758_v57  ;;  %8362 = vmatpush.bf16.msrb.mxu2 %v12890_v15  ;;  %v9403_v0 = vld [vmem:[#allocation7 + $0xf8] sm:$0xf0]  ;;  %v10238_v2 = vor.u32 %v13866_v50, %v10235_v62  ;;  %v9662_v11 = vor.u32 %v13722_v47, %v9659_v9 }
 0x660   :  { %v13794_v57 = vld [vmem:[#allocation7 + $0x51c] sm:$0xf]  ;;  %v9406_v15 = vor.u32 %v13658_v18, %v9403_v0 }
 0x661   :  { %8382 = vmatpush.bf16.msra.mxu0 %v9502_v8  ;;  %8375 = vmatpush.bf16.msrb.mxu3 %v13146_v26  ;;  %v13858_v4 = vld [vmem:[#allocation7 + $0x71c] sm:$0xf]  ;;  %v8131_v8 = vadd.f32 %v8130_v33, %v15250_v63  ;;  %v9950_v22 = vor.u32 %v13794_v57, %v9947_v56 }
 0x662   :  { %8363 = vmatmul.bf16.vlgmr.msrb.gmra.mxu2 %v15093_v19  ;;  %v10203_v7 = vld [vmem:[#allocation7 + $0x738] sm:$0xf0] }
 0x663   :  { %8407 = vmatpush.bf16.msra.mxu2 %v10046_v51  ;;  %8396 = vmatpush.bf16.msra.mxu1 %v9726_v13  ;;  %v13714_v29 = vld [vmem:[#allocation7 + $0x29c] sm:$0xf]  ;;  %v8144_v10 = vadd.f32 %v8143_v55, %v8131_v8  ;;  %v10206_v28 = vor.u32 %v13858_v4, %v10203_v7 }
 0x664   :  { %8376 = vmatmul.bf16.vlgmr.msrb.gmra.mxu3 %v15095_v27  ;;  %v9627_v32 = vld [vmem:[#allocation7 + $0x2b8] sm:$0xf0] }
 0x665   :  { %8420 = vmatpush.bf16.msra.mxu3 %v10302_v46  ;;  %8383 = vmatpush.bf16.msra.mxu0 %v9470_v17  ;;  %v13650_v26 = vld [vmem:[#allocation7 + $0x9c] sm:$0xf]  ;;  %v9630_v16 = vor.u32 %v13714_v29, %v9627_v32  ;;  %v8169_v32 = vpop.f32.mrf.mxu3 }
 0x666   :  { %v9371_v51 = vld [vmem:[#allocation7 + $0xb8] sm:$0xf0] }
 0x667   :  { %8408 = vmatpush.bf16.msra.mxu2 %v10014_v41  ;;  %8397 = vmatpush.bf16.msra.mxu1 %v9694_v37  ;;  %v13786_v46 = vld [vmem:[#allocation7 + $0x4dc] sm:$0xf]  ;;  %v9374_v31 = vor.u32 %v13650_v26, %v9371_v51  ;;  %v8145_v41 = vpop.f32.mrf.mxu1 }
 0x668   :  { %v9915_v13 = vld [vmem:[#allocation7 + $0x4f8] sm:$0xf0] }
 0x669   :  { %8421 = vmatpush.bf16.msra.mxu3 %v10270_v30  ;;  %8384 = vmatpush.bf16.msra.mxu0 %v9438_v35  ;;  %v13850_v12 = vld [vmem:[#allocation7 + $0x6dc] sm:$0xf]  ;;  %v9918_v63 = vor.u32 %v13786_v46, %v9915_v13 }
 0x66a   :  { %v10171_v59 = vld [vmem:[#allocation7 + $0x6f8] sm:$0xf0] }
 0x66b   :  { %8409 = vmatpush.bf16.msra.mxu2 %v9982_v39  ;;  %8398 = vmatpush.bf16.msra.mxu1 %v9662_v11  ;;  %v13706_v14 = vld [vmem:[#allocation7 + $0x25c] sm:$0xf]  ;;  %v10174_v42 = vor.u32 %v13850_v12, %v10171_v59  ;;  %v8156_v11 = vpop.f32.mrf.mxu2 }
 0x66c   :  { %v9595_v49 = vld [vmem:[#allocation7 + $0x278] sm:$0xf0]  ;;  %v8157_v29 = vadd.f32 %v8156_v11, %v8144_v10 }
 0x66d   :  { %8422 = vmatpush.bf16.msra.mxu3 %v10238_v2  ;;  %8385 = vmatpush.bf16.msra.mxu0 %v9406_v15  ;;  %v13642_v36 = vld [vmem:[#allocation7 + $0x5c] sm:$0xf]  ;;  %v9598_v44 = vor.u32 %v13706_v14, %v9595_v49 }
 0x66e   :  { %v9339_v17 = vld [vmem:[#allocation7 + $0x78] sm:$0xf0] }
 0x66f   :  { %8410 = vmatpush.bf16.msra.mxu2 %v9950_v22  ;;  %8399 = vmatpush.bf16.msra.mxu1 %v9630_v16  ;;  %v13778_v30 = vld [vmem:[#allocation7 + $0x49c] sm:$0xf]  ;;  %v9342_v9 = vor.u32 %v13642_v36, %v9339_v17  ;;  %v15257_v16 = vadd.f32 %v8169_v32, %v8157_v29 }
 0x670   :  { %v9883_v37 = vld [vmem:[#allocation7 + $0x4b8] sm:$0xf0] }
 0x671   :  { %8423 = vmatpush.bf16.msra.mxu3 %v10206_v28  ;;  %v13842_v45 = vld [vmem:[#allocation7 + $0x69c] sm:$0xf]  ;;  %8386 = vmatpush.bf16.msra.mxu0 %v9374_v31  ;;  %v9886_v18 = vor.u32 %v13778_v30, %v9883_v37 }
 0x672   :  { %v10139_v50 = vld [vmem:[#allocation7 + $0x6b8] sm:$0xf0] }
 0x673   :  { %v13698_v62 = vld [vmem:[#allocation7 + $0x21c] sm:$0xf]  ;;  %8411 = vmatpush.bf16.msra.mxu2 %v9918_v63  ;;  %8400 = vmatpush.bf16.msra.mxu1 %v9598_v44  ;;  %v10142_v57 = vor.u32 %v13842_v45, %v10139_v50  ;;  %v8158_v50 = vpop.f32.mrf.mxu2 }
 0x674   :  { %v9563_v47 = vld [vmem:[#allocation7 + $0x238] sm:$0xf0] }
 0x675   :  { %v14010_v35 = vld [vmem:[#allocation7 + $0xbdc] sm:$0xf]  ;;  %8424 = vmatpush.bf16.msra.mxu3 %v10174_v42  ;;  %v9566_v56 = vor.u32 %v13698_v62, %v9563_v47  ;;  %8387 = vmatpush.bf16.msra.mxu0 %v9342_v9 }
 0x676   :  { %v10811_v39 = vld [vmem:[#allocation7 + $0xbf8] sm:$0xf0] }
 0x677   :  { %v13634_v0 = vld [vmem:[#allocation7 + $0x1c] sm:$0xf]  ;;  %v10814_v8 = vor.u32 %v14010_v35, %v10811_v39  ;;  %8412 = vmatpush.bf16.msra.mxu2 %v9886_v18  ;;  %8401 = vmatpush.bf16.msra.mxu1 %v9566_v56  ;;  %v8171_v39 = vpop.f32.mrf.mxu3 }
 0x678   :  { %v9307_v55 = vld [vmem:[#allocation7 + $0x38] sm:$0xf0] }
 0x679   :  { %v13946_v2 = vld [vmem:[#allocation7 + $0x9dc] sm:$0xf]  ;;  %v9310_v26 = vor.u32 %v13634_v0, %v9307_v55  ;;  %8425 = vmatpush.bf16.msra.mxu3 %v10142_v57 }
 0x67a   :  { %v10555_v4 = vld [vmem:[#allocation7 + $0x9f8] sm:$0xf0]  ;;  %8402 = vmatmul.bf16.vlgmr.msra.gmra.mxu1 %v15053_v24 }
 0x67b   :  { %v13770_v33 = vld [vmem:[#allocation7 + $0x45c] sm:$0xf]  ;;  %v10558_v46 = vor.u32 %v13946_v2, %v10555_v4  ;;  %8446 = vmatpush.bf16.msrb.mxu1 %v10814_v8  ;;  %8388 = vmatpush.bf16.msra.mxu0 %v9310_v26 }
 0x67c   :  { %v9851_v7 = vld [vmem:[#allocation7 + $0x478] sm:$0xf0] }
 0x67d   :  { %v13834_v15 = vld [vmem:[#allocation7 + $0x65c] sm:$0xf]  ;;  %v9854_v13 = vor.u32 %v13770_v33, %v9851_v7 }
 0x67e   :  { %v10107_v22 = vld [vmem:[#allocation7 + $0x678] sm:$0xf0]  ;;  %8389 = vmatmul.bf16.vlgmr.msra.gmra.mxu0 %v15051_v23 }
 0x67f   :  { %v14002_v51 = vld [vmem:[#allocation7 + $0xb9c] sm:$0xf]  ;;  %v10110_v49 = vor.u32 %v13834_v15, %v10107_v22  ;;  %8433 = vmatpush.bf16.msrb.mxu0 %v10558_v46  ;;  %8413 = vmatpush.bf16.msra.mxu2 %v9854_v13  ;;  %v15263_v46 = vld [vmem:[#allocation8] sm:$0xff] }
 0x680   :  { %v10779_v28 = vld [vmem:[#allocation7 + $0xbb8] sm:$0xf0]  ;;  %v1739_v13 = vperm.slane %v15263_v46, 6 }
 0x681   :  { %v13938_v12 = vld [vmem:[#allocation7 + $0x99c] sm:$0xf]  ;;  %v10782_v36 = vor.u32 %v14002_v51, %v10779_v28  ;;  %8426 = vmatpush.bf16.msra.mxu3 %v10110_v49 }
 0x682   :  { %v10523_v59 = vld [vmem:[#allocation7 + $0x9b8] sm:$0xf0] }
 0x683   :  { %v13762_v14 = vld [vmem:[#allocation7 + $0x41c] sm:$0xf]  ;;  %v10526_v45 = vor.u32 %v13938_v12, %v10523_v59  ;;  %8447 = vmatpush.bf16.msrb.mxu1 %v10782_v36 }
 0x684   :  { %v9819_v10 = vld [vmem:[#allocation7 + $0x438] sm:$0xf0] }
 0x685   :  { %v13826_v31 = vld [vmem:[#allocation7 + $0x61c] sm:$0xf]  ;;  %v9822_v48 = vor.u32 %v13762_v14, %v9819_v10  ;;  %8434 = vmatpush.bf16.msrb.mxu0 %v10526_v45  ;;  %v8195_v10 = vpop.f32.mrf.mxu1 }
 0x686   :  { %v10075_v63 = vld [vmem:[#allocation7 + $0x638] sm:$0xf0] }
 0x687   :  { %v14074_v17 = vld [vmem:[#allocation7 + $0xddc] sm:$0xf]  ;;  %v10078_v62 = vor.u32 %v13826_v31, %v10075_v63  ;;  %8414 = vmatpush.bf16.msra.mxu2 %v9822_v48 }
 0x688   :  { %v11067_v41 = vld [vmem:[#allocation7 + $0xdf8] sm:$0xf0] }
 0x689   :  { %v14138_v42 = vld [vmem:[#allocation7 + $0xfdc] sm:$0xf]  ;;  %v11070_v47 = vor.u32 %v14074_v17, %v11067_v41  ;;  %8427 = vmatpush.bf16.msra.mxu3 %v10078_v62  ;;  %v8182_v41 = vpop.f32.mrf.mxu0 }
 0x68a   :  { %v11323_v44 = vld [vmem:[#allocation7 + $0xff8] sm:$0xf0]  ;;  %8415 = vmatmul.bf16.vlgmr.msra.gmra.mxu2 %v15057_v60 }
 0x68b   :  { %v13994_v30 = vld [vmem:[#allocation7 + $0xb5c] sm:$0xf]  ;;  %v11326_v18 = vor.u32 %v14138_v42, %v11323_v44  ;;  %8459 = vmatpush.bf16.msrb.mxu2 %v11070_v47 }
 0x68c   :  { %v10747_v37 = vld [vmem:[#allocation7 + $0xb78] sm:$0xf0]  ;;  %8428 = vmatmul.bf16.vlgmr.msra.gmra.mxu3 %v15059_v61 }
 0x68d   :  { %v13930_v9 = vld [vmem:[#allocation7 + $0x95c] sm:$0xf]  ;;  %v10750_v0 = vor.u32 %v13994_v30, %v10747_v37  ;;  %8472 = vmatpush.bf16.msrb.mxu3 %v11326_v18  ;;  %v8183_v30 = vadd.f32 %v8182_v41, %v1739_v13 }
 0x68e   :  { %v10491_v35 = vld [vmem:[#allocation7 + $0x978] sm:$0xf0] }
 0x68f   :  { %v14066_v55 = vld [vmem:[#allocation7 + $0xd9c] sm:$0xf]  ;;  %v10494_v33 = vor.u32 %v13930_v9, %v10491_v35  ;;  %8448 = vmatpush.bf16.msrb.mxu1 %v10750_v0  ;;  %v8196_v62 = vadd.f32 %v8195_v10, %v8183_v30  ;;  %v8208_v10 = vpop.f32.mrf.mxu2 }
 0x690   :  { %v11035_v2 = vld [vmem:[#allocation7 + $0xdb8] sm:$0xf0] }
 0x691   :  { %v14130_v11 = vld [vmem:[#allocation7 + $0xf9c] sm:$0xf]  ;;  %v11038_v24 = vor.u32 %v14066_v55, %v11035_v2  ;;  %8435 = vmatpush.bf16.msrb.mxu0 %v10494_v33  ;;  %v8197_v33 = vpop.f32.mrf.mxu1  ;;  %v8209_v41 = vadd.f32 %v8208_v10, %v8196_v62 }
 0x692   :  { %v11291_v57 = vld [vmem:[#allocation7 + $0xfb8] sm:$0xf0] }
 0x693   :  { %v13986_v56 = vld [vmem:[#allocation7 + $0xb1c] sm:$0xf]  ;;  %v11294_v23 = vor.u32 %v14130_v11, %v11291_v57  ;;  %8460 = vmatpush.bf16.msrb.mxu2 %v11038_v24 }
 0x694   :  { %v10715_v4 = vld [vmem:[#allocation7 + $0xb38] sm:$0xf0] }
 0x695   :  { %v13922_v7 = vld [vmem:[#allocation7 + $0x91c] sm:$0xf]  ;;  %v10718_v32 = vor.u32 %v13986_v56, %v10715_v4  ;;  %8473 = vmatpush.bf16.msrb.mxu3 %v11294_v23 }
 0x696   :  { %v10459_v29 = vld [vmem:[#allocation7 + $0x938] sm:$0xf0] }
 0x697   :  { %v14058_v8 = vld [vmem:[#allocation7 + $0xd5c] sm:$0xf]  ;;  %v10462_v12 = vor.u32 %v13922_v7, %v10459_v29  ;;  %8449 = vmatpush.bf16.msrb.mxu1 %v10718_v32 }
 0x698   :  { %v11003_v15 = vld [vmem:[#allocation7 + $0xd78] sm:$0xf0] }
 0x699   :  { %v14122_v22 = vld [vmem:[#allocation7 + $0xf5c] sm:$0xf]  ;;  %v11006_v59 = vor.u32 %v14058_v8, %v11003_v15  ;;  %8436 = vmatpush.bf16.msrb.mxu0 %v10462_v12  ;;  %v8184_v8 = vpop.f32.mrf.mxu0 }
 0x69a   :  { %v11259_v26 = vld [vmem:[#allocation7 + $0xf78] sm:$0xf0] }
 0x69b   :  { %v13978_v51 = vld [vmem:[#allocation7 + $0xadc] sm:$0xf]  ;;  %v11262_v31 = vor.u32 %v14122_v22, %v11259_v26  ;;  %8461 = vmatpush.bf16.msrb.mxu2 %v11006_v59 }
 0x69c   :  { %v10683_v28 = vld [vmem:[#allocation7 + $0xaf8] sm:$0xf0] }
 0x69d   :  { %v13914_v14 = vld [vmem:[#allocation7 + $0x8dc] sm:$0xf]  ;;  %v10686_v60 = vor.u32 %v13978_v51, %v10683_v28  ;;  %8474 = vmatpush.bf16.msrb.mxu3 %v11262_v31 }
 0x69e   :  { %v10427_v49 = vld [vmem:[#allocation7 + $0x8f8] sm:$0xf0] }
 0x69f   :  { %v14050_v63 = vld [vmem:[#allocation7 + $0xd1c] sm:$0xf]  ;;  %v10430_v37 = vor.u32 %v13914_v14, %v10427_v49  ;;  %8450 = vmatpush.bf16.msrb.mxu1 %v10686_v60 }
 0x6a0   :  { %v10971_v36 = vld [vmem:[#allocation7 + $0xd38] sm:$0xf0] }
 0x6a1   :  { %v14114_v17 = vld [vmem:[#allocation7 + $0xf1c] sm:$0xf]  ;;  %v10974_v45 = vor.u32 %v14050_v63, %v10971_v36  ;;  %8437 = vmatpush.bf16.msrb.mxu0 %v10430_v37 }
 0x6a2   :  { %v11227_v61 = vld [vmem:[#allocation7 + $0xf38] sm:$0xf0] }
 0x6a3   :  { %v13970_v42 = vld [vmem:[#allocation7 + $0xa9c] sm:$0xf]  ;;  %v11230_v47 = vor.u32 %v14114_v17, %v11227_v61  ;;  %8462 = vmatpush.bf16.msrb.mxu2 %v10974_v45  ;;  %v8221_v61 = vpop.f32.mrf.mxu3 }
 0x6a4   :  { %v10651_v44 = vld [vmem:[#allocation7 + $0xab8] sm:$0xf0] }
 0x6a5   :  { %v13906_v48 = vld [vmem:[#allocation7 + $0x89c] sm:$0xf]  ;;  %v10654_v9 = vor.u32 %v13970_v42, %v10651_v44  ;;  %8475 = vmatpush.bf16.msrb.mxu3 %v11230_v47 }
 0x6a6   :  { %v10395_v50 = vld [vmem:[#allocation7 + $0x8b8] sm:$0xf0] }
 0x6a7   :  { %v14042_v35 = vld [vmem:[#allocation7 + $0xcdc] sm:$0xf]  ;;  %v10398_v11 = vor.u32 %v13906_v48, %v10395_v50  ;;  %8451 = vmatpush.bf16.msrb.mxu1 %v10654_v9  ;;  %v15266_v50 = vadd.f32 %v8221_v61, %v8209_v41 }
 0x6a8   :  { %v10939_v39 = vld [vmem:[#allocation7 + $0xcf8] sm:$0xf0] }
 0x6a9   :  { %v14106_v18 = vld [vmem:[#allocation7 + $0xedc] sm:$0xf]  ;;  %v10942_v57 = vor.u32 %v14042_v35, %v10939_v39  ;;  %8438 = vmatpush.bf16.msrb.mxu0 %v10398_v11 }
 0x6aa   :  { %v11195_v0 = vld [vmem:[#allocation7 + $0xef8] sm:$0xf0] }
 0x6ab   :  { %v13962_v55 = vld [vmem:[#allocation7 + $0xa5c] sm:$0xf]  ;;  %v11198_v24 = vor.u32 %v14106_v18, %v11195_v0  ;;  %8463 = vmatpush.bf16.msrb.mxu2 %v10942_v57 }
 0x6ac   :  { %v10619_v2 = vld [vmem:[#allocation7 + $0xa78] sm:$0xf0] }
 0x6ad   :  { %v13898_v56 = vld [vmem:[#allocation7 + $0x85c] sm:$0xf]  ;;  %v10622_v7 = vor.u32 %v13962_v55, %v10619_v2  ;;  %8476 = vmatpush.bf16.msrb.mxu3 %v11198_v24 }
 0x6ae   :  { %v10363_v4 = vld [vmem:[#allocation7 + $0x878] sm:$0xf0] }
 0x6af   :  { %v14034_v29 = vld [vmem:[#allocation7 + $0xc9c] sm:$0xf]  ;;  %v10366_v51 = vor.u32 %v13898_v56, %v10363_v4  ;;  %8452 = vmatpush.bf16.msrb.mxu1 %v10622_v7 }
 0x6b0   :  { %v10907_v23 = vld [vmem:[#allocation7 + $0xcb8] sm:$0xf0] }
 0x6b1   :  { %v14098_v32 = vld [vmem:[#allocation7 + $0xe9c] sm:$0xf]  ;;  %v10910_v12 = vor.u32 %v14034_v29, %v10907_v23  ;;  %8439 = vmatpush.bf16.msrb.mxu0 %v10366_v51  ;;  %v8223_v51 = vpop.f32.mrf.mxu3 }
 0x6b2   :  { %v11163_v15 = vld [vmem:[#allocation7 + $0xeb8] sm:$0xf0] }
 0x6b3   :  { %v13954_v22 = vld [vmem:[#allocation7 + $0xa1c] sm:$0xf]  ;;  %v11166_v31 = vor.u32 %v14098_v32, %v11163_v15  ;;  %8464 = vmatpush.bf16.msrb.mxu2 %v10910_v12  ;;  %v8210_v32 = vpop.f32.mrf.mxu2 }
 0x6b4   :  { %v10587_v26 = vld [vmem:[#allocation7 + $0xa38] sm:$0xf0] }
 0x6b5   :  { %v14266_v28 = vld [vmem:[#allocation7 + $0x13dc] sm:$0xf]  ;;  %v10590_v60 = vor.u32 %v13954_v22, %v10587_v26  ;;  %8477 = vmatpush.bf16.msrb.mxu3 %v11166_v31 }
 0x6b6   :  { %v11835_v13 = vld [vmem:[#allocation7 + $0x13f8] sm:$0xf0] }
 0x6b7   :  { %v13890_v59 = vld [vmem:[#allocation7 + $0x81c] sm:$0xf]  ;;  %v11838_v42 = vor.u32 %v14266_v28, %v11835_v13  ;;  %8453 = vmatpush.bf16.msrb.mxu1 %v10590_v60 }
 0x6b8   :  { %v10331_v14 = vld [vmem:[#allocation7 + $0x838] sm:$0xf0] }
 0x6b9   :  { %v14202_v49 = vld [vmem:[#allocation7 + $0x11dc] sm:$0xf]  ;;  %v10334_v37 = vor.u32 %v13890_v59, %v10331_v14 }
 0x6ba   :  { %v11579_v63 = vld [vmem:[#allocation7 + $0x11f8] sm:$0xf0]  ;;  %8454 = vmatmul.bf16.vlgmr.msrb.gmra.mxu1 %v15065_v40 }
 0x6bb   :  { %v14026_v36 = vld [vmem:[#allocation7 + $0xc5c] sm:$0xf]  ;;  %v11582_v47 = vor.u32 %v14202_v49, %v11579_v63  ;;  %8498 = vmatpush.bf16.msra.mxu1 %v11838_v42  ;;  %8440 = vmatpush.bf16.msrb.mxu0 %v10334_v37 }
 0x6bc   :  { %v10875_v17 = vld [vmem:[#allocation7 + $0xc78] sm:$0xf0] }
 0x6bd   :  { %v14090_v44 = vld [vmem:[#allocation7 + $0xe5c] sm:$0xf]  ;;  %v10878_v9 = vor.u32 %v14026_v36, %v10875_v17 }
 0x6be   :  { %v11131_v30 = vld [vmem:[#allocation7 + $0xe78] sm:$0xf0]  ;;  %8441 = vmatmul.bf16.vlgmr.msrb.gmra.mxu0 %v15063_v34 }
 0x6bf   :  { %v14258_v45 = vld [vmem:[#allocation7 + $0x139c] sm:$0xf]  ;;  %v11134_v0 = vor.u32 %v14090_v44, %v11131_v30  ;;  %8485 = vmatpush.bf16.msra.mxu0 %v11582_v47  ;;  %8465 = vmatpush.bf16.msrb.mxu2 %v10878_v9 }
 0x6c0   :  { %v11803_v48 = vld [vmem:[#allocation7 + $0x13b8] sm:$0xf0] }
 0x6c1   :  { %v14194_v35 = vld [vmem:[#allocation7 + $0x119c] sm:$0xf]  ;;  %v11806_v11 = vor.u32 %v14258_v45, %v11803_v48  ;;  %8478 = vmatpush.bf16.msrb.mxu3 %v11134_v0 }
 0x6c2   :  { %v11547_v39 = vld [vmem:[#allocation7 + $0x11b8] sm:$0xf0] }
 0x6c3   :  { %v14018_v18 = vld [vmem:[#allocation7 + $0xc1c] sm:$0xf]  ;;  %v11550_v29 = vor.u32 %v14194_v35, %v11547_v39  ;;  %8499 = vmatpush.bf16.msra.mxu1 %v11806_v11  ;;  %v8247_v35 = vpop.f32.mrf.mxu1 }
 0x6c4   :  { %v10843_v62 = vld [vmem:[#allocation7 + $0xc38] sm:$0xf0] }
 0x6c5   :  { %v14082_v55 = vld [vmem:[#allocation7 + $0xe1c] sm:$0xf]  ;;  %v10846_v23 = vor.u32 %v14018_v18, %v10843_v62  ;;  %8486 = vmatpush.bf16.msra.mxu0 %v11550_v29 }
 0x6c6   :  { %v11099_v2 = vld [vmem:[#allocation7 + $0xe38] sm:$0xf0] }
 0x6c7   :  { %v14330_v57 = vld [vmem:[#allocation7 + $0x15dc] sm:$0xf]  ;;  %v11102_v8 = vor.u32 %v14082_v55, %v11099_v2  ;;  %8466 = vmatpush.bf16.msrb.mxu2 %v10846_v23 }
 0x6c8   :  { %v12091_v56 = vld [vmem:[#allocation7 + $0x15f8] sm:$0xf0] }
 0x6c9   :  { %v14394_v4 = vld [vmem:[#allocation7 + $0x17dc] sm:$0xf]  ;;  %v12094_v15 = vor.u32 %v14330_v57, %v12091_v56  ;;  %8479 = vmatpush.bf16.msrb.mxu3 %v11102_v8 }
 0x6ca   :  { %v12347_v33 = vld [vmem:[#allocation7 + $0x17f8] sm:$0xf0]  ;;  %8467 = vmatmul.bf16.vlgmr.msrb.gmra.mxu2 %v15069_v5  ;;  %v8234_v5 = vpop.f32.mrf.mxu0 }
 0x6cb   :  { %v14250_v24 = vld [vmem:[#allocation7 + $0x135c] sm:$0xf]  ;;  %v12350_v28 = vor.u32 %v14394_v4, %v12347_v33  ;;  %8511 = vmatpush.bf16.msra.mxu2 %v12094_v15 }
 0x6cc   :  { %v11771_v7 = vld [vmem:[#allocation7 + $0x1378] sm:$0xf0]  ;;  %8480 = vmatmul.bf16.vlgmr.msrb.gmra.mxu3 %v15071_v6  ;;  %v8235_v6 = vadd.f32 %v8234_v5, %v15266_v50 }
 0x6cd   :  { %v14186_v22 = vld [vmem:[#allocation7 + $0x115c] sm:$0xf]  ;;  %v11774_v13 = vor.u32 %v14250_v24, %v11771_v7  ;;  %8524 = vmatpush.bf16.msra.mxu3 %v12350_v28 }
 0x6ce   :  { %v11515_v26 = vld [vmem:[#allocation7 + $0x1178] sm:$0xf0]  ;;  %v8248_v7 = vadd.f32 %v8247_v35, %v8235_v6 }
 0x6cf   :  { %v14322_v12 = vld [vmem:[#allocation7 + $0x159c] sm:$0xf]  ;;  %v11518_v60 = vor.u32 %v14186_v22, %v11515_v26  ;;  %8500 = vmatpush.bf16.msra.mxu1 %v11774_v13 }
 0x6d0   :  { %v12059_v59 = vld [vmem:[#allocation7 + $0x15b8] sm:$0xf0] }
 0x6d1   :  { %v14386_v14 = vld [vmem:[#allocation7 + $0x179c] sm:$0xf]  ;;  %v12062_v40 = vor.u32 %v14322_v12, %v12059_v59  ;;  %8487 = vmatpush.bf16.msra.mxu0 %v11518_v60  ;;  %v8249_v59 = vpop.f32.mrf.mxu1 }
 0x6d2   :  { %v12315_v49 = vld [vmem:[#allocation7 + $0x17b8] sm:$0xf0] }
 0x6d3   :  { %v14242_v10 = vld [vmem:[#allocation7 + $0x131c] sm:$0xf]  ;;  %v12318_v34 = vor.u32 %v14386_v14, %v12315_v49  ;;  %8512 = vmatpush.bf16.msra.mxu2 %v12062_v40  ;;  %v8236_v40 = vpop.f32.mrf.mxu0 }
 0x6d4   :  { %v11739_v31 = vld [vmem:[#allocation7 + $0x1338] sm:$0xf0] }
 0x6d5   :  { %v14178_v63 = vld [vmem:[#allocation7 + $0x111c] sm:$0xf]  ;;  %v11742_v17 = vor.u32 %v14242_v10, %v11739_v31  ;;  %8525 = vmatpush.bf16.msra.mxu3 %v12318_v34 }
 0x6d6   :  { %v11483_v36 = vld [vmem:[#allocation7 + $0x1138] sm:$0xf0] }
 0x6d7   :  { %v14314_v41 = vld [vmem:[#allocation7 + $0x155c] sm:$0xf]  ;;  %v11486_v45 = vor.u32 %v14178_v63, %v11483_v36  ;;  %8501 = vmatpush.bf16.msra.mxu1 %v11742_v17 }
 0x6d8   :  { %v12027_v61 = vld [vmem:[#allocation7 + $0x1578] sm:$0xf0] }
 0x6d9   :  { %v14378_v42 = vld [vmem:[#allocation7 + $0x175c] sm:$0xf]  ;;  %v12030_v48 = vor.u32 %v14314_v41, %v12027_v61  ;;  %8488 = vmatpush.bf16.msra.mxu0 %v11486_v45  ;;  %v8260_v45 = vpop.f32.mrf.mxu2 }
 0x6da   :  { %v12283_v44 = vld [vmem:[#allocation7 + $0x1778] sm:$0xf0] }
 0x6db   :  { %v14234_v30 = vld [vmem:[#allocation7 + $0x12dc] sm:$0xf]  ;;  %v12286_v39 = vor.u32 %v14378_v42, %v12283_v44  ;;  %8513 = vmatpush.bf16.msra.mxu2 %v12030_v48 }
 0x6dc   :  { %v11707_v37 = vld [vmem:[#allocation7 + $0x12f8] sm:$0xf0] }
 0x6dd   :  { %v14170_v47 = vld [vmem:[#allocation7 + $0x10dc] sm:$0xf]  ;;  %v11710_v18 = vor.u32 %v14234_v30, %v11707_v37  ;;  %8526 = vmatpush.bf16.msra.mxu3 %v12286_v39 }
 0x6de   :  { %v11451_v9 = vld [vmem:[#allocation7 + $0x10f8] sm:$0xf0] }
 0x6df   :  { %v14306_v0 = vld [vmem:[#allocation7 + $0x151c] sm:$0xf]  ;;  %v11454_v56 = vor.u32 %v14170_v47, %v11451_v9  ;;  %8502 = vmatpush.bf16.msra.mxu1 %v11710_v18  ;;  %v8261_v18 = vadd.f32 %v8260_v45, %v8248_v7 }
 0x6e0   :  { %v11995_v62 = vld [vmem:[#allocation7 + $0x1538] sm:$0xf0] }
 0x6e1   :  { %v14370_v55 = vld [vmem:[#allocation7 + $0x171c] sm:$0xf]  ;;  %v11998_v4 = vor.u32 %v14306_v0, %v11995_v62  ;;  %8489 = vmatpush.bf16.msra.mxu0 %v11454_v56  ;;  %v8273_v0 = vpop.f32.mrf.mxu3 }
 0x6e2   :  { %v12251_v2 = vld [vmem:[#allocation7 + $0x1738] sm:$0xf0]  ;;  %v15273_v6 = vadd.f32 %v8273_v0, %v8261_v18 }
 0x6e3   :  { %v14226_v11 = vld [vmem:[#allocation7 + $0x129c] sm:$0xf]  ;;  %v12254_v29 = vor.u32 %v14370_v55, %v12251_v2  ;;  %8514 = vmatpush.bf16.msra.mxu2 %v11998_v4 }
 0x6e4   :  { %v11675_v57 = vld [vmem:[#allocation7 + $0x12b8] sm:$0xf0] }
 0x6e5   :  { %v14162_v33 = vld [vmem:[#allocation7 + $0x109c] sm:$0xf]  ;;  %v11678_v23 = vor.u32 %v14226_v11, %v11675_v57  ;;  %8527 = vmatpush.bf16.msra.mxu3 %v12254_v29 }
 0x6e6   :  { %v11419_v24 = vld [vmem:[#allocation7 + $0x10b8] sm:$0xf0] }
 0x6e7   :  { %v14298_v32 = vld [vmem:[#allocation7 + $0x14dc] sm:$0xf]  ;;  %v11422_v28 = vor.u32 %v14162_v33, %v11419_v24  ;;  %8503 = vmatpush.bf16.msra.mxu1 %v11678_v23 }
 0x6e8   :  { %v11963_v8 = vld [vmem:[#allocation7 + $0x14f8] sm:$0xf0] }
 0x6e9   :  { %v14362_v15 = vld [vmem:[#allocation7 + $0x16dc] sm:$0xf]  ;;  %v11966_v50 = vor.u32 %v14298_v32, %v11963_v8  ;;  %8490 = vmatpush.bf16.msra.mxu0 %v11422_v28  ;;  %v8275_v40 = vpop.f32.mrf.mxu3 }
 0x6ea   :  { %v12219_v22 = vld [vmem:[#allocation7 + $0x16f8] sm:$0xf0] }
 0x6eb   :  { %v14218_v26 = vld [vmem:[#allocation7 + $0x125c] sm:$0xf]  ;;  %v12222_v14 = vor.u32 %v14362_v15, %v12219_v22  ;;  %8515 = vmatpush.bf16.msra.mxu2 %v11966_v50 }
 0x6ec   :  { %v11643_v51 = vld [vmem:[#allocation7 + $0x1278] sm:$0xf0] }
 0x6ed   :  { %v14154_v13 = vld [vmem:[#allocation7 + $0x105c] sm:$0xf]  ;;  %v11646_v49 = vor.u32 %v14218_v26, %v11643_v51  ;;  %8528 = vmatpush.bf16.msra.mxu3 %v12222_v14  ;;  %v8262_v14 = vpop.f32.mrf.mxu2 }
 0x6ee   :  { %v11387_v12 = vld [vmem:[#allocation7 + $0x1078] sm:$0xf0] }
 0x6ef   :  { %v14290_v10 = vld [vmem:[#allocation7 + $0x149c] sm:$0xf]  ;;  %v11390_v17 = vor.u32 %v14154_v13, %v11387_v12  ;;  %8504 = vmatpush.bf16.msra.mxu1 %v11646_v49 }
 0x6f0   :  { %v11931_v31 = vld [vmem:[#allocation7 + $0x14b8] sm:$0xf0] }
 0x6f1   :  { %v14354_v60 = vld [vmem:[#allocation7 + $0x169c] sm:$0xf]  ;;  %v11934_v42 = vor.u32 %v14290_v10, %v11931_v31  ;;  %8491 = vmatpush.bf16.msra.mxu0 %v11390_v17 }
 0x6f2   :  { %v12187_v63 = vld [vmem:[#allocation7 + $0x16b8] sm:$0xf0] }
 0x6f3   :  { %v14210_v36 = vld [vmem:[#allocation7 + $0x121c] sm:$0xf]  ;;  %v12190_v48 = vor.u32 %v14354_v60, %v12187_v63  ;;  %8516 = vmatpush.bf16.msra.mxu2 %v11934_v42 }
 0x6f4   :  { %v11611_v34 = vld [vmem:[#allocation7 + $0x1238] sm:$0xf0] }
 0x6f5   :  { %v14522_v41 = vld [vmem:[#allocation7 + $0x1bdc] sm:$0xf]  ;;  %v11614_v47 = vor.u32 %v14210_v36, %v11611_v34  ;;  %8529 = vmatpush.bf16.msra.mxu3 %v12190_v48 }
 0x6f6   :  { %v12859_v61 = vld [vmem:[#allocation7 + $0x1bf8] sm:$0xf0] }
 0x6f7   :  { %v14146_v44 = vld [vmem:[#allocation7 + $0x101c] sm:$0xf]  ;;  %v12862_v62 = vor.u32 %v14522_v41, %v12859_v61  ;;  %8505 = vmatpush.bf16.msra.mxu1 %v11614_v47 }
 0x6f8   :  { %v11355_v30 = vld [vmem:[#allocation7 + $0x1038] sm:$0xf0] }
 0x6f9   :  { %v14458_v37 = vld [vmem:[#allocation7 + $0x19dc] sm:$0xf]  ;;  %v11358_v2 = vor.u32 %v14146_v44, %v11355_v30 }
 0x6fa   :  { %v12603_v9 = vld [vmem:[#allocation7 + $0x19f8] sm:$0xf0]  ;;  %8506 = vmatmul.bf16.vlgmr.msra.gmra.mxu1 %v15077_v1 }
 0x6fb   :  { %v14282_v35 = vld [vmem:[#allocation7 + $0x145c] sm:$0xf]  ;;  %v12606_v56 = vor.u32 %v14458_v37, %v12603_v9  ;;  %8550 = vmatpush.bf16.msrb.mxu1 %v12862_v62  ;;  %8492 = vmatpush.bf16.msra.mxu0 %v11358_v2 }
 0x6fc   :  { %v11899_v39 = vld [vmem:[#allocation7 + $0x1478] sm:$0xf0] }
 0x6fd   :  { %v14346_v55 = vld [vmem:[#allocation7 + $0x165c] sm:$0xf]  ;;  %v11902_v4 = vor.u32 %v14282_v35, %v11899_v39 }
 0x6fe   :  { %v12155_v5 = vld [vmem:[#allocation7 + $0x1678] sm:$0xf0]  ;;  %8493 = vmatmul.bf16.vlgmr.msra.gmra.mxu0 %v15075_v54 }
 0x6ff   :  { %v14514_v11 = vld [vmem:[#allocation7 + $0x1b9c] sm:$0xf]  ;;  %v12158_v23 = vor.u32 %v14346_v55, %v12155_v5  ;;  %8537 = vmatpush.bf16.msrb.mxu0 %v12606_v56  ;;  %8517 = vmatpush.bf16.msra.mxu2 %v11902_v4 }
 0x700   :  { %v12827_v57 = vld [vmem:[#allocation7 + $0x1bb8] sm:$0xf0] }
 0x701   :  { %v14450_v33 = vld [vmem:[#allocation7 + $0x199c] sm:$0xf]  ;;  %v12830_v15 = vor.u32 %v14514_v11, %v12827_v57  ;;  %8530 = vmatpush.bf16.msra.mxu3 %v12158_v23  ;;  %v8299_v11 = vpop.f32.mrf.mxu1 }
 0x702   :  { %v12571_v24 = vld [vmem:[#allocation7 + $0x19b8] sm:$0xf0] }
 0x703   :  { %v14274_v29 = vld [vmem:[#allocation7 + $0x141c] sm:$0xf]  ;;  %v12574_v12 = vor.u32 %v14450_v33, %v12571_v24  ;;  %8551 = vmatpush.bf16.msrb.mxu1 %v12830_v15 }
 0x704   :  { %v11867_v7 = vld [vmem:[#allocation7 + $0x1438] sm:$0xf0] }
 0x705   :  { %v14338_v32 = vld [vmem:[#allocation7 + $0x161c] sm:$0xf]  ;;  %v11870_v59 = vor.u32 %v14274_v29, %v11867_v7  ;;  %8538 = vmatpush.bf16.msrb.mxu0 %v12574_v12 }
 0x706   :  { %v12123_v8 = vld [vmem:[#allocation7 + $0x1638] sm:$0xf0] }
 0x707   :  { %v14586_v22 = vld [vmem:[#allocation7 + $0x1ddc] sm:$0xf]  ;;  %v12126_v49 = vor.u32 %v14338_v32, %v12123_v8  ;;  %8518 = vmatpush.bf16.msra.mxu2 %v11870_v59 }
 0x708   :  { %v13115_v26 = vld [vmem:[#allocation7 + $0x1df8] sm:$0xf0] }
 0x709   :  { %v14650_v51 = vld [vmem:[#allocation7 + $0x1fdc] sm:$0xf]  ;;  %v13118_v10 = vor.u32 %v14586_v22, %v13115_v26  ;;  %8531 = vmatpush.bf16.msra.mxu3 %v12126_v49  ;;  %v8301_v40 = vpop.f32.mrf.mxu1 }
 0x70a   :  { %v13371_v28 = vld [vmem:[#allocation7 + $0x1ff8] sm:$0xf0]  ;;  %8519 = vmatmul.bf16.vlgmr.msra.gmra.mxu2 %v15081_v20  ;;  %v8286_v20 = vpop.f32.mrf.mxu0 }
 0x70b   :  { %v14506_v50 = vld [vmem:[#allocation7 + $0x1b5c] sm:$0xf]  ;;  %v13374_v63 = vor.u32 %v14650_v51, %v13371_v28  ;;  %8563 = vmatpush.bf16.msrb.mxu2 %v13118_v10 }
 0x70c   :  { %v12795_v13 = vld [vmem:[#allocation7 + $0x1b78] sm:$0xf0]  ;;  %8532 = vmatmul.bf16.vlgmr.msra.gmra.mxu3 %v15083_v25  ;;  %v8287_v25 = vadd.f32 %v8286_v20, %v15273_v6 }
 0x70d   :  { %v14442_v31 = vld [vmem:[#allocation7 + $0x195c] sm:$0xf]  ;;  %v12798_v36 = vor.u32 %v14506_v50, %v12795_v13  ;;  %8576 = vmatpush.bf16.msrb.mxu3 %v13374_v63 }
 0x70e   :  { %v12539_v60 = vld [vmem:[#allocation7 + $0x1978] sm:$0xf0]  ;;  %v15280_v26 = vadd.f32 %v8299_v11, %v8287_v25 }
 0x70f   :  { %v14578_v34 = vld [vmem:[#allocation7 + $0x1d9c] sm:$0xf]  ;;  %v12542_v30 = vor.u32 %v14442_v31, %v12539_v60  ;;  %8552 = vmatpush.bf16.msrb.mxu1 %v12798_v36 }
 0x710   :  { %v13083_v17 = vld [vmem:[#allocation7 + $0x1db8] sm:$0xf0] }
 0x711   :  { %v14642_v41 = vld [vmem:[#allocation7 + $0x1f9c] sm:$0xf]  ;;  %v13086_v1 = vor.u32 %v14578_v34, %v13083_v17  ;;  %8539 = vmatpush.bf16.msrb.mxu0 %v12542_v30 }
 0x712   :  { %v13339_v61 = vld [vmem:[#allocation7 + $0x1fb8] sm:$0xf0] }
 0x713   :  { %v14498_v42 = vld [vmem:[#allocation7 + $0x1b1c] sm:$0xf]  ;;  %v13342_v54 = vor.u32 %v14642_v41, %v13339_v61  ;;  %8564 = vmatpush.bf16.msrb.mxu2 %v13086_v1  ;;  %v8288_v61 = vpop.f32.mrf.mxu0 }
 0x714   :  { %v12763_v44 = vld [vmem:[#allocation7 + $0x1b38] sm:$0xf0] }
 0x715   :  { %v14434_v37 = vld [vmem:[#allocation7 + $0x191c] sm:$0xf]  ;;  %v12766_v48 = vor.u32 %v14498_v42, %v12763_v44  ;;  %8577 = vmatpush.bf16.msrb.mxu3 %v13342_v54 }
 0x716   :  { %v12507_v45 = vld [vmem:[#allocation7 + $0x1938] sm:$0xf0] }
 0x717   :  { %v14570_v47 = vld [vmem:[#allocation7 + $0x1d5c] sm:$0xf]  ;;  %v12510_v62 = vor.u32 %v14434_v37, %v12507_v45  ;;  %8553 = vmatpush.bf16.msrb.mxu1 %v12766_v48  ;;  %v15282_v48 = vpop.f32.mrf.mxu2 }
 0x718   :  { %v13051_v9 = vld [vmem:[#allocation7 + $0x1d78] sm:$0xf0] }
 0x719   :  { %v14634_v35 = vld [vmem:[#allocation7 + $0x1f5c] sm:$0xf]  ;;  %v13054_v55 = vor.u32 %v14570_v47, %v13051_v9  ;;  %8540 = vmatpush.bf16.msrb.mxu0 %v12510_v62 }
 0x71a   :  { %v13307_v39 = vld [vmem:[#allocation7 + $0x1f78] sm:$0xf0] }
 0x71b   :  { %v14490_v18 = vld [vmem:[#allocation7 + $0x1adc] sm:$0xf]  ;;  %v13310_v57 = vor.u32 %v14634_v35, %v13307_v39  ;;  %8565 = vmatpush.bf16.msrb.mxu2 %v13054_v55 }
 0x71c   :  { %v12731_v0 = vld [vmem:[#allocation7 + $0x1af8] sm:$0xf0] }
 0x71d   :  { %v14426_v5 = vld [vmem:[#allocation7 + $0x18dc] sm:$0xf]  ;;  %v12734_v56 = vor.u32 %v14490_v18, %v12731_v0  ;;  %8578 = vmatpush.bf16.msrb.mxu3 %v13310_v57  ;;  %v15284_v18 = vpop.f32.mrf.mxu3  ;;  %v14670_v0 = vld [vmem:[#allocation10 + $0x78] sm:$0xff] }
 0x71e   :  { %v12475_v2 = vld [vmem:[#allocation7 + $0x18f8] sm:$0xf0] }
 0x71f   :  { %v14562_v4 = vld [vmem:[#allocation7 + $0x1d1c] sm:$0xf]  ;;  %v12478_v32 = vor.u32 %v14426_v5, %v12475_v2  ;;  %8554 = vmatpush.bf16.msrb.mxu1 %v12734_v56  ;;  %v14662_v2 = vld [vmem:[#allocation10 + $0x38] sm:$0xff] }
 0x720   :  { %v13019_v33 = vld [vmem:[#allocation7 + $0x1d38] sm:$0xf0] }
 0x721   :  { %v14626_v24 = vld [vmem:[#allocation7 + $0x1f1c] sm:$0xf]  ;;  %v13022_v8 = vor.u32 %v14562_v4, %v13019_v33  ;;  %8541 = vmatpush.bf16.msrb.mxu0 %v12478_v32  ;;  %v14678_v32 = vld [vmem:[#allocation10 + $0xb8] sm:$0xff] }
 0x722   :  { %v13275_v29 = vld [vmem:[#allocation7 + $0x1f38] sm:$0xf0] }
 0x723   :  { %v14482_v23 = vld [vmem:[#allocation7 + $0x1a9c] sm:$0xf]  ;;  %v13278_v51 = vor.u32 %v14626_v24, %v13275_v29  ;;  %8566 = vmatpush.bf16.msrb.mxu2 %v13022_v8 }
 0x724   :  { %v12699_v7 = vld [vmem:[#allocation7 + $0x1ab8] sm:$0xf0] }
 0x725   :  { %v14418_v15 = vld [vmem:[#allocation7 + $0x189c] sm:$0xf]  ;;  %v12702_v28 = vor.u32 %v14482_v23, %v12699_v7  ;;  %8579 = vmatpush.bf16.msrb.mxu3 %v13278_v51  ;;  %v8314_v7 = vpop.f32.mrf.mxu2  ;;  %v8327_v8 = vpop.f32.mrf.mxu3  ;;  %v14660_v51 = vld [vmem:[#allocation10 + $0x28] sm:$0xff] }
 0x726   :  { %v12443_v22 = vld [vmem:[#allocation7 + $0x18b8] sm:$0xf0]  ;;  %v14708_v7 = vld [vmem:[#allocation10 + $0x1a8] sm:$0xff]  ;;  %v14698_v8 = vld [vmem:[#allocation10 + $0x158] sm:$0xff] }
 0x727   :  { %v14554_v50 = vld [vmem:[#allocation7 + $0x1cdc] sm:$0xf]  ;;  %v12446_v6 = vor.u32 %v14418_v15, %v12443_v22  ;;  %8555 = vmatpush.bf16.msrb.mxu1 %v12702_v28  ;;  %v14686_v15 = vld [vmem:[#allocation10 + $0xf8] sm:$0xff]  ;;  %v14668_v22 = vld [vmem:[#allocation10 + $0x68] sm:$0xff] }
 0x728   :  { %v12987_v13 = vld [vmem:[#allocation7 + $0x1cf8] sm:$0xf0] }
 0x729   :  { %v14618_v12 = vld [vmem:[#allocation7 + $0x1edc] sm:$0xf]  ;;  %v12990_v10 = vor.u32 %v14554_v50, %v12987_v13  ;;  %8542 = vmatpush.bf16.msrb.mxu0 %v12446_v6  ;;  %v14667_v13 = vld [vmem:[#allocation10 + $0x60] sm:$0xff]  ;;  %v14658_v6 = vld [vmem:[#allocation10 + $0x18] sm:$0xff] }
 0x72a   :  { %v13243_v59 = vld [vmem:[#allocation7 + $0x1ef8] sm:$0xf0] }
 0x72b   :  { %v14474_v14 = vld [vmem:[#allocation7 + $0x1a5c] sm:$0xf]  ;;  %v13246_v63 = vor.u32 %v14618_v12, %v13243_v59  ;;  %8567 = vmatpush.bf16.msrb.mxu2 %v12990_v10  ;;  %v15290_v12 = vpop.f32.mrf.mxu1  ;;  %v14684_v59 = vld [vmem:[#allocation10 + $0xe8] sm:$0xff]  ;;  %v14675_v10 = vld [vmem:[#allocation10 + $0xa0] sm:$0xff] }
 0x72c   :  { %v12667_v49 = vld [vmem:[#allocation7 + $0x1a78] sm:$0xf0] }
 0x72d   :  { %v14410_v31 = vld [vmem:[#allocation7 + $0x185c] sm:$0xf]  ;;  %v12670_v36 = vor.u32 %v14474_v14, %v12667_v49  ;;  %8580 = vmatpush.bf16.msrb.mxu3 %v13246_v63  ;;  %v14666_v14 = vld [vmem:[#allocation10 + $0x58] sm:$0xff]  ;;  %v15292_v49 = vpop.f32.mrf.mxu0  ;;  %v15294_v61 = vpop.f32.mrf.mxu2 }
 0x72e   :  { %v12411_v60 = vld [vmem:[#allocation7 + $0x1878] sm:$0xf0]  ;;  %v14682_v63 = vld [vmem:[#allocation10 + $0xd8] sm:$0xff] }
 0x72f   :  { %v14546_v34 = vld [vmem:[#allocation7 + $0x1c9c] sm:$0xf]  ;;  %v12414_v1 = vor.u32 %v14410_v31, %v12411_v60  ;;  %8556 = vmatpush.bf16.msrb.mxu1 %v12670_v36  ;;  %v14674_v60 = vld [vmem:[#allocation10 + $0x98] sm:$0xff]  ;;  %v14664_v36 = vld [vmem:[#allocation10 + $0x48] sm:$0xff] }
 0x730   :  { %v12955_v17 = vld [vmem:[#allocation7 + $0x1cb8] sm:$0xf0] }
 0x731   :  { %v14610_v41 = vld [vmem:[#allocation7 + $0x1e9c] sm:$0xf]  ;;  %v12958_v37 = vor.u32 %v14546_v34, %v12955_v17  ;;  %8543 = vmatpush.bf16.msrb.mxu0 %v12414_v1  ;;  %v14656_v17 = vld [vmem:[#allocation10 + $0x8] sm:$0xff]  ;;  %v14702_v1 = vld [vmem:[#allocation10 + $0x178] sm:$0xff] }
 0x732   :  { %v13211_v42 = vld [vmem:[#allocation7 + $0x1eb8] sm:$0xf0] }
 0x733   :  { %v14466_v44 = vld [vmem:[#allocation7 + $0x1a1c] sm:$0xf]  ;;  %v13214_v47 = vor.u32 %v14610_v41, %v13211_v42  ;;  %8568 = vmatpush.bf16.msrb.mxu2 %v12958_v37  ;;  %v8353_v40 = vpop.f32.mrf.mxu1  ;;  %v8590_v37 = vmax.f32 %v15149_v38, 0.0  ;;  %v8591_v38 = vmax.f32 %v15176_v43, 0.0  ;;  %v14699_v43 = vld [vmem:[#allocation10 + $0x160] sm:$0xff] }
 0x734   :  { %v12635_v30 = vld [vmem:[#allocation7 + $0x1a38] sm:$0xf0] }
 0x735   :  { %v14402_v45 = vld [vmem:[#allocation7 + $0x181c] sm:$0xf]  ;;  %v12638_v9 = vor.u32 %v14466_v44, %v12635_v30  ;;  %8581 = vmatpush.bf16.msrb.mxu3 %v13214_v47  ;;  %v8340_v34 = vpop.f32.mrf.mxu0  ;;  %v14663_v44 = vld [vmem:[#allocation10 + $0x40] sm:$0xff]  ;;  %v15296_v30 = vpop.f32.mrf.mxu3  ;;  %v14694_v47 = vld [vmem:[#allocation10 + $0x138] sm:$0xff] }
 0x736   :  { %v12379_v54 = vld [vmem:[#allocation7 + $0x1838] sm:$0xf0] }
 0x737   :  { %v14538_v35 = vld [vmem:[#allocation7 + $0x1c5c] sm:$0xf]  ;;  %v12382_v5 = vor.u32 %v14402_v45, %v12379_v54  ;;  %8557 = vmatpush.bf16.msrb.mxu1 %v12638_v9  ;;  %v14655_v45 = vld [vmem:[#allocation10] sm:$0xff]  ;;  %v8589_v54 = vmax.f32 %v15121_v58, 0.0  ;;  %v14672_v9 = vld [vmem:[#allocation10 + $0x88] sm:$0xff] }
 0x738   :  { %v12923_v39 = vld [vmem:[#allocation7 + $0x1c78] sm:$0xf0]  ;;  %v14679_v58 = vld [vmem:[#allocation10 + $0xc0] sm:$0xff] }
 0x739   :  { %v14602_v62 = vld [vmem:[#allocation7 + $0x1e5c] sm:$0xf]  ;;  %v12926_v11 = vor.u32 %v14538_v35, %v12923_v39  ;;  %8544 = vmatpush.bf16.msrb.mxu0 %v12382_v5  ;;  %v14680_v35 = vld [vmem:[#allocation10 + $0xc8] sm:$0xff]  ;;  %v14671_v5 = vld [vmem:[#allocation10 + $0x80] sm:$0xff] }
 0x73a   :  { %v13179_v55 = vld [vmem:[#allocation7 + $0x1e78] sm:$0xf0]  ;;  %8558 = vmatmul.bf16.vlgmr.msrb.gmra.mxu1 %v15089_v53  ;;  %v14659_v53 = vld [vmem:[#allocation10 + $0x20] sm:$0xff] }
 0x73b   :  { %v13182_v57 = vor.u32 %v14602_v62, %v13179_v55  ;;  %v14530_v56 = vld [vmem:[#allocation7 + $0x1c1c] sm:$0xf]  ;;  %9131 = vmatpush.bf16.msra.mxu1 %v14670_v0  ;;  %8569 = vmatpush.bf16.msrb.mxu2 %v12926_v11  ;;  %v8599_v0 = vpack.c.bf16 %v8590_v37, %v8590_v37  ;;  %v8598_v62 = vpack.c.bf16 %v8589_v54, %v8589_v54  ;;  %v14710_v11 = vld [vmem:[#allocation10 + $0x1b8] sm:$0xff] }
 0x73c   :  { %v12891_v4 = vld [vmem:[#allocation7 + $0x1c38] sm:$0xf0]  ;;  %8545 = vmatmul.bf16.vlgmr.msrb.gmra.mxu0 %v15087_v52  ;;  %v14676_v52 = vld [vmem:[#allocation10 + $0xa8] sm:$0xff] }
 0x73d   :  { %v14669_v33 = vld [vmem:[#allocation10 + $0x70] sm:$0xff]  ;;  %9118 = vmatpush.bf16.msra.mxu0 %v14662_v2  ;;  %v12894_v23 = vor.u32 %v14530_v56, %v12891_v4  ;;  %8582 = vmatpush.bf16.msrb.mxu3 %v13182_v57  ;;  %v8366_v2 = vpop.f32.mrf.mxu2  ;;  %v8592_v57 = vmax.f32 %v15203_v21, 0.0  ;;  %v8379_v56 = vpop.f32.mrf.mxu3  ;;  %v14700_v4 = vld [vmem:[#allocation10 + $0x168] sm:$0xff]  ;;  %v14691_v21 = vld [vmem:[#allocation10 + $0x120] sm:$0xff] }
 0x73e   :  { %v14594_v24 = vld [vmem:[#allocation7 + $0x1e1c] sm:$0xf] }
 0x73f   :  { %v13147_v20 = vld [vmem:[#allocation7 + $0x1e38] sm:$0xf0]  ;;  %9132 = vmatpush.bf16.msra.mxu1 %v14669_v33  ;;  %8570 = vmatpush.bf16.msrb.mxu2 %v12894_v23  ;;  %v14692_v33 = vld [vmem:[#allocation10 + $0x128] sm:$0xff]  ;;  %v1740_v23 = vperm.slane %v15263_v46, 7 }
 0x740   :  { %v14661_v29 = vld [vmem:[#allocation10 + $0x30] sm:$0xff]  ;;  %v13150_v25 = vor.u32 %v14594_v24, %v13147_v20  ;;  %v8600_v24 = vpack.c.bf16 %v8591_v38, %v8591_v38 }
 0x741   :  { %9119 = vmatpush.bf16.msra.mxu0 %v14661_v29  ;;  %v14677_v28 = vld [vmem:[#allocation10 + $0xb0] sm:$0xff]  ;;  %v8601_v29 = vpack.c.bf16 %v8592_v57, %v8592_v57 }
 0x742   :  { %8583 = vmatpush.bf16.msrb.mxu3 %v13150_v25  ;;  %v14685_v50 = vld [vmem:[#allocation10 + $0xf0] sm:$0xff]  ;;  %8571 = vmatmul.bf16.vlgmr.msrb.gmra.mxu2 %v15093_v19  ;;  %v14683_v19 = vld [vmem:[#allocation10 + $0xe0] sm:$0xff]  ;;  %v8313_v25 = vadd.f32 %v15282_v48, %v15280_v26  ;;  %v14706_v26 = vld [vmem:[#allocation10 + $0x198] sm:$0xff] }
 0x743   :  { %9144 = vmatpush.bf16.msra.mxu2 %v14678_v32  ;;  %9133 = vmatpush.bf16.msra.mxu1 %v14668_v22  ;;  %v14657_v31 = vld [vmem:[#allocation10 + $0x10] sm:$0xff]  ;;  %v8403_v32 = vpop.f32.mrf.mxu1 }
 0x744   :  { %v14673_v41 = vld [vmem:[#allocation10 + $0x90] sm:$0xff] }
 0x745   :  { %8584 = vmatmul.bf16.vlgmr.msrb.gmra.mxu3 %v15095_v27  ;;  %9120 = vmatpush.bf16.msra.mxu0 %v14660_v51  ;;  %v14665_v27 = vld [vmem:[#allocation10 + $0x50] sm:$0xff]  ;;  %v14690_v51 = vld [vmem:[#allocation10 + $0x118] sm:$0xff]  ;;  %v8429_v40 = vpop.f32.mrf.mxu3 }
 0x746   :  { %9157 = vmatpush.bf16.msra.mxu3 %v14686_v15  ;;  %v14681_v42 = vld [vmem:[#allocation10 + $0xd0] sm:$0xff]  ;;  %v8390_v15 = vpop.f32.mrf.mxu0 }
 0x747   :  { %9145 = vmatpush.bf16.msra.mxu2 %v14677_v28  ;;  %9134 = vmatpush.bf16.msra.mxu1 %v14667_v13  ;;  %v14701_v39 = vld [vmem:[#allocation10 + $0x170] sm:$0xff]  ;;  %v8391_v22 = vadd.f32 %v8390_v15, %v1740_v23  ;;  %v14707_v28 = vld [vmem:[#allocation10 + $0x1a0] sm:$0xff] }
 0x748   :  { %v14693_v55 = vld [vmem:[#allocation10 + $0x130] sm:$0xff] }
 0x749   :  { %9121 = vmatpush.bf16.msra.mxu0 %v14659_v53  ;;  %v14709_v20 = vld [vmem:[#allocation10 + $0x1b0] sm:$0xff]  ;;  %v8404_v13 = vadd.f32 %v8403_v32, %v8391_v22 }
 0x74a   :  { %9158 = vmatpush.bf16.msra.mxu3 %v14685_v50  ;;  %v8326_v50 = vadd.f32 %v15284_v18, %v8313_v25  ;;  %v14697_v46 = vld [vmem:[#allocation10 + $0x150] sm:$0xff] }
 0x74b   :  { %9146 = vmatpush.bf16.msra.mxu2 %v14676_v52  ;;  %9135 = vmatpush.bf16.msra.mxu1 %v14666_v14  ;;  %v14689_v52 = vld [vmem:[#allocation10 + $0x110] sm:$0xff]  ;;  %v8405_v48 = vpop.f32.mrf.mxu1 }
 0x74c   :  { %v8339_v53 = vadd.f32 %v15292_v49, %v8326_v50  ;;  %v8594_v49 = vmax.f32 %v15257_v16, 0.0 }
 0x74d   :  { %9122 = vmatpush.bf16.msra.mxu0 %v14658_v6 }
 0x74e   :  { %9159 = vmatpush.bf16.msra.mxu3 %v14684_v59  ;;  %v14696_v59 = vld [vmem:[#allocation10 + $0x148] sm:$0xff]  ;;  %v8392_v14 = vpop.f32.mrf.mxu0  ;;  %v8352_v6 = vadd.f32 %v15290_v12, %v8339_v53 }
 0x74f   :  { %9147 = vmatpush.bf16.msra.mxu2 %v14675_v10  ;;  %9136 = vmatpush.bf16.msra.mxu1 %v14665_v27  ;;  %v14688_v10 = vld [vmem:[#allocation10 + $0x108] sm:$0xff]  ;;  %v8416_v27 = vpop.f32.mrf.mxu2 }
 0x750   :  { %v8365_v18 = vadd.f32 %v15294_v61, %v8352_v6  ;;  %v14704_v12 = vld [vmem:[#allocation10 + $0x188] sm:$0xff] }
 0x751   :  { %9123 = vmatpush.bf16.msra.mxu0 %v14657_v31  ;;  %v14695_v31 = vld [vmem:[#allocation10 + $0x140] sm:$0xff] }
 0x752   :  { %9160 = vmatpush.bf16.msra.mxu3 %v14683_v19  ;;  %v14705_v19 = vld [vmem:[#allocation10 + $0x190] sm:$0xff] }
 0x753   :  { %9148 = vmatpush.bf16.msra.mxu2 %v14674_v60  ;;  %9137 = vmatpush.bf16.msra.mxu1 %v14664_v36  ;;  %v8417_v60 = vadd.f32 %v8416_v27, %v8404_v13  ;;  %v8593_v36 = vmax.f32 %v15230_v3, 0.0  ;;  %v8455_v3 = vpop.f32.mrf.mxu1 }
 0x755   :  { %9124 = vmatpush.bf16.msra.mxu0 %v14656_v17  ;;  %v8430_v34 = vadd.f32 %v8429_v40, %v8417_v60  ;;  %v8378_v17 = vadd.f32 %v15296_v30, %v8365_v18  ;;  %v8602_v61 = vpack.c.bf16 %v8593_v36, %v8593_v36  ;;  %v14718_v30 = vld [vmem:[#allocation10 + $0x1f8] sm:$0xff] }
 0x756   :  { %9161 = vmatpush.bf16.msra.mxu3 %v14682_v63  ;;  %v14687_v63 = vld [vmem:[#allocation10 + $0x100] sm:$0xff] }
 0x757   :  { %9149 = vmatpush.bf16.msra.mxu2 %v14673_v41  ;;  %9138 = vmatpush.bf16.msra.mxu1 %v14663_v44  ;;  %v8603_v41 = vpack.c.bf16 %v8594_v49, %v8594_v49  ;;  %v8595_v44 = vmax.f32 %v8378_v17, 0.0  ;;  %v8418_v16 = vpop.f32.mrf.mxu2 }
 0x759   :  { %9125 = vmatpush.bf16.msra.mxu0 %v14655_v45  ;;  %v8604_v37 = vpack.c.bf16 %v8595_v44, %v8595_v44  ;;  %v8442_v45 = vpop.f32.mrf.mxu0 }
 0x75a   :  { %9162 = vmatpush.bf16.msra.mxu3 %v14681_v42  ;;  %9139 = vmatmul.bf16.vlgmr.msra.gmra.mxu1 %v8599_v0  ;;  %v14703_v42 = vld [vmem:[#allocation10 + $0x180] sm:$0xff] }
 0x75b   :  { %9183 = vmatpush.bf16.msrb.mxu1 %v14702_v1  ;;  %9150 = vmatpush.bf16.msra.mxu2 %v14672_v9  ;;  %v8431_v1 = vpop.f32.mrf.mxu3  ;;  %v8457_v54 = vpop.f32.mrf.mxu1 }
 0x75c   :  { %9126 = vmatmul.bf16.vlgmr.msra.gmra.mxu0 %v8598_v62  ;;  %v14716_v62 = vld [vmem:[#allocation10 + $0x1e8] sm:$0xff]  ;;  %v14745_v54 = vld [vmem:[#allocation11] ss:$0 sm:$0xff] }
 0x75d   :  { %9170 = vmatpush.bf16.msrb.mxu0 %v14694_v47 }
 0x75e   :  { %9163 = vmatpush.bf16.msra.mxu3 %v14680_v35 }
 0x75f   :  { %9184 = vmatpush.bf16.msrb.mxu1 %v14701_v39  ;;  %9151 = vmatpush.bf16.msra.mxu2 %v14671_v5  ;;  %v8468_v9 = vpop.f32.mrf.mxu2  ;;  %v14717_v39 = vld [vmem:[#allocation10 + $0x1f0] sm:$0xff]  ;;  %v14715_v5 = vld [vmem:[#allocation10 + $0x1e0] sm:$0xff] }
 0x761   :  { %9171 = vmatpush.bf16.msrb.mxu0 %v14693_v55  ;;  %v8444_v47 = vpop.f32.mrf.mxu0 }
 0x762   :  { %9164 = vmatpush.bf16.msra.mxu3 %v14679_v58  ;;  %9152 = vmatmul.bf16.vlgmr.msra.gmra.mxu2 %v8600_v24  ;;  %v14714_v58 = vld [vmem:[#allocation10 + $0x1d8] sm:$0xff] }
 0x763   :  { %9196 = vmatpush.bf16.msrb.mxu2 %v14710_v11  ;;  %9185 = vmatpush.bf16.msrb.mxu1 %v14700_v4  ;;  %v8481_v35 = vpop.f32.mrf.mxu3  ;;  %v14713_v11 = vld [vmem:[#allocation10 + $0x1d0] sm:$0xff]  ;;  %v14712_v4 = vld [vmem:[#allocation10 + $0x1c8] sm:$0xff] }
 0x765   :  { %9165 = vmatmul.bf16.vlgmr.msra.gmra.mxu3 %v8601_v29  ;;  %9172 = vmatpush.bf16.msrb.mxu0 %v14692_v33  ;;  %v8443_v33 = vadd.f32 %v8442_v45, %v8430_v34  ;;  %v14711_v29 = vld [vmem:[#allocation10 + $0x1c0] sm:$0xff] }
 0x766   :  { %9209 = vmatpush.bf16.msrb.mxu3 %v14718_v30 }
 0x767   :  { %9197 = vmatpush.bf16.msrb.mxu2 %v14709_v20  ;;  %9186 = vmatpush.bf16.msrb.mxu1 %v14699_v43  ;;  %v8470_v0 = vpop.f32.mrf.mxu2  ;;  %v8456_v43 = vadd.f32 %v8455_v3, %v8443_v33 }
 0x769   :  { %9173 = vmatpush.bf16.msrb.mxu0 %v14691_v21  ;;  %v8469_v23 = vadd.f32 %v8468_v9, %v8456_v43 }
 0x76a   :  { %9210 = vmatpush.bf16.msrb.mxu3 %v14717_v39 }
 0x76b   :  { %9198 = vmatpush.bf16.msrb.mxu2 %v14708_v7  ;;  %9187 = vmatpush.bf16.msrb.mxu1 %v14698_v8  ;;  %v8483_v55 = vpop.f32.mrf.mxu3  ;;  %v8482_v25 = vadd.f32 %v8481_v35, %v8469_v23 }
 0x76d   :  { %9174 = vmatpush.bf16.msrb.mxu0 %v14690_v51 }
 0x76e   :  { %9211 = vmatpush.bf16.msrb.mxu3 %v14716_v62 }
 0x76f   :  { %9199 = vmatpush.bf16.msrb.mxu2 %v14707_v28  ;;  %9188 = vmatpush.bf16.msrb.mxu1 %v14697_v46 }
 0x771   :  { %9175 = vmatpush.bf16.msrb.mxu0 %v14689_v52 }
 0x772   :  { %9212 = vmatpush.bf16.msrb.mxu3 %v14715_v5 }
 0x773   :  { %9200 = vmatpush.bf16.msrb.mxu2 %v14706_v26  ;;  %9189 = vmatpush.bf16.msrb.mxu1 %v14696_v59 }
 0x775   :  { %9176 = vmatpush.bf16.msrb.mxu0 %v14688_v10 }
 0x776   :  { %9213 = vmatpush.bf16.msrb.mxu3 %v14714_v58 }
 0x777   :  { %9201 = vmatpush.bf16.msrb.mxu2 %v14705_v19  ;;  %9190 = vmatpush.bf16.msrb.mxu1 %v14695_v31  ;;  %v8507_v38 = vpop.f32.mrf.mxu1 }
 0x779   :  { %9177 = vmatpush.bf16.msrb.mxu0 %v14687_v63 }
 0x77a   :  { %9191 = vmatmul.bf16.vlgmr.msrb.gmra.mxu1 %v8603_v41  ;;  %9214 = vmatpush.bf16.msrb.mxu3 %v14713_v11 }
 0x77b   :  { %9202 = vmatpush.bf16.msrb.mxu2 %v14704_v12  ;;  %v8494_v2 = vpop.f32.mrf.mxu0 }
 0x77c   :  { %9178 = vmatmul.bf16.vlgmr.msrb.gmra.mxu0 %v8602_v61  ;;  %v8495_v32 = vadd.f32 %v8494_v2, %v8482_v25 }
 0x77e   :  { %9215 = vmatpush.bf16.msrb.mxu3 %v14712_v4  ;;  %v8508_v8 = vadd.f32 %v8507_v38, %v8495_v32 }
 0x77f   :  { %9203 = vmatpush.bf16.msrb.mxu2 %v14703_v42  ;;  %v8509_v57 = vpop.f32.mrf.mxu1 }
 0x782   :  { %9204 = vmatmul.bf16.vlgmr.msrb.gmra.mxu2 %v8604_v37  ;;  %9216 = vmatpush.bf16.msrb.mxu3 %v14711_v29 }
 0x783   :  { %v8496_v56 = vpop.f32.mrf.mxu0 }
 0x78d   :  { %v8520_v24 = vpop.f32.mrf.mxu2 }
 0x78e   :  { %v8521_v22 = vadd.f32 %v8520_v24, %v8508_v8 }
 0x78f   :  { %v8533_v20 = vpop.f32.mrf.mxu3 }
 0x790   :  { %v8534_v28 = vadd.f32 %v8533_v20, %v8521_v22 }
 0x795   :  { %v8522_v21 = vpop.f32.mrf.mxu2 }
 0x797   :  { %v8535_v7 = vpop.f32.mrf.mxu3 }
 0x7b7   :  { %v8559_v15 = vpop.f32.mrf.mxu1 }
 0x7b9   :  { %v8546_v51 = vpop.f32.mrf.mxu0 }
 0x7ba   :  { %v8547_v50 = vadd.f32 %v8546_v51, %v8534_v28 }
 0x7bc   :  { %v8560_v53 = vadd.f32 %v8559_v15, %v8547_v50 }
 0x7bf   :  { %v8561_v13 = vpop.f32.mrf.mxu1 }
 0x7c1   :  { %v8548_v46 = vpop.f32.mrf.mxu0 }
 0x7c5   :  { %v8572_v52 = vpop.f32.mrf.mxu2 }
 0x7c6   :  { %v8573_v26 = vadd.f32 %v8572_v52, %v8560_v53 }
 0x7c8   :  { %v8585_v48 = vpop.f32.mrf.mxu3 }
 0x7c9   :  { %v8586_v59 = vadd.f32 %v8585_v48, %v8573_v26 }
 0x7cb   :  { %v8596_v14 = vmax.f32 %v8586_v59, 0.0 }
 0x7cd   :  { %v8605_v6 = vpack.c.bf16 %v8596_v14, %v8596_v14  ;;  %v8574_v10 = vpop.f32.mrf.mxu2 }
 0x7cf   :  { %9217 = vmatmul.bf16.vlgmr.msrb.gmra.mxu3 %v8605_v6 }
 0x7d0   :  { %v8587_v19 = vpop.f32.mrf.mxu3 }
 0x7d7   :  { %v9140_v18 = vpop.f32.mrf.mxu1 }
 0x7d9   :  { %v9127_v27 = vpop.f32.mrf.mxu0 }
 0x7da   :  { %v9141_v31 = vadd.f32 %v9140_v18, %v9127_v27 }
 0x7df   :  { %v9142_v49 = vpop.f32.mrf.mxu1 }
 0x7e1   :  { %v9129_v60 = vpop.f32.mrf.mxu0 }
 0x7e5   :  { %v9153_v40 = vpop.f32.mrf.mxu2 }
 0x7e6   :  { %v9154_v63 = vadd.f32 %v9153_v40, %v9141_v31 }
 0x7e8   :  { %v9166_v36 = vpop.f32.mrf.mxu3 }
 0x7e9   :  { %v9167_v34 = vadd.f32 %v9166_v36, %v9154_v63 }
 0x7ed   :  { %v9155_v12 = vpop.f32.mrf.mxu2 }
 0x7f0   :  { %v9168_v17 = vpop.f32.mrf.mxu3 }
 0x7f7   :  { %v9192_v41 = vpop.f32.mrf.mxu1 }
 0x7f9   :  { %v9179_v61 = vpop.f32.mrf.mxu0 }
 0x7fa   :  { %v9180_v42 = vadd.f32 %v9179_v61, %v9167_v34 }
 0x7fc   :  { %v9193_v44 = vadd.f32 %v9192_v41, %v9180_v42 }
 0x7ff   :  { %v9194_v16 = vpop.f32.mrf.mxu1 }
 0x801   :  { %v9181_v1 = vpop.f32.mrf.mxu0 }
 0x805   :  { %v9205_v37 = vpop.f32.mrf.mxu2 }
 0x806   :  { %v9206_v3 = vadd.f32 %v9205_v37, %v9193_v44 }
 0x80d   :  { %v9207_v45 = vpop.f32.mrf.mxu2 }
 0x852   :  { %v9218_v47 = vpop.f32.mrf.mxu3 }
 0x853   :  { %v9219_v9 = vadd.f32 %v9218_v47, %v9206_v3 }
 0x855   :  { %v9222_v30 = vadd.f32 %v14745_v54, %v9219_v9 }
 0x857   :  { %9223 = vst [vmem:[%s15322_s7] sm:$0xff] %v9222_v30 }
 0x85a   :  { %v9220_v35 = vpop.f32.mrf.mxu3 }
 0x85b   :  { %9228 = vsyncpa [#allocation4], 1 }
 0x85c   :  { %9229 = vsyncpa [#allocation6], 1 }
 0x85d   :  { %9230 = vsyncpa [#allocation9], 1 }
 0x85e   :  { %9231 = vsyncpa [#allocation12], 1 }

</bundles_post_ra>
